<compile_context>
chip_gen: v5e
topology: v5e:2x2
jax: 0.10.0
libtpu: 0.0.40
codegen_flags: <defaults>
</compile_context>

<pallas_src>
from functools import partial

import numpy as np
import jax
import jax.numpy as jnp
from jax import lax
from jax.experimental import pallas as pl
from jax.experimental.pallas import tpu as pltpu


def _query_and_group_kernel(new_xyz_ref, rhs_ref, out_ref, acc_ref, *,
                            radius2, ns, tile_np, n_tile, n_tiles,
                            out_ch_rhs, c_feat, use_xyz, mxu_scan, gather_dtype):
    f32 = jnp.float32
    T = tile_np
    NS = ns
    M = T * NS

    new_c = new_xyz_ref[0]                                   # (T, 3) centroids of this tile

    # slot targets: slot k selects the (k+1)-th in-ball point
    kp1 = (lax.broadcasted_iota(jnp.int32, (1, NS, 1), 1) + 1).astype(f32)

    if mxu_scan:
        # lower-triangular (inclusive) scan matrix: cnt = mask @ tri runs on the MXU
        r_io = lax.broadcasted_iota(jnp.int32, (n_tile, n_tile), 0)
        c_io = lax.broadcasted_iota(jnp.int32, (n_tile, n_tile), 1)
        tri = (r_io <= c_io).astype(f32)                     # (n_tile, n_tile)

    acc_ref[...] = jnp.zeros_like(acc_ref)

    def chunk_body(t, count_in):
        rhs_t = rhs_ref[0, t]                                # (out_ch_rhs, n_tile)

        # ---------------- ball query on this N chunk ----------------
        d2 = jnp.zeros((T, n_tile), f32)
        for c in range(3):                                   # rows 0..2 of rhs are xyz
            diff = new_c[:, c:c + 1] - rhs_t[c:c + 1, :]
            d2 = d2 + diff * diff
        in_ball = d2 < radius2                               # strict '<' as in the CUDA op
        mask = in_ball.astype(f32)
        if mxu_scan:
            cnt_local = jnp.dot(mask, tri, preferred_element_type=f32)
        else:
            cnt_local = jnp.cumsum(in_ball.astype(jnp.int32), axis=-1).astype(f32)
        cnt = cnt_local + count_in                           # global inclusive in-ball count
        s = mask * cnt                                       # slot code: 1..count in-ball, 0 outside

        # -------- gather one-hot built directly from the slot code --------
        # oh[j, k, n] = 1 iff point n is the (k+1)-th in-ball point of centroid j.
        # (slots beyond the count match nothing here; they are fixed up after the loop)
        oh = (s[:, None, :] == kp1).astype(f32).reshape(M, n_tile)
        contrib = lax.dot_general(rhs_t.astype(gather_dtype), oh.astype(gather_dtype),
                                  (((1,), (1,)), ((), ())),
                                  preferred_element_type=f32)        # (out_ch_rhs, M)
        acc_ref[...] += contrib
        return count_in + cnt_local[:, n_tile - 1:n_tile]

    count0 = jnp.zeros((T, 1), f32)
    if n_tiles == 1:
        count = chunk_body(0, count0)
    else:
        count = lax.fori_loop(0, n_tiles, chunk_body, count0)        # (T, 1) total in-ball count

    # ---- finalize: overflow slots take the first-in-ball point, empty balls take point 0 ----
    acc = acc_ref[...]                                       # (out_ch_rhs, M)

    j_row = lax.broadcasted_iota(jnp.int32, (T, M), 0)
    m_col = lax.broadcasted_iota(jnp.int32, (T, M), 1)
    expand_b = (m_col >= j_row * NS) & (m_col < (j_row + 1) * NS)    # column m belongs to centroid j
    expand = expand_b.astype(f32)                                    # (T, M)

    j_iota = lax.broadcasted_iota(jnp.int32, (T, 1), 0)
    j_of_m = jnp.sum(jnp.where(expand_b, j_iota, 0), axis=0, keepdims=True)   # (1, M) = m // NS
    m_iota = lax.broadcasted_iota(jnp.int32, (1, M), 1)
    kp1_row = (m_iota - j_of_m * NS + 1).astype(f32)                          # (1, M) = (m % NS) + 1
    count_row = jnp.sum(expand * count, axis=0, keepdims=True)                # (1, M)

    over_row = (kp1_row > count_row).astype(f32)             # slot index >= in-ball count
    empty_row = (count_row == 0.0).astype(f32)               # ball completely empty

    # slot-0 (first-in-ball) values per centroid, replicated to every slot of that centroid
    mprime = lax.broadcasted_iota(jnp.int32, (M, T), 0)
    jcol = lax.broadcasted_iota(jnp.int32, (M, T), 1)
    pick0 = (mprime == jcol * NS).astype(f32)                # (M, T)
    slot0 = jnp.dot(acc, pick0, preferred_element_type=f32)          # (out_ch_rhs, T)
    fill = jnp.dot(slot0, expand, preferred_element_type=f32)        # (out_ch_rhs, M)

    point0 = rhs_ref[0, 0, :, 0:1]                           # (out_ch_rhs, 1): global point index 0
    # overflow / empty slots accumulated exactly 0.0, so the fixups are pure adds
    gathered = acc + fill * over_row + point0 * empty_row

    if use_xyz:
        cent = jnp.dot(jnp.transpose(new_c), expand,
                       preferred_element_type=f32)           # (3, M) per-slot owning centroid
        out_ref[0, 0:3, :] = gathered[0:3, :] - cent
        if c_feat > 0:
            out_ref[0, 3:, :] = gathered[3:, :]
    else:
        out_ref[0, :, :] = gathered[3:, :]


def _tpu_vmem_capacity_bytes():
    try:
        return int(pltpu.get_tpu_info().vmem_capacity_bytes)
    except Exception:
        return 128 * 1024 * 1024      # assume a 128 MiB-VMEM part if the query is unavailable


def query_and_group(xyz, new_xyz, features=None, *, radius, nsample, use_xyz=True,
                    tile_npoint=None, n_tile=None, mxu_scan=None,
                    gather_dtype=jnp.float32, vmem_limit_bytes=None):
    """Pallas TPU implementation of pointnet2 QueryAndGroup.forward."""
    xyz = jnp.asarray(xyz, jnp.float32)
    new_xyz = jnp.asarray(new_xyz, jnp.float32)
    B, N, _ = xyz.shape
    npoint = new_xyz.shape[1]
    has_feat = features is not None
    if not has_feat:
        assert use_xyz, "Cannot have not features and not use xyz as a feature!"
    C = features.shape[1] if has_feat else 0
    out_ch_rhs = 3 + C                      # xyz rows always lead the gather RHS
    out_ch_out = (3 + C) if use_xyz else C
    nsample = int(nsample)

    # nsample is padded to a multiple of 8 so the in-kernel one-hot reshape stays
    # (8,128)-tile aligned (no hidden VMEM copies); padded slots are sliced off below.
    ns_k = -(-nsample // 8) * 8

    # ---- generation-aware sizing (v5e/v6e: 128 MiB VMEM, v7x: 64 MiB per TC) ----
    vmem_cap = _tpu_vmem_capacity_bytes()
    small_vmem = vmem_cap <= 96 * 1024 * 1024
    if vmem_limit_bytes is None:
        vmem_limit_bytes = (48 if small_vmem else 100) * 1024 * 1024

    # ---- tiling of the centroid axis ----
    if tile_npoint is None:
        cand = 64 if (small_vmem and (N >= 8192 or out_ch_rhs >= 128)) else 128
        tile_npoint = cand if npoint % cand == 0 else npoint
    tile_npoint = int(tile_npoint)
    assert npoint % tile_npoint == 0, "tile_npoint must divide npoint"
    M = tile_npoint * ns_k
    if tile_npoint != npoint:
        assert tile_npoint % 8 == 0 and M % 128 == 0, \
            "tiled npoint blocks must be (8,128)-compatible"

    # ---- tiling of the N axis (bounds the per-chunk one-hot / ball-query temps) ----
    if n_tile is None:
        onehot_budget = (4 if small_vmem else 8) * 1024 * 1024
        cap = max(128, onehot_budget // (4 * M))
        cap = min(cap, 4096 if small_vmem else 8192)
        if N <= cap:
            n_tile = N
        else:
            n_tile = N                                   # fallback: single chunk
            for c_ in range(cap - cap % 128, 127, -128):
                if N % c_ == 0:
                    n_tile = c_
                    break
    n_tile = int(n_tile)
    if N % n_tile != 0 or (n_tile != N and n_tile % 128 != 0):
        n_tile = N                                       # fall back to a single, untiled chunk
    n_tiles = N // n_tile

    if mxu_scan is None:
        mxu_scan = n_tile <= 512          # triangular scan matrix stays <= 1 MiB

    # ---- fused, channel-major gather RHS: [xyz(3); features(C)] pre-tiled along N ----
    xyz_t = jnp.transpose(xyz, (0, 2, 1))                                     # (B, 3, N)
    if has_feat:
        rhs = jnp.concatenate([xyz_t, jnp.asarray(features, jnp.float32)], axis=1)
    else:
        rhs = xyz_t
    # TODO(synk): stream rhs chunks through a third ("arbitrary") grid axis instead of
    # keeping it VMEM-resident when (3+C)*N*4 bytes no longer fits the VMEM budget.
    rhs = rhs.reshape(B, out_ch_rhs, n_tiles, n_tile).transpose(0, 2, 1, 3)   # (B, n_tiles, 3+C, n_tile)

    radius2 = float(np.float32(radius) * np.float32(radius))

    kernel = partial(_query_and_group_kernel,
                     radius2=radius2, ns=ns_k, tile_np=tile_npoint,
                     n_tile=n_tile, n_tiles=n_tiles, out_ch_rhs=out_ch_rhs,
                     c_feat=C, use_xyz=bool(use_xyz), mxu_scan=bool(mxu_scan),
                     gather_dtype=gather_dtype)

    grid = (B, npoint // tile_npoint)
    in_specs = [
        pl.BlockSpec((1, tile_npoint, 3), lambda b, p: (b, p, 0)),                  # centroids (tiled)
        pl.BlockSpec((1, n_tiles, out_ch_rhs, n_tile), lambda b, p: (b, 0, 0, 0)),  # gather RHS (resident)
    ]
    out_specs = pl.BlockSpec((1, out_ch_out, M), lambda b, p: (b, 0, p))

    out_flat = pl.pallas_call(
        kernel,
        out_shape=jax.ShapeDtypeStruct((B, out_ch_out, npoint * ns_k), jnp.float32),
        grid_spec=pltpu.PrefetchScalarGridSpec(
            num_scalar_prefetch=0,
            grid=grid,
            in_specs=in_specs,
            out_specs=out_specs,
            scratch_shapes=[pltpu.VMEM((out_ch_rhs, M), jnp.float32)],
        ),
        compiler_params=pltpu.CompilerParams(
            dimension_semantics=("parallel", "parallel"),
            vmem_limit_bytes=int(vmem_limit_bytes)),
    )(new_xyz, rhs)

    out = out_flat.reshape(B, out_ch_out, npoint, ns_k)
    if ns_k != nsample:
        out = out[..., :nsample]
    return out


def _reference(xyz, new_xyz, features, radius, nsample, use_xyz=True):
    """Numpy reference replicating the pointnet2 CUDA ball_query + grouping ops."""
    xyz = np.asarray(xyz, np.float32)
    new_xyz = np.asarray(new_xyz, np.float32)
    B, N, _ = xyz.shape
    npoint = new_xyz.shape[1]
    r2 = np.float32(radius) * np.float32(radius)
    diff = new_xyz[:, :, None, :] - xyz[:, None, :, :]
    d2 = np.sum(diff * diff, axis=-1, dtype=np.float32)                  # (B, npoint, N)
    mask = d2 < r2
    idx = np.zeros((B, npoint, nsample), dtype=np.int64)
    for b in range(B):
        for j in range(npoint):
            nz = np.nonzero(mask[b, j])[0]
            if nz.size:
                take = nz[:nsample]
                idx[b, j, :] = take[0]
                idx[b, j, :take.size] = take
    grouped_xyz = np.stack([xyz[b][idx[b]] for b in range(B)])           # (B, np, ns, 3)
    grouped_xyz = np.transpose(grouped_xyz, (0, 3, 1, 2))                # (B, 3, np, ns)
    grouped_xyz = grouped_xyz - new_xyz.transpose(0, 2, 1)[:, :, :, None]
    parts = []
    if use_xyz:
        parts.append(grouped_xyz)
    if features is not None:
        f = np.asarray(features, np.float32)
        gf = np.stack([f[b][:, idx[b]] for b in range(B)])               # (B, C, np, ns)
        parts.append(gf)
    return np.concatenate(parts, axis=1)


if __name__ == "__main__":
    key = jax.random.PRNGKey(0)
    k1, k2 = jax.random.split(key)

    B, N, npoint, nsample, C = 2, 256, 256, 8, 4
    radius = 0.3

    xyz = jax.random.uniform(k1, (B, N, 3), dtype=jnp.float32)
    new_xyz = xyz[:, :npoint, :]                    # centroids = subset of the points
    features = jax.random.normal(k2, (B, C, N), dtype=jnp.float32)

    ref = _reference(xyz, new_xyz, features, radius, nsample, use_xyz=True)

    # 1) defaults: npoint tiled by 128, single N chunk, MXU prefix scan
    out = jax.block_until_ready(query_and_group(xyz, new_xyz, features,
                                                radius=radius, nsample=nsample))
    assert out.shape == (B, 3 + C, npoint, nsample)
    np.testing.assert_allclose(np.asarray(out), ref, rtol=1e-5, atol=1e-5)

    # 2) chunked ball query + gather (in-kernel loop over N chunks)
    out2 = jax.block_until_ready(query_and_group(xyz, new_xyz, features,
                                                 radius=radius, nsample=nsample, n_tile=128))
    np.testing.assert_allclose(np.asarray(out2), ref, rtol=1e-5, atol=1e-5)

    # 3) no features + empty-ball fill path (first centroid far away -> gathers point 0)
    new_xyz_far = new_xyz.at[:, 0, :].set(100.0)
    out3 = jax.block_until_ready(query_and_group(xyz, new_xyz_far, None,
                                                 radius=radius, nsample=nsample))
    ref3 = _reference(xyz, new_xyz_far, None, radius, nsample, use_xyz=True)
    np.testing.assert_allclose(np.asarray(out3), ref3, rtol=1e-5, atol=1e-5)

    # 4) features only (use_xyz=False)
    out4 = jax.block_until_ready(query_and_group(xyz, new_xyz, features,
                                                 radius=radius, nsample=nsample, use_xyz=False))
    ref4 = _reference(xyz, new_xyz, features, radius, nsample, use_xyz=False)
    np.testing.assert_allclose(np.asarray(out4), ref4, rtol=1e-5, atol=1e-5)

    # 5) nsample not a multiple of 8 (internal padding) + cumsum scan path
    out5 = jax.block_until_ready(query_and_group(xyz, new_xyz, features,
                                                 radius=radius, nsample=6, mxu_scan=False))
    ref5 = _reference(xyz, new_xyz, features, radius, 6, use_xyz=True)
    np.testing.assert_allclose(np.asarray(out5), ref5, rtol=1e-5, atol=1e-5)

    # 6) bf16 gather matmul (exact 0/1 one-hot, gathered values bf16-rounded)
    out6 = jax.block_until_ready(query_and_group(xyz, new_xyz, features,
                                                 radius=radius, nsample=nsample,
                                                 gather_dtype=jnp.bfloat16))
    np.testing.assert_allclose(np.asarray(out6), ref, rtol=2e-2, atol=2e-2)

    print("KERNEL_OK")
</pallas_src>

<mosaic_0001>
module attributes {stable_mosaic.version = 11 : i64} {
  func.func @_query_and_group_kernel(%arg0: i32, %arg1: i32, %arg2: memref<1x128x3xf32, #tpu.memory_space<vmem>>, %arg3: memref<1x1x7x256xf32, #tpu.memory_space<vmem>>, %arg4: memref<1x7x1024xf32, #tpu.memory_space<vmem>>, %arg5: memref<7x1024xf32, #tpu.memory_space<vmem>>) attributes {dimension_semantics = [#tpu.dimension_semantics<parallel>, #tpu.dimension_semantics<parallel>], iteration_bounds = array<i64: 2, 2>, scalar_prefetch = 0 : i64, scratch_operands = 1 : i64, tpu.core_type = #tpu.core_type<tc>, window_params = [{transform_indices = @transform_0, window_bounds = array<i64: 1, 128, 3>}, {transform_indices = @transform_1, window_bounds = array<i64: 1, 1, 7, 256>}, {transform_indices = @transform_2, window_bounds = array<i64: 1, 7, 1024>}]} {
    %c0 = arith.constant 0 : index
    %c0_0 = arith.constant 0 : index
    %c0_1 = arith.constant 0 : index
    %0 = vector.load %arg2[%c0, %c0_0, %c0_1] : memref<1x128x3xf32, #tpu.memory_space<vmem>>, vector<1x128x3xf32>
    %1 = vector.shape_cast %0 : vector<1x128x3xf32> to vector<128x3xf32>
    %2 = tpu.iota {dimensions = array<i32: 1>} : vector<1x8x1xi32>
    %c1_i32 = arith.constant 1 : i32
    %3 = vector.broadcast %c1_i32 : i32 to vector<1x8x1xi32>
    %4 = arith.addi %2, %3 : vector<1x8x1xi32>
    %5 = arith.sitofp %4 : vector<1x8x1xi32> to vector<1x8x1xf32>
    %6 = tpu.iota {dimensions = array<i32: 0>} : vector<256x256xi32>
    %7 = tpu.iota {dimensions = array<i32: 1>} : vector<256x256xi32>
    %8 = arith.cmpi sle, %6, %7 : vector<256x256xi32>
    %9 = arith.extui %8 : vector<256x256xi1> to vector<256x256xi32>
    %10 = arith.sitofp %9 : vector<256x256xi32> to vector<256x256xf32>
    %cst = arith.constant 0.000000e+00 : f32
    %11 = vector.broadcast %cst : f32 to vector<7x1024xf32>
    %c0_2 = arith.constant 0 : index
    %c0_3 = arith.constant 0 : index
    %12 = vector.load %arg5[%c0_2, %c0_3] : memref<7x1024xf32, #tpu.memory_space<vmem>>, vector<7x1024xf32>
    tpu.vector_store %arg5[%c0_2, %c0_3], %11 {strides = array<i32>} : memref<7x1024xf32, #tpu.memory_space<vmem>>, vector<7x1024xf32>,
    %cst_4 = arith.constant 0.000000e+00 : f32
    %13 = vector.broadcast %cst_4 : f32 to vector<128x1xf32>
    %c0_5 = arith.constant 0 : index
    %c0_6 = arith.constant 0 : index
    %c0_7 = arith.constant 0 : index
    %c0_8 = arith.constant 0 : index
    %14 = vector.load %arg3[%c0_5, %c0_6, %c0_7, %c0_8] : memref<1x1x7x256xf32, #tpu.memory_space<vmem>>, vector<1x1x7x256xf32>
    %15 = vector.shape_cast %14 : vector<1x1x7x256xf32> to vector<7x256xf32>
    %cst_9 = arith.constant 0.000000e+00 : f32
    %16 = vector.broadcast %cst_9 : f32 to vector<128x256xf32>
    %17 = vector.extract_strided_slice %1 {offsets = [0, 0], sizes = [128, 1], strides = [1, 1]} : vector<128x3xf32> to vector<128x1xf32>
    %18 = vector.extract_strided_slice %15 {offsets = [0, 0], sizes = [1, 256], strides = [1, 1]} : vector<7x256xf32> to vector<1x256xf32>
    %19 = vector.broadcast %17 : vector<128x1xf32> to vector<128x256xf32>
    %20 = vector.broadcast %18 : vector<1x256xf32> to vector<128x256xf32>
    %21 = arith.subf %19, %20 : vector<128x256xf32>
    %22 = arith.mulf %21, %21 : vector<128x256xf32>
    %23 = arith.addf %16, %22 : vector<128x256xf32>
    %24 = vector.extract_strided_slice %1 {offsets = [0, 1], sizes = [128, 1], strides = [1, 1]} : vector<128x3xf32> to vector<128x1xf32>
    %25 = vector.extract_strided_slice %15 {offsets = [1, 0], sizes = [1, 256], strides = [1, 1]} : vector<7x256xf32> to vector<1x256xf32>
    %26 = vector.broadcast %24 : vector<128x1xf32> to vector<128x256xf32>
    %27 = vector.broadcast %25 : vector<1x256xf32> to vector<128x256xf32>
    %28 = arith.subf %26, %27 : vector<128x256xf32>
    %29 = arith.mulf %28, %28 : vector<128x256xf32>
    %30 = arith.addf %23, %29 : vector<128x256xf32>
    %31 = vector.extract_strided_slice %1 {offsets = [0, 2], sizes = [128, 1], strides = [1, 1]} : vector<128x3xf32> to vector<128x1xf32>
    %32 = vector.extract_strided_slice %15 {offsets = [2, 0], sizes = [1, 256], strides = [1, 1]} : vector<7x256xf32> to vector<1x256xf32>
    %33 = vector.broadcast %31 : vector<128x1xf32> to vector<128x256xf32>
    %34 = vector.broadcast %32 : vector<1x256xf32> to vector<128x256xf32>
    %35 = arith.subf %33, %34 : vector<128x256xf32>
    %36 = arith.mulf %35, %35 : vector<128x256xf32>
    %37 = arith.addf %30, %36 : vector<128x256xf32>
    %cst_10 = arith.constant 9.000000e-02 : f32
    %38 = vector.broadcast %cst_10 : f32 to vector<128x256xf32>
    %39 = arith.cmpf olt, %37, %38 : vector<128x256xf32>
    %40 = arith.extui %39 : vector<128x256xi1> to vector<128x256xi32>
    %41 = arith.sitofp %40 : vector<128x256xi32> to vector<128x256xf32>
    %cst_11 = arith.constant dense<0.000000e+00> : vector<128x256xf32>
    %42 = tpu.matmul %41, %10, %cst_11 {dimension_numbers = #tpu.dot_dimension_numbers<[1], [0], [0], [1], [0, 0, 1, 1], [], []>} : vector<128x256xf32>, vector<256x256xf32>, vector<128x256xf32> -> vector<128x256xf32>
    %43 = vector.broadcast %13 : vector<128x1xf32> to vector<128x256xf32>
    %44 = arith.addf %42, %43 : vector<128x256xf32>
    %45 = arith.mulf %41, %44 : vector<128x256xf32>
    %46 = vector.shape_cast %45 : vector<128x256xf32> to vector<128x1x256xf32>
    %47 = vector.broadcast %46 : vector<128x1x256xf32> to vector<128x8x256xf32>
    %48 = vector.broadcast %5 : vector<1x8x1xf32> to vector<128x8x256xf32>
    %49 = arith.cmpf oeq, %47, %48 : vector<128x8x256xf32>
    %50 = arith.extui %49 : vector<128x8x256xi1> to vector<128x8x256xi32>
    %51 = arith.sitofp %50 : vector<128x8x256xi32> to vector<128x8x256xf32>
    %52 = vector.shape_cast %51 : vector<128x8x256xf32> to vector<1024x256xf32>
    %cst_12 = arith.constant dense<0.000000e+00> : vector<7x1024xf32>
    %53 = tpu.matmul %15, %52, %cst_12 {dimension_numbers = #tpu.dot_dimension_numbers<[1], [1], [0], [0], [0, 0, 1, 0], [], []>} : vector<7x256xf32>, vector<1024x256xf32>, vector<7x1024xf32> -> vector<7x1024xf32>
    %c0_13 = arith.constant 0 : index
    %c0_14 = arith.constant 0 : index
    %54 = vector.load %arg5[%c0_13, %c0_14] : memref<7x1024xf32, #tpu.memory_space<vmem>>, vector<7x1024xf32>
    %55 = arith.addf %54, %53 : vector<7x1024xf32>
    %c0_15 = arith.constant 0 : index
    %c0_16 = arith.constant 0 : index
    %56 = vector.load %arg5[%c0_15, %c0_16] : memref<7x1024xf32, #tpu.memory_space<vmem>>, vector<7x1024xf32>
    tpu.vector_store %arg5[%c0_15, %c0_16], %55 {strides = array<i32>} : memref<7x1024xf32, #tpu.memory_space<vmem>>, vector<7x1024xf32>,
    %57 = vector.extract_strided_slice %42 {offsets = [0, 255], sizes = [128, 1], strides = [1, 1]} : vector<128x256xf32> to vector<128x1xf32>
    %58 = arith.addf %13, %57 : vector<128x1xf32>
    %c0_17 = arith.constant 0 : index
    %c0_18 = arith.constant 0 : index
    %59 = vector.load %arg5[%c0_17, %c0_18] : memref<7x1024xf32, #tpu.memory_space<vmem>>, vector<7x1024xf32>
    %60 = tpu.iota {dimensions = array<i32: 0>} : vector<128x1024xi32>
    %61 = tpu.iota {dimensions = array<i32: 1>} : vector<128x1024xi32>
    %c8_i32 = arith.constant 8 : i32
    %62 = vector.broadcast %c8_i32 : i32 to vector<128x1024xi32>
    %63 = arith.muli %60, %62 : vector<128x1024xi32>
    %64 = arith.cmpi sge, %61, %63 : vector<128x1024xi32>
    %c1_i32_19 = arith.constant 1 : i32
    %65 = vector.broadcast %c1_i32_19 : i32 to vector<128x1024xi32>
    %66 = arith.addi %60, %65 : vector<128x1024xi32>
    %c8_i32_20 = arith.constant 8 : i32
    %67 = vector.broadcast %c8_i32_20 : i32 to vector<128x1024xi32>
    %68 = arith.muli %66, %67 : vector<128x1024xi32>
    %69 = arith.cmpi slt, %61, %68 : vector<128x1024xi32>
    %70 = arith.andi %64, %69 : vector<128x1024xi1>
    %71 = arith.extui %70 : vector<128x1024xi1> to vector<128x1024xi32>
    %72 = arith.sitofp %71 : vector<128x1024xi32> to vector<128x1024xf32>
    %73 = tpu.iota {dimensions = array<i32: 0>} : vector<128x1xi32>
    %c0_i32 = arith.constant 0 : i32
    %74 = vector.shape_cast %73 : vector<128x1xi32> to vector<128x1xi32>
    %75 = vector.broadcast %74 : vector<128x1xi32> to vector<128x1024xi32>
    %76 = vector.broadcast %c0_i32 : i32 to vector<128x1024xi32>
    %77 = arith.select %70, %75, %76 : vector<128x1024xi1>, vector<128x1024xi32>
    %cst_21 = arith.constant dense<0> : vector<1024xi32>
    %78 = vector.multi_reduction <add>, %77, %cst_21 [0] : vector<128x1024xi32> to vector<1024xi32>
    %79 = vector.shape_cast %78 : vector<1024xi32> to vector<1x1024xi32>
    %80 = tpu.iota {dimensions = array<i32: 1>} : vector<1x1024xi32>
    %c8_i32_22 = arith.constant 8 : i32
    %81 = vector.broadcast %c8_i32_22 : i32 to vector<1x1024xi32>
    %82 = arith.muli %79, %81 : vector<1x1024xi32>
    %83 = arith.subi %80, %82 : vector<1x1024xi32>
    %c1_i32_23 = arith.constant 1 : i32
    %84 = vector.broadcast %c1_i32_23 : i32 to vector<1x1024xi32>
    %85 = arith.addi %83, %84 : vector<1x1024xi32>
    %86 = arith.sitofp %85 : vector<1x1024xi32> to vector<1x1024xf32>
    %87 = vector.broadcast %58 : vector<128x1xf32> to vector<128x1024xf32>
    %88 = arith.mulf %72, %87 : vector<128x1024xf32>
    %cst_24 = arith.constant dense<0.000000e+00> : vector<1024xf32>
    %89 = vector.multi_reduction <add>, %88, %cst_24 [0] : vector<128x1024xf32> to vector<1024xf32>
    %90 = vector.shape_cast %89 : vector<1024xf32> to vector<1x1024xf32>
    %91 = arith.cmpf ogt, %86, %90 : vector<1x1024xf32>
    %92 = arith.extui %91 : vector<1x1024xi1> to vector<1x1024xi32>
    %93 = arith.sitofp %92 : vector<1x1024xi32> to vector<1x1024xf32>
    %cst_25 = arith.constant 0.000000e+00 : f32
    %94 = vector.broadcast %cst_25 : f32 to vector<1x1024xf32>
    %95 = arith.cmpf oeq, %90, %94 : vector<1x1024xf32>
    %96 = arith.extui %95 : vector<1x1024xi1> to vector<1x1024xi32>
    %97 = arith.sitofp %96 : vector<1x1024xi32> to vector<1x1024xf32>
    %98 = tpu.iota {dimensions = array<i32: 0>} : vector<1024x128xi32>
    %99 = tpu.iota {dimensions = array<i32: 1>} : vector<1024x128xi32>
    %c8_i32_26 = arith.constant 8 : i32
    %100 = vector.broadcast %c8_i32_26 : i32 to vector<1024x128xi32>
    %101 = arith.muli %99, %100 : vector<1024x128xi32>
    %102 = arith.cmpi eq, %98, %101 : vector<1024x128xi32>
    %103 = arith.extui %102 : vector<1024x128xi1> to vector<1024x128xi32>
    %104 = arith.sitofp %103 : vector<1024x128xi32> to vector<1024x128xf32>
    %cst_27 = arith.constant dense<0.000000e+00> : vector<7x128xf32>
    %105 = tpu.matmul %59, %104, %cst_27 {dimension_numbers = #tpu.dot_dimension_numbers<[1], [0], [0], [1], [0, 0, 1, 1], [], []>} : vector<7x1024xf32>, vector<1024x128xf32>, vector<7x128xf32> -> vector<7x128xf32>
    %cst_28 = arith.constant dense<0.000000e+00> : vector<7x1024xf32>
    %106 = tpu.matmul %105, %72, %cst_28 {dimension_numbers = #tpu.dot_dimension_numbers<[1], [0], [0], [1], [0, 0, 1, 1], [], []>} : vector<7x128xf32>, vector<128x1024xf32>, vector<7x1024xf32> -> vector<7x1024xf32>
    %c0_29 = arith.constant 0 : index
    %c0_30 = arith.constant 0 : index
    %c0_31 = arith.constant 0 : index
    %c0_32 = arith.constant 0 : index
    %107 = vector.load %arg3[%c0_29, %c0_30, %c0_31, %c0_32] : memref<1x1x7x256xf32, #tpu.memory_space<vmem>>, vector<1x1x7x1xf32>
    %108 = vector.shape_cast %107 : vector<1x1x7x1xf32> to vector<7x1xf32>
    %109 = vector.broadcast %93 : vector<1x1024xf32> to vector<7x1024xf32>
    %110 = arith.mulf %106, %109 : vector<7x1024xf32>
    %111 = arith.addf %59, %110 : vector<7x1024xf32>
    %112 = vector.broadcast %108 : vector<7x1xf32> to vector<7x1024xf32>
    %113 = vector.broadcast %97 : vector<1x1024xf32> to vector<7x1024xf32>
    %114 = arith.mulf %112, %113 : vector<7x1024xf32>
    %115 = arith.addf %111, %114 : vector<7x1024xf32>
    %116 = tpu.transpose %1, [1, 0] : vector<128x3xf32> -> vector<3x128xf32>
    %cst_33 = arith.constant dense<0.000000e+00> : vector<3x1024xf32>
    %117 = tpu.matmul %116, %72, %cst_33 {dimension_numbers = #tpu.dot_dimension_numbers<[1], [0], [0], [1], [0, 0, 1, 1], [], []>} : vector<3x128xf32>, vector<128x1024xf32>, vector<3x1024xf32> -> vector<3x1024xf32>
    %118 = vector.extract_strided_slice %115 {offsets = [0, 0], sizes = [3, 1024], strides = [1, 1]} : vector<7x1024xf32> to vector<3x1024xf32>
    %119 = arith.subf %118, %117 : vector<3x1024xf32>
    %c0_34 = arith.constant 0 : index
    %c0_35 = arith.constant 0 : index
    %c0_36 = arith.constant 0 : index
    %120 = vector.load %arg4[%c0_34, %c0_35, %c0_36] : memref<1x7x1024xf32, #tpu.memory_space<vmem>>, vector<1x3x1024xf32>
    %121 = vector.shape_cast %120 : vector<1x3x1024xf32> to vector<3x1024xf32>
    %122 = vector.shape_cast %119 : vector<3x1024xf32> to vector<1x3x1024xf32>
    tpu.vector_store %arg4[%c0_34, %c0_35, %c0_36], %122 {strides = array<i32>} : memref<1x7x1024xf32, #tpu.memory_space<vmem>>, vector<1x3x1024xf32>,
    %123 = vector.extract_strided_slice %115 {offsets = [3, 0], sizes = [4, 1024], strides = [1, 1]} : vector<7x1024xf32> to vector<4x1024xf32>
    %c0_37 = arith.constant 0 : index
    %c3 = arith.constant 3 : index
    %c0_38 = arith.constant 0 : index
    %124 = vector.load %arg4[%c0_37, %c3, %c0_38] : memref<1x7x1024xf32, #tpu.memory_space<vmem>>, vector<1x4x1024xf32>
    %125 = vector.shape_cast %124 : vector<1x4x1024xf32> to vector<4x1024xf32>
    %126 = vector.shape_cast %123 : vector<4x1024xf32> to vector<1x4x1024xf32>
    tpu.vector_store %arg4[%c0_37, %c3, %c0_38], %126 {strides = array<i32>} : memref<1x7x1024xf32, #tpu.memory_space<vmem>>, vector<1x4x1024xf32>,
    return
  }
  func.func @transform_0(%arg0: i32, %arg1: i32) -> (i32, i32, i32) {
    %c0_i32 = arith.constant 0 : i32
    %c0_i32_0 = arith.constant 0 : i32
    return %arg0, %arg1, %c0_i32 : i32, i32, i32
  }
  func.func @transform_1(%arg0: i32, %arg1: i32) -> (i32, i32, i32, i32) {
    %c0_i32 = arith.constant 0 : i32
    %c0_i32_0 = arith.constant 0 : i32
    %c0_i32_1 = arith.constant 0 : i32
    %c0_i32_2 = arith.constant 0 : i32
    return %arg0, %c0_i32, %c0_i32_0, %c0_i32_1 : i32, i32, i32, i32
  }
  func.func @transform_2(%arg0: i32, %arg1: i32) -> (i32, i32, i32) {
    %c0_i32 = arith.constant 0 : i32
    %c0_i32_0 = arith.constant 0 : i32
    return %arg0, %c0_i32, %arg1 : i32, i32, i32
  }
}

</mosaic_0001>

<bundles_post_ra>
// kernel: tpu_custom_call.1
= control target key start
LH: loop header
LB: loop body
LE: loop exit
PB: predicated region body
PF: predicated region fallthrough
CT: control target
= control target key end

     0   :  { %s7514_s9 = smov 0   ;;  %s7516_s10 = smov 0   ;;  %s13839_s0 = inlined_call_operand.vmem [shape: f32[2,256,3], index: 0, kind: input, shape index: {}]   ;;  %s13840_s1 = inlined_call_operand.vmem [shape: f32[2,1,7,256], index: 1, kind: input, shape index: {}]   ;;  %s13841_s2 = inlined_call_operand.vmem [shape: f32[2,7,2048], index: 2, kind: output, shape index: {}]  }
   0x1   :  { %s7518_s11 = smov 0   ;;  %s7520_s12 = smov 0  }
   0x2   :  { %s7522_s13 = smov 0  }
   0x3 LB: > { %s21_s14 = sadd.s32 1, %s7479_s11  ;;  %s24_s15 = sadd.s32 1, %s7483_s12  ;;  %s7487_s13 = sphi %s7522_s13, %s12_s13   ;;  %s7483_s12 = sphi %s7520_s12, %s15898_s12   ;;  %s7479_s11 = sphi %s7518_s11, %s15897_s11   ;;  %s7475_s10 = sphi %s7516_s10, %s15896_s10   ;;  %s7471_s9 = sphi %s7514_s9, %s15895_s9  }
   0x4   : > { %p22_p0 = scmp.ge.s32.totalorder %s21_s14, 2  ;;  %p5915_p1 = scmp.ge.s32.totalorder %s7487_s13, 1 }
   0x5   : > { %p143_p2 = scmp.lt.s32.totalorder %s7487_s13, 5 }
   0x6   : > { %s15900_s14 = smov (%p22_p0, %s21_s14), 0  ;;  %s15902_s15 = smov (!%p22_p0, %s24_s15), %s7483_s12 }
   0x7   : > { %p144_p3 = pnand %p5915_p1, %p143_p2  ;;  %p26_p4 = scmp.ge.s32.totalorder %s15902_s15, 2 }
   0x9   : > { %s15904_s15 = smov (%p26_p4, %s15902_s15), 0  ;;  %147 = sbr.rel (%p144_p3) target bundleno = 1168 (0x490), region = 28 }
   0xe   : > { %s5916_s16 = sshll.u32 %s7471_s9, 4  ;;  %p179_p5 = scmp.lt.s32.totalorder %s7475_s10, 1  ;;  %v13844_v0 = vmov 2   ;;  %v13852_v1 = vmov 0   ;;  %v13848_v2 = vmov 1   ;;  %v219_v12 = vlaneseq }
   0xf   : > { %7403 = vset.pattern.permute.xlu1 %v13844_v0  ;;  %7401 = vset.pattern.permute.xlu0 %v13852_v1  ;;  %p181_p6 = scmp.lt.s32.totalorder %s5916_s16, 31  ;;  %v13846_v19 = vmov 1.0   ;;  %v13842_v53 = vmov 0.0   ;;  %s5921_s27 = sshll.u32 %s7471_s9, 3 }
  0x10   : > { %s15906_s10 = smov (!%p179_p5, %s7475_s10), 1  ;;  %7405 = vset.pattern.permute.xlu2 %v13848_v2  ;;  %v7622_v13 = vshrl.u32 %v219_v12, 7  ;;  %v7624_v14 = vand.u32 127, %v219_v12  ;;  %1187 = vmatpush.msra.mxu2 %v13846_v19  ;;  %449 = vst [vmem:[#allocation2 + $0x30] sm:$0x7f] %v13842_v53  ;;  %p13656_p7 = scmp.lt.s32.totalorder %s5921_s27, 15 }
  0x11   : > { %s15908_s16 = smov (!%p181_p6, %s5916_s16), 31  ;;  %s5917_s17 = sshll.u32 %s15906_s10, 5  ;;  %1137 = vmatpush.msra.mxu1 %v13842_v53  ;;  %450 = vst [vmem:[#allocation2] sm:$0x7f] %v13842_v53 }
  0x12   : > { %s184_s18 = sadd.s32 %s5917_s17, %s15908_s16  ;;  %14587 = vst [vmem:[#allocation3_spill] sm:$0xff] %v7622_v13  ;;  %v7628_v15 = vadd.s32 120, %v7622_v13  ;;  %v7631_v16 = vadd.s32 248, %v7622_v13  ;;  %v7634_v17 = vadd.s32 128, %v7624_v14  ;;  %v7642_v18 = vadd.s32 112, %v7622_v13  ;;  %1188 = vmatpush.msra.mxu2 %v13846_v19  ;;  %s7254_s23 = sshll.u32 %s15906_s10, 4 }
  0x13   : > { %s5918_s19 = sshll.u32 %s184_s18, 3  ;;  %14588 = vst [vmem:[#allocation4_spill] sm:$0xff] %v7624_v14  ;;  %v7647_v20 = vadd.s32 240, %v7622_v13  ;;  %v7650_v21 = vadd.s32 104, %v7622_v13  ;;  %v7653_v22 = vadd.s32 232, %v7622_v13  ;;  %v7656_v23 = vadd.s32 96, %v7622_v13  ;;  %s7890_s26 = scalar_lea.vmem %s13840_s1, %s7254_s23 }
  0x14   : > { %s7556_s22 = scalar_lea.vmem %s13839_s0, %s5918_s19  ;;  %14589 = vst [vmem:[#allocation5_spill] sm:$0xff] %v7628_v15  ;;  %vm287_vm0 = vcmp.le.s32.totalorder %v7628_v15, %v7624_v14  ;;  %vm320_vm1 = vcmp.le.s32.totalorder %v7631_v16, %v7634_v17  ;;  %vm285_vm2 = vcmp.le.s32.totalorder %v7642_v18, %v7624_v14  ;;  %v7663_v24 = vadd.s32 224, %v7622_v13  ;;  %1189 = vmatpush.msra.mxu2 %v13846_v19  ;;  %v457_v59 = vld [vmem:[%s7890_s26] sm:$0x7f]  ;;  %v458_v60 = vld [vmem:[%s7890_s26 + $0x8] sm:$0x7f] }
  0x15   : > { %v7559_v3 = vld [vmem:[%s7556_s22] sm:$0xff]  ;;  %v7564_v4 = vld [vmem:[%s7556_s22 + $0x8] sm:$0xff]  ;;  %v7574_v5 = vld [vmem:[%s7556_s22 + $0x10] sm:$0xff]  ;;  %14590 = vst [vmem:[#allocation6_spill] sm:$0xff] %v7631_v16  ;;  %5988 = vmatpush.msk.msra.mxu0 %vm287_vm0, %v13846_v19  ;;  %6052 = vmatpush.msk.msra.mxu3 %vm320_vm1, %v13846_v19  ;;  %vm318_vm3 = vcmp.le.s32.totalorder %v7647_v20, %v7634_v17  ;;  %vm283_vm4 = vcmp.le.s32.totalorder %v7650_v21, %v7624_v14  ;;  %v7672_v25 = vadd.s32 88, %v7622_v13  ;;  %v7684_v28 = vadd.s32 216, %v7622_v13 }
  0x16   : > { %800 = vperm.xlu1 %7403, %v7559_v3   ;;  %461 = vperm.xlu0 %7401, %v7559_v3   ;;  %v7582_v6 = vld [vmem:[%s7556_s22 + $0x18] sm:$0xff]  ;;  %v7585_v7 = vld [vmem:[%s7556_s22 + $0x20] sm:$0xff]  ;;  %v7593_v8 = vld [vmem:[%s7556_s22 + $0x30] sm:$0xff]  ;;  %14591 = vst [vmem:[#allocation7_spill] sm:$0xff] %v7634_v17  ;;  %vm316_vm5 = vcmp.le.s32.totalorder %v7653_v22, %v7634_v17  ;;  %vm281_vm6 = vcmp.le.s32.totalorder %v7656_v23, %v7624_v14  ;;  %v7703_v29 = vadd.s32 80, %v7622_v13  ;;  %v7706_v30 = vadd.s32 208, %v7622_v13 }
  0x17   : > { %642 = vperm.xlu2 %7405, %v7564_v4   ;;  %v7602_v9 = vld [vmem:[%s7556_s22 + $0x28] sm:$0xff]  ;;  %v7605_v10 = vld [vmem:[%s7556_s22 + $0x38] sm:$0xff]  ;;  %14592 = vst [vmem:[#allocation8_spill] sm:$0xff] %v7642_v18  ;;  %5989 = vmatpush.msk.msra.mxu0 %vm285_vm2, %v13846_v19  ;;  %v7678_v27 = vld [vmem:[%s7556_s22 + $0x40] sm:$0xff]  ;;  %vm314_vm7 = vcmp.le.s32.totalorder %v7663_v24, %v7634_v17  ;;  %vm279_vm8 = vcmp.le.s32.totalorder %v7672_v25, %v7624_v14  ;;  %v7710_v31 = vadd.s32 72, %v7622_v13  ;;  %v7713_v32 = vadd.s32 200, %v7622_v13 }
  0x18   : > { %v7615_v11 = vld [vmem:[%s7556_s22 + $0x48] sm:$0xff]  ;;  %14593 = vst [vmem:[#allocation9_spill] sm:$0xff] %v7647_v20  ;;  %v7675_v26 = vld [vmem:[%s7556_s22 + $0x58] sm:$0xff]  ;;  %6053 = vmatpush.msk.msra.mxu3 %vm318_vm3, %v13846_v19  ;;  %1190 = vmatpush.msra.mxu2 %v13846_v19  ;;  %vm312_vm9 = vcmp.le.s32.totalorder %v7684_v28, %v7634_v17  ;;  %vm277_vm10 = vcmp.le.s32.totalorder %v7703_v29, %v7624_v14  ;;  %v7727_v33 = vadd.s32 64, %v7622_v13  ;;  %v7730_v34 = vadd.s32 192, %v7622_v13  ;;  %v7781_v41 = vld [vmem:[%s7556_s22 + $0x60] sm:$0xff] }
  0x19   : > { %14594 = vst [vmem:[#allocation10_spill] sm:$0xff] %v7650_v21  ;;  %5990 = vmatpush.msk.msra.mxu0 %vm283_vm4, %v13846_v19  ;;  %vm310_vm11 = vcmp.le.s32.totalorder %v7706_v30, %v7634_v17  ;;  %vm275_vm12 = vcmp.le.s32.totalorder %v7710_v31, %v7624_v14  ;;  %vm308_vm13 = vcmp.le.s32.totalorder %v7713_v32, %v7634_v17  ;;  %v7740_v35 = vadd.s32 56, %v7622_v13  ;;  %v7823_v49 = vld [vmem:[%s7556_s22 + $0x50] sm:$0xff]  ;;  %s15910_s27 = smov (!%p13656_p7, %s5921_s27), 15 }
  0x1a   : > { %14595 = vst [vmem:[#allocation11_spill] sm:$0xff] %v7653_v22  ;;  %6054 = vmatpush.msk.msra.mxu3 %vm316_vm5, %v13846_v19  ;;  %1191 = vmatpush.msra.mxu2 %v13846_v19  ;;  %vm273_vm14 = vcmp.le.s32.totalorder %v7727_v33, %v7624_v14  ;;  %v7743_v36 = vadd.s32 184, %v7622_v13  ;;  %vm306_vm15 = vcmp.le.s32.totalorder %v7730_v34, %v7634_v17  ;;  %v7755_v37 = vadd.s32 48, %v7622_v13  ;;  %v7882_v56 = vld [vmem:[%s7556_s22 + $0x70] sm:$0xff]  ;;  %s13689_s29 = sadd.s32 %s7254_s23, %s15910_s27 }
  0x1b   : > { %14596 = vst [vmem:[#allocation12_spill] sm:$0xff] %v7656_v23  ;;  %5991 = vmatpush.msk.msra.mxu0 %vm281_vm6, %v13846_v19  ;;  %vm271_vm0 = vcmp.le.s32.totalorder %v7740_v35, %v7624_v14  ;;  %v7758_v38 = vadd.s32 176, %v7622_v13  ;;  %v7769_v39 = vadd.s32 40, %v7622_v13  ;;  %v7772_v40 = vadd.s32 168, %v7622_v13  ;;  %s5923_s30 = sshll.u32 %s13689_s29, 3 }
  0x1c   : > { %14597 = vst [vmem:[#allocation13_spill] sm:$0xff] %v7663_v24  ;;  %6055 = vmatpush.msk.msra.mxu3 %vm314_vm7, %v13846_v19  ;;  %1192 = vmatpush.msra.mxu2 %v13846_v19  ;;  %vm304_vm1 = vcmp.le.s32.totalorder %v7743_v36, %v7634_v17  ;;  %vm269_vm2 = vcmp.le.s32.totalorder %v7755_v37, %v7624_v14  ;;  %v7786_v42 = vadd.s32 32, %v7622_v13  ;;  %v7789_v43 = vadd.s32 160, %v7622_v13  ;;  %s13721_s5 = scalar_lea.vmem %s13841_s2, %s5923_s30 }
  0x1d   : > { %14598 = vst [vmem:[#allocation14_spill] sm:$0xff] %v7672_v25  ;;  %5992 = vmatpush.msk.msra.mxu0 %vm279_vm8, %v13846_v19  ;;  %vm302_vm3 = vcmp.le.s32.totalorder %v7758_v38, %v7634_v17  ;;  %vm267_vm4 = vcmp.le.s32.totalorder %v7769_v39, %v7624_v14  ;;  %vm300_vm5 = vcmp.le.s32.totalorder %v7772_v40, %v7634_v17  ;;  %v7802_v45 = vadd.s32 24, %v7622_v13 }
  0x1e   : > { %7404 = vset.pattern.permute.xlu1 %v13852_v1  ;;  %7402 = vset.pattern.permute.xlu0 %v13848_v2  ;;  %14599 = vst [vmem:[#allocation15_spill] sm:$0xff] %v7684_v28  ;;  %vm265_vm6 = vcmp.le.s32.totalorder %v7786_v42, %v7624_v14  ;;  %v7805_v46 = vadd.s32 152, %v7622_v13  ;;  %vm298_vm7 = vcmp.le.s32.totalorder %v7789_v43, %v7634_v17  ;;  %v7813_v47 = vadd.s32 16, %v7622_v13 }
  0x1f   : > { %466 = vperm.xlu1 %7404, %v7564_v4   ;;  %638 = vperm.xlu0 %7402, %v7559_v3   ;;  %14600 = vst [vmem:[#allocation16_spill] sm:$0xff] %v7703_v29  ;;  %v7816_v48 = vadd.s32 144, %v7622_v13  ;;  %vm263_vm8 = vcmp.le.s32.totalorder %v7802_v45, %v7624_v14  ;;  %v7829_v50 = vadd.s32 8, %v7622_v13  ;;  %v7836_v51 = vadd.s32 136, %v7622_v13 }
  0x20   : > { %7406 = vset.pattern.permute.xlu2 %v13844_v0  ;;  %14601 = vst [vmem:[#allocation17_spill] sm:$0xff] %v7706_v30  ;;  %6056 = vmatpush.msk.msra.mxu3 %vm312_vm9, %v13846_v19  ;;  %vm296_vm9 = vcmp.le.s32.totalorder %v7805_v46, %v7634_v17  ;;  %v7846_v52 = vadd.s32 128, %v7622_v13  ;;  %v7895_v61 = vperm.slane %v457_v59, 0  ;;  %v7897_v62 = vperm.slane %v458_v60, 0 }
  0x21   : > { %804 = vperm.xlu2 %7406, %v7564_v4   ;;  %14602 = vst [vmem:[#allocation18_spill] sm:$0xff] %v7710_v31  ;;  %5993 = vmatpush.msk.msra.mxu0 %vm277_vm10, %v13846_v19  ;;  %vm261_vm10 = vcmp.le.s32.totalorder %v7813_v47, %v7624_v14  ;;  %v7900_v63 = vperm.slane %v457_v59, 1  ;;  %v7902_v12 = vperm.slane %v457_v59, 2 }
  0x22   : > { %14603 = vst [vmem:[#allocation19_spill] sm:$0xff] %v7713_v32  ;;  %6057 = vmatpush.msk.msra.mxu3 %vm310_vm11, %v13846_v19  ;;  %1193 = vmatpush.msra.mxu2 %v13846_v19  ;;  %vm294_vm11 = vcmp.le.s32.totalorder %v7816_v48, %v7634_v17 }
  0x23   : > { %14604 = vst [vmem:[#allocation20_spill] sm:$0xff] %v7727_v33  ;;  %5994 = vmatpush.msk.msra.mxu0 %vm275_vm12, %v13846_v19  ;;  %vm259_vm12 = vcmp.le.s32.totalorder %v7829_v50, %v7624_v14 }
  0x24   : > { %14605 = vst [vmem:[#allocation21_spill] sm:$0xff] %v7730_v34  ;;  %6058 = vmatpush.msk.msra.mxu3 %vm308_vm13, %v13846_v19  ;;  %1194 = vmatpush.msra.mxu2 %v13846_v19  ;;  %vm292_vm13 = vcmp.le.s32.totalorder %v7836_v51, %v7634_v17 }
  0x25   : > { %14606 = vst [vmem:[#allocation22_spill] sm:$0xff] %v7740_v35  ;;  %5995 = vmatpush.msk.msra.mxu0 %vm273_vm14, %v13846_v19  ;;  %vm257_vm14 = vcmp.le.s32.totalorder %v7622_v13, %v7624_v14 }
  0x26   : > { %14607 = vst [vmem:[#allocation23_spill] sm:$0xff] %v7743_v36  ;;  %6059 = vmatpush.msk.msra.mxu3 %vm306_vm15, %v13846_v19  ;;  %1195 = vmatpush.msra.mxu2 %v13846_v19  ;;  %vm290_vm15 = vcmp.le.s32.totalorder %v7846_v52, %v7634_v17  ;;  %v14621_v17 = vmov 1  }
  0x27   : > { %471 = vperm.xlu1 %7404, %v7574_v5   ;;  %7408 = vset.pattern.permute.xlu0 %v13844_v0  ;;  %14608 = vst [vmem:[#allocation24_spill] sm:$0xff] %v7755_v37 }
  0x28   : > { %808 = vperm.xlu0 %7408, %v7574_v5   ;;  %14609 = vst [vmem:[#allocation25_spill] sm:$0xff] %v7758_v38  ;;  %5996 = vmatpush.msk.msra.mxu0 %vm271_vm0, %v13846_v19 }
  0x29   : > { %7407 = vset.pattern.permute.xlu2 %v13848_v2  ;;  %14610 = vst [vmem:[#allocation26_spill] sm:$0xff] %v7769_v39  ;;  %6060 = vmatpush.msk.msra.mxu3 %vm304_vm1, %v13846_v19 }
  0x2a   : > { %646 = vperm.xlu2 %7407, %v7574_v5   ;;  %14611 = vst [vmem:[#allocation27_spill] sm:$0xff] %v7772_v40  ;;  %5997 = vmatpush.msk.msra.mxu0 %vm269_vm2, %v13846_v19 }
  0x2b   : > { %14612 = vst [vmem:[#allocation28_spill] sm:$0xff] %v7786_v42  ;;  %1196 = vmatpush.msra.mxu2 %v13846_v19  ;;  %6061 = vmatpush.msk.msra.mxu3 %vm302_vm3, %v13846_v19 }
  0x2c   : > { %14613 = vst [vmem:[#allocation29_spill] sm:$0xff] %v7789_v43  ;;  %5998 = vmatpush.msk.msra.mxu0 %vm267_vm4, %v13846_v19  ;;  %v216_v43 = vld [vmem:[%s7556_s22 + $0x68] sm:$0xff] }
  0x2d   : > { %14614 = vst [vmem:[#allocation30_spill] sm:$0xff] %v7802_v45  ;;  %1197 = vmatpush.msra.mxu2 %v13846_v19  ;;  %6062 = vmatpush.msk.msra.mxu3 %vm300_vm5, %v13846_v19 }
  0x2e   : > { %14615 = vst [vmem:[#allocation31_spill] sm:$0xff] %v7805_v46  ;;  %5999 = vmatpush.msk.msra.mxu0 %vm265_vm6, %v13846_v19 }
  0x2f   : > { %476 = vperm.xlu1 %7404, %v7582_v6   ;;  %14616 = vst [vmem:[#allocation32_spill] sm:$0xff] %v7813_v47  ;;  %1198 = vmatpush.msra.mxu2 %v13846_v19 }
  0x30   : > { %7411 = vset.pattern.permute.xlu0 %v13848_v2  ;;  %14617 = vst [vmem:[#allocation33_spill] sm:$0xff] %v7816_v48  ;;  %6063 = vmatpush.msk.msra.mxu3 %vm298_vm7, %v13846_v19 }
  0x31   : > { %654 = vperm.xlu0 %7411, %v7585_v7   ;;  %14618 = vst [vmem:[#allocation34_spill] sm:$0xff] %v7829_v50  ;;  %6000 = vmatpush.msk.msra.mxu0 %vm263_vm8, %v13846_v19 }
  0x32   : > { %650 = vperm.xlu2 %7407, %v7582_v6   ;;  %14619 = vst [vmem:[#allocation35_spill] sm:$0xff] %v7836_v51  ;;  %1199 = vmatpush.msra.mxu2 %v13846_v19 }
  0x33   : > { %6064 = vmatpush.msk.msra.mxu3 %vm296_vm9, %v13846_v19  ;;  %14620 = vst [vmem:[#allocation36_spill] sm:$0xff] %v7846_v52  ;;  %6001 = vmatpush.msk.msra.mxu0 %vm261_vm10, %v13846_v19 }
  0x34   : > { %1200 = vmatpush.msra.mxu2 %v13846_v19  ;;  %451 = vst [vmem:[#allocation2 + $0x18] sm:$0x7f] %v13842_v53 }
  0x35   : > { %6065 = vmatpush.msk.msra.mxu3 %vm294_vm11, %v13846_v19  ;;  %6002 = vmatpush.msk.msra.mxu0 %vm259_vm12, %v13846_v19  ;;  %452 = vst [vmem:[#allocation2 + $0x10] sm:$0x7f] %v13842_v53 }
  0x36   : > { %1201 = vmatpush.msra.mxu2 %v13846_v19  ;;  %453 = vst [vmem:[#allocation2 + $0x8] sm:$0x7f] %v13842_v53 }
  0x37   : > { %7409 = vset.pattern.permute.xlu1 %v13844_v0  ;;  %6066 = vmatpush.msk.msra.mxu3 %vm292_vm13, %v13846_v19  ;;  %454 = vst [vmem:[#allocation2 + $0x20] sm:$0x7f] %v13842_v53 }
  0x38   : > { %812 = vperm.xlu1 %7409, %v7582_v6   ;;  %6003 = vmatpush.msk.msra.mxu0 %vm257_vm14, %v13846_v19  ;;  %455 = vst [vmem:[#allocation2 + $0x28] sm:$0x7f] %v13842_v53 }
  0x39   : > { %7414 = vset.pattern.permute.xlu0 %v13852_v1  ;;  %1202 = vmatpush.msra.mxu2 %v13846_v19  ;;  %456 = vst [vmem:[#allocation2 + $0x38] sm:$0x7f] %v13842_v53  ;;  %v7904_v53 = vperm.slane %v458_v60, 2 }
  0x3a   : > { %7410 = vset.pattern.permute.xlu2 %v13852_v1  ;;  %491 = vperm.xlu0 %7414, %v7593_v8  }
  0x3b   : > { %481 = vperm.xlu2 %7410, %v7585_v7   ;;  %6067 = vmatpush.msk.msra.mxu3 %vm290_vm15, %v13846_v19  ;;  %v7910_v19 = vld [vmem:[%s7556_s22 + $0x78] sm:$0xff] }
  0x3c   : > { %7286 = vmatpush.lsf.msrb.mxu1 %v7910_v19  ;;  %7261 = vmatpush.lsf.msrb.mxu0 %v7910_v19 }
  0x3d   : > { %7311 = vmatpush.lsf.msrb.mxu2 %v7910_v19  ;;  %7336 = vmatpush.lsf.msrb.mxu3 %v7910_v19 }
  0x3e   : > { %7287 = vmatpush.lsf.msrb.mxu1 %v7882_v56  ;;  %7262 = vmatpush.lsf.msrb.mxu0 %v7882_v56 }
  0x3f   : > { %7312 = vmatpush.lsf.msrb.mxu2 %v7882_v56  ;;  %7337 = vmatpush.lsf.msrb.mxu3 %v7882_v56 }
  0x40   : > { %816 = vperm.xlu1 %7409, %v7585_v7   ;;  %7288 = vmatpush.lsf.msrb.mxu1 %v216_v43 }
  0x41   : > { %7263 = vmatpush.lsf.msrb.mxu0 %v216_v43  ;;  %7313 = vmatpush.lsf.msrb.mxu2 %v216_v43 }
  0x42   : > { %7417 = vset.pattern.permute.xlu0 %v13844_v0  ;;  %7338 = vmatpush.lsf.msrb.mxu3 %v216_v43 }
  0x43   : > { %486 = vperm.xlu2 %7410, %v7602_v9   ;;  %828 = vperm.xlu0 %7417, %v7605_v10  }
  0x44   : > { %7289 = vmatpush.lsf.msrb.mxu1 %v7781_v41  ;;  %7264 = vmatpush.lsf.msrb.mxu0 %v7781_v41 }
  0x45   : > { %7314 = vmatpush.lsf.msrb.mxu2 %v7781_v41  ;;  %7339 = vmatpush.lsf.msrb.mxu3 %v7781_v41 }
  0x46   : > { %7290 = vmatpush.lsf.msrb.mxu1 %v7675_v26  ;;  %7265 = vmatpush.lsf.msrb.mxu0 %v7675_v26 }
  0x47   : > { %7315 = vmatpush.lsf.msrb.mxu2 %v7675_v26  ;;  %7340 = vmatpush.lsf.msrb.mxu3 %v7675_v26 }
  0x48   : > { %7412 = vset.pattern.permute.xlu1 %v13848_v2  ;;  %7291 = vmatpush.lsf.msrb.mxu1 %v7823_v49 }
  0x49   : > { %658 = vperm.xlu1 %7412, %v7602_v9   ;;  %7266 = vmatpush.lsf.msrb.mxu0 %v7823_v49 }
  0x4a   : > { %7316 = vmatpush.lsf.msrb.mxu2 %v7823_v49  ;;  %7341 = vmatpush.lsf.msrb.mxu3 %v7823_v49 }
  0x4b   : > { %7413 = vset.pattern.permute.xlu2 %v13844_v0  ;;  %7420 = vset.pattern.permute.xlu0 %v13848_v2 }
  0x4c   : > { %820 = vperm.xlu2 %7413, %v7602_v9   ;;  %674 = vperm.xlu0 %7420, %v7615_v11  }
  0x4d   : > { %7292 = vmatpush.lsf.msrb.mxu1 %v7615_v11  ;;  %7267 = vmatpush.lsf.msrb.mxu0 %v7615_v11 }
  0x4e   : > { %7317 = vmatpush.lsf.msrb.mxu2 %v7615_v11  ;;  %7342 = vmatpush.lsf.msrb.mxu3 %v7615_v11 }
  0x4f   : > { %7293 = vmatpush.lsf.msrb.mxu1 %v7678_v27  ;;  %7268 = vmatpush.lsf.msrb.mxu0 %v7678_v27 }
  0x50   : > { %7318 = vmatpush.lsf.msrb.mxu2 %v7678_v27  ;;  %7343 = vmatpush.lsf.msrb.mxu3 %v7678_v27 }
  0x51   : > { %662 = vperm.xlu1 %7412, %v7593_v8   ;;  %7294 = vmatpush.lsf.msrb.mxu1 %v7605_v10 }
  0x52   : > { %7269 = vmatpush.lsf.msrb.mxu0 %v7605_v10  ;;  %7319 = vmatpush.lsf.msrb.mxu2 %v7605_v10 }
  0x53   : > { %7344 = vmatpush.lsf.msrb.mxu3 %v7605_v10  ;;  %7295 = vmatpush.lsf.msrb.mxu1 %v7593_v8 }
  0x54   : > { %824 = vperm.xlu2 %7413, %v7593_v8   ;;  %7423 = vset.pattern.permute.xlu0 %v13852_v1 }
  0x55   : > { %516 = vperm.xlu0 %7423, %v7675_v26   ;;  %7270 = vmatpush.lsf.msrb.mxu0 %v7593_v8 }
  0x56   : > { %7320 = vmatpush.lsf.msrb.mxu2 %v7593_v8  ;;  %7345 = vmatpush.lsf.msrb.mxu3 %v7593_v8 }
  0x57   : > { %7296 = vmatpush.lsf.msrb.mxu1 %v7602_v9  ;;  %7271 = vmatpush.lsf.msrb.mxu0 %v7602_v9 }
  0x58   : > { %7321 = vmatpush.lsf.msrb.mxu2 %v7602_v9  ;;  %7346 = vmatpush.lsf.msrb.mxu3 %v7602_v9 }
  0x59   : > { %7415 = vset.pattern.permute.xlu1 %v13852_v1  ;;  %7297 = vmatpush.lsf.msrb.mxu1 %v7585_v7 }
  0x5a   : > { %496 = vperm.xlu1 %7415, %v7605_v10   ;;  %7272 = vmatpush.lsf.msrb.mxu0 %v7585_v7 }
  0x5b   : > { %7322 = vmatpush.lsf.msrb.mxu2 %v7585_v7  ;;  %7347 = vmatpush.lsf.msrb.mxu3 %v7585_v7 }
  0x5c   : > { %7416 = vset.pattern.permute.xlu2 %v13848_v2  ;;  %7298 = vmatpush.lsf.msrb.mxu1 %v7582_v6 }
  0x5d   : > { %666 = vperm.xlu2 %7416, %v7605_v10   ;;  %7426 = vset.pattern.permute.xlu0 %v13844_v0 }
  0x5e   : > { %848 = vperm.xlu0 %7426, %v7781_v41   ;;  %7273 = vmatpush.lsf.msrb.mxu0 %v7582_v6 }
  0x5f   : > { %7323 = vmatpush.lsf.msrb.mxu2 %v7582_v6  ;;  %7348 = vmatpush.lsf.msrb.mxu3 %v7582_v6 }
  0x60   : > { %7299 = vmatpush.lsf.msrb.mxu1 %v7574_v5  ;;  %7274 = vmatpush.lsf.msrb.mxu0 %v7574_v5 }
  0x61   : > { %7324 = vmatpush.lsf.msrb.mxu2 %v7574_v5  ;;  %7349 = vmatpush.lsf.msrb.mxu3 %v7574_v5 }
  0x62   : > { %501 = vperm.xlu1 %7415, %v7678_v27   ;;  %7300 = vmatpush.lsf.msrb.mxu1 %v7564_v4 }
  0x63   : > { %7275 = vmatpush.lsf.msrb.mxu0 %v7564_v4  ;;  %7325 = vmatpush.lsf.msrb.mxu2 %v7564_v4 }
  0x64   : > { %7350 = vmatpush.lsf.msrb.mxu3 %v7564_v4  ;;  %7301 = vmatpush.lsf.msrb.mxu1 %v7559_v3 }
  0x65   : > { %670 = vperm.xlu2 %7416, %v7678_v27   ;;  %7276 = vmatpush.lsf.msrb.mxu0 %v7559_v3 }
  0x66   : > { %7429 = vset.pattern.permute.xlu0 %v13848_v2  ;;  %7326 = vmatpush.lsf.msrb.mxu2 %v7559_v3 }
  0x67   : > { %694 = vperm.xlu0 %7429, %v7882_v56   ;;  %7351 = vmatpush.lsf.msrb.mxu3 %v7559_v3 }
  0x6a   : > { %7418 = vset.pattern.permute.xlu1 %v13844_v0 }
  0x6b   : > { %832 = vperm.xlu1 %7418, %v7678_v27  }
  0x6d   : > { %7419 = vset.pattern.permute.xlu2 %v13852_v1 }
  0x6e   : > { %506 = vperm.xlu2 %7419, %v7615_v11  }
  0x71   : > { %v7793_v44 = vpop.permute.xlu2 %642 }
  0x72   : > { %v705_v52 = vsub.f32 %v7793_v44, %v7900_v63 }
  0x73   : > { %836 = vperm.xlu1 %7418, %v7615_v11  }
  0x74   : > { %v737_v32 = vmul.f32 %v705_v52, %v705_v52 }
  0x76   : > { %511 = vperm.xlu2 %7419, %v7823_v49  }
  0x7b   : > { %7421 = vset.pattern.permute.xlu1 %v13848_v2  ;;  %v805_v54 = vpop.permute.xlu2 %804  ;;  %v7912_v2 = vperm.slane %v458_v60, 1 }
  0x7c   : > { %678 = vperm.xlu1 %7421, %v7823_v49   ;;  %v867_v42 = vsub.f32 %v805_v54, %v7902_v12  ;;  %v868_v40 = vsub.f32 %v805_v54, %v7904_v53 }
  0x7e   : > { %7422 = vset.pattern.permute.xlu2 %v13844_v0  ;;  %v899_v30 = vmul.f32 %v867_v42, %v867_v42 }
  0x7f   : > { %840 = vperm.xlu2 %7422, %v7823_v49  }
  0x84   : > { %682 = vperm.xlu1 %7421, %v7675_v26   ;;  %v7879_v55 = vpop.permute.xlu2 %646 }
  0x87   : > { %844 = vperm.xlu2 %7422, %v7675_v26  }
  0x88   : > { %v462_v57 = vpop.permute.xlu0 %461  ;;  %v801_v58 = vpop.permute.xlu1 %800 }
  0x89   : > { %v542_v59 = vsub.f32 %v462_v57, %v7897_v62  ;;  %v865_v51 = vsub.f32 %v801_v58, %v7902_v12  ;;  %v866_v60 = vsub.f32 %v801_v58, %v7904_v53  ;;  %v706_v58 = vsub.f32 %v7793_v44, %v7912_v2 }
  0x8b   : > { %v897_v44 = vmul.f32 %v865_v51, %v865_v51  ;;  %v898_v34 = vmul.f32 %v866_v60, %v866_v60  ;;  %v738_v31 = vmul.f32 %v706_v58, %v706_v58  ;;  %v708_v51 = vsub.f32 %v7879_v55, %v7912_v2 }
  0x8c   : > { %7424 = vset.pattern.permute.xlu1 %v13852_v1  ;;  %v7907_v0 = vpop.permute.xlu2 %650  ;;  %v541_v1 = vsub.f32 %v462_v57, %v7895_v61 }
  0x8d   : > { %521 = vperm.xlu1 %7424, %v7781_v41   ;;  %v709_v26 = vsub.f32 %v7907_v0, %v7900_v63 }
  0x8e   : > { %v573_v39 = vmul.f32 %v541_v1, %v541_v1  ;;  %v900_v1 = vmul.f32 %v868_v40, %v868_v40 }
  0x8f   : > { %7425 = vset.pattern.permute.xlu2 %v14621_v17 }
  0x90   : > { %686 = vperm.xlu2 %7425, %v7781_v41   ;;  %v14623_v41 = vmov 2  }
  0x91   : > { %v467_v50 = vpop.permute.xlu1 %466  ;;  %v639_v48 = vpop.permute.xlu0 %638 }
  0x92   : > { %v543_v47 = vsub.f32 %v467_v50, %v7895_v61  ;;  %v544_v57 = vsub.f32 %v467_v50, %v7897_v62  ;;  %v703_v46 = vsub.f32 %v639_v48, %v7900_v63  ;;  %v704_v45 = vsub.f32 %v639_v48, %v7912_v2 }
  0x93   : > { %v574_v50 = vmul.f32 %v542_v59, %v542_v59 }
  0x94   : > { %v735_v38 = vmul.f32 %v703_v46, %v703_v46  ;;  %v736_v37 = vmul.f32 %v704_v45, %v704_v45  ;;  %v575_v48 = vmul.f32 %v543_v47, %v543_v47  ;;  %v576_v36 = vmul.f32 %v544_v57, %v544_v57 }
  0x95   : > { %526 = vperm.xlu1 %7424, %v216_v43   ;;  %v7939_v35 = vpop.permute.xlu2 %481  ;;  %v707_v45 = vsub.f32 %v7879_v55, %v7900_v63 }
  0x96   : > { %v767_v33 = vadd.f32 %v735_v38, %v573_v39  ;;  %v768_v54 = vadd.f32 %v736_v37, %v574_v50  ;;  %v769_v37 = vadd.f32 %v737_v32, %v575_v48  ;;  %v770_v39 = vadd.f32 %v738_v31, %v576_v36 }
  0x97   : > { %v739_v31 = vmul.f32 %v707_v45, %v707_v45  ;;  %v740_v32 = vmul.f32 %v708_v51, %v708_v51  ;;  %v14624_v50 = vmov 0  }
  0x98   : > { %v7943_v46 = vadd.f32 %v897_v44, %v767_v33  ;;  %v7945_v47 = vadd.f32 %v898_v34, %v768_v54  ;;  %690 = vperm.xlu2 %7425, %v216_v43   ;;  %v14622_v34 = vmov 1.0   ;;  %v7971_v52 = vadd.f32 %v899_v30, %v769_v37 }
  0x99   : > { %v472_v38 = vpop.permute.xlu1 %471  ;;  %v7975_v57 = vadd.f32 %v900_v1, %v770_v39  ;;  %v710_v1 = vsub.f32 %v7907_v0, %v7912_v2  ;;  %v741_v39 = vmul.f32 %v709_v26, %v709_v26 }
  0x9a   : > { %v545_v40 = vsub.f32 %v472_v38, %v7895_v61  ;;  %v546_v42 = vsub.f32 %v472_v38, %v7897_v62  ;;  %vm961_vm0 = vcmp.lt.f32.partialorder %v7943_v46, 0.09  ;;  %vm962_vm1 = vcmp.lt.f32.partialorder %v7945_v47, 0.09  ;;  %v809_v33 = vpop.permute.xlu0 %808 }
  0x9b   : > { %6004 = vmatmul.msk.f32.vlgmr.msra.gmra.mxu0 %vm961_vm0, %v14622_v34  ;;  %6020 = vmatmul.msk.f32.vlgmr.msra.gmra.mxu1 %vm962_vm1, %v14622_v34  ;;  %v869_v36 = vsub.f32 %v809_v33, %v7902_v12  ;;  %v870_v60 = vsub.f32 %v809_v33, %v7904_v53  ;;  %vm963_vm2 = vcmp.lt.f32.partialorder %v7971_v52, 0.09  ;;  %vm964_vm3 = vcmp.lt.f32.partialorder %v7975_v57, 0.09 }
  0x9c   : > { %6036 = vmatmul.msk.f32.vlgmr.msra.gmra.mxu2 %vm961_vm0, %v14622_v34  ;;  %6068 = vmatmul.msk.f32.vlgmr.msra.gmra.mxu3 %vm962_vm1, %v14622_v34  ;;  %v577_v55 = vmul.f32 %v545_v40, %v545_v40  ;;  %v578_v59 = vmul.f32 %v546_v42, %v546_v42  ;;  %v742_v40 = vmul.f32 %v710_v1, %v710_v1  ;;  %v8425_v52 = vadd.s32 1, %v7622_v13 }
  0x9d   : > { %7427 = vset.pattern.permute.xlu1 %v14623_v41  ;;  %v7977_v58 = vpop.permute.xlu2 %486  ;;  %v901_v48 = vmul.f32 %v869_v36, %v869_v36  ;;  %v902_v44 = vmul.f32 %v870_v60, %v870_v60  ;;  %v549_v33 = vsub.f32 %v7939_v35, %v7895_v61 }
  0x9e   : > { %852 = vperm.xlu1 %7427, %v216_v43   ;;  %v771_v43 = vadd.f32 %v739_v31, %v577_v55  ;;  %v772_v54 = vadd.f32 %v740_v32, %v578_v59  ;;  %v550_v32 = vsub.f32 %v7939_v35, %v7897_v62  ;;  %14626 = vst [vmem:[#allocation37_spill] sm:$0xff] %v8425_v52 }
  0xa0   : > { %7428 = vset.pattern.permute.xlu2 %v14624_v50  ;;  %v8009_v38 = vadd.f32 %v901_v48, %v771_v43  ;;  %v8011_v0 = vadd.f32 %v902_v44, %v772_v54  ;;  %v582_v43 = vmul.f32 %v550_v32, %v550_v32 }
  0xa1   : > { %v477_v30 = vpop.permute.xlu1 %476  ;;  %531 = vperm.xlu2 %7428, %v7882_v56  }
  0xa2   : > { %v547_v45 = vsub.f32 %v477_v30, %v7895_v61  ;;  %v548_v51 = vsub.f32 %v477_v30, %v7897_v62  ;;  %vm965_vm4 = vcmp.lt.f32.partialorder %v8009_v38, 0.09  ;;  %vm966_vm5 = vcmp.lt.f32.partialorder %v8011_v0, 0.09 }
  0xa3   : > { %6005 = vmatmul.msk.f32.gmra.mxu0 %vm963_vm2, %v14622_v34  ;;  %6021 = vmatmul.msk.f32.gmra.mxu1 %vm964_vm3, %v14622_v34  ;;  %v655_v37 = vpop.permute.xlu0 %654  ;;  %v581_v30 = vmul.f32 %v549_v33, %v549_v33  ;;  %v552_v33 = vsub.f32 %v7977_v58, %v7897_v62 }
  0xa4   : > { %6037 = vmatmul.msk.f32.gmra.mxu2 %vm963_vm2, %v14622_v34  ;;  %6069 = vmatmul.msk.f32.gmra.mxu3 %vm964_vm3, %v14622_v34  ;;  %v579_v49 = vmul.f32 %v547_v45, %v547_v45  ;;  %v711_v11 = vsub.f32 %v655_v37, %v7900_v63  ;;  %v712_v35 = vsub.f32 %v655_v37, %v7912_v2 }
  0xa5   : > { %v584_v32 = vmul.f32 %v552_v33, %v552_v33 }
  0xa6   : > { %856 = vperm.xlu1 %7427, %v7882_v56   ;;  %v8016_v42 = vpop.permute.xlu2 %820  ;;  %v580_v56 = vmul.f32 %v548_v51, %v548_v51  ;;  %v773_v60 = vadd.f32 %v741_v39, %v579_v49  ;;  %v743_v44 = vmul.f32 %v711_v11, %v711_v11  ;;  %v744_v54 = vmul.f32 %v712_v35, %v712_v35 }
  0xa7   : > { %v875_v8 = vsub.f32 %v8016_v42, %v7902_v12 }
  0xa8   : > { %v774_v48 = vadd.f32 %v742_v40, %v580_v56  ;;  %v775_v45 = vadd.f32 %v743_v44, %v581_v30  ;;  %v776_v10 = vadd.f32 %v744_v54, %v582_v43  ;;  %v551_v40 = vsub.f32 %v7977_v58, %v7895_v61 }
  0xa9   : > { %536 = vperm.xlu2 %7428, %v7910_v19  }
  0xaa   : > { %v813_v31 = vpop.permute.xlu1 %812  ;;  %v583_v9 = vmul.f32 %v551_v40, %v551_v40 }
  0xab   : > { %v871_v36 = vsub.f32 %v813_v31, %v7902_v12  ;;  %v872_v55 = vsub.f32 %v813_v31, %v7904_v53  ;;  %6006 = vmatmul.msk.f32.gmra.mxu0 %vm965_vm4, %v14622_v34  ;;  %6022 = vmatmul.msk.f32.gmra.mxu1 %vm966_vm5, %v14622_v34  ;;  %v876_v31 = vsub.f32 %v8016_v42, %v7904_v53 }
  0xac   : > { %6038 = vmatmul.msk.f32.gmra.mxu2 %vm965_vm4, %v14622_v34  ;;  %6070 = vmatmul.msk.f32.gmra.mxu3 %vm966_vm5, %v14622_v34  ;;  %v492_v7 = vpop.permute.xlu0 %491 }
  0xad   : > { %v903_v27 = vmul.f32 %v871_v36, %v871_v36  ;;  %v904_v59 = vmul.f32 %v872_v55, %v872_v55  ;;  %v907_v55 = vmul.f32 %v875_v8, %v875_v8 }
  0xae   : > { %7430 = vset.pattern.permute.xlu1 %v14621_v17  ;;  %v825_v51 = vpop.permute.xlu2 %824 }
  0xaf   : > { %698 = vperm.xlu1 %7430, %v7910_v19   ;;  %v8050_v26 = vadd.f32 %v903_v27, %v773_v60  ;;  %v8052_v1 = vadd.f32 %v904_v59, %v774_v48  ;;  %v908_v59 = vmul.f32 %v876_v31, %v876_v31  ;;  %v553_v60 = vsub.f32 %v492_v7, %v7895_v61 }
  0xb0   : > { %v554_v48 = vsub.f32 %v492_v7, %v7897_v62  ;;  %v877_v43 = vsub.f32 %v825_v51, %v7902_v12  ;;  %v878_v6 = vsub.f32 %v825_v51, %v7904_v53 }
  0xb1   : > { %vm967_vm6 = vcmp.lt.f32.partialorder %v8050_v26, 0.09  ;;  %vm968_vm7 = vcmp.lt.f32.partialorder %v8052_v1, 0.09  ;;  %7431 = vset.pattern.permute.xlu2 %v14623_v41 }
  0xb2   : > { %v817_v17 = vpop.permute.xlu1 %816  ;;  %860 = vperm.xlu2 %7431, %v7910_v19   ;;  %v910_v40 = vmul.f32 %v878_v6, %v878_v6 }
  0xb3   : > { %v873_v37 = vsub.f32 %v817_v17, %v7902_v12  ;;  %v874_v39 = vsub.f32 %v817_v17, %v7904_v53  ;;  %6007 = vmatmul.msk.f32.gmra.mxu0 %vm967_vm6, %v14622_v34  ;;  %6023 = vmatmul.msk.f32.gmra.mxu1 %vm968_vm7, %v14622_v34 }
  0xb4   : > { %6039 = vmatmul.msk.f32.gmra.mxu2 %vm967_vm6, %v14622_v34  ;;  %6071 = vmatmul.msk.f32.gmra.mxu3 %vm968_vm7, %v14622_v34 }
  0xb5   : > { %v905_v19 = vmul.f32 %v873_v37, %v873_v37  ;;  %v906_v41 = vmul.f32 %v874_v39, %v874_v39  ;;  %v585_v37 = vmul.f32 %v553_v60, %v553_v60  ;;  %v586_v39 = vmul.f32 %v554_v48, %v554_v48 }
  0xb7   : > { %v8082_v49 = vadd.f32 %v905_v19, %v775_v45  ;;  %v8084_v56 = vadd.f32 %v906_v41, %v776_v10  ;;  %v667_v42 = vpop.permute.xlu2 %666  ;;  %v909_v19 = vmul.f32 %v877_v43, %v877_v43 }
  0xb8   : > { %v717_v33 = vsub.f32 %v667_v42, %v7900_v63 }
  0xb9   : > { %vm13889_vm8 = vcmp.lt.f32.partialorder %v8082_v49, 0.09  ;;  %vm970_vm9 = vcmp.lt.f32.partialorder %v8084_v56, 0.09 }
  0xba   : > { %v749_v3 = vmul.f32 %v717_v33, %v717_v33 }
  0xbb   : > { %v659_v58 = vpop.permute.xlu1 %658  ;;  %6008 = vmatmul.msk.f32.gmra.mxu0 %vm13889_vm8, %v14622_v34  ;;  %6024 = vmatmul.msk.f32.gmra.mxu1 %vm970_vm9, %v14622_v34 }
  0xbc   : > { %v713_v11 = vsub.f32 %v659_v58, %v7900_v63  ;;  %v714_v36 = vsub.f32 %v659_v58, %v7912_v2  ;;  %6040 = vmatmul.msk.f32.gmra.mxu2 %vm13889_vm8, %v14622_v34  ;;  %6072 = vmatmul.msk.f32.gmra.mxu3 %vm970_vm9, %v14622_v34  ;;  %v718_v58 = vsub.f32 %v667_v42, %v7912_v2 }
  0xbe   : > { %v745_v35 = vmul.f32 %v713_v11, %v713_v11  ;;  %v746_v27 = vmul.f32 %v714_v36, %v714_v36 }
  0xbf   : > { %v671_v51 = vpop.permute.xlu2 %670 }
  0xc0   : > { %v777_v30 = vadd.f32 %v745_v35, %v583_v9  ;;  %v778_v44 = vadd.f32 %v746_v27, %v584_v32  ;;  %v829_v9 = vpop.permute.xlu0 %828  ;;  %v750_v35 = vmul.f32 %v718_v58, %v718_v58 }
  0xc1   : > { %v879_v36 = vsub.f32 %v829_v9, %v7902_v12  ;;  %v880_v7 = vsub.f32 %v829_v9, %v7904_v53 }
  0xc2   : > { %v8128_v54 = vadd.f32 %v907_v55, %v777_v30  ;;  %v8130_v17 = vadd.f32 %v908_v59, %v778_v44 }
  0xc3   : > { %v663_v45 = vpop.permute.xlu1 %662  ;;  %v911_v30 = vmul.f32 %v879_v36, %v879_v36  ;;  %v912_v44 = vmul.f32 %v880_v7, %v880_v7 }
  0xc4   : > { %v715_v5 = vsub.f32 %v663_v45, %v7900_v63  ;;  %v716_v10 = vsub.f32 %v663_v45, %v7912_v2  ;;  %vm13926_vm10 = vcmp.lt.f32.partialorder %v8128_v54, 0.09  ;;  %vm13916_vm11 = vcmp.lt.f32.partialorder %v8130_v17, 0.09 }
  0xc5   : > { %6009 = vmatmul.msk.f32.gmra.mxu0 %vm13926_vm10, %v14622_v34  ;;  %6025 = vmatmul.msk.f32.gmra.mxu1 %vm13916_vm11, %v14622_v34 }
  0xc6   : > { %v747_v4 = vmul.f32 %v715_v5, %v715_v5  ;;  %v748_v41 = vmul.f32 %v716_v10, %v716_v10  ;;  %6041 = vmatmul.msk.f32.gmra.mxu2 %vm13926_vm10, %v14622_v34  ;;  %6073 = vmatmul.msk.f32.gmra.mxu3 %vm13916_vm11, %v14622_v34  ;;  %v719_v5 = vsub.f32 %v671_v51, %v7900_v63  ;;  %vm1434_vm11 = vcmask 1042434  }
  0xc8   : > { %v779_v8 = vadd.f32 %v747_v4, %v585_v37  ;;  %v780_v31 = vadd.f32 %v748_v41, %v586_v39  ;;  %v507_v59 = vpop.permute.xlu2 %506  ;;  %v720_v4 = vsub.f32 %v671_v51, %v7912_v2  ;;  %v675_v9 = vpop.permute.xlu0 %674 }
  0xc9   : > { %v559_v36 = vsub.f32 %v507_v59, %v7895_v61  ;;  %v560_v7 = vsub.f32 %v507_v59, %v7897_v62  ;;  %v721_v51 = vsub.f32 %v675_v9, %v7900_v63 }
  0xca   : > { %v8156_v32 = vadd.f32 %v909_v19, %v779_v8  ;;  %v8158_v11 = vadd.f32 %v910_v40, %v780_v31  ;;  %v751_v8 = vmul.f32 %v719_v5, %v719_v5  ;;  %v752_v31 = vmul.f32 %v720_v4, %v720_v4 }
  0xcc   : > { %7302 = vllmr.1.mxu1  ;;  %7277 = vllmr.1.mxu0  ;;  %v497_v55 = vpop.permute.xlu1 %496  ;;  %vm13886_vm12 = vcmp.lt.f32.partialorder %v8156_v32, 0.09  ;;  %vm13915_vm13 = vcmp.lt.f32.partialorder %v8158_v11, 0.09 }
  0xcd   : > { %7327 = vllmr.1.mxu2  ;;  %7352 = vllmr.1.mxu3  ;;  %v555_v27 = vsub.f32 %v497_v55, %v7895_v61  ;;  %v556_v42 = vsub.f32 %v497_v55, %v7897_v62 }
  0xce   : > { %6010 = vmatmul.msk.f32.gmra.mxu0 %vm13886_vm12, %v14622_v34  ;;  %6026 = vmatmul.msk.f32.gmra.mxu1 %vm13915_vm13, %v14622_v34 }
  0xcf   : > { %6042 = vmatmul.msk.f32.gmra.mxu2 %vm13886_vm12, %v14622_v34  ;;  %6074 = vmatmul.msk.f32.gmra.mxu3 %vm13915_vm13, %v14622_v34  ;;  %v587_v60 = vmul.f32 %v555_v27, %v555_v27  ;;  %v588_v48 = vmul.f32 %v556_v42, %v556_v42 }
  0xd0   : > { %v512_v41 = vpop.permute.xlu2 %511 }
  0xd1   : > { %v781_v43 = vadd.f32 %v749_v3, %v587_v60  ;;  %v782_v6 = vadd.f32 %v750_v35, %v588_v48  ;;  %v722_v3 = vsub.f32 %v675_v9, %v7912_v2 }
  0xd3   : > { %v8178_v45 = vadd.f32 %v911_v30, %v781_v43  ;;  %v8180_v37 = vadd.f32 %v912_v44, %v782_v6  ;;  %v591_v30 = vmul.f32 %v559_v36, %v559_v36  ;;  %v753_v44 = vmul.f32 %v721_v51, %v721_v51 }
  0xd4   : > { %v502_v39 = vpop.permute.xlu1 %501  ;;  %v592_v43 = vmul.f32 %v560_v7, %v560_v7  ;;  %v754_v6 = vmul.f32 %v722_v3, %v722_v3  ;;  %v561_v36 = vsub.f32 %v512_v41, %v7895_v61  ;;  %v562_v7 = vsub.f32 %v512_v41, %v7897_v62 }
  0xd5   : > { %vm13887_vm14 = vcmp.lt.f32.partialorder %v8178_v45, 0.09  ;;  %vm13888_vm15 = vcmp.lt.f32.partialorder %v8180_v37, 0.09  ;;  %v557_v10 = vsub.f32 %v502_v39, %v7895_v61  ;;  %v558_v19 = vsub.f32 %v502_v39, %v7897_v62 }
  0xd6   : > { %6011 = vmatmul.msk.f32.gmra.mxu0 %vm13887_vm14, %v14622_v34  ;;  %6027 = vmatmul.msk.f32.gmra.mxu1 %vm13888_vm15, %v14622_v34 }
  0xd7   : > { %6043 = vmatmul.msk.f32.gmra.mxu2 %vm13887_vm14, %v14622_v34  ;;  %6075 = vmatmul.msk.f32.gmra.mxu3 %vm13888_vm15, %v14622_v34  ;;  %v589_v40 = vmul.f32 %v557_v10, %v557_v10  ;;  %v590_v33 = vmul.f32 %v558_v19, %v558_v19  ;;  %v785_v19 = vadd.f32 %v753_v44, %v591_v30 }
  0xd9   : > { %v783_v27 = vadd.f32 %v751_v8, %v589_v40  ;;  %v784_v42 = vadd.f32 %v752_v31, %v590_v33  ;;  %v841_v59 = vpop.permute.xlu2 %840  ;;  %v786_v33 = vadd.f32 %v754_v6, %v592_v43 }
  0xda   : > { %v885_v3 = vsub.f32 %v841_v59, %v7902_v12 }
  0xdc   : > { %v917_v43 = vmul.f32 %v885_v3, %v885_v3 }
  0xdd   : > { %v833_v58 = vpop.permute.xlu1 %832 }
  0xde   : > { %v881_v55 = vsub.f32 %v833_v58, %v7902_v12  ;;  %v882_v35 = vsub.f32 %v833_v58, %v7904_v53 }
  0xe0   : > { %v913_v60 = vmul.f32 %v881_v55, %v881_v55  ;;  %v914_v48 = vmul.f32 %v882_v35, %v882_v35  ;;  %v886_v55 = vsub.f32 %v841_v59, %v7904_v53  ;;  %v593_v35 = vmul.f32 %v561_v36, %v561_v36 }
  0xe1   : > { %v845_v51 = vpop.permute.xlu2 %844 }
  0xe2   : > { %v8206_v39 = vadd.f32 %v913_v60, %v783_v27  ;;  %v8208_v5 = vadd.f32 %v914_v48, %v784_v42  ;;  %v594_v27 = vmul.f32 %v562_v7, %v562_v7  ;;  %v517_v48 = vpop.permute.xlu0 %516  ;;  %v918_v6 = vmul.f32 %v886_v55, %v886_v55 }
  0xe3   : > { %v563_v59 = vsub.f32 %v517_v48, %v7895_v61 }
  0xe4   : > { %vm13895_vm12 = vcmp.lt.f32.partialorder %v8206_v39, 0.09  ;;  %vm13912_vm14 = vcmp.lt.f32.partialorder %v8208_v5, 0.09 }
  0xe5   : > { %v837_v10 = vpop.permute.xlu1 %836  ;;  %6012 = vmatmul.msk.f32.gmra.mxu0 %vm13895_vm12, %v14622_v34  ;;  %6028 = vmatmul.msk.f32.gmra.mxu1 %vm13912_vm14, %v14622_v34  ;;  %v595_v7 = vmul.f32 %v563_v59, %v563_v59 }
  0xe6   : > { %v883_v4 = vsub.f32 %v837_v10, %v7902_v12  ;;  %v884_v40 = vsub.f32 %v837_v10, %v7904_v53  ;;  %6044 = vmatmul.msk.f32.gmra.mxu2 %vm13895_vm12, %v14622_v34  ;;  %6076 = vmatmul.msk.f32.gmra.mxu3 %vm13912_vm14, %v14622_v34  ;;  %v564_v10 = vsub.f32 %v517_v48, %v7897_v62  ;;  %vm1440_vm14 = vcmask 1044484  }
  0xe8   : > { %v915_v8 = vmul.f32 %v883_v4, %v883_v4  ;;  %v916_v31 = vmul.f32 %v884_v40, %v884_v40  ;;  %v887_v40 = vsub.f32 %v845_v51, %v7902_v12 }
  0xea   : > { %v8226_v9 = vadd.f32 %v915_v8, %v785_v19  ;;  %v8228_v58 = vadd.f32 %v916_v31, %v786_v33  ;;  %v888_v33 = vsub.f32 %v845_v51, %v7904_v53  ;;  %v849_v48 = vpop.permute.xlu0 %848 }
  0xec   : > { %vm13890_vm15 = vcmp.lt.f32.partialorder %v8226_v9, 0.09  ;;  %vm13891_vm8 = vcmp.lt.f32.partialorder %v8228_v58, 0.09 }
  0xed   : > { %6013 = vmatmul.msk.f32.gmra.mxu0 %vm13890_vm15, %v14622_v34  ;;  %6029 = vmatmul.msk.f32.gmra.mxu1 %vm13891_vm8, %v14622_v34 }
  0xee   : > { %6045 = vmatmul.msk.f32.gmra.mxu2 %vm13890_vm15, %v14622_v34  ;;  %6077 = vmatmul.msk.f32.gmra.mxu3 %vm13891_vm8, %v14622_v34  ;;  %v679_v41 = vpop.permute.xlu1 %678 }
  0xef   : > { %v723_v42 = vsub.f32 %v679_v41, %v7900_v63  ;;  %v724_v60 = vsub.f32 %v679_v41, %v7912_v2  ;;  %v596_v41 = vmul.f32 %v564_v10, %v564_v10 }
  0xf1   : > { %v755_v30 = vmul.f32 %v723_v42, %v723_v42  ;;  %v756_v44 = vmul.f32 %v724_v60, %v724_v60  ;;  %v687_v42 = vpop.permute.xlu2 %686  ;;  %v920_v60 = vmul.f32 %v888_v33, %v888_v33 }
  0xf3   : > { %v787_v19 = vadd.f32 %v755_v30, %v593_v35  ;;  %v788_v4 = vadd.f32 %v756_v44, %v594_v27  ;;  %v919_v35 = vmul.f32 %v887_v40, %v887_v40  ;;  %v727_v30 = vsub.f32 %v687_v42, %v7900_v63 }
  0xf5   : > { %v8254_v8 = vadd.f32 %v917_v43, %v787_v19  ;;  %v8256_v31 = vadd.f32 %v918_v6, %v788_v4  ;;  %v728_v6 = vsub.f32 %v687_v42, %v7912_v2  ;;  %v889_v19 = vsub.f32 %v849_v48, %v7902_v12 }
  0xf6   : > { %v683_v36 = vpop.permute.xlu1 %682  ;;  %v890_v4 = vsub.f32 %v849_v48, %v7904_v53  ;;  %v759_v33 = vmul.f32 %v727_v30, %v727_v30 }
  0xf7   : > { %v725_v3 = vsub.f32 %v683_v36, %v7900_v63  ;;  %v726_v55 = vsub.f32 %v683_v36, %v7912_v2  ;;  %vm13892_vm15 = vcmp.lt.f32.partialorder %v8254_v8, 0.09  ;;  %vm13893_vm8 = vcmp.lt.f32.partialorder %v8256_v31, 0.09 }
  0xf8   : > { %6014 = vmatmul.msk.f32.gmra.mxu0 %vm13892_vm15, %v14622_v34  ;;  %6030 = vmatmul.msk.f32.gmra.mxu1 %vm13893_vm8, %v14622_v34  ;;  %v921_v42 = vmul.f32 %v889_v19, %v889_v19 }
  0xf9   : > { %v757_v51 = vmul.f32 %v725_v3, %v725_v3  ;;  %v758_v27 = vmul.f32 %v726_v55, %v726_v55  ;;  %6046 = vmatmul.msk.f32.gmra.mxu2 %vm13892_vm15, %v14622_v34  ;;  %6078 = vmatmul.msk.f32.gmra.mxu3 %vm13893_vm8, %v14622_v34  ;;  %v691_v40 = vpop.permute.xlu2 %690  ;;  %v760_v3 = vmul.f32 %v728_v6, %v728_v6 }
  0xfa   : > { %v729_v6 = vsub.f32 %v691_v40, %v7900_v63 }
  0xfb   : > { %v789_v44 = vadd.f32 %v757_v51, %v595_v7  ;;  %v790_v43 = vadd.f32 %v758_v27, %v596_v41  ;;  %v922_v51 = vmul.f32 %v890_v4, %v890_v4  ;;  %v7494_v27 = vmov 127  }
  0xfc   : > { %7432 = vset.pattern.permute.xlu0 %v7494_v27  ;;  %7433 = vset.pattern.permute.xlu1 %v7494_v27 }
  0xfd   : > { %v8276_v59 = vadd.f32 %v919_v35, %v789_v44  ;;  %v8278_v10 = vadd.f32 %v920_v60, %v790_v43  ;;  %7434 = vset.pattern.permute.xlu2 %v7494_v27 }
  0xff   : > { %v522_v36 = vpop.permute.xlu1 %521  ;;  %vm13894_vm15 = vcmp.lt.f32.partialorder %v8276_v59, 0.09  ;;  %vm13910_vm8 = vcmp.lt.f32.partialorder %v8278_v10, 0.09 }
 0x100   : > { %v565_v7 = vsub.f32 %v522_v36, %v7895_v61  ;;  %v566_v41 = vsub.f32 %v522_v36, %v7897_v62  ;;  %6015 = vmatmul.msk.f32.gmra.mxu0 %vm13894_vm15, %v14622_v34  ;;  %6031 = vmatmul.msk.f32.gmra.mxu1 %vm13910_vm8, %v14622_v34 }
 0x101   : > { %6047 = vmatmul.msk.f32.gmra.mxu2 %vm13894_vm15, %v14622_v34  ;;  %6079 = vmatmul.msk.f32.gmra.mxu3 %vm13910_vm8, %v14622_v34  ;;  %v532_v19 = vpop.permute.xlu2 %531 }
 0x102   : > { %v597_v55 = vmul.f32 %v565_v7, %v565_v7  ;;  %v598_v35 = vmul.f32 %v566_v41, %v566_v41  ;;  %v761_v41 = vmul.f32 %v729_v6, %v729_v6  ;;  %v570_v27 = vsub.f32 %v532_v19, %v7897_v62 }
 0x104   : > { %v791_v60 = vadd.f32 %v759_v33, %v597_v55  ;;  %v792_v48 = vadd.f32 %v760_v3, %v598_v35  ;;  %v730_v33 = vsub.f32 %v691_v40, %v7912_v2  ;;  %v695_v55 = vpop.permute.xlu0 %694  ;;  %v602_v24 = vmul.f32 %v570_v27, %v570_v27 }
 0x105   : > { %v731_v40 = vsub.f32 %v695_v55, %v7900_v63 }
 0x106   : > { %v8298_v30 = vadd.f32 %v921_v42, %v791_v60  ;;  %v8300_v44 = vadd.f32 %v922_v51, %v792_v48  ;;  %v762_v42 = vmul.f32 %v730_v33, %v730_v33  ;;  %v569_v51 = vsub.f32 %v532_v19, %v7895_v61 }
 0x107   : > { %v527_v43 = vpop.permute.xlu1 %526  ;;  %v732_v60 = vsub.f32 %v695_v55, %v7912_v2  ;;  %v763_v25 = vmul.f32 %v731_v40, %v731_v40 }
 0x108   : > { %vm13905_vm15 = vcmp.lt.f32.partialorder %v8298_v30, 0.09  ;;  %vm13906_vm12 = vcmp.lt.f32.partialorder %v8300_v44, 0.09  ;;  %v567_v4 = vsub.f32 %v527_v43, %v7895_v61  ;;  %v568_v36 = vsub.f32 %v527_v43, %v7897_v62 }
 0x109   : > { %6048 = vmatmul.msk.f32.gmra.mxu2 %vm13905_vm15, %v14622_v34  ;;  %6080 = vmatmul.msk.f32.gmra.mxu3 %vm13906_vm12, %v14622_v34  ;;  %v601_v33 = vmul.f32 %v569_v51, %v569_v51  ;;  %v764_v23 = vmul.f32 %v732_v60, %v732_v60 }
 0x10a   : > { %6016 = vmatmul.msk.f32.gmra.mxu0 %vm13905_vm15, %v14622_v34  ;;  %6032 = vmatmul.msk.f32.gmra.mxu1 %vm13906_vm12, %v14622_v34  ;;  %v599_v3 = vmul.f32 %v567_v4, %v567_v4  ;;  %v600_v7 = vmul.f32 %v568_v36, %v568_v36  ;;  %v537_v4 = vpop.permute.xlu2 %536 }
 0x10b   : > { %v571_v27 = vsub.f32 %v537_v4, %v7895_v61 }
 0x10c   : > { %v793_v29 = vadd.f32 %v761_v41, %v599_v3  ;;  %v794_v28 = vadd.f32 %v762_v42, %v600_v7  ;;  %v795_v3 = vadd.f32 %v763_v25, %v601_v33  ;;  %v796_v41 = vadd.f32 %v764_v23, %v602_v24 }
 0x10d   : > { %v572_v25 = vsub.f32 %v537_v4, %v7897_v62  ;;  %v14625_v24 = vmov 0.0  }
 0x10e   : > { %v5956_v61 = vsel %vm961_vm0, 1.0, %v14625_v24  ;;  %vm1449_vm0 = vcmask 1046528  }
 0x10f   : > { %v604_v33 = vmul.f32 %v572_v25, %v572_v25 }
 0x110   : > { %v853_v35 = vpop.permute.xlu1 %852 }
 0x111   : > { %v891_v48 = vsub.f32 %v853_v35, %v7902_v12  ;;  %v892_v43 = vsub.f32 %v853_v35, %v7904_v53 }
 0x112   : > { %v861_v51 = vpop.permute.xlu2 %860 }
 0x113   : > { %v923_v36 = vmul.f32 %v891_v48, %v891_v48  ;;  %v924_v6 = vmul.f32 %v892_v43, %v892_v43  ;;  %v896_v23 = vsub.f32 %v861_v51, %v7904_v53 }
 0x115   : > { %v8326_v22 = vadd.f32 %v923_v36, %v793_v29  ;;  %v8328_v19 = vadd.f32 %v924_v6, %v794_v28  ;;  %v895_v36 = vsub.f32 %v861_v51, %v7902_v12 }
 0x117   : > { %vm13909_vm15 = vcmp.lt.f32.partialorder %v8326_v22, 0.09  ;;  %vm13911_vm12 = vcmp.lt.f32.partialorder %v8328_v19, 0.09  ;;  %v927_v47 = vmul.f32 %v895_v36, %v895_v36 }
 0x118   : > { %v857_v55 = vpop.permute.xlu1 %856  ;;  %v1074_v21 = vpop.f32.mrf.mxu0  ;;  %6017 = vmatmul.msk.f32.gmra.mxu0 %vm13909_vm15, %v14622_v34  ;;  %6033 = vmatmul.msk.f32.gmra.mxu1 %vm13911_vm12, %v14622_v34 }
 0x119   : > { %v893_v29 = vsub.f32 %v857_v55, %v7902_v12  ;;  %v894_v28 = vsub.f32 %v857_v55, %v7904_v53  ;;  %v1139_v7 = vpop.f32.mrf.mxu1  ;;  %6049 = vmatmul.msk.f32.gmra.mxu2 %vm13909_vm15, %v14622_v34  ;;  %6081 = vmatmul.msk.f32.gmra.mxu3 %vm13911_vm12, %v14622_v34  ;;  %v5957_v12 = vsel %vm962_vm1, 1.0, %v14625_v24  ;;  %v603_v53 = vmul.f32 %v571_v27, %v571_v27 }
 0x11a   : > { %v1140_v6 = vadd.f32 %v1139_v7, %v1074_v21  ;;  %vm1446_vm1 = vcmask 1046534   ;;  %vm1443_vm12 = vcmask 1045509  }
 0x11b   : > { %v925_v42 = vmul.f32 %v893_v29, %v893_v29  ;;  %v926_v35 = vmul.f32 %v894_v28, %v894_v28  ;;  %v928_v28 = vmul.f32 %v896_v23, %v896_v23 }
 0x11c   : > { %v8376_v7 = vmul.f32 %v5956_v61, %v1140_v6 }
 0x11d   : > { %v8348_v40 = vadd.f32 %v925_v42, %v795_v3  ;;  %v8350_v60 = vadd.f32 %v926_v35, %v796_v41 }
 0x11f   : > { %v1204_v48 = vpop.f32.mrf.mxu2  ;;  %v1269_v43 = vpop.f32.mrf.mxu3  ;;  %vm13913_vm15 = vcmp.lt.f32.partialorder %v8348_v40, 0.09  ;;  %vm13914_vm8 = vcmp.lt.f32.partialorder %v8350_v60, 0.09 }
 0x120   : > { %v1270_v62 = vadd.f32 %v1269_v43, %v1204_v48  ;;  %v1077_v4 = vpop.f32.mrf.mxu0  ;;  %6018 = vmatmul.msk.f32.gmra.mxu0 %vm13913_vm15, %v14622_v34  ;;  %6034 = vmatmul.msk.f32.gmra.mxu1 %vm13914_vm8, %v14622_v34 }
 0x121   : > { %v1142_v55 = vpop.f32.mrf.mxu1  ;;  %6050 = vmatmul.msk.f32.gmra.mxu2 %vm13913_vm15, %v14622_v34  ;;  %6082 = vmatmul.msk.f32.gmra.mxu3 %vm13914_vm8, %v14622_v34  ;;  %v699_v21 = vpop.permute.xlu1 %698  ;;  %vm1437_vm15 = vcmask 1043459  }
 0x122   : > { %v1350_v46 = vmul.f32 %v5957_v12, %v1270_v62  ;;  %v733_v3 = vsub.f32 %v699_v21, %v7900_v63  ;;  %v734_v29 = vsub.f32 %v699_v21, %v7912_v2  ;;  %4332 = vperm.xlu0 %7432, %v1270_v62   ;;  %v1143_v23 = vadd.f32 %v1142_v55, %v1077_v4 }
 0x123   : > { %v5959_v12 = vsel %vm964_vm3, 1.0, %v14625_v24  ;;  %v5958_v4 = vsel %vm963_vm2, 1.0, %v14625_v24  ;;  %vm13927_vm2 = vcmask 1041409  }
 0x124   : > { %v8378_v41 = vrot.slane %v1350_v46, 7  ;;  %v765_v42 = vmul.f32 %v733_v3, %v733_v3  ;;  %v766_v35 = vmul.f32 %v734_v29, %v734_v29  ;;  %v1351_v57 = vmul.f32 %v5958_v4, %v1143_v23 }
 0x126   : > { %v797_v51 = vadd.f32 %v765_v42, %v603_v53  ;;  %v798_v27 = vadd.f32 %v766_v35, %v604_v33  ;;  %v8383_v63 = vsel %vm1449_vm0, %v8378_v41, %v8376_v7  ;;  %v8388_v2 = vsel %vm1446_vm1, %v8376_v7, %v8378_v41 }
 0x127   : > { %v1207_v25 = vpop.f32.mrf.mxu2  ;;  %v1272_v48 = vpop.f32.mrf.mxu3  ;;  %v8393_v43 = vsel %vm1443_vm12, %v8376_v7, %v8378_v41  ;;  %v8398_v36 = vsel %vm1440_vm14, %v8376_v7, %v8378_v41  ;;  %v8430_v46 = vsel %vm1437_vm15, %v8376_v7, %v8378_v41  ;;  %v8435_v3 = vsel %vm1434_vm11, %v8376_v7, %v8378_v41 }
 0x128   : > { %v1273_v61 = vadd.f32 %v1272_v48, %v1207_v25  ;;  %v8400_v6 = vadd.f32 %v927_v47, %v797_v51  ;;  %v8402_v62 = vadd.f32 %v928_v28, %v798_v27  ;;  %v1080_v33 = vpop.f32.mrf.mxu0 }
 0x129   : > { %v1145_v55 = vpop.f32.mrf.mxu1 }
 0x12a   : > { %v1352_v53 = vmul.f32 %v5959_v12, %v1273_v61  ;;  %4337 = vperm.xlu1 %7433, %v1273_v61   ;;  %vm13920_vm8 = vcmp.lt.f32.partialorder %v8400_v6, 0.09  ;;  %vm13924_vm13 = vcmp.lt.f32.partialorder %v8402_v62, 0.09 }
 0x12b   : > { %6019 = vmatmul.msk.f32.gmra.mxu0 %vm13920_vm8, %v14622_v34  ;;  %6035 = vmatmul.msk.f32.gmra.mxu1 %vm13924_vm13, %v14622_v34 }
 0x12c   : > { %v1414_v21 = vrot.slane %v1352_v53, 7  ;;  %6051 = vmatmul.msk.f32.gmra.mxu2 %vm13920_vm8, %v14622_v34  ;;  %6083 = vmatmul.msk.f32.gmra.mxu3 %vm13924_vm13, %v14622_v34  ;;  %v8449_v53 = vcvt.s32.f32 %v8425_v52  ;;  %vm1429_vm13 = vcmask 1040384  }
 0x12e   : > { %v1465_v29 = vsel %vm1449_vm0, %v1414_v21, %v1351_v57  ;;  %v1463_v47 = vsel %vm1446_vm1, %v1351_v57, %v1414_v21  ;;  %v1461_v28 = vsel %vm1443_vm12, %v1351_v57, %v1414_v21  ;;  %v1459_v42 = vsel %vm1440_vm14, %v1351_v57, %v1414_v21 }
 0x12f   : > { %v1210_v35 = vpop.f32.mrf.mxu2  ;;  %v1275_v51 = vpop.f32.mrf.mxu3  ;;  %v1466_v27 = vrot.slane %v1465_v29, 7  ;;  %v1464_v25 = vrot.slane %v1463_v47, 6  ;;  %v1457_v23 = vsel %vm1437_vm15, %v1351_v57, %v1414_v21  ;;  %v8443_v61 = vsel %vm1434_vm11, %v1351_v57, %v1414_v21 }
 0x130   : > { %v1276_v48 = vadd.f32 %v1275_v51, %v1210_v35  ;;  %v8446_v12 = vsel %vm13927_vm2, %v1351_v57, %v1414_v21  ;;  %v1462_v20 = vrot.slane %v1461_v28, 5  ;;  %v5961_v35 = vsel %vm966_vm5, 1.0, %v14625_v24  ;;  %v1083_v52 = vpop.f32.mrf.mxu0 }
 0x131   : > { %v1707_v4 = vperm.slane %v1466_v27, 0  ;;  %v1708_v13 = vperm.slane %v1466_v27, 1  ;;  %v1705_v29 = vperm.slane %v1464_v25, 0  ;;  %v1706_v47 = vperm.slane %v1464_v25, 1  ;;  %v1148_v18 = vpop.f32.mrf.mxu1 }
 0x132   : > { %4342 = vperm.xlu2 %7434, %v1276_v48   ;;  %v1354_v51 = vmul.f32 %v5961_v35, %v1276_v48  ;;  %v1460_v27 = vrot.slane %v1459_v42, 4  ;;  %v1146_v28 = vadd.f32 %v1145_v55, %v1080_v33  ;;  %v1703_v0 = vperm.slane %v1462_v20, 0 }
 0x133   : > { %vm2219_vm3 = vcmp.eq.f32.partialorder %v1707_v4, %v8449_v53  ;;  %vm2220_vm8 = vcmp.eq.f32.partialorder %v1708_v13, %v8449_v53  ;;  %v8459_v4 = vsel %vm1429_vm13, %v1351_v57, %v1414_v21  ;;  %vm2217_vm10 = vcmp.eq.f32.partialorder %v1705_v29, %v8449_v53 }
 0x134   : > { %6340 = vmatpush.xpose.msk.msra.mxu1 %vm2219_vm3, %v14622_v34  ;;  %6356 = vmatpush.xpose.msk.msra.mxu0 %vm2220_vm8, %v14622_v34  ;;  %vm2218_vm2 = vcmp.eq.f32.partialorder %v1706_v47, %v8449_v53  ;;  %v1704_v25 = vperm.slane %v1462_v20, 1  ;;  %v1149_v15 = vadd.f32 %v1148_v18, %v1083_v52  ;;  %v5960_v33 = vsel %vm965_vm4, 1.0, %v14625_v24 }
 0x135   : > { %v8468_v55 = vrot.slane %v1354_v51, 7  ;;  %v5963_v57 = vsel %vm968_vm7, 1.0, %v14625_v24  ;;  %v1701_v21 = vperm.slane %v1460_v27, 0  ;;  %v8473_v42 = vmul.f32 %v5960_v33, %v1146_v28 }
 0x136   : > { %vm2215_vm5 = vcmp.eq.f32.partialorder %v1703_v0, %v8449_v53  ;;  %vm2216_vm8 = vcmp.eq.f32.partialorder %v1704_v25, %v8449_v53  ;;  %v1702_v20 = vperm.slane %v1460_v27, 1  ;;  %v1458_v38 = vrot.slane %v1457_v23, 3 }
 0x137   : > { %v1213_v13 = vpop.f32.mrf.mxu2  ;;  %v1278_v16 = vpop.f32.mrf.mxu3  ;;  %vm2213_vm4 = vcmp.eq.f32.partialorder %v1701_v21, %v8449_v53  ;;  %v1456_v1 = vrot.slane %v8443_v61, 2  ;;  %v5965_v33 = vsel %vm970_vm9, 1.0, %v14625_v24  ;;  %vm14627_vm9 = vcmask 1041409  }
 0x138   : > { %v1279_v14 = vadd.f32 %v1278_v16, %v1213_v13  ;;  %6341 = vmatpush.xpose.msk.msra.mxu1 %vm2217_vm10, %v14622_v34  ;;  %6357 = vmatpush.xpose.msk.msra.mxu0 %vm2218_vm2, %v14622_v34  ;;  %v5962_v16 = vsel %vm967_vm6, 1.0, %v14625_v24  ;;  %vm2214_vm6 = vcmp.eq.f32.partialorder %v1702_v20, %v8449_v53  ;;  %v1699_v51 = vperm.slane %v1458_v38, 0 }
 0x139   : > { %v1355_v52 = vmul.f32 %v5962_v16, %v1149_v15  ;;  %v1700_v61 = vperm.slane %v1458_v38, 1  ;;  %v1698_v20 = vperm.slane %v1456_v1, 1  ;;  %v1454_v38 = vrot.slane %v8446_v12, 1  ;;  %v8516_v56 = vpop.f32.mrf.mxu1 }
 0x13a   : > { %v1356_v18 = vmul.f32 %v5963_v57, %v1279_v14  ;;  %4347 = vperm.xlu1 %7433, %v1279_v14   ;;  %v8487_v14 = vsel %vm1449_vm0, %v8468_v55, %v8473_v42  ;;  %vm2211_vm7 = vcmp.eq.f32.partialorder %v1699_v51, %v8449_v53 }
 0x13b   : > { %vm2212_vm10 = vcmp.eq.f32.partialorder %v1700_v61, %v8449_v53  ;;  %v1695_v12 = vperm.slane %v1454_v38, 0  ;;  %v1696_v61 = vperm.slane %v1454_v38, 1 }
 0x13c   : > { %v1416_v48 = vrot.slane %v1356_v18, 7  ;;  %6342 = vmatpush.xpose.msk.msra.mxu1 %vm2215_vm5, %v14622_v34  ;;  %6358 = vmatpush.xpose.msk.msra.mxu0 %vm2216_vm8, %v14622_v34  ;;  %v1697_v18 = vperm.slane %v1456_v1, 0  ;;  %vm2210_vm8 = vcmp.eq.f32.partialorder %v1698_v20, %v8449_v53 }
 0x13e   : > { %v1495_v26 = vsel %vm1449_vm0, %v1416_v48, %v1355_v52  ;;  %v1493_v29 = vsel %vm1446_vm1, %v1355_v52, %v1416_v48  ;;  %v1491_v15 = vsel %vm1443_vm12, %v1355_v52, %v1416_v48  ;;  %v8493_v23 = vsel %vm1440_vm14, %v1355_v52, %v1416_v48 }
 0x13f   : > { %v1216_v47 = vpop.f32.mrf.mxu2  ;;  %v1281_v35 = vpop.f32.mrf.mxu3  ;;  %v1496_v27 = vrot.slane %v1495_v26, 7  ;;  %v1494_v13 = vrot.slane %v1493_v29, 6  ;;  %v8499_v0 = vsel %vm1437_vm15, %v1355_v52, %v1416_v48  ;;  %v8502_v25 = vsel %vm1434_vm11, %v1355_v52, %v1416_v48 }
 0x140   : > { %v1282_v28 = vadd.f32 %v1281_v35, %v1216_v47  ;;  %6343 = vmatpush.xpose.msk.msra.mxu1 %vm2213_vm4, %v14622_v34  ;;  %6359 = vmatpush.xpose.msk.msra.mxu0 %vm2214_vm6, %v14622_v34  ;;  %v8514_v26 = vpop.f32.mrf.mxu0  ;;  %v1492_v47 = vrot.slane %v1491_v15, 5  ;;  %v8523_v35 = vsel %vm14627_vm9, %v1355_v52, %v1416_v48  ;;  %v8526_v51 = vsel %vm1429_vm13, %v1355_v52, %v1416_v48 }
 0x141   : > { %v1739_v57 = vperm.slane %v1496_v27, 0  ;;  %v1740_v21 = vperm.slane %v1496_v27, 1  ;;  %v1737_v29 = vperm.slane %v1494_v13, 0  ;;  %v1738_v1 = vperm.slane %v1494_v13, 1 }
 0x142   : > { %v8507_v16 = vmul.f32 %v5965_v33, %v1282_v28  ;;  %4352 = vperm.xlu2 %7434, %v1282_v28   ;;  %vm2209_vm5 = vcmp.eq.f32.partialorder %v1697_v18, %v8449_v53  ;;  %v1490_v27 = vrot.slane %v8493_v23, 4  ;;  %v1735_v15 = vperm.slane %v1492_v47, 0  ;;  %v1154_v20 = vpop.f32.mrf.mxu1 }
 0x143   : > { %vm2251_vm2 = vcmp.eq.f32.partialorder %v1739_v57, %v8449_v53  ;;  %vm2252_vm3 = vcmp.eq.f32.partialorder %v1740_v21, %v8449_v53  ;;  %vm2249_vm4 = vcmp.eq.f32.partialorder %v1737_v29, %v8449_v53  ;;  %vm2250_vm6 = vcmp.eq.f32.partialorder %v1738_v1, %v8449_v53 }
 0x144   : > { %6344 = vmatpush.xpose.msk.msra.mxu1 %vm2211_vm7, %v14622_v34  ;;  %6360 = vmatpush.xpose.msk.msra.mxu0 %vm2212_vm10, %v14622_v34  ;;  %v1736_v28 = vperm.slane %v1492_v47, 1  ;;  %v1693_v33 = vperm.slane %v8459_v4, 0  ;;  %v1694_v23 = vperm.slane %v8459_v4, 1  ;;  %v1451_v57 = vrot.slane %v8383_v63, 7 }
 0x145   : > { %6372 = vmatpush.xpose.msk.msra.mxu2 %vm2251_vm2, %v14622_v34  ;;  %6388 = vmatpush.xpose.msk.msra.mxu3 %vm2252_vm3, %v14622_v34  ;;  %vm2207_vm7 = vcmp.eq.f32.partialorder %v1695_v12, %v8449_v53  ;;  %vm2208_vm10 = vcmp.eq.f32.partialorder %v1696_v61, %v8449_v53  ;;  %v1733_v21 = vperm.slane %v1490_v27, 0  ;;  %vm2247_vm2 = vcmp.eq.f32.partialorder %v1735_v15, %v8449_v53 }
 0x146   : > { %vm2248_vm3 = vcmp.eq.f32.partialorder %v1736_v28, %v8449_v53  ;;  %v1734_v38 = vperm.slane %v1490_v27, 1  ;;  %v1488_v4 = vrot.slane %v8499_v0, 3  ;;  %vm14628_vm9 = vcmp.lt.f32.partialorder %v8128_v54, 0.09 }
 0x147   : > { %v5966_v63 = vsel %vm14628_vm9, 1.0, %v14625_v24  ;;  %v1448_v1 = vrot.slane %v8388_v2, 6  ;;  %v8559_v47 = vsel %vm1446_vm1, %v8473_v42, %v8468_v55  ;;  %v1691_v54 = vperm.slane %v1451_v57, 0 }
 0x148   : > { %6345 = vmatpush.xpose.msk.msra.mxu1 %vm2209_vm5, %v14622_v34  ;;  %6361 = vmatpush.xpose.msk.msra.mxu0 %vm2210_vm8, %v14622_v34  ;;  %v1089_v18 = vpop.f32.mrf.mxu0  ;;  %vm14629_vm5 = vcmp.lt.f32.partialorder %v8130_v17, 0.09  ;;  %vm2205_vm8 = vcmp.eq.f32.partialorder %v1693_v33, %v8449_v53  ;;  %v1692_v0 = vperm.slane %v1451_v57, 1  ;;  %v1486_v12 = vrot.slane %v8502_v25, 2 }
 0x149   : > { %6373 = vmatpush.xpose.msk.msra.mxu2 %vm2249_vm4, %v14622_v34  ;;  %6389 = vmatpush.xpose.msk.msra.mxu3 %vm2250_vm6, %v14622_v34  ;;  %v1219_v52 = vpop.f32.mrf.mxu2  ;;  %v1284_v48 = vpop.f32.mrf.mxu3  ;;  %v5967_v29 = vsel %vm14629_vm5, 1.0, %v14625_v24  ;;  %vm2206_vm4 = vcmp.eq.f32.partialorder %v1694_v23, %v8449_v53  ;;  %vm2245_vm6 = vcmp.eq.f32.partialorder %v1733_v21, %v8449_v53  ;;  %v1731_v61 = vperm.slane %v1488_v4, 0 }
 0x14a   : > { %v1285_v13 = vadd.f32 %v1284_v48, %v1219_v52  ;;  %v1732_v27 = vperm.slane %v1488_v4, 1  ;;  %v8576_v15 = vsel %vm1443_vm12, %v8473_v42, %v8468_v55  ;;  %v1155_v28 = vadd.f32 %v1154_v20, %v1089_v18 }
 0x14b   : > { %v8586_v33 = vsel %vm1429_vm13, %v8376_v7, %v8378_v41  ;;  %v1690_v57 = vperm.slane %v1448_v1, 1  ;;  %v1445_v21 = vrot.slane %v8393_v43, 5  ;;  %vm2204_vm9 = vcmp.eq.f32.partialorder %v1692_v0, %v8449_v53 }
 0x14c   : > { %6346 = vmatpush.xpose.msk.msra.mxu1 %vm2207_vm7, %v14622_v34  ;;  %6362 = vmatpush.xpose.msk.msra.mxu0 %vm2208_vm10, %v14622_v34  ;;  %v1360_v17 = vmul.f32 %v5967_v29, %v1285_v13  ;;  %vm14630_vm7 = vcmask 1041409   ;;  %vm2246_vm10 = vcmp.eq.f32.partialorder %v1734_v38, %v8449_v53  ;;  %v1729_v20 = vperm.slane %v1486_v12, 0 }
 0x14d   : > { %6374 = vmatpush.xpose.msk.msra.mxu2 %vm2247_vm2, %v14622_v34  ;;  %6390 = vmatpush.xpose.msk.msra.mxu3 %vm2248_vm3, %v14622_v34  ;;  %v8568_v2 = vsel %vm14630_vm7, %v8376_v7, %v8378_v41  ;;  %vm14631_vm2 = vcmp.lt.f32.partialorder %v8158_v11, 0.09  ;;  %vm2203_vm3 = vcmp.eq.f32.partialorder %v1691_v54, %v8449_v53  ;;  %v1484_v11 = vrot.slane %v8523_v35, 1  ;;  %v8607_v35 = vpop.f32.mrf.mxu1 }
 0x14e   : > { %4357 = vperm.xlu0 %7432, %v1285_v13   ;;  %v5969_v52 = vsel %vm14631_vm2, 1.0, %v14625_v24  ;;  %v1689_v13 = vperm.slane %v1448_v1, 0  ;;  %v8590_v18 = vrot.slane %v1360_v17, 7  ;;  %vm2243_vm5 = vcmp.eq.f32.partialorder %v1731_v61, %v8449_v53 }
 0x14f   : > { %v1730_v7 = vperm.slane %v1486_v12, 1  ;;  %v8600_v41 = vmul.f32 %v5966_v63, %v1155_v28  ;;  %v1687_v4 = vperm.slane %v1445_v21, 0  ;;  %v1688_v29 = vperm.slane %v1445_v21, 1 }
 0x150   : > { %6347 = vmatpush.xpose.msk.msra.mxu1 %vm2205_vm8, %v14622_v34  ;;  %6363 = vmatpush.xpose.msk.msra.mxu0 %vm2206_vm4, %v14622_v34  ;;  %vm2244_vm8 = vcmp.eq.f32.partialorder %v1732_v27, %v8449_v53  ;;  %vm2201_vm4 = vcmp.eq.f32.partialorder %v1689_v13, %v8449_v53  ;;  %v8605_v43 = vpop.f32.mrf.mxu0  ;;  %v1442_v1 = vrot.slane %v8398_v36, 4  ;;  %v1727_v54 = vperm.slane %v1484_v11, 0 }
 0x151   : > { %6375 = vmatpush.xpose.msk.msra.mxu2 %vm2245_vm6, %v14622_v34  ;;  %6391 = vmatpush.xpose.msk.msra.mxu3 %vm2246_vm10, %v14622_v34  ;;  %vm2202_vm6 = vcmp.eq.f32.partialorder %v1690_v57, %v8449_v53  ;;  %v8614_v63 = vsel %vm1440_vm14, %v8473_v42, %v8468_v55  ;;  %v8619_v0 = vsel %vm1437_vm15, %v8473_v42, %v8468_v55  ;;  %v1728_v36 = vperm.slane %v1484_v11, 1 }
 0x152   : > { %v1222_v25 = vpop.f32.mrf.mxu2  ;;  %v1287_v48 = vpop.f32.mrf.mxu3  ;;  %v8624_v17 = vsel %vm1449_vm0, %v8590_v18, %v8600_v41  ;;  %vm2241_vm7 = vcmp.eq.f32.partialorder %v1729_v20, %v8449_v53  ;;  %vm2242_vm10 = vcmp.eq.f32.partialorder %v1730_v7, %v8449_v53  ;;  %v8633_v12 = vsel %vm1434_vm11, %v8473_v42, %v8468_v55 }
 0x153   : > { %v1288_v23 = vadd.f32 %v1287_v48, %v1222_v25  ;;  %v1439_v61 = vrot.slane %v8430_v46, 3  ;;  %v8641_v27 = vsel %vm1446_vm1, %v8600_v41, %v8590_v18  ;;  %vm14632_vm2 = vcmask 1041409  }
 0x154   : > { %6348 = vmatpush.xpose.msk.msra.mxu1 %vm2203_vm3, %v14622_v34  ;;  %6364 = vmatpush.xpose.msk.msra.mxu0 %vm2204_vm9, %v14622_v34  ;;  %v8646_v28 = vsel %vm14632_vm2, %v8473_v42, %v8468_v55  ;;  %v1152_v25 = vadd.f32 %v8516_v56, %v8514_v26  ;;  %vm2199_vm3 = vcmp.eq.f32.partialorder %v1687_v4, %v8449_v53  ;;  %v1685_v13 = vperm.slane %v1442_v1, 0 }
 0x155   : > { %v8594_v38 = vmul.f32 %v5969_v52, %v1288_v23  ;;  %6376 = vmatpush.xpose.msk.msra.mxu2 %vm2243_vm5, %v14622_v34  ;;  %6392 = vmatpush.xpose.msk.msra.mxu3 %vm2244_vm8, %v14622_v34  ;;  %vm2200_vm9 = vcmp.eq.f32.partialorder %v1688_v29, %v8449_v53  ;;  %v1686_v46 = vperm.slane %v1442_v1, 1  ;;  %v1726_v57 = vperm.slane %v8526_v51, 1  ;;  %v1160_v29 = vpop.f32.mrf.mxu1 }
 0x156   : > { %4362 = vperm.xlu1 %7433, %v1288_v23   ;;  %v1725_v23 = vperm.slane %v8526_v51, 0  ;;  %vm2239_vm5 = vcmp.eq.f32.partialorder %v1727_v54, %v8449_v53  ;;  %vm2240_vm8 = vcmp.eq.f32.partialorder %v1728_v36, %v8449_v53  ;;  %v1481_v26 = vrot.slane %v8487_v14, 7 }
 0x157   : > { %v1683_v51 = vperm.slane %v1439_v61, 0  ;;  %v1684_v7 = vperm.slane %v1439_v61, 1  ;;  %v1436_v14 = vrot.slane %v8435_v3, 2 }
 0x158   : > { %6349 = vmatpush.xpose.msk.msra.mxu1 %vm2201_vm4, %v14622_v34  ;;  %6365 = vmatpush.xpose.msk.msra.mxu0 %vm2202_vm6, %v14622_v34  ;;  %vm14633_vm4 = vcmp.lt.f32.partialorder %v8082_v49, 0.09  ;;  %vm14634_vm6 = vcmp.lt.f32.partialorder %v8180_v37, 0.09  ;;  %v8672_v49 = vrot.slane %v8507_v16, 7  ;;  %vm2237_vm2 = vcmp.eq.f32.partialorder %v1725_v23, %v8449_v53  ;;  %v1095_v4 = vpop.f32.mrf.mxu0 }
 0x159   : > { %6377 = vmatpush.xpose.msk.msra.mxu2 %vm2241_vm7, %v14622_v34  ;;  %6393 = vmatpush.xpose.msk.msra.mxu3 %vm2242_vm10, %v14622_v34  ;;  %v5964_v56 = vsel %vm14633_vm4, 1.0, %v14625_v24  ;;  %v5971_v20 = vsel %vm14634_vm6, 1.0, %v14625_v24  ;;  %vm2197_vm7 = vcmp.eq.f32.partialorder %v1685_v13, %v8449_v53  ;;  %vm2198_vm10 = vcmp.eq.f32.partialorder %v1686_v46, %v8449_v53 }
 0x15a   : > { %v1225_v52 = vpop.f32.mrf.mxu2  ;;  %v1290_v48 = vpop.f32.mrf.mxu3  ;;  %v8667_v11 = vmul.f32 %v5964_v56, %v1152_v25  ;;  %v1479_v37 = vrot.slane %v8559_v47, 6  ;;  %v1723_v1 = vperm.slane %v1481_v26, 0  ;;  %v1724_v3 = vperm.slane %v1481_v26, 1 }
 0x15b   : > { %v1291_v21 = vadd.f32 %v1290_v48, %v1225_v52  ;;  %v8683_v16 = vsel %vm1429_vm13, %v8473_v42, %v8468_v55  ;;  %v8691_v47 = vsel %vm1443_vm12, %v8600_v41, %v8590_v18  ;;  %v1681_v36 = vperm.slane %v1436_v14, 0 }
 0x15c   : > { %6350 = vmatpush.xpose.msk.msra.mxu1 %vm2199_vm3, %v14622_v34  ;;  %6366 = vmatpush.xpose.msk.msra.mxu0 %vm2200_vm9, %v14622_v34  ;;  %vm2238_vm3 = vcmp.eq.f32.partialorder %v1726_v57, %v8449_v53  ;;  %vm2195_vm9 = vcmp.eq.f32.partialorder %v1683_v51, %v8449_v53  ;;  %v1682_v61 = vperm.slane %v1436_v14, 1  ;;  %v1433_v25 = vrot.slane %v8568_v2, 1 }
 0x15d   : > { %6378 = vmatpush.xpose.msk.msra.mxu2 %vm2239_vm5, %v14622_v34  ;;  %6394 = vmatpush.xpose.msk.msra.mxu3 %vm2240_vm8, %v14622_v34  ;;  %v1364_v54 = vmul.f32 %v5971_v20, %v1291_v21  ;;  %vm2196_vm5 = vcmp.eq.f32.partialorder %v1684_v7, %v8449_v53  ;;  %v1161_v55 = vadd.f32 %v1160_v29, %v1095_v4  ;;  %v1721_v42 = vperm.slane %v1479_v37, 0 }
 0x15e   : > { %4367 = vperm.xlu2 %7434, %v1291_v21   ;;  %v8698_v52 = vsel %vm1440_vm14, %v8600_v41, %v8590_v18  ;;  %v8703_v48 = vsel %vm1449_vm0, %v8672_v49, %v8667_v11  ;;  %vm2235_vm8 = vcmp.eq.f32.partialorder %v1723_v1, %v8449_v53  ;;  %vm2236_vm4 = vcmp.eq.f32.partialorder %v1724_v3, %v8449_v53 }
 0x15f   : > { %v1722_v2 = vperm.slane %v1479_v37, 1  ;;  %v1477_v13 = vrot.slane %v8576_v15, 5  ;;  %vm14635_vm6 = vcmp.lt.f32.partialorder %v8178_v45, 0.09  ;;  %v8713_v23 = vrot.slane %v1364_v54, 7 }
 0x160   : > { %6351 = vmatpush.xpose.msk.msra.mxu1 %vm2197_vm7, %v14622_v34  ;;  %6367 = vmatpush.xpose.msk.msra.mxu0 %vm2198_vm10, %v14622_v34  ;;  %v5970_v46 = vsel %vm14635_vm6, 1.0, %v14625_v24  ;;  %v8720_v57 = vsel %vm1446_vm1, %v8667_v11, %v8672_v49  ;;  %v8725_v21 = vsel %vm1443_vm12, %v8667_v11, %v8672_v49  ;;  %vm2193_vm7 = vcmp.eq.f32.partialorder %v1681_v36, %v8449_v53 }
 0x161   : > { %6379 = vmatpush.xpose.msk.msra.mxu2 %vm2237_vm2, %v14622_v34  ;;  %6395 = vmatpush.xpose.msk.msra.mxu3 %vm2238_vm3, %v14622_v34  ;;  %vm14636_vm10 = vcmp.lt.f32.partialorder %v8208_v5, 0.09  ;;  %v1679_v15 = vperm.slane %v1433_v25, 0  ;;  %v1680_v26 = vperm.slane %v1433_v25, 1  ;;  %v8731_v56 = vmul.f32 %v5970_v46, %v1161_v55 }
 0x162   : > { %v5973_v45 = vsel %vm14636_vm10, 1.0, %v14625_v24  ;;  %vm2194_vm2 = vcmp.eq.f32.partialorder %v1682_v61, %v8449_v53  ;;  %vm2233_vm3 = vcmp.eq.f32.partialorder %v1721_v42, %v8449_v53  ;;  %v1475_v20 = vrot.slane %v8614_v63, 4 }
 0x163   : > { %v1719_v51 = vperm.slane %v1477_v13, 0  ;;  %v1720_v7 = vperm.slane %v1477_v13, 1  ;;  %v8742_v5 = vsel %vm1440_vm14, %v8667_v11, %v8672_v49  ;;  %v1677_v63 = vperm.slane %v8586_v33, 0 }
 0x164   : > { %6352 = vmatpush.xpose.msk.msra.mxu1 %vm2195_vm9, %v14622_v34  ;;  %6368 = vmatpush.xpose.msk.msra.mxu0 %vm2196_vm5, %v14622_v34  ;;  %vm2234_vm9 = vcmp.eq.f32.partialorder %v1722_v2, %v8449_v53  ;;  %v8750_v4 = vsel %vm1437_vm15, %v8600_v41, %v8590_v18  ;;  %v8755_v29 = vsel %vm1449_vm0, %v8713_v23, %v8731_v56  ;;  %v1678_v54 = vperm.slane %v8586_v33, 1 }
 0x165   : > { %6380 = vmatpush.xpose.msk.msra.mxu2 %vm2235_vm8, %v14622_v34  ;;  %6396 = vmatpush.xpose.msk.msra.mxu3 %vm2236_vm4, %v14622_v34  ;;  %v8760_v1 = vsel %vm1434_vm11, %v8600_v41, %v8590_v18  ;;  %vm2191_vm5 = vcmp.eq.f32.partialorder %v1679_v15, %v8449_v53  ;;  %vm2192_vm8 = vcmp.eq.f32.partialorder %v1680_v26, %v8449_v53  ;;  %v1717_v36 = vperm.slane %v1475_v20, 0 }
 0x166   : > { %v1473_v61 = vrot.slane %v8619_v0, 3  ;;  %v1526_v25 = vrot.slane %v8624_v17, 7  ;;  %v8770_v55 = vsel %vm1446_vm1, %v8731_v56, %v8713_v23  ;;  %vm2231_vm4 = vcmp.eq.f32.partialorder %v1719_v51, %v8449_v53 }
 0x167   : > { %vm2232_vm6 = vcmp.eq.f32.partialorder %v1720_v7, %v8449_v53  ;;  %v1718_v33 = vperm.slane %v1475_v20, 1  ;;  %vm2190_vm10 = vcmp.eq.f32.partialorder %v1678_v54, %v8449_v53  ;;  %v1471_v0 = vrot.slane %v8633_v12, 2 }
 0x168   : > { %6353 = vmatpush.xpose.msk.msra.mxu1 %vm2193_vm7, %v14622_v34  ;;  %6369 = vmatpush.xpose.msk.msra.mxu0 %vm2194_vm2, %v14622_v34  ;;  %vm2189_vm7 = vcmp.eq.f32.partialorder %v1677_v63, %v8449_v53  ;;  %vm2229_vm2 = vcmp.eq.f32.partialorder %v1717_v36, %v8449_v53  ;;  %v1715_v17 = vperm.slane %v1473_v61, 0  ;;  %v1771_v2 = vperm.slane %v1526_v25, 0  ;;  %v8818_v63 = vld [vmem:[%s7890_s26 + $0x8] sm:$0x7f] }
 0x169   : > { %6381 = vmatpush.xpose.msk.msra.mxu2 %vm2233_vm3, %v14622_v34  ;;  %6397 = vmatpush.xpose.msk.msra.mxu3 %vm2234_vm9, %v14622_v34  ;;  %v1228_v14 = vpop.f32.mrf.mxu2  ;;  %v1293_v37 = vpop.f32.mrf.mxu3  ;;  %v1524_v13 = vrot.slane %v8641_v27, 6  ;;  %vm2230_vm3 = vcmp.eq.f32.partialorder %v1718_v33, %v8449_v53  ;;  %v1716_v46 = vperm.slane %v1473_v61, 1  ;;  %vm14637_vm9 = vcmask 1041409  }
 0x16a   : > { %v1294_v3 = vadd.f32 %v1293_v37, %v1228_v14  ;;  %v8796_v12 = vsel %vm1443_vm12, %v8731_v56, %v8713_v23  ;;  %v1772_v26 = vperm.slane %v1526_v25, 1  ;;  %v1469_v51 = vrot.slane %v8646_v28, 1  ;;  %v8814_v37 = vld [vmem:[%s7890_s26] sm:$0x7f] }
 0x16b   : > { %v8806_v7 = vsel %vm1429_vm13, %v8600_v41, %v8590_v18  ;;  %v8811_v14 = vsel %vm1440_vm14, %v8731_v56, %v8713_v23  ;;  %v1769_v28 = vperm.slane %v1524_v13, 0  ;;  %v1770_v54 = vperm.slane %v1524_v13, 1 }
 0x16c   : > { %v8772_v42 = vmul.f32 %v5973_v45, %v1294_v3  ;;  %6354 = vmatpush.xpose.msk.msra.mxu1 %vm2191_vm5, %v14622_v34  ;;  %6370 = vmatpush.xpose.msk.msra.mxu0 %vm2192_vm8, %v14622_v34  ;;  %v8791_v45 = vsel %vm14637_vm9, %v8600_v41, %v8590_v18  ;;  %vm2283_vm5 = vcmp.eq.f32.partialorder %v1771_v2, %v8449_v53  ;;  %v1713_v18 = vperm.slane %v1471_v0, 0 }
 0x16d   : > { %6382 = vmatpush.xpose.msk.msra.mxu2 %vm2231_vm4, %v14622_v34  ;;  %6398 = vmatpush.xpose.msk.msra.mxu3 %vm2232_vm6, %v14622_v34  ;;  %vm2227_vm8 = vcmp.eq.f32.partialorder %v1715_v17, %v8449_v53  ;;  %vm2228_vm4 = vcmp.eq.f32.partialorder %v1716_v46, %v8449_v53  ;;  %v1714_v41 = vperm.slane %v1471_v0, 1  ;;  %vm2284_vm6 = vcmp.eq.f32.partialorder %v1772_v26, %v8449_v53 }
 0x16e   : > { %4372 = vperm.xlu0 %7432, %v1294_v3   ;;  %v1522_v3 = vrot.slane %v8691_v47, 5  ;;  %v1158_v47 = vadd.f32 %v8607_v35, %v8605_v43  ;;  %v1711_v36 = vperm.slane %v1469_v51, 0  ;;  %v1712_v61 = vperm.slane %v1469_v51, 1 }
 0x16f   : > { %v1520_v33 = vrot.slane %v8698_v52, 4  ;;  %v8836_v0 = vrot.slane %v8594_v38, 7  ;;  %v8844_v43 = vsel %vm1437_vm15, %v8731_v56, %v8713_v23  ;;  %vm2282_vm9 = vcmp.eq.f32.partialorder %v1770_v54, %v8449_v53 }
 0x170   : > { %6355 = vmatpush.xpose.msk.msra.mxu1 %vm2189_vm7, %v14622_v34  ;;  %6371 = vmatpush.xpose.msk.msra.mxu0 %vm2190_vm10, %v14622_v34  ;;  %vm2281_vm7 = vcmp.eq.f32.partialorder %v1769_v28, %v8449_v53  ;;  %v1767_v25 = vperm.slane %v1522_v3, 0  ;;  %vm2225_vm10 = vcmp.eq.f32.partialorder %v1713_v18, %v8449_v53  ;;  %v1768_v38 = vperm.slane %v1522_v3, 1 }
 0x171   : > { %6383 = vmatpush.xpose.msk.msra.mxu2 %vm2229_vm2, %v14622_v34  ;;  %6399 = vmatpush.xpose.msk.msra.mxu3 %vm2230_vm3, %v14622_v34  ;;  %v1231_v27 = vpop.f32.mrf.mxu2  ;;  %v1296_v15 = vpop.f32.mrf.mxu3  ;;  %vm2226_vm2 = vcmp.eq.f32.partialorder %v1714_v41, %v8449_v53  ;;  %vm14638_vm3 = vcmp.lt.f32.partialorder %v8156_v32, 0.09  ;;  %v1709_v17 = vperm.slane %v8683_v16, 0  ;;  %v8860_v32 = vsel %vm1434_vm11, %v8731_v56, %v8713_v23 }
 0x172   : > { %v8800_v20 = vadd.f32 %v1296_v15, %v1231_v27  ;;  %v5968_v35 = vsel %vm14638_vm3, 1.0, %v14625_v24  ;;  %v1710_v2 = vperm.slane %v8683_v16, 1  ;;  %v1765_v13 = vperm.slane %v1520_v33, 0 }
 0x173   : > { %2973 = vmatmul.f32.vlgmr.msra.gmra.mxu1 %v8814_v37  ;;  %2993 = vmatmul.f32.vlgmr.msra.gmra.mxu0 %v8818_v63  ;;  %v8852_v52 = vmul.f32 %v5968_v35, %v1158_v47  ;;  %v1518_v15 = vrot.slane %v8750_v4, 3  ;;  %v1556_v26 = vrot.slane %v8755_v29, 7  ;;  %v8871_v51 = vsel %vm1437_vm15, %v8667_v11, %v8672_v49 }
 0x174   : > { %4377 = vperm.xlu1 %7433, %v8800_v20   ;;  %6404 = vmatpush.xpose.msk.msra.mxu1 %vm2283_vm5, %v14622_v34  ;;  %vm2223_vm5 = vcmp.eq.f32.partialorder %v1711_v36, %v8449_v53  ;;  %v1766_v4 = vperm.slane %v1520_v33, 1  ;;  %vm2277_vm3 = vcmp.eq.f32.partialorder %v1765_v13, %v8449_v53  ;;  %v1516_v3 = vrot.slane %v8760_v1, 2 }
 0x175   : > { %6384 = vmatpush.xpose.msk.msra.mxu2 %vm2227_vm8, %v14622_v34  ;;  %6400 = vmatpush.xpose.msk.msra.mxu3 %vm2228_vm4, %v14622_v34  ;;  %vm2224_vm8 = vcmp.eq.f32.partialorder %v1712_v61, %v8449_v53  ;;  %vm2279_vm4 = vcmp.eq.f32.partialorder %v1767_v25, %v8449_v53  ;;  %v8876_v28 = vsel %vm1449_vm0, %v8836_v0, %v8852_v52  ;;  %v1763_v18 = vperm.slane %v1518_v15, 0 }
 0x176   : > { %6420 = vmatpush.xpose.msk.msra.mxu0 %vm2284_vm6, %v14622_v34  ;;  %vm2280_vm6 = vcmp.eq.f32.partialorder %v1768_v38, %v8449_v53  ;;  %v1803_v41 = vperm.slane %v1556_v26, 0  ;;  %v1554_v54 = vrot.slane %v8770_v55, 6  ;;  %v8899_v47 = vsel %vm1429_vm13, %v8731_v56, %v8713_v23 }
 0x177   : > { %v1764_v1 = vperm.slane %v1518_v15, 1  ;;  %v1804_v36 = vperm.slane %v1556_v26, 1  ;;  %v1761_v61 = vperm.slane %v1516_v3, 0  ;;  %v1762_v25 = vperm.slane %v1516_v3, 1 }
 0x178   : > { %6405 = vmatpush.xpose.msk.msra.mxu1 %vm2281_vm7, %v14622_v34  ;;  %vm14639_vm7 = vcmask 1041409   ;;  %v1514_v33 = vrot.slane %v8791_v45, 1  ;;  %v1552_v55 = vrot.slane %v8796_v12, 5  ;;  %v1802_v45 = vperm.slane %v1554_v54, 1 }
 0x179   : > { %6385 = vmatpush.xpose.msk.msra.mxu2 %vm2225_vm10, %v14622_v34  ;;  %6401 = vmatpush.xpose.msk.msra.mxu3 %vm2226_vm2, %v14622_v34  ;;  %v8887_v29 = vsel %vm14639_vm7, %v8731_v56, %v8713_v23  ;;  %vm2221_vm10 = vcmp.eq.f32.partialorder %v1709_v17, %v8449_v53  ;;  %vm2222_vm2 = vcmp.eq.f32.partialorder %v1710_v2, %v8449_v53  ;;  %v1801_v23 = vperm.slane %v1554_v54, 0 }
 0x17a   : > { %6421 = vmatpush.xpose.msk.msra.mxu0 %vm2282_vm9, %v14622_v34  ;;  %vm2278_vm9 = vcmp.eq.f32.partialorder %v1766_v4, %v8449_v53  ;;  %v8914_v56 = vsel %vm1434_vm11, %v8667_v11, %v8672_v49  ;;  %v8927_v12 = vsel %vm1446_vm1, %v8852_v52, %v8836_v0  ;;  %v8932_v2 = vsel %vm14639_vm7, %v8667_v11, %v8672_v49 }
 0x17b   : > { %v1759_v13 = vperm.slane %v1514_v33, 0  ;;  %v1760_v15 = vperm.slane %v1514_v33, 1  ;;  %v1800_v26 = vperm.slane %v1552_v55, 1  ;;  %v8945_v4 = vsel %vm1443_vm12, %v8852_v52, %v8836_v0  ;;  %v1163_v33 = vpop.f32.mrf.mxu1 }
 0x17c   : > { %v1234_v46 = vpop.f32.mrf.mxu2  ;;  %v1299_v27 = vpop.f32.mrf.mxu3  ;;  %6406 = vmatpush.xpose.msk.msra.mxu1 %vm2279_vm4, %v14622_v34  ;;  %vm2276_vm4 = vcmp.eq.f32.partialorder %v1764_v1, %v8449_v53  ;;  %v1511_v3 = vrot.slane %v8703_v48, 7 }
 0x17d   : > { %v8878_v16 = vadd.f32 %v1299_v27, %v1234_v46  ;;  %6386 = vmatpush.xpose.msk.msra.mxu2 %vm2223_vm5, %v14622_v34  ;;  %6402 = vmatpush.xpose.msk.msra.mxu3 %vm2224_vm8, %v14622_v34  ;;  %vm2275_vm5 = vcmp.eq.f32.partialorder %v1763_v18, %v8449_v53  ;;  %vm2315_vm8 = vcmp.eq.f32.partialorder %v1803_v41, %v8449_v53  ;;  %v1799_v46 = vperm.slane %v1552_v55, 0 }
 0x17e   : > { %6422 = vmatpush.xpose.msk.msra.mxu0 %vm2280_vm6, %v14622_v34  ;;  %vm2316_vm6 = vcmp.eq.f32.partialorder %v1804_v36, %v8449_v53  ;;  %v1550_v27 = vrot.slane %v8811_v14, 4  ;;  %v1757_v14 = vperm.slane %v8806_v7, 0  ;;  %v1758_v18 = vperm.slane %v8806_v7, 1 }
 0x17f   : > { %4382 = vperm.xlu2 %7434, %v8878_v16   ;;  %v1548_v36 = vrot.slane %v8844_v43, 3  ;;  %v1755_v43 = vperm.slane %v1511_v3, 0  ;;  %v8974_v55 = vsel %vm1440_vm14, %v8852_v52, %v8836_v0 }
 0x180   : > { %6407 = vmatpush.xpose.msk.msra.mxu1 %vm2277_vm3, %v14622_v34  ;;  %vm2313_vm3 = vcmp.eq.f32.partialorder %v1801_v23, %v8449_v53  ;;  %v1797_v54 = vperm.slane %v1550_v27, 0  ;;  %v1798_v1 = vperm.slane %v1550_v27, 1  ;;  %vm2269_vm7 = vcmp.eq.f32.partialorder %v1757_v14, %v8449_v53 }
 0x181   : > { %6387 = vmatpush.xpose.msk.msra.mxu2 %vm2221_vm10, %v14622_v34  ;;  %6403 = vmatpush.xpose.msk.msra.mxu3 %vm2222_vm2, %v14622_v34  ;;  %vm2273_vm10 = vcmp.eq.f32.partialorder %v1761_v61, %v8449_v53  ;;  %vm2274_vm2 = vcmp.eq.f32.partialorder %v1762_v25, %v8449_v53  ;;  %v8958_v61 = vsel %vm1429_vm13, %v8667_v11, %v8672_v49  ;;  %v1756_v25 = vperm.slane %v1511_v3, 1  ;;  %v1098_v49 = vpop.f32.mrf.mxu0 }
 0x182   : > { %6423 = vmatpush.xpose.msk.msra.mxu0 %vm2278_vm9, %v14622_v34  ;;  %vm2314_vm9 = vcmp.eq.f32.partialorder %v1802_v45, %v8449_v53  ;;  %v1509_v11 = vrot.slane %v8720_v57, 6  ;;  %v1795_v57 = vperm.slane %v1548_v36, 0  ;;  %v1796_v23 = vperm.slane %v1548_v36, 1 }
 0x183   : > { %v8990_v45 = vsel %vm1434_vm11, %v8852_v52, %v8836_v0  ;;  %v9005_v27 = vrot.slane %v8772_v42, 7 }
 0x184   : > { %v1237_v35 = vpop.f32.mrf.mxu2  ;;  %v1302_v38 = vpop.f32.mrf.mxu3  ;;  %3013 = vmatmul.f32.vlgmr.msra.gmra.mxu2 %v8814_v37  ;;  %3033 = vmatmul.f32.vlgmr.msra.gmra.mxu3 %v8818_v63  ;;  %v1754_v3 = vperm.slane %v1509_v11, 1 }
 0x185   : > { %v8916_v17 = vadd.f32 %v1302_v38, %v1237_v35  ;;  %6408 = vmatpush.xpose.msk.msra.mxu1 %vm2275_vm5, %v14622_v34  ;;  %6436 = vmatpush.xpose.msk.msra.mxu2 %vm2315_vm8, %v14622_v34  ;;  %vm2271_vm5 = vcmp.eq.f32.partialorder %v1759_v13, %v8449_v53  ;;  %vm2311_vm8 = vcmp.eq.f32.partialorder %v1799_v46, %v8449_v53  ;;  %v1546_v38 = vrot.slane %v8860_v32, 2 }
 0x186   : > { %6424 = vmatpush.xpose.msk.msra.mxu0 %vm2276_vm4, %v14622_v34  ;;  %6452 = vmatpush.xpose.msk.msra.mxu3 %vm2316_vm6, %v14622_v34  ;;  %vm2272_vm4 = vcmp.eq.f32.partialorder %v1760_v15, %v8449_v53  ;;  %vm2312_vm6 = vcmp.eq.f32.partialorder %v1800_v26, %v8449_v53  ;;  %v8979_v35 = vsel %vm1437_vm15, %v8852_v52, %v8836_v0  ;;  %v1753_v15 = vperm.slane %v1509_v11, 0 }
 0x187   : > { %4387 = vperm.xlu0 %7432, %v8916_v17   ;;  %v9000_v46 = vsel %vm1429_vm13, %v8852_v52, %v8836_v0  ;;  %v1164_v32 = vadd.f32 %v1163_v33, %v1098_v49  ;;  %v1507_v26 = vrot.slane %v8725_v21, 5  ;;  %v1793_v14 = vperm.slane %v1546_v38, 0 }
 0x188   : > { %v1794_v42 = vperm.slane %v1546_v38, 1  ;;  %v1503_v11 = vrot.slane %v8871_v51, 3  ;;  %v1541_v49 = vrot.slane %v8876_v28, 7  ;;  %v1501_v28 = vrot.slane %v8914_v56, 2 }
 0x189   : > { %6409 = vmatpush.xpose.msk.msra.mxu1 %vm2273_vm10, %v14622_v34  ;;  %6437 = vmatpush.xpose.msk.msra.mxu2 %vm2313_vm3, %v14622_v34  ;;  %vm2270_vm10 = vcmp.eq.f32.partialorder %v1758_v18, %v8449_v53  ;;  %vm2310_vm3 = vcmp.eq.f32.partialorder %v1798_v1, %v8449_v53 }
 0x18a   : > { %6425 = vmatpush.xpose.msk.msra.mxu0 %vm2274_vm2, %v14622_v34  ;;  %6453 = vmatpush.xpose.msk.msra.mxu3 %vm2314_vm9, %v14622_v34  ;;  %vm2309_vm2 = vcmp.eq.f32.partialorder %v1797_v54, %v8449_v53  ;;  %vm14640_vm9 = vcmask 1041409   ;;  %v1752_v54 = vperm.slane %v1507_v26, 1 }
 0x18b   : > { %v8995_v13 = vsel %vm14640_vm9, %v8852_v52, %v8836_v0  ;;  %v1544_v0 = vrot.slane %v8887_v29, 1  ;;  %v1751_v29 = vperm.slane %v1507_v26, 0  ;;  %vm2306_vm9 = vcmp.eq.f32.partialorder %v1794_v42, %v8449_v53 }
 0x18c   : > { %v1240_v41 = vpop.f32.mrf.mxu2  ;;  %v1305_v48 = vpop.f32.mrf.mxu3  ;;  %v1499_v42 = vrot.slane %v8932_v2, 1 }
 0x18d   : > { %6410 = vmatpush.xpose.msk.msra.mxu1 %vm2271_vm5, %v14622_v34  ;;  %6438 = vmatpush.xpose.msk.msra.mxu2 %vm2311_vm8, %v14622_v34  ;;  %v8966_v7 = vadd.f32 %v1305_v48, %v1240_v41  ;;  %vm2267_vm5 = vcmp.eq.f32.partialorder %v1755_v43, %v8449_v53  ;;  %vm2307_vm8 = vcmp.eq.f32.partialorder %v1795_v57, %v8449_v53  ;;  %v1791_v18 = vperm.slane %v1544_v0, 0 }
 0x18e   : > { %6426 = vmatpush.xpose.msk.msra.mxu0 %vm2272_vm4, %v14622_v34  ;;  %6454 = vmatpush.xpose.msk.msra.mxu3 %vm2312_vm6, %v14622_v34  ;;  %vm14641_vm4 = vcmp.lt.f32.partialorder %v8206_v39, 0.09  ;;  %vm2268_vm6 = vcmp.eq.f32.partialorder %v1756_v25, %v8449_v53  ;;  %v1505_v39 = vrot.slane %v8742_v5, 4  ;;  %v1792_v1 = vperm.slane %v1544_v0, 1 }
 0x18f   : > { %4392 = vperm.xlu1 %7433, %v8966_v7   ;;  %v5972_v52 = vsel %vm14641_vm4, 1.0, %v14625_v24  ;;  %v1789_v25 = vperm.slane %v8899_v47, 0  ;;  %vm2264_vm4 = vcmp.eq.f32.partialorder %v1752_v54, %v8449_v53  ;;  %v1788_v0 = vperm.slane %v1541_v49, 1 }
 0x190   : > { %v9018_v21 = vmul.f32 %v5972_v52, %v1164_v32  ;;  %v1749_v43 = vperm.slane %v1505_v39, 0  ;;  %v1750_v38 = vperm.slane %v1505_v39, 1  ;;  %v1101_v32 = vpop.f32.mrf.mxu0  ;;  %v1537_v39 = vrot.slane %v8945_v4, 5 }
 0x191   : > { %6411 = vmatpush.xpose.msk.msra.mxu1 %vm2269_vm7, %v14622_v34  ;;  %6439 = vmatpush.xpose.msk.msra.mxu2 %vm2309_vm2, %v14622_v34  ;;  %vm2308_vm7 = vcmp.eq.f32.partialorder %v1796_v23, %v8449_v53  ;;  %vm2266_vm2 = vcmp.eq.f32.partialorder %v1754_v3, %v8449_v53  ;;  %v1790_v23 = vperm.slane %v8899_v47, 1  ;;  %v1747_v3 = vperm.slane %v1503_v11, 0 }
 0x192   : > { %6427 = vmatpush.xpose.msk.msra.mxu0 %vm2270_vm10, %v14622_v34  ;;  %6455 = vmatpush.xpose.msk.msra.mxu3 %vm2310_vm3, %v14622_v34  ;;  %vm2265_vm10 = vcmp.eq.f32.partialorder %v1753_v15, %v8449_v53  ;;  %vm2305_vm3 = vcmp.eq.f32.partialorder %v1793_v14, %v8449_v53  ;;  %v9029_v41 = vsel %vm1449_vm0, %v9005_v27, %v9018_v21  ;;  %v1166_v15 = vpop.f32.mrf.mxu1  ;;  %v1787_v47 = vperm.slane %v1541_v49, 0 }
 0x193   : > { %v9037_v5 = vsel %vm1446_vm1, %v9018_v21, %v9005_v27  ;;  %v9044_v36 = vsel %vm1443_vm12, %v9018_v21, %v9005_v27  ;;  %v9049_v48 = vsel %vm1440_vm14, %v9018_v21, %v9005_v27  ;;  %v1539_v14 = vrot.slane %v8927_v12, 6 }
 0x194   : > { %v1167_v52 = vadd.f32 %v1166_v15, %v1101_v32  ;;  %v1745_v12 = vperm.slane %v1501_v28, 0  ;;  %v1742_v15 = vperm.slane %v8958_v61, 1 }
 0x195   : > { %6412 = vmatpush.xpose.msk.msra.mxu1 %vm2267_vm5, %v14622_v34  ;;  %6440 = vmatpush.xpose.msk.msra.mxu2 %vm2307_vm8, %v14622_v34  ;;  %vm2263_vm5 = vcmp.eq.f32.partialorder %v1751_v29, %v8449_v53  ;;  %vm2303_vm8 = vcmp.eq.f32.partialorder %v1791_v18, %v8449_v53  ;;  %v1785_v29 = vperm.slane %v1539_v14, 0 }
 0x196   : > { %6428 = vmatpush.xpose.msk.msra.mxu0 %vm2268_vm6, %v14622_v34  ;;  %6456 = vmatpush.xpose.msk.msra.mxu3 %vm2308_vm7, %v14622_v34  ;;  %vm2304_vm6 = vcmp.eq.f32.partialorder %v1792_v1, %v8449_v53  ;;  %vm14642_vm7 = vcmp.lt.f32.partialorder %v8228_v58, 0.09  ;;  %v1748_v58 = vperm.slane %v1503_v11, 1  ;;  %v1786_v1 = vperm.slane %v1539_v14, 1 }
 0x197   : > { %v5975_v51 = vsel %vm14642_vm7, 1.0, %v14625_v24  ;;  %vm14643_vm7 = vcmp.lt.f32.partialorder %v8226_v9, 0.09  ;;  %v1744_v9 = vperm.slane %v1499_v42, 1 }
 0x198   : > { %v1368_v56 = vmul.f32 %v5975_v51, %v8800_v20  ;;  %v1746_v20 = vperm.slane %v1501_v28, 1  ;;  %v5974_v2 = vsel %vm14643_vm7, 1.0, %v14625_v24  ;;  %v1533_v51 = vrot.slane %v8979_v35, 3 }
 0x199   : > { %6413 = vmatpush.xpose.msk.msra.mxu1 %vm2265_vm10, %v14622_v34  ;;  %6441 = vmatpush.xpose.msk.msra.mxu2 %vm2305_vm3, %v14622_v34  ;;  %vm2261_vm10 = vcmp.eq.f32.partialorder %v1749_v43, %v8449_v53  ;;  %vm2262_vm3 = vcmp.eq.f32.partialorder %v1750_v38, %v8449_v53  ;;  %v9101_v49 = vmul.f32 %v5974_v2, %v1167_v52  ;;  %v1535_v38 = vrot.slane %v8974_v55, 4 }
 0x19a   : > { %6429 = vmatpush.xpose.msk.msra.mxu0 %vm2266_vm2, %v14622_v34  ;;  %6457 = vmatpush.xpose.msk.msra.mxu3 %vm2306_vm9, %v14622_v34  ;;  %vm2301_vm2 = vcmp.eq.f32.partialorder %v1789_v25, %v8449_v53  ;;  %vm2302_vm9 = vcmp.eq.f32.partialorder %v1790_v23, %v8449_v53  ;;  %v9091_v43 = vrot.slane %v1368_v56, 7  ;;  %v9093_v25 = vpop.f32.mrf.mxu0  ;;  %v9095_v4 = vpop.f32.mrf.mxu1  ;;  %v1784_v23 = vperm.slane %v1537_v39, 1 }
 0x19b   : > { %v1741_v55 = vperm.slane %v8958_v61, 0  ;;  %v1781_v28 = vperm.slane %v1535_v38, 0  ;;  %v9129_v61 = vsel %vm1437_vm15, %v9018_v21, %v9005_v27  ;;  %vm14644_vm7 = vcmp.lt.f32.partialorder %v8278_v10, 0.09 }
 0x19c   : > { %v1243_v33 = vpop.f32.mrf.mxu2  ;;  %v1308_v57 = vpop.f32.mrf.mxu3  ;;  %v1585_v32 = vsel %vm1449_vm0, %v9091_v43, %v9101_v49  ;;  %v5979_v35 = vsel %vm14644_vm7, 1.0, %v14625_v24  ;;  %v1583_v14 = vsel %vm1446_vm1, %v9101_v49, %v9091_v43  ;;  %v1779_v52 = vperm.slane %v1533_v51, 0 }
 0x19d   : > { %6414 = vmatpush.xpose.msk.msra.mxu1 %vm2263_vm5, %v14622_v34  ;;  %6442 = vmatpush.xpose.msk.msra.mxu2 %vm2303_vm8, %v14622_v34  ;;  %v9061_v26 = vadd.f32 %v1308_v57, %v1243_v33  ;;  %vm2259_vm5 = vcmp.eq.f32.partialorder %v1747_v3, %v8449_v53  ;;  %vm2299_vm8 = vcmp.eq.f32.partialorder %v1787_v47, %v8449_v53  ;;  %v1743_v33 = vperm.slane %v1499_v42, 0 }
 0x19e   : > { %6430 = vmatpush.xpose.msk.msra.mxu0 %vm2264_vm4, %v14622_v34  ;;  %6458 = vmatpush.xpose.msk.msra.mxu3 %vm2304_vm6, %v14622_v34  ;;  %vm2260_vm4 = vcmp.eq.f32.partialorder %v1748_v58, %v8449_v53  ;;  %vm2300_vm6 = vcmp.eq.f32.partialorder %v1788_v0, %v8449_v53  ;;  %v1783_v57 = vperm.slane %v1537_v39, 0  ;;  %v1782_v3 = vperm.slane %v1535_v38, 1 }
 0x19f   : > { %4397 = vperm.xlu2 %7434, %v9061_v26   ;;  %v1586_v47 = vrot.slane %v1585_v32, 7  ;;  %v1372_v58 = vmul.f32 %v5979_v35, %v8916_v17  ;;  %v1531_v39 = vrot.slane %v8990_v45, 2  ;;  %v1579_v32 = vsel %vm1440_vm14, %v9101_v49, %v9091_v43 }
 0x1a0   : > { %v1577_v35 = vsel %vm1437_vm15, %v9101_v49, %v9091_v43 }
 0x1a1   : > { %6415 = vmatpush.xpose.msk.msra.mxu1 %vm2261_vm10, %v14622_v34  ;;  %6443 = vmatpush.xpose.msk.msra.mxu2 %vm2301_vm2, %v14622_v34  ;;  %vm2257_vm10 = vcmp.eq.f32.partialorder %v1745_v12, %v8449_v53  ;;  %vm2297_vm2 = vcmp.eq.f32.partialorder %v1785_v29, %v8449_v53  ;;  %v1780_v29 = vperm.slane %v1533_v51, 1  ;;  %v1835_v17 = vperm.slane %v1586_v47, 0 }
 0x1a2   : > { %6431 = vmatpush.xpose.msk.msra.mxu0 %vm2262_vm3, %v14622_v34  ;;  %6459 = vmatpush.xpose.msk.msra.mxu3 %vm2302_vm9, %v14622_v34  ;;  %vm2258_vm3 = vcmp.eq.f32.partialorder %v1746_v20, %v8449_v53  ;;  %vm2298_vm9 = vcmp.eq.f32.partialorder %v1786_v1, %v8449_v53  ;;  %v1107_v12 = vpop.f32.mrf.mxu0  ;;  %v1172_v10 = vpop.f32.mrf.mxu1  ;;  %v1836_v45 = vperm.slane %v1586_v47, 1  ;;  %v1529_v1 = vrot.slane %v8995_v13, 1 }
 0x1a3   : > { %v1173_v20 = vadd.f32 %v1172_v10, %v1107_v12  ;;  %v9162_v2 = vrot.slane %v1372_v58, 7  ;;  %v1774_v58 = vperm.slane %v9000_v46, 1 }
 0x1a4   : > { %v1246_v18 = vpop.f32.mrf.mxu2  ;;  %v1311_v54 = vpop.f32.mrf.mxu3  ;;  %vm2348_vm7 = vcmp.eq.f32.partialorder %v1836_v45, %v8449_v53 }
 0x1a5   : > { %6416 = vmatpush.xpose.msk.msra.mxu1 %vm2259_vm5, %v14622_v34  ;;  %6444 = vmatpush.xpose.msk.msra.mxu2 %vm2299_vm8, %v14622_v34  ;;  %v9097_v11 = vadd.f32 %v1311_v54, %v1246_v18  ;;  %vm2255_vm5 = vcmp.eq.f32.partialorder %v1743_v33, %v8449_v53  ;;  %vm2256_vm8 = vcmp.eq.f32.partialorder %v1744_v9, %v8449_v53  ;;  %v1584_v18 = vrot.slane %v1583_v14, 6 }
 0x1a6   : > { %6432 = vmatpush.xpose.msk.msra.mxu0 %vm2260_vm4, %v14622_v34  ;;  %6460 = vmatpush.xpose.msk.msra.mxu3 %vm2300_vm6, %v14622_v34  ;;  %vm2295_vm4 = vcmp.eq.f32.partialorder %v1783_v57, %v8449_v53  ;;  %vm2296_vm6 = vcmp.eq.f32.partialorder %v1784_v23, %v8449_v53  ;;  %v9153_v54 = vsel %vm1434_vm11, %v9018_v21, %v9005_v27  ;;  %v1777_v33 = vperm.slane %v1531_v39, 0 }
 0x1a7   : > { %4402 = vperm.xlu0 %7432, %v9097_v11   ;;  %7435 = vset.pattern.permute.xlu2 %v14624_v50  ;;  %v1778_v9 = vperm.slane %v1531_v39, 1  ;;  %v1833_v57 = vperm.slane %v1584_v18, 0  ;;  %v1834_v23 = vperm.slane %v1584_v18, 1  ;;  %v1773_v14 = vperm.slane %v9000_v46, 0 }
 0x1a8   : > { %v1578_v46 = vrot.slane %v1577_v35, 3 }
 0x1a9   : > { %6417 = vmatpush.xpose.msk.msra.mxu1 %vm2257_vm10, %v14622_v34  ;;  %6445 = vmatpush.xpose.msk.msra.mxu2 %vm2297_vm2, %v14622_v34  ;;  %vm2253_vm10 = vcmp.eq.f32.partialorder %v1741_v55, %v8449_v53  ;;  %vm2254_vm2 = vcmp.eq.f32.partialorder %v1742_v15, %v8449_v53  ;;  %v1775_v15 = vperm.slane %v1529_v1, 0 }
 0x1aa   : > { %6433 = vmatpush.xpose.msk.msra.mxu0 %vm2258_vm3, %v14622_v34  ;;  %6461 = vmatpush.xpose.msk.msra.mxu3 %vm2298_vm9, %v14622_v34  ;;  %vm2293_vm3 = vcmp.eq.f32.partialorder %v1781_v28, %v8449_v53  ;;  %vm2294_vm9 = vcmp.eq.f32.partialorder %v1782_v3, %v8449_v53  ;;  %v1580_v28 = vrot.slane %v1579_v32, 4 }
 0x1ac   : > { %v1829_v10 = vperm.slane %v1580_v28, 0  ;;  %v1830_v39 = vperm.slane %v1580_v28, 1 }
 0x1ad   : > { %6418 = vmatpush.xpose.msk.msra.mxu1 %vm2255_vm5, %v14622_v34  ;;  %6446 = vmatpush.xpose.msk.msra.mxu2 %vm2295_vm4, %v14622_v34  ;;  %vm2291_vm5 = vcmp.eq.f32.partialorder %v1779_v52, %v8449_v53  ;;  %vm2347_vm4 = vcmp.eq.f32.partialorder %v1835_v17, %v8449_v53  ;;  %v1575_v52 = vsel %vm1434_vm11, %v9101_v49, %v9091_v43 }
 0x1ae   : > { %6434 = vmatpush.xpose.msk.msra.mxu0 %vm2256_vm8, %v14622_v34  ;;  %6462 = vmatpush.xpose.msk.msra.mxu3 %vm2296_vm6, %v14622_v34  ;;  %vm2292_vm8 = vcmp.eq.f32.partialorder %v1780_v29, %v8449_v53  ;;  %vm14645_vm6 = vcmp.lt.f32.partialorder %v8276_v59, 0.09  ;;  %v1776_v59 = vperm.slane %v1529_v1, 1  ;;  %v9220_v17 = vsel %vm1429_vm13, %v9018_v21, %v9005_v27 }
 0x1af   : > { %v1249_v0 = vpop.f32.mrf.mxu2  ;;  %v1314_v56 = vpop.f32.mrf.mxu3  ;;  %7436 = vset.pattern.permute.xlu0 %v14624_v50  ;;  %v1581_v50 = vsel %vm1443_vm12, %v9101_v49, %v9091_v43  ;;  %v5978_v13 = vsel %vm14645_vm6, 1.0, %v14625_v24  ;;  %v1576_v18 = vrot.slane %v1575_v52, 2  ;;  %v1827_v1 = vperm.slane %v1578_v46, 0 }
 0x1b0   : > { %v9142_v42 = vadd.f32 %v1314_v56, %v1249_v0  ;;  %v1582_v38 = vrot.slane %v1581_v50, 5  ;;  %v9179_v55 = vmul.f32 %v5978_v13, %v1173_v20  ;;  %v5555_v0 = vld [vmem:[%s7890_s26] sm:$0x7f] }
 0x1b1   : > { %6419 = vmatpush.xpose.msk.msra.mxu1 %vm2253_vm10, %v14622_v34  ;;  %6447 = vmatpush.xpose.msk.msra.mxu2 %vm2293_vm3, %v14622_v34  ;;  %vm2289_vm10 = vcmp.eq.f32.partialorder %v1777_v33, %v8449_v53  ;;  %vm2345_vm3 = vcmp.eq.f32.partialorder %v1833_v57, %v8449_v53  ;;  %v1828_v33 = vperm.slane %v1578_v46, 1 }
 0x1b2   : > { %6435 = vmatpush.xpose.msk.msra.mxu0 %vm2254_vm2, %v14622_v34  ;;  %6463 = vmatpush.xpose.msk.msra.mxu3 %vm2294_vm9, %v14622_v34  ;;  %vm2290_vm2 = vcmp.eq.f32.partialorder %v1778_v9, %v8449_v53  ;;  %v1831_v51 = vperm.slane %v1582_v38, 0  ;;  %v1615_v3 = vsel %vm1449_vm0, %v9162_v2, %v9179_v55  ;;  %vm2346_vm9 = vcmp.eq.f32.partialorder %v1834_v23, %v8449_v53 }
 0x1b3   : > { %4407 = vperm.xlu1 %7433, %v9142_v42   ;;  %v1832_v47 = vperm.slane %v1582_v38, 1  ;;  %v1616_v56 = vrot.slane %v1615_v3, 7  ;;  %5574 = vperm.xlu2 %7435, %v5555_v0   ;;  %v1613_v29 = vsel %vm1446_vm1, %v9179_v55, %v9162_v2  ;;  %v1825_v9 = vperm.slane %v1576_v18, 0 }
 0x1b4   : > { %3053 = vmatmul.f32.vlgmr.msra.gmra.mxu1 %v8814_v37  ;;  %vm2343_vm6 = vcmp.eq.f32.partialorder %v1831_v51, %v8449_v53  ;;  %v1614_v50 = vrot.slane %v1613_v29, 6  ;;  %v1609_v32 = vsel %vm1440_vm14, %v9179_v55, %v9162_v2  ;;  %v1607_v3 = vsel %vm1437_vm15, %v9179_v55, %v9162_v2 }
 0x1b5   : > { %3073 = vmatmul.f32.vlgmr.msra.gmra.mxu0 %v8818_v63  ;;  %6448 = vmatpush.xpose.msk.msra.mxu2 %vm2291_vm5, %v14622_v34  ;;  %vm2287_vm5 = vcmp.eq.f32.partialorder %v1775_v15, %v8449_v53  ;;  %v1867_v45 = vperm.slane %v1616_v56, 0  ;;  %v1605_v0 = vsel %vm1434_vm11, %v9179_v55, %v9162_v2 }
 0x1b6   : > { %6464 = vmatpush.xpose.msk.msra.mxu3 %vm2292_vm8, %v14622_v34  ;;  %6468 = vmatpush.xpose.msk.msra.mxu1 %vm2347_vm4, %v14622_v34  ;;  %vm2288_vm8 = vcmp.eq.f32.partialorder %v1776_v59, %v8449_v53  ;;  %vm14646_vm4 = vcmask 1041409   ;;  %v1865_v57 = vperm.slane %v1614_v50, 0  ;;  %v1866_v23 = vperm.slane %v1614_v50, 1 }
 0x1b7   : > { %6484 = vmatpush.xpose.msk.msra.mxu0 %vm2348_vm7, %v14622_v34  ;;  %v9207_v12 = vsel %vm14646_vm4, %v9018_v21, %v9005_v27  ;;  %vm2344_vm7 = vcmp.eq.f32.partialorder %v1832_v47, %v8449_v53  ;;  %v1868_v27 = vperm.slane %v1616_v56, 1  ;;  %v1611_v21 = vsel %vm1443_vm12, %v9179_v55, %v9162_v2 }
 0x1b8   : > { %v1612_v13 = vrot.slane %v1611_v21, 5  ;;  %v1610_v59 = vrot.slane %v1609_v32, 4 }
 0x1b9   : > { %6449 = vmatpush.xpose.msk.msra.mxu2 %vm2289_vm10, %v14622_v34  ;;  %vm2285_vm10 = vcmp.eq.f32.partialorder %v1773_v14, %v8449_v53  ;;  %v1608_v14 = vrot.slane %v1607_v3, 3 }
 0x1ba   : > { %6465 = vmatpush.xpose.msk.msra.mxu3 %vm2290_vm2, %v14622_v34  ;;  %6469 = vmatpush.xpose.msk.msra.mxu1 %vm2345_vm3, %v14622_v34  ;;  %vm2286_vm2 = vcmp.eq.f32.partialorder %v1774_v58, %v8449_v53  ;;  %vm14647_vm3 = vmmov %vm14646_vm4  ;;  %vm2339_vm4 = vcmp.eq.f32.partialorder %v1827_v1, %v8449_v53  ;;  %v1863_v15 = vperm.slane %v1612_v13, 0  ;;  %v1864_v28 = vperm.slane %v1612_v13, 1 }
 0x1bb   : > { %6485 = vmatpush.xpose.msk.msra.mxu0 %vm2346_vm9, %v14622_v34  ;;  %v1573_v20 = vsel %vm14647_vm3, %v9101_v49, %v9091_v43  ;;  %vm2341_vm9 = vcmp.eq.f32.partialorder %v1829_v10, %v8449_v53  ;;  %vm2378_vm3 = vcmp.eq.f32.partialorder %v1866_v23, %v8449_v53  ;;  %v1861_v35 = vperm.slane %v1610_v59, 0 }
 0x1bc   : > { %v1574_v38 = vrot.slane %v1573_v20, 1  ;;  %v1862_v58 = vperm.slane %v1610_v59, 1  ;;  %v1569_v10 = vrot.slane %v9037_v5, 6  ;;  %v1859_v29 = vperm.slane %v1608_v14, 0 }
 0x1bd   : > { %6450 = vmatpush.xpose.msk.msra.mxu2 %vm2287_vm5, %v14622_v34  ;;  %vm2342_vm5 = vcmp.eq.f32.partialorder %v1830_v39, %v8449_v53  ;;  %v1606_v39 = vrot.slane %v1605_v0, 2  ;;  %v1567_v20 = vrot.slane %v9044_v36, 5  ;;  %v1602_v23 = vsel %vm1429_vm13, %v9179_v55, %v9162_v2 }
 0x1be   : > { %6466 = vmatpush.xpose.msk.msra.mxu3 %vm2288_vm8, %v14622_v34  ;;  %6470 = vmatpush.xpose.msk.msra.mxu1 %vm2343_vm6, %v14622_v34  ;;  %vm2379_vm8 = vcmp.eq.f32.partialorder %v1867_v45, %v8449_v53  ;;  %vm2380_vm6 = vcmp.eq.f32.partialorder %v1868_v27, %v8449_v53  ;;  %v1823_v51 = vperm.slane %v1574_v38, 0  ;;  %v1817_v45 = vperm.slane %v1569_v10, 0 }
 0x1bf   : > { %6486 = vmatpush.xpose.msk.msra.mxu0 %vm2344_vm7, %v14622_v34  ;;  %vm2340_vm7 = vcmp.eq.f32.partialorder %v1828_v33, %v8449_v53  ;;  %v1857_v50 = vperm.slane %v1606_v39, 0  ;;  %v1858_v21 = vperm.slane %v1606_v39, 1  ;;  %v9306_v33 = vpop.f32.mrf.mxu1  ;;  %v1818_v36 = vperm.slane %v1569_v10, 1 }
 0x1c1   : > { %6451 = vmatpush.xpose.msk.msra.mxu2 %vm2285_vm10, %v14622_v34  ;;  %vm2337_vm10 = vcmp.eq.f32.partialorder %v1825_v9, %v8449_v53 }
 0x1c2   : > { %6467 = vmatpush.xpose.msk.msra.mxu3 %vm2286_vm2, %v14622_v34  ;;  %6471 = vmatpush.xpose.msk.msra.mxu1 %vm2341_vm9, %v14622_v34  ;;  %vm2377_vm2 = vcmp.eq.f32.partialorder %v1865_v57, %v8449_v53  ;;  %v1565_v57 = vrot.slane %v9049_v48, 4  ;;  %v1816_v48 = vperm.slane %v1567_v20, 1 }
 0x1c3   : > { %6487 = vmatpush.xpose.msk.msra.mxu0 %vm2342_vm5, %v14622_v34  ;;  %vm2375_vm5 = vcmp.eq.f32.partialorder %v1863_v15, %v8449_v53  ;;  %v1854_v15 = vperm.slane %v1602_v23, 1 }
 0x1c4   : > { %3093 = vmatmul.f32.vlgmr.msra.gmra.mxu2 %v8814_v37  ;;  %v1826_v37 = vperm.slane %v1576_v18, 1  ;;  %v1170_v18 = vadd.f32 %v9095_v4, %v9093_v25  ;;  %v9304_v4 = vpop.f32.mrf.mxu0 }
 0x1c5   : > { %3113 = vmatmul.f32.vlgmr.msra.gmra.mxu3 %v8818_v63  ;;  %6500 = vmatpush.xpose.msk.msra.mxu2 %vm2379_vm8, %v14622_v34  ;;  %v1572_v63 = vsel %vm1429_vm13, %v9101_v49, %v9091_v43  ;;  %v1824_v43 = vperm.slane %v1574_v38, 1  ;;  %v1571_v49 = vrot.slane %v9029_v41, 7  ;;  %vm2335_vm8 = vcmp.eq.f32.partialorder %v1823_v51, %v8449_v53 }
 0x1c6   : > { %6472 = vmatpush.xpose.msk.msra.mxu1 %vm2339_vm4, %v14622_v34  ;;  %6516 = vmatpush.xpose.msk.msra.mxu3 %vm2380_vm6, %v14622_v34  ;;  %vm2338_vm9 = vcmp.eq.f32.partialorder %v1826_v37, %v8449_v53  ;;  %v1821_v47 = vperm.slane %v1572_v63, 0  ;;  %vm2376_vm4 = vcmp.eq.f32.partialorder %v1864_v28, %v8449_v53  ;;  %vm14648_vm6 = vcmp.lt.f32.partialorder %v8256_v31, 0.09 }
 0x1c7   : > { %6488 = vmatpush.xpose.msk.msra.mxu0 %vm2340_vm7, %v14622_v34  ;;  %v5977_v41 = vsel %vm14648_vm6, 1.0, %v14625_v24  ;;  %vm2336_vm7 = vcmp.eq.f32.partialorder %v1824_v43, %v8449_v53  ;;  %v1822_v56 = vperm.slane %v1572_v63, 1  ;;  %v1819_v46 = vperm.slane %v1571_v49, 0  ;;  %v1178_v28 = vpop.f32.mrf.mxu1 }
 0x1c8   : > { %v1370_v52 = vmul.f32 %v5977_v41, %v8878_v16  ;;  %v1860_v31 = vperm.slane %v1608_v14, 1  ;;  %v1820_v5 = vperm.slane %v1571_v49, 1  ;;  %v1563_v37 = vrot.slane %v9129_v61, 3 }
 0x1c9   : > { %6501 = vmatpush.xpose.msk.msra.mxu2 %vm2377_vm2, %v14622_v34  ;;  %vm2333_vm2 = vcmp.eq.f32.partialorder %v1821_v47, %v8449_v53  ;;  %v1813_v63 = vperm.slane %v1565_v57, 0  ;;  %v1814_v61 = vperm.slane %v1565_v57, 1  ;;  %v1561_v49 = vrot.slane %v9153_v54, 2 }
 0x1ca   : > { %6473 = vmatpush.xpose.msk.msra.mxu1 %vm2337_vm10, %v14622_v34  ;;  %6517 = vmatpush.xpose.msk.msra.mxu3 %vm2378_vm3, %v14622_v34  ;;  %vm2373_vm10 = vcmp.eq.f32.partialorder %v1861_v35, %v8449_v53  ;;  %vm2374_vm3 = vcmp.eq.f32.partialorder %v1862_v58, %v8449_v53  ;;  %v9296_v27 = vrot.slane %v1370_v52, 7  ;;  %vm2372_vm6 = vcmp.eq.f32.partialorder %v1860_v31, %v8449_v53 }
 0x1cb   : > { %6489 = vmatpush.xpose.msk.msra.mxu0 %vm2338_vm9, %v14622_v34  ;;  %vm14649_vm9 = vcmask 1041409   ;;  %v1811_v3 = vperm.slane %v1563_v37, 0  ;;  %v1812_v54 = vperm.slane %v1563_v37, 1  ;;  %v1810_v39 = vperm.slane %v1561_v49, 1 }
 0x1cc   : > { %v1603_v16 = vsel %vm14649_vm9, %v9179_v55, %v9162_v2  ;;  %vm2370_vm9 = vcmp.eq.f32.partialorder %v1858_v21, %v8449_v53  ;;  %v1853_v2 = vperm.slane %v1602_v23, 0  ;;  %v1113_v51 = vpop.f32.mrf.mxu0  ;;  %v1805_v21 = vperm.slane %v9220_v17, 0 }
 0x1cd   : > { %6502 = vmatpush.xpose.msk.msra.mxu2 %vm2375_vm5, %v14622_v34  ;;  %vm2334_vm5 = vcmp.eq.f32.partialorder %v1822_v56, %v8449_v53  ;;  %v1604_v1 = vrot.slane %v1603_v16, 1  ;;  %v1179_v0 = vadd.f32 %v1178_v28, %v1113_v51  ;;  %v1809_v56 = vperm.slane %v1561_v49, 0 }
 0x1ce   : > { %6474 = vmatpush.xpose.msk.msra.mxu1 %vm2335_vm8, %v14622_v34  ;;  %6518 = vmatpush.xpose.msk.msra.mxu3 %vm2376_vm4, %v14622_v34  ;;  %vm2371_vm8 = vcmp.eq.f32.partialorder %v1859_v29, %v8449_v53  ;;  %vm2331_vm4 = vcmp.eq.f32.partialorder %v1819_v46, %v8449_v53  ;;  %v1559_v46 = vrot.slane %v9207_v12, 1 }
 0x1cf   : > { %6490 = vmatpush.xpose.msk.msra.mxu0 %vm2336_vm7, %v14622_v34  ;;  %vm14650_vm7 = vcmp.lt.f32.partialorder %v8254_v8, 0.09  ;;  %v1815_v8 = vperm.slane %v1567_v20, 0  ;;  %v1855_v38 = vperm.slane %v1604_v1, 0  ;;  %v1856_v13 = vperm.slane %v1604_v1, 1 }
 0x1d0   : > { %v5976_v25 = vsel %vm14650_vm7, 1.0, %v14625_v24  ;;  %vm2328_vm7 = vcmp.eq.f32.partialorder %v1816_v48, %v8449_v53  ;;  %v1808_v1 = vperm.slane %v1559_v46, 1 }
 0x1d1   : > { %6503 = vmatpush.xpose.msk.msra.mxu2 %vm2373_vm10, %v14622_v34  ;;  %vm2332_vm10 = vcmp.eq.f32.partialorder %v1820_v5, %v8449_v53  ;;  %v9311_v9 = vmul.f32 %v5976_v25, %v1170_v18  ;;  %v9378_v5 = vpop.f32.mrf.mxu1 }
 0x1d2   : > { %6475 = vmatpush.xpose.msk.msra.mxu1 %vm2333_vm2, %v14622_v34  ;;  %6519 = vmatpush.xpose.msk.msra.mxu3 %vm2374_vm3, %v14622_v34  ;;  %vm2329_vm2 = vcmp.eq.f32.partialorder %v1817_v45, %v8449_v53  ;;  %vm2369_vm3 = vcmp.eq.f32.partialorder %v1857_v50, %v8449_v53  ;;  %v1807_v45 = vperm.slane %v1559_v46, 0 }
 0x1d3   : > { %6491 = vmatpush.xpose.msk.msra.mxu0 %vm2334_vm5, %v14622_v34  ;;  %v1600_v32 = vsel %vm1449_vm0, %v9296_v27, %v9311_v9  ;;  %vm2330_vm5 = vcmp.eq.f32.partialorder %v1818_v36, %v8449_v53  ;;  %v1598_v59 = vsel %vm1446_vm1, %v9311_v9, %v9296_v27  ;;  %v1596_v14 = vsel %vm1443_vm12, %v9311_v9, %v9296_v27 }
 0x1d4   : > { %v1601_v55 = vrot.slane %v1600_v32, 7  ;;  %v1599_v47 = vrot.slane %v1598_v59, 6  ;;  %v9376_v12 = vpop.f32.mrf.mxu0  ;;  %v1592_v20 = vsel %vm1437_vm15, %v9311_v9, %v9296_v27  ;;  %v1806_v36 = vperm.slane %v9220_v17, 1 }
 0x1d5   : > { %6504 = vmatpush.xpose.msk.msra.mxu2 %vm2371_vm8, %v14622_v34  ;;  %vm2327_vm8 = vcmp.eq.f32.partialorder %v1815_v8, %v8449_v53  ;;  %v1593_v8 = vrot.slane %v1592_v20, 3 }
 0x1d6   : > { %6476 = vmatpush.xpose.msk.msra.mxu1 %vm2331_vm4, %v14622_v34  ;;  %6520 = vmatpush.xpose.msk.msra.mxu3 %vm2372_vm6, %v14622_v34  ;;  %vm2367_vm4 = vcmp.eq.f32.partialorder %v1855_v38, %v8449_v53  ;;  %vm2368_vm6 = vcmp.eq.f32.partialorder %v1856_v13, %v8449_v53  ;;  %v1851_v43 = vperm.slane %v1601_v55, 0  ;;  %v1852_v35 = vperm.slane %v1601_v55, 1 }
 0x1d7   : > { %6492 = vmatpush.xpose.msk.msra.mxu0 %vm2332_vm10, %v14622_v34  ;;  %vm2365_vm10 = vcmp.eq.f32.partialorder %v1853_v2, %v8449_v53  ;;  %v1849_v52 = vperm.slane %v1599_v47, 0  ;;  %v1850_v10 = vperm.slane %v1599_v47, 1  ;;  %v1590_v13 = vsel %vm1434_vm11, %v9311_v9, %v9296_v27 }
 0x1d8   : > { %v1591_v55 = vrot.slane %v1590_v13, 2 }
 0x1d9   : > { %6505 = vmatpush.xpose.msk.msra.mxu2 %vm2369_vm3, %v14622_v34  ;;  %vm2366_vm3 = vcmp.eq.f32.partialorder %v1854_v15, %v8449_v53  ;;  %v1184_v2 = vpop.f32.mrf.mxu1 }
 0x1da   : > { %6477 = vmatpush.xpose.msk.msra.mxu1 %vm2329_vm2, %v14622_v34  ;;  %6521 = vmatpush.xpose.msk.msra.mxu3 %vm2370_vm9, %v14622_v34  ;;  %vm2325_vm2 = vcmp.eq.f32.partialorder %v1813_v63, %v8449_v53  ;;  %vm14651_vm9 = vcmp.lt.f32.partialorder %v8328_v19, 0.09  ;;  %v1597_v19 = vrot.slane %v1596_v14, 5  ;;  %v1841_v49 = vperm.slane %v1591_v55, 0 }
 0x1db   : > { %6493 = vmatpush.xpose.msk.msra.mxu0 %vm2330_vm5, %v14622_v34  ;;  %v5983_v58 = vsel %vm14651_vm9, 1.0, %v14625_v24  ;;  %vm2326_vm5 = vcmp.eq.f32.partialorder %v1814_v61, %v8449_v53  ;;  %vm2362_vm9 = vcmp.eq.f32.partialorder %v1850_v10, %v8449_v53  ;;  %v1842_v14 = vperm.slane %v1591_v55, 1 }
 0x1dc   : > { %v1376_v41 = vmul.f32 %v5983_v58, %v9061_v26  ;;  %v1594_v26 = vsel %vm1440_vm14, %v9311_v9, %v9296_v27  ;;  %v1848_v50 = vperm.slane %v1597_v19, 1  ;;  %v1119_v37 = vpop.f32.mrf.mxu0 }
 0x1dd   : > { %6506 = vmatpush.xpose.msk.msra.mxu2 %vm2367_vm4, %v14622_v34  ;;  %vm2363_vm4 = vcmp.eq.f32.partialorder %v1851_v43, %v8449_v53  ;;  %v1595_v18 = vrot.slane %v1594_v26, 4 }
 0x1de   : > { %6478 = vmatpush.xpose.msk.msra.mxu1 %vm2327_vm8, %v14622_v34  ;;  %6522 = vmatpush.xpose.msk.msra.mxu3 %vm2368_vm6, %v14622_v34  ;;  %vm2323_vm8 = vcmp.eq.f32.partialorder %v1811_v3, %v8449_v53  ;;  %vm2364_vm6 = vcmp.eq.f32.partialorder %v1852_v35, %v8449_v53  ;;  %v9373_v16 = vrot.slane %v1376_v41, 7  ;;  %v1185_v3 = vadd.f32 %v1184_v2, %v1119_v37  ;;  %v9435_v35 = vld [vmem:[%s7890_s26] sm:$0x7f] }
 0x1df   : > { %6494 = vmatpush.xpose.msk.msra.mxu0 %vm2328_vm7, %v14622_v34  ;;  %vm14652_vm7 = vcmp.lt.f32.partialorder %v8326_v22, 0.09  ;;  %v1847_v22 = vperm.slane %v1597_v19, 0  ;;  %v1845_v57 = vperm.slane %v1595_v18, 0  ;;  %v1846_v38 = vperm.slane %v1595_v18, 1 }
 0x1e0   : > { %v5982_v29 = vsel %vm14652_vm7, 1.0, %v14625_v24  ;;  %vm14653_vm7 = vcmp.lt.f32.partialorder %v8402_v62, 0.09  ;;  %v1843_v62 = vperm.slane %v1593_v8, 0  ;;  %v1587_v19 = vsel %vm1429_vm13, %v9311_v9, %v9296_v27 }
 0x1e1   : > { %6507 = vmatpush.xpose.msk.msra.mxu2 %vm2365_vm10, %v14622_v34  ;;  %vm2324_vm10 = vcmp.eq.f32.partialorder %v1812_v54, %v8449_v53  ;;  %v9371_v31 = vmul.f32 %v5982_v29, %v1179_v0  ;;  %v5987_v23 = vsel %vm14653_vm7, 1.0, %v14625_v24  ;;  %v9444_v54 = vld [vmem:[%s7890_s26 + $0x8] sm:$0x7f] }
 0x1e2   : > { %6479 = vmatpush.xpose.msk.msra.mxu1 %vm2325_vm2, %v14622_v34  ;;  %6523 = vmatpush.xpose.msk.msra.mxu3 %vm2366_vm3, %v14622_v34  ;;  %vm2321_vm2 = vcmp.eq.f32.partialorder %v1809_v56, %v8449_v53  ;;  %vm2361_vm3 = vcmp.eq.f32.partialorder %v1849_v52, %v8449_v53  ;;  %v1380_v32 = vmul.f32 %v5987_v23, %v9142_v42  ;;  %v1844_v42 = vperm.slane %v1593_v8, 1 }
 0x1e3   : > { %6495 = vmatpush.xpose.msk.msra.mxu0 %vm2326_vm5, %v14622_v34  ;;  %vm2322_vm5 = vcmp.eq.f32.partialorder %v1810_v39, %v8449_v53  ;;  %v1645_v25 = vsel %vm1449_vm0, %v9373_v16, %v9371_v31  ;;  %v1643_v48 = vsel %vm1446_vm1, %v9371_v31, %v9373_v16  ;;  %v1641_v28 = vsel %vm1443_vm12, %v9371_v31, %v9373_v16 }
 0x1e4   : > { %v1646_v17 = vrot.slane %v1645_v25, 7  ;;  %v1644_v51 = vrot.slane %v1643_v48, 6  ;;  %v9431_v43 = vrot.slane %v1380_v32, 7  ;;  %vm2356_vm7 = vcmp.eq.f32.partialorder %v1844_v42, %v8449_v53 }
 0x1e5   : > { %6508 = vmatpush.xpose.msk.msra.mxu2 %vm2363_vm4, %v14622_v34  ;;  %vm2319_vm4 = vcmp.eq.f32.partialorder %v1807_v45, %v8449_v53  ;;  %v1639_v58 = vsel %vm1440_vm14, %v9371_v31, %v9373_v16  ;;  %v1635_v25 = vsel %vm1434_vm11, %v9371_v31, %v9373_v16  ;;  %v1176_v48 = vadd.f32 %v9306_v33, %v9304_v4 }
 0x1e6   : > { %6480 = vmatpush.xpose.msk.msra.mxu1 %vm2323_vm8, %v14622_v34  ;;  %6524 = vmatpush.xpose.msk.msra.mxu3 %vm2364_vm6, %v14622_v34  ;;  %vm2359_vm8 = vcmp.eq.f32.partialorder %v1847_v22, %v8449_v53  ;;  %vm2360_vm6 = vcmp.eq.f32.partialorder %v1848_v50, %v8449_v53  ;;  %v1899_v15 = vperm.slane %v1646_v17, 0  ;;  %v1900_v59 = vperm.slane %v1646_v17, 1 }
 0x1e7   : > { %6496 = vmatpush.xpose.msk.msra.mxu0 %vm2324_vm10, %v14622_v34  ;;  %vm2320_vm10 = vcmp.eq.f32.partialorder %v1808_v1, %v8449_v53  ;;  %v1897_v0 = vperm.slane %v1644_v51, 0  ;;  %v1898_v41 = vperm.slane %v1644_v51, 1  ;;  %v1640_v46 = vrot.slane %v1639_v58, 4 }
 0x1e8   : > { %v1838_v22 = vperm.slane %v1587_v19, 1  ;;  %v1636_v17 = vrot.slane %v1635_v25, 2 }
 0x1e9   : > { %6509 = vmatpush.xpose.msk.msra.mxu2 %vm2361_vm3, %v14622_v34  ;;  %vm2357_vm3 = vcmp.eq.f32.partialorder %v1845_v57, %v8449_v53  ;;  %v1893_v50 = vperm.slane %v1640_v46, 0  ;;  %v1894_v1 = vperm.slane %v1640_v46, 1 }
 0x1ea   : > { %6481 = vmatpush.xpose.msk.msra.mxu1 %vm2321_vm2, %v14622_v34  ;;  %6525 = vmatpush.xpose.msk.msra.mxu3 %vm2362_vm9, %v14622_v34  ;;  %vm2317_vm2 = vcmp.eq.f32.partialorder %v1805_v21, %v8449_v53  ;;  %vm2318_vm9 = vcmp.eq.f32.partialorder %v1806_v36, %v8449_v53  ;;  %v1889_v55 = vperm.slane %v1636_v17, 0  ;;  %v1890_v42 = vperm.slane %v1636_v17, 1 }
 0x1eb   : > { %6497 = vmatpush.xpose.msk.msra.mxu0 %vm2322_vm5, %v14622_v34  ;;  %vm2358_vm5 = vcmp.eq.f32.partialorder %v1846_v38, %v8449_v53 }
 0x1ed   : > { %6510 = vmatpush.xpose.msk.msra.mxu2 %vm2359_vm8, %v14622_v34  ;;  %vm14654_vm8 = vcmask 1041409  }
 0x1ee   : > { %6482 = vmatpush.xpose.msk.msra.mxu1 %vm2319_vm4, %v14622_v34  ;;  %6526 = vmatpush.xpose.msk.msra.mxu3 %vm2360_vm6, %v14622_v34  ;;  %v1588_v63 = vsel %vm14654_vm8, %v9311_v9, %v9296_v27  ;;  %vm14655_vm4 = vcmp.lt.f32.partialorder %v8400_v6, 0.09  ;;  %vm2355_vm6 = vcmp.eq.f32.partialorder %v1843_v62, %v8449_v53  ;;  %v1642_v6 = vrot.slane %v1641_v28, 5 }
 0x1ef   : > { %6498 = vmatpush.xpose.msk.msra.mxu0 %vm2320_vm10, %v14622_v34  ;;  %v5986_v61 = vsel %vm14655_vm4, 1.0, %v14625_v24  ;;  %v1589_v47 = vrot.slane %v1588_v63, 1  ;;  %vm2411_vm10 = vcmp.eq.f32.partialorder %v1899_v15, %v8449_v53  ;;  %vm2410_vm8 = vcmp.eq.f32.partialorder %v1898_v41, %v8449_v53 }
 0x1f0   : > { %v9450_v56 = vmul.f32 %v5986_v61, %v1185_v3  ;;  %v1895_v29 = vperm.slane %v1642_v6, 0  ;;  %v1896_v39 = vperm.slane %v1642_v6, 1  ;;  %v1637_v27 = vsel %vm1437_vm15, %v9371_v31, %v9373_v16 }
 0x1f1   : > { %6511 = vmatpush.xpose.msk.msra.mxu2 %vm2357_vm3, %v14622_v34  ;;  %vm2353_vm3 = vcmp.eq.f32.partialorder %v1841_v49, %v8449_v53  ;;  %v1839_v52 = vperm.slane %v1589_v47, 0  ;;  %v1840_v10 = vperm.slane %v1589_v47, 1  ;;  %v1837_v9 = vperm.slane %v1587_v19, 0 }
 0x1f2   : > { %6483 = vmatpush.xpose.msk.msra.mxu1 %vm2317_vm2, %v14622_v34  ;;  %6527 = vmatpush.xpose.msk.msra.mxu3 %vm2358_vm5, %v14622_v34  ;;  %vm2412_vm2 = vcmp.eq.f32.partialorder %v1900_v59, %v8449_v53  ;;  %v1675_v26 = vsel %vm1449_vm0, %v9431_v43, %v9450_v56  ;;  %vm2409_vm5 = vcmp.eq.f32.partialorder %v1897_v0, %v8449_v53  ;;  %v1638_v21 = vrot.slane %v1637_v27, 3 }
 0x1f3   : > { %6499 = vmatpush.xpose.msk.msra.mxu0 %vm2318_vm9, %v14622_v34  ;;  %vm2354_vm9 = vcmp.eq.f32.partialorder %v1842_v14, %v8449_v53  ;;  %vm2351_vm4 = vcmp.eq.f32.partialorder %v1839_v52, %v8449_v53  ;;  %v1676_v18 = vrot.slane %v1675_v26, 7  ;;  %v1673_v20 = vsel %vm1446_vm1, %v9450_v56, %v9431_v43 }
 0x1f4   : > { %v1674_v57 = vrot.slane %v1673_v20, 6  ;;  %v1671_v38 = vsel %vm1443_vm12, %v9450_v56, %v9431_v43  ;;  %v1891_v13 = vperm.slane %v1638_v21, 0  ;;  %v1892_v23 = vperm.slane %v1638_v21, 1 }
 0x1f5   : > { %3133 = vmatmul.f32.vlgmr.msra.gmra.mxu1 %v9435_v35  ;;  %6512 = vmatpush.xpose.msk.msra.mxu2 %vm2355_vm6, %v14622_v34  ;;  %vm14656_vm6 = vcmp.lt.f32.partialorder %v8300_v44, 0.09  ;;  %v1931_v36 = vperm.slane %v1676_v18, 0  ;;  %v1932_v8 = vperm.slane %v1676_v18, 1  ;;  %v1672_v62 = vrot.slane %v1671_v38, 5 }
 0x1f6   : > { %3153 = vmatmul.f32.vlgmr.msra.gmra.mxu0 %v9444_v54  ;;  %6528 = vmatpush.xpose.msk.msra.mxu3 %vm2356_vm7, %v14622_v34  ;;  %v5981_v45 = vsel %vm14656_vm6, 1.0, %v14625_v24  ;;  %vm2352_vm7 = vcmp.eq.f32.partialorder %v1840_v10, %v8449_v53  ;;  %vm14658_vm6 = vcmp.lt.f32.partialorder %v8298_v30, 0.09  ;;  %v1929_v2 = vperm.slane %v1674_v57, 0 }
 0x1f7   : > { %6532 = vmatpush.xpose.msk.msra.mxu1 %vm2411_vm10, %v14622_v34  ;;  %6548 = vmatpush.xpose.msk.msra.mxu0 %vm2412_vm2, %v14622_v34  ;;  %vm2407_vm10 = vcmp.eq.f32.partialorder %v1895_v29, %v8449_v53  ;;  %vm2408_vm2 = vcmp.eq.f32.partialorder %v1896_v39, %v8449_v53  ;;  %v1374_v44 = vmul.f32 %v5981_v45, %v8966_v7  ;;  %v5980_v32 = vsel %vm14658_vm6, 1.0, %v14625_v24 }
 0x1f8   : > { %v1930_v30 = vperm.slane %v1674_v57, 1  ;;  %v1669_v33 = vsel %vm1440_vm14, %v9450_v56, %v9431_v43  ;;  %v9521_v63 = vmul.f32 %v5980_v32, %v1176_v48  ;;  %v1927_v15 = vperm.slane %v1672_v62, 0 }
 0x1f9   : > { %6513 = vmatpush.xpose.msk.msra.mxu2 %vm2353_vm3, %v14622_v34  ;;  %vm2349_vm3 = vcmp.eq.f32.partialorder %v1837_v9, %v8449_v53  ;;  %v9508_v37 = vrot.slane %v1374_v44, 7  ;;  %v1670_v59 = vrot.slane %v1669_v33, 4  ;;  %v1928_v51 = vperm.slane %v1672_v62, 1 }
 0x1fa   : > { %6529 = vmatpush.xpose.msk.msra.mxu3 %vm2354_vm9, %v14622_v34  ;;  %vm2350_vm9 = vcmp.eq.f32.partialorder %v1838_v22, %v8449_v53  ;;  %v1667_v61 = vsel %vm1437_vm15, %v9450_v56, %v9431_v43  ;;  %v1632_v47 = vsel %vm1429_vm13, %v9371_v31, %v9373_v16  ;;  %vm2439_vm6 = vcmp.eq.f32.partialorder %v1927_v15, %v8449_v53 }
 0x1fb   : > { %6533 = vmatpush.xpose.msk.msra.mxu1 %vm2409_vm5, %v14622_v34  ;;  %6549 = vmatpush.xpose.msk.msra.mxu0 %vm2410_vm8, %v14622_v34  ;;  %vm2405_vm5 = vcmp.eq.f32.partialorder %v1893_v50, %v8449_v53  ;;  %vm14657_vm8 = vcmask 1041409   ;;  %v1630_v28 = vsel %vm1449_vm0, %v9508_v37, %v9521_v63  ;;  %v1925_v14 = vperm.slane %v1670_v59, 0 }
 0x1fc   : > { %v1633_v7 = vsel %vm14657_vm8, %v9371_v31, %v9373_v16  ;;  %vm2401_vm8 = vcmp.eq.f32.partialorder %v1889_v55, %v8449_v53  ;;  %v1631_v6 = vrot.slane %v1630_v28, 7  ;;  %v1668_v58 = vrot.slane %v1667_v61, 3 }
 0x1fd   : > { %6514 = vmatpush.xpose.msk.msra.mxu2 %vm2351_vm4, %v14622_v34  ;;  %vm2406_vm4 = vcmp.eq.f32.partialorder %v1894_v1, %v8449_v53  ;;  %v1634_v4 = vrot.slane %v1633_v7, 1  ;;  %v1926_v41 = vperm.slane %v1670_v59, 1  ;;  %v1665_v52 = vsel %vm1434_vm11, %v9450_v56, %v9431_v43 }
 0x1fe   : > { %6530 = vmatpush.xpose.msk.msra.mxu3 %vm2352_vm7, %v14622_v34  ;;  %vm2443_vm7 = vcmp.eq.f32.partialorder %v1931_v36, %v8449_v53  ;;  %v1885_v31 = vperm.slane %v1632_v47, 0  ;;  %v1886_v16 = vperm.slane %v1632_v47, 1  ;;  %v1628_v19 = vsel %vm1446_vm1, %v9521_v63, %v9508_v37 }
 0x1ff   : > { %6534 = vmatpush.xpose.msk.msra.mxu1 %vm2407_vm10, %v14622_v34  ;;  %6550 = vmatpush.xpose.msk.msra.mxu0 %vm2408_vm2, %v14622_v34  ;;  %vm2444_vm10 = vcmp.eq.f32.partialorder %v1932_v8, %v8449_v53  ;;  %vm2403_vm2 = vcmp.eq.f32.partialorder %v1891_v13, %v8449_v53  ;;  %v1887_v3 = vperm.slane %v1634_v4, 0  ;;  %v1888_v49 = vperm.slane %v1634_v4, 1 }
 0x200   : > { %v1883_v10 = vperm.slane %v1631_v6, 0  ;;  %v1923_v46 = vperm.slane %v1668_v58, 0  ;;  %v1666_v26 = vrot.slane %v1665_v52, 2  ;;  %v1924_v29 = vperm.slane %v1668_v58, 1 }
 0x201   : > { %6515 = vmatpush.xpose.msk.msra.mxu2 %vm2349_vm3, %v14622_v34  ;;  %vm2404_vm3 = vcmp.eq.f32.partialorder %v1892_v23, %v8449_v53  ;;  %v1884_v27 = vperm.slane %v1631_v6, 1  ;;  %v1629_v9 = vrot.slane %v1628_v19, 6  ;;  %v1182_v22 = vadd.f32 %v9378_v5, %v9376_v12 }
 0x202   : > { %6531 = vmatpush.xpose.msk.msra.mxu3 %vm2350_vm9, %v14622_v34  ;;  %vm2441_vm9 = vcmp.eq.f32.partialorder %v1929_v2, %v8449_v53  ;;  %v1921_v18 = vperm.slane %v1666_v26, 0  ;;  %v1922_v12 = vperm.slane %v1666_v26, 1  ;;  %v1622_v57 = vsel %vm1437_vm15, %v9521_v63, %v9508_v37 }
 0x203   : > { %6535 = vmatpush.xpose.msk.msra.mxu1 %vm2405_vm5, %v14622_v34  ;;  %6551 = vmatpush.xpose.msk.msra.mxu0 %vm2406_vm4, %v14622_v34  ;;  %vm2442_vm5 = vcmp.eq.f32.partialorder %v1930_v30, %v8449_v53  ;;  %vm2402_vm4 = vcmp.eq.f32.partialorder %v1890_v42, %v8449_v53  ;;  %v1881_v5 = vperm.slane %v1629_v9, 0  ;;  %v1882_v21 = vperm.slane %v1629_v9, 1 }
 0x204   : > { %3173 = vmatmul.f32.vlgmr.msra.gmra.mxu2 %v9435_v35  ;;  %v1662_v7 = vsel %vm1429_vm13, %v9450_v56, %v9431_v43  ;;  %v1623_v48 = vrot.slane %v1622_v57, 3  ;;  %v1617_v9 = vsel %vm1429_vm13, %v9521_v63, %v9508_v37 }
 0x205   : > { %3193 = vmatmul.f32.vlgmr.msra.gmra.mxu3 %v9444_v54  ;;  %6564 = vmatpush.xpose.msk.msra.mxu2 %vm2443_vm7, %v14622_v34  ;;  %vm14659_vm7 = vcmp.lt.f32.partialorder %v8350_v60, 0.09  ;;  %v1917_v17 = vperm.slane %v1662_v7, 0  ;;  %v1918_v32 = vperm.slane %v1662_v7, 1 }
 0x206   : > { %6580 = vmatpush.xpose.msk.msra.mxu3 %vm2444_vm10, %v14622_v34  ;;  %v5985_v0 = vsel %vm14659_vm7, 1.0, %v14625_v24  ;;  %vm2440_vm10 = vcmp.eq.f32.partialorder %v1928_v51, %v8449_v53  ;;  %vm2435_vm7 = vcmp.eq.f32.partialorder %v1923_v46, %v8449_v53  ;;  %v1875_v51 = vperm.slane %v1623_v48, 0 }
 0x207   : > { %6536 = vmatpush.xpose.msk.msra.mxu1 %vm2403_vm2, %v14622_v34  ;;  %6552 = vmatpush.xpose.msk.msra.mxu0 %vm2404_vm3, %v14622_v34  ;;  %vm2399_vm2 = vcmp.eq.f32.partialorder %v1887_v3, %v8449_v53  ;;  %vm2400_vm3 = vcmp.eq.f32.partialorder %v1888_v49, %v8449_v53  ;;  %v1378_v60 = vmul.f32 %v5985_v0, %v9097_v11  ;;  %v1876_v28 = vperm.slane %v1623_v48, 1  ;;  %v3014_v26 = vpop.f32.mrf.mxu2  ;;  %v3279_v48 = vld [vmem:[#allocation2 + $0x18] sm:$0x7f] }
 0x208   : > { %v1626_v11 = vsel %vm1443_vm12, %v9521_v63, %v9508_v37 }
 0x209   : > { %6565 = vmatpush.xpose.msk.msra.mxu2 %vm2441_vm9, %v14622_v34  ;;  %vm2437_vm9 = vcmp.eq.f32.partialorder %v1925_v14, %v8449_v53  ;;  %v1627_v45 = vrot.slane %v1626_v11, 5  ;;  %v9580_v1 = vrot.slane %v1378_v60, 7  ;;  %v3277_v60 = vld [vmem:[#allocation2 + $0x30] sm:$0x7f]  ;;  %v3278_v11 = vld [vmem:[#allocation2] sm:$0x7f] }
 0x20a   : > { %6581 = vmatpush.xpose.msk.msra.mxu3 %vm2442_vm5, %v14622_v34  ;;  %vm2438_vm5 = vcmp.eq.f32.partialorder %v1926_v41, %v8449_v53 }
 0x20b   : > { %6537 = vmatpush.xpose.msk.msra.mxu1 %vm2401_vm8, %v14622_v34  ;;  %6553 = vmatpush.xpose.msk.msra.mxu0 %vm2402_vm4, %v14622_v34  ;;  %vm14660_vm8 = vcmask 1041409   ;;  %vm2397_vm4 = vcmp.eq.f32.partialorder %v1885_v31, %v8449_v53  ;;  %v1879_v25 = vperm.slane %v1627_v45, 0  ;;  %v1880_v13 = vperm.slane %v1627_v45, 1  ;;  %v2974_v31 = vpop.f32.mrf.mxu1 }
 0x20c   : > { %v1663_v39 = vsel %vm14660_vm8, %v9450_v56, %v9431_v43  ;;  %vm2434_vm8 = vcmp.eq.f32.partialorder %v1922_v12, %v8449_v53  ;;  %v1620_v56 = vsel %vm1434_vm11, %v9521_v63, %v9508_v37 }
 0x20d   : > { %6566 = vmatpush.xpose.msk.msra.mxu2 %vm2439_vm6, %v14622_v34  ;;  %vm2398_vm6 = vcmp.eq.f32.partialorder %v1886_v16, %v8449_v53  ;;  %v1664_v50 = vrot.slane %v1663_v39, 1  ;;  %v1621_v15 = vrot.slane %v1620_v56, 2  ;;  %v2994_v16 = vpop.f32.mrf.mxu0 }
 0x20e   : > { %6582 = vmatpush.xpose.msk.msra.mxu3 %vm2440_vm10, %v14622_v34  ;;  %vm14661_vm10 = vcmp.lt.f32.partialorder %v8348_v40, 0.09  ;;  %v1624_v40 = vsel %vm1440_vm14, %v9521_v63, %v9508_v37  ;;  %v2995_v46 = vadd.f32 %v2994_v16, %v2974_v31  ;;  %v14681_v31 = vld [vmem:[#allocation21_spill] sm:$0xff] }
 0x20f   : > { %6538 = vmatpush.xpose.msk.msra.mxu1 %vm2399_vm2, %v14622_v34  ;;  %6554 = vmatpush.xpose.msk.msra.mxu0 %vm2400_vm3, %v14622_v34  ;;  %v5984_v20 = vsel %vm14661_vm10, 1.0, %v14625_v24  ;;  %vm2436_vm2 = vcmp.eq.f32.partialorder %v1924_v29, %v8449_v53  ;;  %vm2395_vm3 = vcmp.eq.f32.partialorder %v1883_v10, %v8449_v53  ;;  %v1919_v36 = vperm.slane %v1664_v50, 0  ;;  %v3034_v29 = vpop.f32.mrf.mxu3 }
 0x210   : > { %v9587_v44 = vmul.f32 %v5984_v20, %v1182_v22  ;;  %v1920_v8 = vperm.slane %v1664_v50, 1  ;;  %v1625_v23 = vrot.slane %v1624_v40, 4  ;;  %vm2391_vm10 = vcmp.eq.f32.partialorder %v1879_v25, %v8449_v53 }
 0x211   : > { %6567 = vmatpush.xpose.msk.msra.mxu2 %vm2437_vm9, %v14622_v34  ;;  %vm2396_vm9 = vcmp.eq.f32.partialorder %v1884_v27, %v8449_v53  ;;  %v1873_v6 = vperm.slane %v1621_v15, 0  ;;  %v1874_v58 = vperm.slane %v1621_v15, 1  ;;  %v3035_v27 = vadd.f32 %v3034_v29, %v3014_v26  ;;  %v14685_v26 = vld [vmem:[#allocation25_spill] sm:$0xff] }
 0x212   : > { %6583 = vmatpush.xpose.msk.msra.mxu3 %vm2438_vm5, %v14622_v34  ;;  %vm2433_vm5 = vcmp.eq.f32.partialorder %v1921_v18, %v8449_v53  ;;  %v1660_v38 = vsel %vm1449_vm0, %v9580_v1, %v9587_v44  ;;  %vm2432_vm0 = vcmp.eq.f32.partialorder %v1920_v8, %v8449_v53  ;;  %v1658_v2 = vsel %vm1446_vm1, %v9587_v44, %v9580_v1  ;;  %v14665_v8 = vld [vmem:[#allocation5_spill] sm:$0xff] }
 0x213   : > { %6539 = vmatpush.xpose.msk.msra.mxu1 %vm2397_vm4, %v14622_v34  ;;  %6555 = vmatpush.xpose.msk.msra.mxu0 %vm2398_vm6, %v14622_v34  ;;  %vm2393_vm4 = vcmp.eq.f32.partialorder %v1881_v5, %v8449_v53  ;;  %vm2394_vm6 = vcmp.eq.f32.partialorder %v1882_v21, %v8449_v53  ;;  %v1661_v43 = vrot.slane %v1660_v38, 7  ;;  %v1877_v62 = vperm.slane %v1625_v23, 0  ;;  %v14663_v21 = vld [vmem:[#allocation4_spill] sm:$0xff] }
 0x214   : > { %v1878_v30 = vperm.slane %v1625_v23, 1  ;;  %v1659_v33 = vrot.slane %v1658_v2, 6  ;;  %vm2430_vm1 = vcmp.eq.f32.partialorder %v1918_v32, %v8449_v53  ;;  %v1656_v59 = vsel %vm1443_vm12, %v9587_v44, %v9580_v1  ;;  %v14667_v23 = vld [vmem:[#allocation8_spill] sm:$0xff]  ;;  %v14669_v2 = vld [vmem:[#allocation10_spill] sm:$0xff] }
 0x215   : > { %6568 = vmatpush.xpose.msk.msra.mxu2 %vm2435_vm7, %v14622_v34  ;;  %vm2431_vm7 = vcmp.eq.f32.partialorder %v1919_v36, %v8449_v53  ;;  %v1915_v4 = vperm.slane %v1661_v43, 0  ;;  %v1916_v42 = vperm.slane %v1661_v43, 1  ;;  %v1657_v49 = vrot.slane %v1656_v59, 5  ;;  %v14668_v43 = vld [vmem:[#allocation9_spill] sm:$0xff] }
 0x216   : > { %6584 = vmatpush.xpose.msk.msra.mxu3 %vm2436_vm2, %v14622_v34  ;;  %vm2392_vm2 = vcmp.eq.f32.partialorder %v1880_v13, %v8449_v53  ;;  %v1913_v61 = vperm.slane %v1659_v33, 0  ;;  %v1914_v47 = vperm.slane %v1659_v33, 1  ;;  %v1654_v14 = vsel %vm1440_vm14, %v9587_v44, %v9580_v1  ;;  %v14666_v13 = vld [vmem:[#allocation6_spill] sm:$0xff]  ;;  %v14672_v59 = vld [vmem:[#allocation13_spill] sm:$0xff] }
 0x217   : > { %6540 = vmatpush.xpose.msk.msra.mxu1 %vm2395_vm3, %v14622_v34  ;;  %6556 = vmatpush.xpose.msk.msra.mxu0 %vm2396_vm9, %v14622_v34  ;;  %vm2429_vm3 = vcmp.eq.f32.partialorder %v1917_v17, %v8449_v53  ;;  %vm14662_vm9 = vcmask 1041409   ;;  %vm2428_vm12 = vcmp.eq.f32.partialorder %v1916_v42, %v8449_v53  ;;  %v1911_v41 = vperm.slane %v1657_v49, 0 }
 0x218   : > { %v1618_v55 = vsel %vm14662_vm9, %v9521_v63, %v9508_v37  ;;  %v1655_v52 = vrot.slane %v1654_v14, 4  ;;  %vm2426_vm14 = vcmp.eq.f32.partialorder %v1914_v47, %v8449_v53  ;;  %v1912_v19 = vperm.slane %v1657_v49, 1  ;;  %v14677_v47 = vld [vmem:[#allocation17_spill] sm:$0xff]  ;;  %v14678_v14 = vld [vmem:[#allocation18_spill] sm:$0xff] }
 0x219   : > { %6569 = vmatpush.xpose.msk.msra.mxu2 %vm2433_vm5, %v14622_v34  ;;  %vm2389_vm5 = vcmp.eq.f32.partialorder %v1877_v62, %v8449_v53  ;;  %v1619_v3 = vrot.slane %v1618_v55, 1  ;;  %v1652_v10 = vsel %vm1437_vm15, %v9587_v44, %v9580_v1  ;;  %v3285_v22 = vadd.f32 %v3277_v60, %v2995_v46  ;;  %v14671_v55 = vld [vmem:[#allocation12_spill] sm:$0xff] }
 0x21a   : > { %6585 = vmatpush.xpose.msk.msra.mxu3 %vm2434_vm8, %v14622_v34  ;;  %vm2390_vm8 = vcmp.eq.f32.partialorder %v1878_v30, %v8449_v53  ;;  %vm2423_vm15 = vcmp.eq.f32.partialorder %v1911_v41, %v8449_v53  ;;  %v1909_v18 = vperm.slane %v1655_v52, 0  ;;  %v1653_v45 = vrot.slane %v1652_v10, 3  ;;  %v14680_v41 = vld [vmem:[#allocation20_spill] sm:$0xff] }
 0x21b   : > { %6541 = vmatpush.xpose.msk.msra.mxu1 %vm2393_vm4, %v14622_v34  ;;  %6557 = vmatpush.xpose.msk.msra.mxu0 %vm2394_vm6, %v14622_v34  ;;  %vm2427_vm4 = vcmp.eq.f32.partialorder %v1915_v4, %v8449_v53  ;;  %vm2387_vm6 = vcmp.eq.f32.partialorder %v1875_v51, %v8449_v53  ;;  %v1871_v0 = vperm.slane %v1619_v3, 0  ;;  %v1872_v39 = vperm.slane %v1619_v3, 1  ;;  %3293 = vst [vmem:[#allocation2 + $0x30] sm:$0x7f] %v3285_v22  ;;  %v14670_v4 = vld [vmem:[#allocation11_spill] sm:$0xff] }
 0x21c   : > { %v3286_v50 = vadd.f32 %v3278_v11, %v3035_v27  ;;  %v1910_v20 = vperm.slane %v1655_v52, 1  ;;  %v1650_v12 = vsel %vm1434_vm11, %v9587_v44, %v9580_v1  ;;  %v1869_v37 = vperm.slane %v1617_v9, 0  ;;  %v14674_v51 = vld [vmem:[#allocation15_spill] sm:$0xff] }
 0x21d   : > { %6570 = vmatpush.xpose.msk.msra.mxu2 %vm2431_vm7, %v14622_v34  ;;  %vm2388_vm7 = vcmp.eq.f32.partialorder %v1876_v28, %v8449_v53  ;;  %vm2383_vm9 = vcmp.eq.f32.partialorder %v1871_v0, %v8449_v53  ;;  %v1870_v63 = vperm.slane %v1617_v9, 1  ;;  %v1907_v5 = vperm.slane %v1653_v45, 0  ;;  %v14675_v28 = vld [vmem:[#allocation16_spill] sm:$0xff]  ;;  %v14676_v3 = vld [vmem:[#allocation3_spill] sm:$0xff]  ;;  %v3280_v9 = vld [vmem:[#allocation2 + $0x10] sm:$0x7f] }
 0x21e   : > { %6586 = vmatpush.xpose.msk.msra.mxu3 %vm2432_vm0, %v14622_v34  ;;  %vm2425_vm0 = vcmp.eq.f32.partialorder %v1913_v61, %v8449_v53  ;;  %3294 = vst [vmem:[#allocation2] sm:$0x7f] %v3286_v50  ;;  %v9677_v40 = vmul.u32 8, %v14663_v21  ;;  %v1651_v25 = vrot.slane %v1650_v12, 2  ;;  %vm2422_vm11 = vcmp.eq.f32.partialorder %v1910_v20, %v8449_v53  ;;  %v14687_v22 = vld [vmem:[#allocation27_spill] sm:$0xff]  ;;  %v14688_v50 = vld [vmem:[#allocation28_spill] sm:$0xff] }
 0x21f   : > { %6542 = vmatpush.xpose.msk.msra.mxu1 %vm2391_vm10, %v14622_v34  ;;  %6558 = vmatpush.xpose.msk.msra.mxu0 %vm2392_vm2, %v14622_v34  ;;  %vm2385_vm10 = vcmp.eq.f32.partialorder %v1873_v6, %v8449_v53  ;;  %vm2386_vm2 = vcmp.eq.f32.partialorder %v1874_v58, %v8449_v53  ;;  %v1908_v57 = vperm.slane %v1653_v45, 1  ;;  %v1647_v33 = vsel %vm1429_vm13, %v9587_v44, %v9580_v1  ;;  %v14679_v58 = vld [vmem:[#allocation19_spill] sm:$0xff]  ;;  %v14689_v12 = vld [vmem:[#allocation29_spill] sm:$0xff] }
 0x220   : > { %v1905_v7 = vperm.slane %v1651_v25, 0  ;;  %v1906_v17 = vperm.slane %v1651_v25, 1  ;;  %v1902_v61 = vperm.slane %v1647_v33, 1  ;;  %v4769_v49 = vadd.s32 376, %v14676_v3 }
 0x221   : > { %6571 = vmatpush.xpose.msk.msra.mxu2 %vm2429_vm3, %v14622_v34  ;;  %vm2424_vm3 = vcmp.eq.f32.partialorder %v1912_v19, %v8449_v53  ;;  %v4768_v6 = vadd.s32 368, %v14676_v3  ;;  %v4785_v0 = vadd.s32 504, %v14676_v3  ;;  %v4767_v52 = vadd.s32 360, %v14676_v3  ;;  %v14683_v19 = vld [vmem:[#allocation23_spill] sm:$0xff] }
 0x222   : > { %6587 = vmatpush.xpose.msk.msra.mxu3 %vm2430_vm1, %v14622_v34  ;;  %vm2384_vm1 = vcmp.eq.f32.partialorder %v1872_v39, %v8449_v53  ;;  %v4784_v16 = vadd.s32 496, %v14676_v3  ;;  %v4766_v60 = vadd.s32 352, %v14676_v3  ;;  %v4783_v10 = vadd.s32 488, %v14676_v3 }
 0x223   : > { %6543 = vmatpush.xpose.msk.msra.mxu1 %vm2389_vm5, %v14622_v34  ;;  %6559 = vmatpush.xpose.msk.msra.mxu0 %vm2390_vm8, %v14622_v34  ;;  %vm2421_vm5 = vcmp.eq.f32.partialorder %v1909_v18, %v8449_v53  ;;  %vm14664_vm8 = vcmask 1041409   ;;  %v4765_v46 = vadd.s32 344, %v14676_v3  ;;  %v4782_v29 = vadd.s32 480, %v14676_v3 }
 0x224   : > { %v1648_v36 = vsel %vm14664_vm8, %v9587_v44, %v9580_v1  ;;  %v14673_v1 = vld [vmem:[#allocation14_spill] sm:$0xff]  ;;  %v1901_v44 = vperm.slane %v1647_v33, 0  ;;  %v4764_v39 = vadd.s32 336, %v14676_v3  ;;  %v4781_v18 = vadd.s32 472, %v14676_v3 }
 0x225   : > { %6572 = vmatpush.xpose.msk.msra.mxu2 %vm2427_vm4, %v14622_v34  ;;  %vm2381_vm4 = vcmp.eq.f32.partialorder %v1869_v37, %v8449_v53  ;;  %v1649_v38 = vrot.slane %v1648_v36, 1  ;;  %vm4862_vm8 = vcmp.eq.s32.totalorder %v14673_v1, %v9677_v40  ;;  %v4763_v20 = vadd.s32 328, %v14676_v3  ;;  %v14691_v36 = vld [vmem:[#allocation31_spill] sm:$0xff] }
 0x226   : > { %6588 = vmatpush.xpose.msk.msra.mxu3 %vm2428_vm12, %v14622_v34  ;;  %vm2382_vm12 = vcmp.eq.f32.partialorder %v1870_v63, %v8449_v53  ;;  %v4780_v37 = vadd.s32 464, %v14676_v3  ;;  %v4762_v25 = vadd.s32 320, %v14676_v3  ;;  %v4800_v33 = vadd.s32 624, %v14676_v3 }
 0x227   : > { %6544 = vmatpush.xpose.msk.msra.mxu1 %vm2387_vm6, %v14622_v34  ;;  %6560 = vmatpush.xpose.msk.msra.mxu0 %vm2388_vm7, %v14622_v34  ;;  %vm2419_vm6 = vcmp.eq.f32.partialorder %v1907_v5, %v8449_v53  ;;  %vm4866_vm7 = vcmp.eq.s32.totalorder %v14665_v8, %v9677_v40  ;;  %v1903_v62 = vperm.slane %v1649_v38, 0  ;;  %v1904_v42 = vperm.slane %v1649_v38, 1  ;;  %v14690_v5 = vld [vmem:[#allocation30_spill] sm:$0xff] }
 0x228   : > { %v4761_v38 = vadd.s32 312, %v14676_v3 }
 0x229   : > { %6573 = vmatpush.xpose.msk.msra.mxu2 %vm2425_vm0, %v14622_v34  ;;  %vm4882_vm0 = vcmp.eq.s32.totalorder %v14666_v13, %v9677_v40  ;;  %vm2415_vm13 = vcmp.eq.f32.partialorder %v1903_v62, %v8449_v53  ;;  %v14693_v13 = vld [vmem:[#allocation33_spill] sm:$0xff]  ;;  %v4777_v62 = vadd.s32 440, %v14676_v3 }
 0x22a   : > { %6589 = vmatpush.xpose.msk.msra.mxu3 %vm2426_vm14, %v14622_v34  ;;  %vm2420_vm14 = vcmp.eq.f32.partialorder %v1908_v57, %v8449_v53  ;;  %v4779_v57 = vadd.s32 456, %v14676_v3 }
 0x22b   : > { %6545 = vmatpush.xpose.msk.msra.mxu1 %vm2385_vm10, %v14622_v34  ;;  %6561 = vmatpush.xpose.msk.msra.mxu0 %vm2386_vm2, %v14622_v34  ;;  %vm4865_vm10 = vcmp.eq.s32.totalorder %v14667_v23, %v9677_v40  ;;  %vm4881_vm2 = vcmp.eq.s32.totalorder %v14668_v43, %v9677_v40  ;;  %v4778_v43 = vadd.s32 448, %v14676_v3 }
 0x22d   : > { %6574 = vmatpush.xpose.msk.msra.mxu2 %vm2423_vm15, %v14622_v34  ;;  %vm2417_vm15 = vcmp.eq.f32.partialorder %v1905_v7, %v8449_v53  ;;  %v14692_v7 = vld [vmem:[#allocation32_spill] sm:$0xff] }
 0x22e   : > { %6590 = vmatpush.xpose.msk.msra.mxu3 %vm2424_vm3, %v14622_v34  ;;  %vm4864_vm3 = vcmp.eq.s32.totalorder %v14669_v2, %v9677_v40 }
 0x22f   : > { %6546 = vmatpush.xpose.msk.msra.mxu1 %vm2383_vm9, %v14622_v34  ;;  %6562 = vmatpush.xpose.msk.msra.mxu0 %vm2384_vm1, %v14622_v34  ;;  %vm4880_vm9 = vcmp.eq.s32.totalorder %v14670_v4, %v9677_v40  ;;  %vm2418_vm1 = vcmp.eq.f32.partialorder %v1906_v17, %v8449_v53  ;;  %v14694_v17 = vld [vmem:[#allocation34_spill] sm:$0xff]  ;;  %v4759_v4 = vadd.s32 296, %v14676_v3 }
 0x231   : > { %6575 = vmatpush.xpose.msk.msra.mxu2 %vm2421_vm5, %v14622_v34  ;;  %v3054_v56 = vpop.f32.mrf.mxu1  ;;  %vm4863_vm5 = vcmp.eq.s32.totalorder %v14671_v55, %v9677_v40 }
 0x232   : > { %6591 = vmatpush.xpose.msk.msra.mxu3 %vm2422_vm11, %v14622_v34  ;;  %v3074_v32 = vpop.f32.mrf.mxu0  ;;  %vm4879_vm11 = vcmp.eq.s32.totalorder %v14672_v59, %v9677_v40  ;;  %v3301_v59 = vld [vmem:[#allocation2 + $0x30] sm:$0x7f] }
 0x233   : > { %6547 = vmatpush.xpose.msk.msra.mxu1 %vm2381_vm4, %v14622_v34  ;;  %6563 = vmatpush.xpose.msk.msra.mxu0 %vm2382_vm12, %v14622_v34  ;;  %v3075_v30 = vadd.f32 %v3074_v32, %v3054_v56  ;;  %vm4878_vm4 = vcmp.eq.s32.totalorder %v14674_v51, %v9677_v40  ;;  %vm2416_vm12 = vcmp.eq.f32.partialorder %v1904_v42, %v8449_v53  ;;  %v14695_v56 = vld [vmem:[#allocation35_spill] sm:$0xff]  ;;  %v4760_v32 = vadd.s32 304, %v14676_v3 }
 0x234   : > { %v4776_v42 = vadd.s32 432, %v14676_v3  ;;  %v3302_v51 = vld [vmem:[#allocation2] sm:$0x7f] }
 0x235   : > { %6576 = vmatpush.xpose.msk.msra.mxu2 %vm2419_vm6, %v14622_v34  ;;  %v3287_v15 = vadd.f32 %v3279_v48, %v3075_v30  ;;  %vm4861_vm6 = vcmp.eq.s32.totalorder %v14675_v28, %v9677_v40  ;;  %v4801_v48 = vadd.s32 632, %v14676_v3  ;;  %v14696_v30 = vld [vmem:[#allocation36_spill] sm:$0xff] }
 0x236   : > { %3213 = vmatmul.f32.vlgmr.msra.gmra.mxu1 %v9435_v35  ;;  %3233 = vmatmul.f32.vlgmr.msra.gmra.mxu0 %v9444_v54 }
 0x237   : > { %6592 = vmatpush.xpose.msk.msra.mxu3 %vm2420_vm14, %v14622_v34  ;;  %6868 = vmatpush.msk.msra.mxu1 %vm4866_vm7, %v14622_v34  ;;  %3295 = vst [vmem:[#allocation2 + $0x18] sm:$0x7f] %v3287_v15  ;;  %vm4877_vm7 = vcmp.eq.s32.totalorder %v14677_v47, %v9677_v40  ;;  %vm4860_vm14 = vcmp.eq.s32.totalorder %v14678_v14, %v9677_v40  ;;  %v4758_v15 = vadd.s32 288, %v14676_v3  ;;  %v4798_v47 = vadd.s32 608, %v14676_v3 }
 0x238   : > { %6884 = vmatpush.msk.msra.mxu0 %vm4882_vm0, %v14622_v34  ;;  %vm2413_vm0 = vcmp.eq.f32.partialorder %v1901_v44, %v8449_v53  ;;  %v4799_v44 = vadd.s32 616, %v14676_v3 }
 0x239   : > { %6869 = vmatpush.msk.msra.mxu1 %vm4865_vm10, %v14622_v34  ;;  %6577 = vmatpush.xpose.msk.msra.mxu2 %vm2417_vm15, %v14622_v34  ;;  %vm4876_vm10 = vcmp.eq.s32.totalorder %v14679_v58, %v9677_v40  ;;  %vm4859_vm15 = vcmp.eq.s32.totalorder %v14680_v41, %v9677_v40  ;;  %v4817_v58 = vadd.s32 760, %v14676_v3 }
 0x23a   : > { %6885 = vmatpush.msk.msra.mxu0 %vm4881_vm2, %v14622_v34  ;;  %vm2414_vm2 = vcmp.eq.f32.partialorder %v1902_v61, %v8449_v53  ;;  %v14682_v53 = vld [vmem:[#allocation22_spill] sm:$0xff]  ;;  %v4775_v61 = vadd.s32 424, %v14676_v3 }
 0x23b   : > { %6593 = vmatpush.xpose.msk.msra.mxu3 %vm2418_vm1, %v14622_v34  ;;  %6870 = vmatpush.msk.msra.mxu1 %vm4864_vm3, %v14622_v34  ;;  %vm4898_vm3 = vcmp.eq.s32.totalorder %v4769_v49, %v9677_v40  ;;  %vm4858_vm1 = vcmp.eq.s32.totalorder %v14682_v53, %v9677_v40  ;;  %v4757_v49 = vadd.s32 280, %v14676_v3 }
 0x23c   : > { %6886 = vmatpush.msk.msra.mxu0 %vm4880_vm9, %v14622_v34  ;;  %vm4875_vm9 = vcmp.eq.s32.totalorder %v14681_v31, %v9677_v40  ;;  %v4816_v31 = vadd.s32 752, %v14676_v3 }
 0x23d   : > { %6871 = vmatpush.msk.msra.mxu1 %vm4863_vm5, %v14622_v34  ;;  %6578 = vmatpush.xpose.msk.msra.mxu2 %vm2415_vm13, %v14622_v34  ;;  %vm4897_vm5 = vcmp.eq.s32.totalorder %v4768_v6, %v9677_v40  ;;  %vm4914_vm13 = vcmp.eq.s32.totalorder %v4785_v0, %v9677_v40  ;;  %v4774_v6 = vadd.s32 416, %v14676_v3  ;;  %v4756_v0 = vadd.s32 272, %v14676_v3 }
 0x23e   : > { %6887 = vmatpush.msk.msra.mxu0 %vm4879_vm11, %v14622_v34  ;;  %vm4874_vm11 = vcmp.eq.s32.totalorder %v14683_v19, %v9677_v40  ;;  %v4755_v19 = vadd.s32 264, %v14676_v3 }
 0x23f   : > { %6594 = vmatpush.xpose.msk.msra.mxu3 %vm2416_vm12, %v14622_v34  ;;  %6872 = vmatpush.msk.msra.mxu1 %vm4862_vm8, %v14622_v34  ;;  %vm4873_vm12 = vcmp.eq.s32.totalorder %v14685_v26, %v9677_v40  ;;  %v4814_v26 = vadd.s32 736, %v14676_v3 }
 0x240   : > { %6888 = vmatpush.msk.msra.mxu0 %vm4878_vm4, %v14622_v34  ;;  %vm4896_vm4 = vcmp.eq.s32.totalorder %v4767_v52, %v9677_v40  ;;  %v4797_v52 = vadd.s32 600, %v14676_v3 }
 0x241   : > { %6873 = vmatpush.msk.msra.mxu1 %vm4861_vm6, %v14622_v34  ;;  %6579 = vmatpush.xpose.msk.msra.mxu2 %vm2413_vm0, %v14622_v34  ;;  %vm4913_vm6 = vcmp.eq.s32.totalorder %v4784_v16, %v9677_v40  ;;  %vm4895_vm0 = vcmp.eq.s32.totalorder %v4766_v60, %v9677_v40  ;;  %v4773_v16 = vadd.s32 408, %v14676_v3  ;;  %v4815_v60 = vadd.s32 744, %v14676_v3 }
 0x242   : > { %6889 = vmatpush.msk.msra.mxu0 %vm4877_vm7, %v14622_v34 }
 0x243   : > { %6595 = vmatpush.xpose.msk.msra.mxu3 %vm2414_vm2, %v14622_v34  ;;  %6874 = vmatpush.msk.msra.mxu1 %vm4860_vm14, %v14622_v34  ;;  %vm4872_vm14 = vcmp.eq.s32.totalorder %v14687_v22, %v9677_v40  ;;  %vm4855_vm2 = vcmp.eq.s32.totalorder %v14688_v50, %v9677_v40  ;;  %v4770_v22 = vadd.s32 384, %v14676_v3 }
 0x244   : > { %6890 = vmatpush.msk.msra.mxu0 %vm4876_vm10, %v14622_v34  ;;  %3253 = vmatmul.f32.vlgmr.msra.gmra.mxu2 %v9435_v35  ;;  %v14684_v35 = vld [vmem:[#allocation24_spill] sm:$0xff]  ;;  %vm4912_vm10 = vcmp.eq.s32.totalorder %v4783_v10, %v9677_v40  ;;  %v4796_v10 = vadd.s32 592, %v14676_v3 }
 0x245   : > { %6875 = vmatpush.msk.msra.mxu1 %vm4859_vm15, %v14622_v34  ;;  %6900 = vmatpush.msk.msra.mxu2 %vm4898_vm3, %v14622_v34  ;;  %vm4857_vm8 = vcmp.eq.s32.totalorder %v14684_v35, %v9677_v40  ;;  %vm4894_vm15 = vcmp.eq.s32.totalorder %v4765_v46, %v9677_v40  ;;  %vm4871_vm3 = vcmp.eq.s32.totalorder %v14689_v12, %v9677_v40  ;;  %v4772_v46 = vadd.s32 400, %v14676_v3  ;;  %v3303_v12 = vld [vmem:[#allocation2 + $0x18] sm:$0x7f] }
 0x246   : > { %6891 = vmatpush.msk.msra.mxu0 %vm4875_vm9, %v14622_v34  ;;  %3273 = vmatmul.f32.vlgmr.msra.gmra.mxu3 %v9444_v54  ;;  %v14686_v54 = vld [vmem:[#allocation26_spill] sm:$0xff]  ;;  %vm4911_vm9 = vcmp.eq.s32.totalorder %v4782_v29, %v9677_v40  ;;  %v4754_v29 = vadd.s32 256, %v14676_v3 }
 0x247   : > { %6876 = vmatpush.msk.msra.mxu1 %vm4858_vm1, %v14622_v34  ;;  %6901 = vmatpush.msk.msra.mxu2 %vm4897_vm5, %v14622_v34  ;;  %v3094_v11 = vpop.f32.mrf.mxu2  ;;  %vm4856_vm7 = vcmp.eq.s32.totalorder %v14686_v54, %v9677_v40  ;;  %vm4854_vm1 = vcmp.eq.s32.totalorder %v14690_v5, %v9677_v40  ;;  %vm4893_vm5 = vcmp.eq.s32.totalorder %v4764_v39, %v9677_v40  ;;  %v4771_v39 = vadd.s32 392, %v14676_v3 }
 0x248   : > { %6892 = vmatpush.msk.msra.mxu0 %vm4874_vm11, %v14622_v34  ;;  %6916 = vmatpush.msk.msra.mxu3 %vm4914_vm13, %v14622_v34  ;;  %v3114_v27 = vpop.f32.mrf.mxu3  ;;  %vm4870_vm11 = vcmp.eq.s32.totalorder %v14691_v36, %v9677_v40  ;;  %vm4910_vm13 = vcmp.eq.s32.totalorder %v4781_v18, %v9677_v40  ;;  %v4793_v18 = vadd.s32 568, %v14676_v3 }
 0x249   : > { %6877 = vmatpush.msk.msra.mxu1 %vm4857_vm8, %v14622_v34  ;;  %6902 = vmatpush.msk.msra.mxu2 %vm4896_vm4, %v14622_v34  ;;  %v3115_v45 = vadd.f32 %v3114_v27, %v3094_v11  ;;  %vm4853_vm8 = vcmp.eq.s32.totalorder %v14692_v7, %v9677_v40  ;;  %vm4892_vm4 = vcmp.eq.s32.totalorder %v4763_v20, %v9677_v40  ;;  %v4795_v11 = vadd.s32 584, %v14676_v3 }
 0x24a   : > { %6893 = vmatpush.msk.msra.mxu0 %vm4873_vm12, %v14622_v34  ;;  %6917 = vmatpush.msk.msra.mxu3 %vm4913_vm6, %v14622_v34  ;;  %vm4869_vm12 = vcmp.eq.s32.totalorder %v14693_v13, %v9677_v40  ;;  %vm4909_vm6 = vcmp.eq.s32.totalorder %v4780_v37, %v9677_v40  ;;  %v4794_v27 = vadd.s32 576, %v14676_v3  ;;  %v4792_v20 = vadd.s32 560, %v14676_v3 }
 0x24b   : > { %6878 = vmatpush.msk.msra.mxu1 %vm4856_vm7, %v14622_v34  ;;  %6903 = vmatpush.msk.msra.mxu2 %vm4895_vm0, %v14622_v34  ;;  %v3288_v63 = vadd.f32 %v3280_v9, %v3115_v45  ;;  %vm4852_vm7 = vcmp.eq.s32.totalorder %v14694_v17, %v9677_v40  ;;  %vm4891_vm0 = vcmp.eq.s32.totalorder %v4762_v25, %v9677_v40  ;;  %v4813_v9 = vadd.s32 728, %v14676_v3 }
 0x24c   : > { %6894 = vmatpush.msk.msra.mxu0 %vm4872_vm14, %v14622_v34  ;;  %6918 = vmatpush.msk.msra.mxu3 %vm4912_vm10, %v14622_v34  ;;  %vm4868_vm14 = vcmp.eq.s32.totalorder %v14695_v56, %v9677_v40  ;;  %vm4908_vm10 = vcmp.eq.s32.totalorder %v4779_v57, %v9677_v40  ;;  %v4812_v45 = vadd.s32 720, %v14676_v3  ;;  %v4811_v37 = vadd.s32 712, %v14676_v3 }
 0x24d   : > { %6879 = vmatpush.msk.msra.mxu1 %vm4855_vm2, %v14622_v34  ;;  %6904 = vmatpush.msk.msra.mxu2 %vm4894_vm15, %v14622_v34  ;;  %3296 = vst [vmem:[#allocation2 + $0x10] sm:$0x7f] %v3288_v63  ;;  %vm4851_vm2 = vcmp.eq.s32.totalorder %v14676_v3, %v9677_v40  ;;  %vm4890_vm15 = vcmp.eq.s32.totalorder %v4761_v38, %v9677_v40  ;;  %v4791_v63 = vadd.s32 552, %v14676_v3  ;;  %v4810_v25 = vadd.s32 704, %v14676_v3 }
 0x24e   : > { %6895 = vmatpush.msk.msra.mxu0 %vm4871_vm3, %v14622_v34  ;;  %6919 = vmatpush.msk.msra.mxu3 %vm4911_vm9, %v14622_v34  ;;  %vm4867_vm3 = vcmp.eq.s32.totalorder %v14696_v30, %v9677_v40  ;;  %vm4907_vm9 = vcmp.eq.s32.totalorder %v4778_v43, %v9677_v40  ;;  %v4790_v57 = vadd.s32 544, %v14676_v3  ;;  %v4809_v38 = vadd.s32 696, %v14676_v3 }
 0x24f   : > { %6880 = vmatpush.msk.msra.mxu1 %vm4854_vm1, %v14622_v34  ;;  %6905 = vmatpush.msk.msra.mxu2 %vm4893_vm5, %v14622_v34  ;;  %vm4889_vm1 = vcmp.eq.s32.totalorder %v4760_v32, %v9677_v40  ;;  %vm4930_vm5 = vcmp.eq.s32.totalorder %v4801_v48, %v9677_v40  ;;  %v4789_v13 = vadd.s32 536, %v14676_v3  ;;  %v4788_v43 = vadd.s32 528, %v14676_v3 }
 0x250   : > { %6896 = vmatpush.msk.msra.mxu0 %vm4870_vm11, %v14622_v34  ;;  %6920 = vmatpush.msk.msra.mxu3 %vm4910_vm13, %v14622_v34  ;;  %vm4906_vm11 = vcmp.eq.s32.totalorder %v4777_v62, %v9677_v40  ;;  %vm4888_vm13 = vcmp.eq.s32.totalorder %v4759_v4, %v9677_v40  ;;  %v4787_v56 = vadd.s32 520, %v14676_v3  ;;  %v4808_v32 = vadd.s32 688, %v14676_v3 }
 0x251   : > { %6881 = vmatpush.msk.msra.mxu1 %vm4853_vm8, %v14622_v34  ;;  %6906 = vmatpush.msk.msra.mxu2 %vm4892_vm4, %v14622_v34  ;;  %vm4929_vm8 = vcmp.eq.s32.totalorder %v4800_v33, %v9677_v40  ;;  %vm4905_vm4 = vcmp.eq.s32.totalorder %v4776_v42, %v9677_v40  ;;  %v4807_v48 = vadd.s32 680, %v14676_v3  ;;  %v4806_v62 = vadd.s32 672, %v14676_v3 }
 0x252   : > { %6897 = vmatpush.msk.msra.mxu0 %vm4869_vm12, %v14622_v34  ;;  %6921 = vmatpush.msk.msra.mxu3 %vm4909_vm6, %v14622_v34  ;;  %vm4887_vm12 = vcmp.eq.s32.totalorder %v4758_v15, %v9677_v40  ;;  %vm4928_vm6 = vcmp.eq.s32.totalorder %v4799_v44, %v9677_v40  ;;  %v4786_v30 = vadd.s32 512, %v14676_v3  ;;  %v4805_v4 = vadd.s32 664, %v14676_v3 }
 0x253   : > { %6882 = vmatpush.msk.msra.mxu1 %vm4852_vm7, %v14622_v34  ;;  %6907 = vmatpush.msk.msra.mxu2 %vm4891_vm0, %v14622_v34  ;;  %vm4904_vm7 = vcmp.eq.s32.totalorder %v4775_v61, %v9677_v40  ;;  %vm4886_vm0 = vcmp.eq.s32.totalorder %v4757_v49, %v9677_v40  ;;  %v4804_v42 = vadd.s32 656, %v14676_v3  ;;  %v4833_v61 = vadd.s32 888, %v14676_v3 }
 0x254   : > { %6898 = vmatpush.msk.msra.mxu0 %vm4868_vm14, %v14622_v34  ;;  %6922 = vmatpush.msk.msra.mxu3 %vm4908_vm10, %v14622_v34  ;;  %vm4927_vm14 = vcmp.eq.s32.totalorder %v4798_v47, %v9677_v40  ;;  %vm4946_vm10 = vcmp.eq.s32.totalorder %v4817_v58, %v9677_v40  ;;  %v3304_v36 = vld [vmem:[#allocation2 + $0x10] sm:$0x7f]  ;;  %v4832_v49 = vadd.s32 880, %v14676_v3  ;;  %v4831_v47 = vadd.s32 872, %v14676_v3 }
 0x255   : > { %6883 = vmatpush.msk.msra.mxu1 %vm4851_vm2, %v14622_v34  ;;  %6908 = vmatpush.msk.msra.mxu2 %vm4890_vm15, %v14622_v34  ;;  %vm4903_vm2 = vcmp.eq.s32.totalorder %v4774_v6, %v9677_v40  ;;  %vm4945_vm15 = vcmp.eq.s32.totalorder %v4816_v31, %v9677_v40  ;;  %v4802_v58 = vadd.s32 640, %v14676_v3  ;;  %v3471_v31 = vadd.s32 1, %v14669_v2 }
 0x256   : > { %6899 = vmatpush.msk.msra.mxu0 %vm4867_vm3, %v14622_v34  ;;  %5251 = vmatmul.f32.vlgmr.msra.gmra.mxu1 %v3301_v59  ;;  %vm4885_vm3 = vcmp.eq.s32.totalorder %v4756_v0, %v9677_v40  ;;  %v3281_v59 = vld [vmem:[#allocation2 + $0x8] sm:$0x7f]  ;;  %v3473_v0 = vadd.s32 1, %v14665_v8 }
 0x257   : > { %5271 = vmatmul.f32.vlgmr.msra.gmra.mxu0 %v3302_v51  ;;  %6923 = vmatpush.msk.msra.mxu3 %vm4907_vm9, %v14622_v34  ;;  %vm4926_vm9 = vcmp.eq.s32.totalorder %v4797_v52, %v9677_v40  ;;  %v4803_v51 = vadd.s32 648, %v14676_v3  ;;  %v4830_v52 = vadd.s32 864, %v14676_v3 }
 0x258   : > { %6909 = vmatpush.msk.msra.mxu2 %vm4889_vm1, %v14622_v34  ;;  %6932 = vmatpush.msk.msra.mxu1 %vm4930_vm5, %v14622_v34  ;;  %vm4902_vm1 = vcmp.eq.s32.totalorder %v4773_v16, %v9677_v40  ;;  %vm4944_vm5 = vcmp.eq.s32.totalorder %v4815_v60, %v9677_v40  ;;  %v4829_v16 = vadd.s32 856, %v14676_v3  ;;  %v3472_v60 = vadd.s32 1, %v14667_v23 }
 0x259   : > { %6924 = vmatpush.msk.msra.mxu3 %vm4906_vm11, %v14622_v34  ;;  %6948 = vmatpush.msk.msra.mxu0 %vm4946_vm10, %v14622_v34  ;;  %vm4884_vm11 = vcmp.eq.s32.totalorder %v4755_v19, %v9677_v40  ;;  %vm4899_vm10 = vcmp.eq.s32.totalorder %v4770_v22, %v9677_v40  ;;  %v10063_v19 = vmul.u32 8, %v14665_v8  ;;  %v3469_v22 = vadd.s32 1, %v14673_v1 }
 0x25a   : > { %6910 = vmatpush.msk.msra.mxu2 %vm4888_vm13, %v14622_v34  ;;  %6933 = vmatpush.msk.msra.mxu1 %vm4929_vm8, %v14622_v34  ;;  %vm4925_vm13 = vcmp.eq.s32.totalorder %v4796_v10, %v9677_v40  ;;  %vm4901_vm8 = vcmp.eq.s32.totalorder %v4772_v46, %v9677_v40  ;;  %v10065_v10 = vmul.u32 8, %v3473_v0  ;;  %v3470_v46 = vadd.s32 1, %v14671_v55 }
 0x25b   : > { %6925 = vmatpush.msk.msra.mxu3 %vm4905_vm4, %v14622_v34  ;;  %6949 = vmatpush.msk.msra.mxu0 %vm4945_vm15, %v14622_v34  ;;  %vm4943_vm4 = vcmp.eq.s32.totalorder %v4814_v26, %v9677_v40  ;;  %vm4941_vm15 = vcmp.eq.s32.totalorder %v4812_v45, %v9677_v40  ;;  %v4828_v26 = vadd.s32 848, %v14676_v3  ;;  %v14727_v0 = vmov 0 }
 0x25c   : > { %6911 = vmatpush.msk.msra.mxu2 %vm4887_vm12, %v14622_v34  ;;  %6934 = vmatpush.msk.msra.mxu1 %vm4928_vm6, %v14622_v34  ;;  %vm4883_vm12 = vcmp.eq.s32.totalorder %v4754_v29, %v9677_v40  ;;  %vm4924_vm6 = vcmp.eq.s32.totalorder %v4795_v11, %v9677_v40  ;;  %v10072_v29 = vmul.u32 8, %v14667_v23  ;;  %v10080_v11 = vmul.u32 8, %v14669_v2 }
 0x25d   : > { %6926 = vmatpush.msk.msra.mxu3 %vm4904_vm7, %v14622_v34  ;;  %6950 = vmatpush.msk.msra.mxu0 %vm4944_vm5, %v14622_v34  ;;  %vm4900_vm7 = vcmp.eq.s32.totalorder %v4771_v39, %v9677_v40  ;;  %vm4939_vm5 = vcmp.eq.s32.totalorder %v4810_v25, %v9677_v40  ;;  %v10082_v39 = vmul.u32 8, %v3471_v31  ;;  %v10096_v45 = vmul.u32 8, %v3470_v46 }
 0x25e   : > { %6912 = vmatpush.msk.msra.mxu2 %vm4886_vm0, %v14622_v34  ;;  %6935 = vmatpush.msk.msra.mxu1 %vm4927_vm14, %v14622_v34  ;;  %vm4923_vm0 = vcmp.eq.s32.totalorder %v4794_v27, %v9677_v40  ;;  %vm4942_vm14 = vcmp.eq.s32.totalorder %v4813_v9, %v9677_v40  ;;  %14697 = vst [vmem:[#allocation6_spill] sm:$0xff] %v10080_v11  ;;  %v4827_v27 = vadd.s32 840, %v14676_v3  ;;  %v10087_v9 = vmul.u32 8, %v3472_v60 }
 0x25f   : > { %6927 = vmatpush.msk.msra.mxu3 %vm4903_vm2, %v14622_v34  ;;  %6951 = vmatpush.msk.msra.mxu0 %vm4943_vm4, %v14622_v34  ;;  %vm4922_vm2 = vcmp.eq.s32.totalorder %v4793_v18, %v9677_v40  ;;  %vm4917_vm4 = vcmp.eq.s32.totalorder %v4788_v43, %v9677_v40  ;;  %14698 = vst [vmem:[#allocation9_spill] sm:$0xff] %v10082_v39  ;;  %v10094_v18 = vmul.u32 8, %v14671_v55  ;;  %v3467_v25 = vadd.s32 1, %v14678_v14 }
 0x260   : > { %6913 = vmatpush.msk.msra.mxu2 %vm4885_vm3, %v14622_v34  ;;  %6936 = vmatpush.msk.msra.mxu1 %vm4926_vm9, %v14622_v34  ;;  %vm4921_vm3 = vcmp.eq.s32.totalorder %v4792_v20, %v9677_v40  ;;  %vm4940_vm9 = vcmp.eq.s32.totalorder %v4811_v37, %v9677_v40  ;;  %14699 = vst [vmem:[#allocation11_spill] sm:$0xff] %v10087_v9  ;;  %v3468_v37 = vadd.s32 1, %v14675_v28  ;;  %v10146_v43 = vmul.u32 8, %v14675_v28 }
 0x261   : > { %6928 = vmatpush.msk.msra.mxu3 %vm4902_vm1, %v14622_v34  ;;  %6952 = vmatpush.msk.msra.mxu0 %vm4942_vm14, %v14622_v34  ;;  %vm4920_vm1 = vcmp.eq.s32.totalorder %v4791_v63, %v9677_v40  ;;  %vm4915_vm14 = vcmp.eq.s32.totalorder %v4786_v30, %v9677_v40  ;;  %14700 = vst [vmem:[#allocation13_spill] sm:$0xff] %v10094_v18  ;;  %v14702_v63 = vmov 0  ;;  %v10165_v30 = vmul.u32 8, %v3467_v25 }
 0x262   : > { %6914 = vmatpush.msk.msra.mxu2 %vm4884_vm11, %v14622_v34  ;;  %6937 = vmatpush.msk.msra.mxu1 %vm4925_vm13, %v14622_v34  ;;  %vm4919_vm11 = vcmp.eq.s32.totalorder %v4790_v57, %v9677_v40  ;;  %vm4938_vm13 = vcmp.eq.s32.totalorder %v4809_v38, %v9677_v40  ;;  %14701 = vst [vmem:[#allocation15_spill] sm:$0xff] %v10096_v45  ;;  %v10125_v57 = vmul.u32 8, %v14673_v1  ;;  %v10127_v38 = vmul.u32 8, %v3469_v22  ;;  %v14742_v22 = vld [vmem:[#allocation7_spill] sm:$0xff] }
 0x263   : > { %6929 = vmatpush.msk.msra.mxu3 %vm4901_vm8, %v14622_v34  ;;  %6953 = vmatpush.msk.msra.mxu0 %vm4941_vm15, %v14622_v34  ;;  %vm4918_vm8 = vcmp.eq.s32.totalorder %v4789_v13, %v9677_v40  ;;  %vm4962_vm15 = vcmp.eq.s32.totalorder %v4833_v61, %v9677_v40  ;;  %v14707_v13 = vmov 0  ;;  %14710 = vst [vmem:[#allocation25_spill] sm:$0xff] %v10146_v43  ;;  %v14722_v61 = vmov 0 }
 0x264   : > { %6915 = vmatpush.msk.msra.mxu2 %vm4883_vm12, %v14622_v34  ;;  %6938 = vmatpush.msk.msra.mxu1 %vm4924_vm6, %v14622_v34  ;;  %vm4937_vm12 = vcmp.eq.s32.totalorder %v4808_v32, %v9677_v40  ;;  %vm4936_vm6 = vcmp.eq.s32.totalorder %v4807_v48, %v9677_v40  ;;  %14705 = vst [vmem:[#allocation19_spill] sm:$0xff] %v10125_v57  ;;  %v3466_v32 = vadd.s32 1, %v14680_v41  ;;  %v14712_v48 = vmov 0 }
 0x265   : > { %6930 = vmatpush.msk.msra.mxu3 %vm4900_vm7, %v14622_v34  ;;  %5291 = vmatmul.f32.vlgmr.msra.gmra.mxu2 %v3303_v12  ;;  %vm4916_vm7 = vcmp.eq.s32.totalorder %v4787_v56, %v9677_v40  ;;  %v4826_v12 = vadd.s32 832, %v14676_v3  ;;  %14706 = vst [vmem:[#allocation21_spill] sm:$0xff] %v10127_v38  ;;  %v10148_v56 = vmul.u32 8, %v3468_v37  ;;  %v10232_v31 = vmul.u32 8, %v14684_v35 }
 0x266   : > { %6939 = vmatpush.msk.msra.mxu1 %vm4923_vm0, %v14622_v34  ;;  %6954 = vmatpush.msk.msra.mxu0 %vm4940_vm9, %v14622_v34  ;;  %vm4935_vm0 = vcmp.eq.s32.totalorder %v4806_v62, %v9677_v40  ;;  %vm4932_vm9 = vcmp.eq.s32.totalorder %v4803_v51, %v9677_v40  ;;  %v10163_v62 = vmul.u32 8, %v14678_v14  ;;  %14716 = vst [vmem:[#allocation33_spill] sm:$0xff] %v10165_v30  ;;  %v3282_v51 = vld [vmem:[#allocation2 + $0x20] sm:$0x7f]  ;;  %v14735_v46 = vmov 0 }
 0x267   : > { %6931 = vmatpush.msk.msra.mxu3 %vm4899_vm10, %v14622_v34  ;;  %vm4934_vm10 = vcmp.eq.s32.totalorder %v4805_v4, %v9677_v40  ;;  %6964 = vmatpush.msk.msra.mxu2 %vm4962_vm15, %v14622_v34  ;;  %14711 = vst [vmem:[#allocation27_spill] sm:$0xff] %v10148_v56  ;;  %v3465_v4 = vadd.s32 1, %v14682_v53  ;;  %v10511_v14 = vmul.u32 8, %v14690_v5  ;;  %v14887_v55 = vmov 0 }
 0x268   : > { %5311 = vmatmul.f32.vlgmr.msra.gmra.mxu3 %v3304_v36  ;;  %6940 = vmatpush.msk.msra.mxu1 %vm4922_vm2, %v14622_v34  ;;  %vm4933_vm2 = vcmp.eq.s32.totalorder %v4804_v42, %v9677_v40  ;;  %v4825_v36 = vadd.s32 824, %v14676_v3  ;;  %14715 = vst [vmem:[#allocation31_spill] sm:$0xff] %v10163_v62 }
 0x269   : > { %6955 = vmatpush.msk.msra.mxu0 %vm4939_vm5, %v14622_v34  ;;  %vm4931_vm5 = vcmp.eq.s32.totalorder %v4802_v58, %v9677_v40  ;;  %v3464_v58 = vadd.s32 1, %v14684_v35  ;;  %14730 = vst [vmem:[#allocation43_spill] sm:$0xff] %v10232_v31  ;;  %v4845_v35 = vadd.s32 984, %v14676_v3 }
 0x26a   : > { %6941 = vmatpush.msk.msra.mxu1 %vm4921_vm3, %v14622_v34  ;;  %vm4961_vm3 = vcmp.eq.s32.totalorder %v4832_v49, %v9677_v40 }
 0x26b   : > { %6956 = vmatpush.msk.msra.mxu0 %vm4938_vm13, %v14622_v34  ;;  %6965 = vmatpush.msk.msra.mxu2 %vm4961_vm3, %v14622_v34  ;;  %vm3451_vm13 = vcmp.ge.s32.totalorder %v14663_v21, %v10063_v19  ;;  %vm3427_vm3 = vcmp.ge.s32.totalorder %v14663_v21, %v10094_v18  ;;  %v10245_v60 = vmul.u32 8, %v3464_v58  ;;  %v4848_v58 = vadd.s32 1008, %v14676_v3 }
 0x26c   : > { %6942 = vmatpush.msk.msra.mxu1 %vm4920_vm1, %v14622_v34  ;;  %vm4960_vm1 = vcmp.eq.s32.totalorder %v4831_v47, %v9677_v40  ;;  %v10212_v47 = vmul.u32 8, %v14682_v53  ;;  %v10394_v53 = vmul.u32 8, %v14688_v50 }
 0x26d   : > { %6957 = vmatpush.msk.msra.mxu0 %vm4937_vm12, %v14622_v34  ;;  %6966 = vmatpush.msk.msra.mxu2 %vm4960_vm1, %v14622_v34  ;;  %vm3443_vm12 = vcmp.ge.s32.totalorder %v14663_v21, %v10072_v29  ;;  %vm4955_vm1 = vcmp.eq.s32.totalorder %v4826_v12, %v9677_v40  ;;  %14734 = vst [vmem:[#allocation45_spill] sm:$0xff] %v10245_v60  ;;  %v3463_v12 = vadd.s32 1, %v14686_v54 }
 0x26e   : > { %6943 = vmatpush.msk.msra.mxu1 %vm4919_vm11, %v14622_v34  ;;  %vm4959_vm11 = vcmp.eq.s32.totalorder %v4830_v52, %v9677_v40  ;;  %14725 = vst [vmem:[#allocation40_spill] sm:$0xff] %v10212_v47 }
 0x26f   : > { %6958 = vmatpush.msk.msra.mxu0 %vm4936_vm6, %v14622_v34  ;;  %6967 = vmatpush.msk.msra.mxu2 %vm4959_vm11, %v14622_v34  ;;  %vm4957_vm6 = vcmp.eq.s32.totalorder %v4828_v26, %v9677_v40  ;;  %vm4954_vm11 = vcmp.eq.s32.totalorder %v4825_v36, %v9677_v40  ;;  %v14738_v26 = vmov 0  ;;  %v10286_v25 = vmul.u32 8, %v3463_v12 }
 0x270   : > { %6944 = vmatpush.msk.msra.mxu1 %vm4918_vm8, %v14622_v34  ;;  %vm3610_vm8 = vcmp.lt.s32.totalorder %v14663_v21, %v10065_v10  ;;  %v14747_v36 = vmov 0  ;;  %v14756_v12 = vmov 0 }
 0x271   : > { %6959 = vmatpush.msk.msra.mxu0 %vm4935_vm0, %v14622_v34  ;;  %vm10110_vm0 = vmand %vm3451_vm13, %vm3610_vm8  ;;  %vm3419_vm13 = vcmp.ge.s32.totalorder %v14663_v21, %v10125_v57  ;;  %vm3578_vm8 = vcmp.lt.s32.totalorder %v14663_v21, %v10127_v38  ;;  %14746 = vst [vmem:[#allocation50_spill] sm:$0xff] %v10286_v25 }
 0x272   : > { %v3134_v33 = vpop.f32.mrf.mxu1  ;;  %6945 = vmatpush.msk.msra.mxu1 %vm4917_vm4, %v14622_v34  ;;  %vm4958_vm4 = vcmp.eq.s32.totalorder %v4829_v16, %v9677_v40  ;;  %v14703_v63 = vsel %vm10110_vm0, 4294967295, %v14702_v63  ;;  %v14731_v16 = vmov 0 }
 0x273   : > { %v3154_v15 = vpop.f32.mrf.mxu0  ;;  %6960 = vmatpush.msk.msra.mxu0 %vm4934_vm10, %v14622_v34  ;;  %6968 = vmatpush.msk.msra.mxu2 %vm4958_vm4, %v14622_v34  ;;  %14704 = vst [vmem:[#allocation17_spill] sm:$0xff] %v14703_v63  ;;  %vm3594_vm10 = vcmp.lt.s32.totalorder %v14663_v21, %v10082_v39 }
 0x274   : > { %v3155_v44 = vadd.f32 %v3154_v15, %v3134_v33  ;;  %6946 = vmatpush.msk.msra.mxu1 %vm4916_vm7, %v14622_v34  ;;  %vm3602_vm7 = vcmp.lt.s32.totalorder %v14663_v21, %v10087_v9  ;;  %v14717_v33 = vmov 0  ;;  %v10195_v15 = vmul.u32 8, %v14680_v41 }
 0x275   : > { %6961 = vmatpush.msk.msra.mxu0 %vm4933_vm2, %v14622_v34  ;;  %vm4956_vm2 = vcmp.eq.s32.totalorder %v4827_v27, %v9677_v40  ;;  %6969 = vmatpush.msk.msra.mxu2 %vm4957_vm6, %v14622_v34  ;;  %vm10133_vm15 = vmand %vm3443_vm12, %vm3602_vm7  ;;  %vm3411_vm12 = vcmp.ge.s32.totalorder %v14663_v21, %v10146_v43  ;;  %vm3570_vm6 = vcmp.lt.s32.totalorder %v14663_v21, %v10148_v56  ;;  %v10266_v27 = vmul.u32 8, %v14686_v54 }
 0x276   : > { %v3289_v6 = vadd.f32 %v3281_v59, %v3155_v44  ;;  %6947 = vmatpush.msk.msra.mxu1 %vm4915_vm14, %v14622_v34  ;;  %vm3435_vm14 = vcmp.ge.s32.totalorder %v14663_v21, %v10080_v11  ;;  %v14708_v13 = vsel %vm10133_vm15, 4294967295, %v14707_v13  ;;  %14720 = vst [vmem:[#allocation36_spill] sm:$0xff] %v10195_v15  ;;  %v10197_v59 = vmul.u32 8, %v3466_v32  ;;  %vm10200_vm7 = vmand %vm3419_vm13, %vm3578_vm8 }
 0x277   : > { %6962 = vmatpush.msk.msra.mxu0 %vm4932_vm9, %v14622_v34  ;;  %14709 = vst [vmem:[#allocation23_spill] sm:$0xff] %v14708_v13  ;;  %vm3586_vm9 = vcmp.lt.s32.totalorder %v14663_v21, %v10096_v45  ;;  %6970 = vmatpush.msk.msra.mxu2 %vm4956_vm2, %v14622_v34  ;;  %v14723_v61 = vsel %vm10200_vm7, 4294967295, %v14722_v61  ;;  %vm10220_vm2 = vmand %vm3411_vm12, %vm3570_vm6  ;;  %vm3379_vm12 = vcmp.ge.s32.totalorder %v14663_v21, %v10232_v31  ;;  %v14750_v32 = vmov 0 }
 0x278   : > { %3297 = vst [vmem:[#allocation2 + $0x8] sm:$0x7f] %v3289_v6  ;;  %vm10183_vm4 = vmand %vm3427_vm3, %vm3586_vm9  ;;  %v10214_v6 = vmul.u32 8, %v3465_v4  ;;  %v14728_v0 = vsel %vm10220_vm2, 4294967295, %v14727_v0  ;;  %vm3395_vm3 = vcmp.ge.s32.totalorder %v14663_v21, %v10195_v15  ;;  %vm3554_vm9 = vcmp.lt.s32.totalorder %v14663_v21, %v10197_v59 }
 0x279   : > { %6963 = vmatpush.msk.msra.mxu0 %vm4931_vm5, %v14622_v34  ;;  %vm10158_vm5 = vmand %vm3435_vm14, %vm3594_vm10  ;;  %6971 = vmatpush.msk.msra.mxu2 %vm4955_vm1, %v14622_v34  ;;  %v14718_v33 = vsel %vm10183_vm4, 4294967295, %v14717_v33  ;;  %14721 = vst [vmem:[#allocation38_spill] sm:$0xff] %v10197_v59  ;;  %vm3403_vm14 = vcmp.ge.s32.totalorder %v14663_v21, %v10163_v62  ;;  %vm3562_vm10 = vcmp.lt.s32.totalorder %v14663_v21, %v10165_v30  ;;  %v14753_v4 = vmov 0 }
 0x27a   : > { %v14713_v48 = vsel %vm10158_vm5, 4294967295, %v14712_v48  ;;  %14719 = vst [vmem:[#allocation35_spill] sm:$0xff] %v14718_v33  ;;  %vm10234_vm1 = vmand %vm3403_vm14, %vm3562_vm10  ;;  %vm3546_vm13 = vcmp.lt.s32.totalorder %v14663_v21, %v10214_v6  ;;  %vm3538_vm6 = vcmp.lt.s32.totalorder %v14663_v21, %v10245_v60  ;;  %vm3452_vm10 = vcmp.ge.s32.totalorder %v14742_v22, %v10063_v19 }
 0x27b   : > { %14714 = vst [vmem:[#allocation29_spill] sm:$0xff] %v14713_v48  ;;  %6972 = vmatpush.msk.msra.mxu2 %vm4954_vm11, %v14622_v34  ;;  %v14732_v16 = vsel %vm10234_vm1, 4294967295, %v14731_v16  ;;  %vm3387_vm11 = vcmp.ge.s32.totalorder %v14663_v21, %v10212_v47  ;;  %vm10247_vm8 = vmand %vm3395_vm3, %vm3554_vm9  ;;  %vm3611_vm3 = vcmp.lt.s32.totalorder %v14742_v22, %v10065_v10  ;;  %v4820_v54 = vadd.s32 784, %v14676_v3 }
 0x27c   : > { %14724 = vst [vmem:[#allocation39_spill] sm:$0xff] %v14723_v61  ;;  %v14736_v46 = vsel %vm10247_vm8, 4294967295, %v14735_v46  ;;  %vm10258_vm14 = vmand %vm3387_vm11, %vm3546_vm13  ;;  %vm3444_vm11 = vcmp.ge.s32.totalorder %v14742_v22, %v10072_v29  ;;  %vm3603_vm13 = vcmp.lt.s32.totalorder %v14742_v22, %v10087_v9  ;;  %v4844_v41 = vadd.s32 976, %v14676_v3 }
 0x27d   : > { %14726 = vst [vmem:[#allocation41_spill] sm:$0xff] %v10214_v6  ;;  %v14739_v26 = vsel %vm10258_vm14, 4294967295, %v14738_v26  ;;  %vm10272_vm9 = vmand %vm3379_vm12, %vm3538_vm6 }
 0x27e   : > { %14729 = vst [vmem:[#allocation42_spill] sm:$0xff] %v14728_v0  ;;  %vm10288_vm12 = vmand %vm3452_vm10, %vm3611_vm3  ;;  %vm3530_vm10 = vcmp.lt.s32.totalorder %v14663_v21, %v10286_v25  ;;  %v4835_v0 = vadd.s32 904, %v14676_v3 }
 0x27f   : > { %v3305_v20 = vld [vmem:[#allocation2 + $0x8] sm:$0x7f]  ;;  %14733 = vst [vmem:[#allocation44_spill] sm:$0xff] %v14732_v16  ;;  %v14748_v36 = vsel %vm10288_vm12, 4294967295, %v14747_v36  ;;  %vm10295_vm6 = vmand %vm3444_vm11, %vm3603_vm13  ;;  %vm14760_vm11 = vcmp.ge.s32.totalorder %v14742_v22, %v10094_v18 }
 0x280   : > { %5331 = vmatmul.f32.vlgmr.msra.gmra.mxu1 %v3305_v20  ;;  %14737 = vst [vmem:[#allocation46_spill] sm:$0xff] %v14736_v46  ;;  %v14743_v20 = vmov 0  ;;  %v14751_v32 = vsel %vm10295_vm6, 4294967295, %v14750_v32  ;;  %v3461_v46 = vadd.s32 1, %v14690_v5  ;;  %v14810_v5 = vmov 0 }
 0x281   : > { %6996 = vmatpush.msk.msra.mxu1 %vm10110_vm0, %v14622_v34  ;;  %14740 = vst [vmem:[#allocation47_spill] sm:$0xff] %v14739_v26  ;;  %v14744_v20 = vsel %vm10272_vm9, 4294967295, %v14743_v20  ;;  %v14781_v26 = vmov 0  ;;  %v3283_v16 = vld [vmem:[#allocation2 + $0x28] sm:$0x7f] }
 0x282   : > { %14741 = vst [vmem:[#allocation48_spill] sm:$0xff] %v10266_v27 }
 0x283   : > { %6997 = vmatpush.msk.msra.mxu1 %vm10133_vm15, %v14622_v34  ;;  %14745 = vst [vmem:[#allocation49_spill] sm:$0xff] %v14744_v20  ;;  %v4843_v20 = vadd.s32 968, %v14676_v3 }
 0x284   : > { %14749 = vst [vmem:[#allocation51_spill] sm:$0xff] %v14748_v36 }
 0x285   : > { %6998 = vmatpush.msk.msra.mxu1 %vm10158_vm5, %v14622_v34  ;;  %14752 = vst [vmem:[#allocation52_spill] sm:$0xff] %v14751_v32 }
 0x287   : > { %v3174_v42 = vpop.f32.mrf.mxu2  ;;  %6999 = vmatpush.msk.msra.mxu1 %vm10183_vm4, %v14622_v34 }
 0x288   : > { %v3194_v44 = vpop.f32.mrf.mxu3 }
 0x289   : > { %v3195_v49 = vadd.f32 %v3194_v44, %v3174_v42  ;;  %7000 = vmatpush.msk.msra.mxu1 %vm10200_vm7, %v14622_v34  ;;  %v4824_v42 = vadd.s32 816, %v14676_v3  ;;  %v4823_v44 = vadd.s32 808, %v14676_v3  ;;  %vm14772_vm7 = vcmp.ge.s32.totalorder %v14742_v22, %v10146_v43 }
 0x28b   : > { %v3290_v52 = vadd.f32 %v3282_v51, %v3195_v49  ;;  %7001 = vmatpush.msk.msra.mxu1 %vm10220_vm2, %v14622_v34  ;;  %v4822_v51 = vadd.s32 800, %v14676_v3  ;;  %v4849_v49 = vadd.s32 1016, %v14676_v3  ;;  %vm4953_vm3 = vcmp.eq.s32.totalorder %v4824_v42, %v9677_v40 }
 0x28c   : > { %6973 = vmatpush.msk.msra.mxu2 %vm4953_vm3, %v14622_v34  ;;  %v14761_v42 = vmov 0  ;;  %vm14771_vm2 = vcmp.lt.s32.totalorder %v14742_v22, %v10148_v56 }
 0x28d   : > { %3298 = vst [vmem:[#allocation2 + $0x20] sm:$0x7f] %v3290_v52  ;;  %7002 = vmatpush.msk.msra.mxu1 %vm10234_vm1, %v14622_v34  ;;  %v4847_v52 = vadd.s32 1000, %v14676_v3  ;;  %vm4951_vm3 = vcmp.eq.s32.totalorder %v4822_v51, %v9677_v40  ;;  %vm14766_vm1 = vcmp.ge.s32.totalorder %v14742_v22, %v10125_v57  ;;  %v14767_v51 = vmov 0 }
 0x28f   : > { %7003 = vmatpush.msk.msra.mxu1 %vm10247_vm8, %v14622_v34  ;;  %vm3595_vm8 = vcmp.lt.s32.totalorder %v14742_v22, %v10082_v39 }
 0x291   : > { %7004 = vmatpush.msk.msra.mxu1 %vm10258_vm14, %v14622_v34  ;;  %vm3371_vm14 = vcmp.ge.s32.totalorder %v14663_v21, %v10266_v27 }
 0x292   : > { %vm10311_vm13 = vmand %vm3371_vm14, %vm3530_vm10 }
 0x293   : > { %7005 = vmatpush.msk.msra.mxu1 %vm10272_vm9, %v14622_v34  ;;  %vm3436_vm9 = vcmp.ge.s32.totalorder %v14742_v22, %v10080_v11  ;;  %v14754_v4 = vsel %vm10311_vm13, 4294967295, %v14753_v4 }
 0x294   : > { %v3306_v37 = vld [vmem:[#allocation2 + $0x20] sm:$0x7f]  ;;  %14755 = vst [vmem:[#allocation53_spill] sm:$0xff] %v14754_v4  ;;  %vm10330_vm14 = vmand %vm3436_vm9, %vm3595_vm8  ;;  %vm4977_vm8 = vcmp.eq.s32.totalorder %v4848_v58, %v9677_v40  ;;  %vm14759_vm9 = vcmp.lt.s32.totalorder %v14742_v22, %v10096_v45  ;;  %v4846_v58 = vadd.s32 992, %v14676_v3  ;;  %v14773_v4 = vmov 0 }
 0x295   : > { %5351 = vmatmul.f32.vlgmr.msra.gmra.mxu0 %v3306_v37  ;;  %7006 = vmatpush.msk.msra.mxu1 %vm10311_vm13, %v14622_v34  ;;  %v14757_v12 = vsel %vm10330_vm14, 4294967295, %v14756_v12  ;;  %vm4978_vm13 = vcmp.eq.s32.totalorder %v4849_v49, %v9677_v40  ;;  %v4821_v37 = vadd.s32 792, %v14676_v3  ;;  %vm10355_vm10 = vmand %vm14760_vm11, %vm14759_vm9  ;;  %v3462_v49 = vadd.s32 1, %v14688_v50 }
 0x296   : > { %7012 = vmatpush.msk.msra.mxu0 %vm10288_vm12, %v14622_v34  ;;  %14758 = vst [vmem:[#allocation54_spill] sm:$0xff] %v14757_v12  ;;  %6980 = vmatpush.msk.msra.mxu3 %vm4978_vm13, %v14622_v34  ;;  %v14762_v42 = vsel %vm10355_vm10, 4294967295, %v14761_v42  ;;  %vm14764_vm11 = vcmp.eq.s32.totalorder %v4823_v44, %v9677_v40  ;;  %vm14765_vm9 = vcmp.lt.s32.totalorder %v14742_v22, %v10127_v38  ;;  %v4819_v44 = vadd.s32 776, %v14676_v3 }
 0x297   : > { %14763 = vst [vmem:[#allocation55_spill] sm:$0xff] %v14762_v42  ;;  %6974 = vmatpush.msk.msra.mxu2 %vm14764_vm11, %v14622_v34  ;;  %vm10379_vm13 = vmand %vm14766_vm1, %vm14765_vm9  ;;  %vm14770_vm9 = vcmp.eq.s32.totalorder %v4847_v52, %v9677_v40  ;;  %v10415_v50 = vmul.u32 8, %v3462_v49  ;;  %v4818_v52 = vadd.s32 768, %v14676_v3  ;;  %v10431_v49 = vadd.s32 384, %v14663_v21 }
 0x298   : > { %7013 = vmatpush.msk.msra.mxu0 %vm10295_vm6, %v14622_v34  ;;  %6981 = vmatpush.msk.msra.mxu3 %vm4977_vm8, %v14622_v34  ;;  %v14768_v51 = vsel %vm10379_vm13, 4294967295, %v14767_v51  ;;  %vm10407_vm8 = vmand %vm14772_vm7, %vm14771_vm2  ;;  %vm14776_vm7 = vcmp.eq.s32.totalorder %v4821_v37, %v9677_v40  ;;  %vm14777_vm2 = vcmp.eq.s32.totalorder %v4846_v58, %v9677_v40  ;;  %vm14779_vm11 = vcmp.lt.s32.totalorder %v14742_v22, %v10165_v30 }
 0x299   : > { %14769 = vst [vmem:[#allocation56_spill] sm:$0xff] %v14768_v51  ;;  %6975 = vmatpush.msk.msra.mxu2 %vm4951_vm3, %v14622_v34  ;;  %v14774_v4 = vsel %vm10407_vm8, 4294967295, %v14773_v4  ;;  %vm14780_vm3 = vcmp.ge.s32.totalorder %v14742_v22, %v10163_v62  ;;  %v4842_v37 = vadd.s32 960, %v14676_v3  ;;  %v14788_v58 = vmov 0 }
 0x29a   : > { %7014 = vmatpush.msk.msra.mxu0 %vm10330_vm14, %v14622_v34  ;;  %6982 = vmatpush.msk.msra.mxu3 %vm14770_vm9, %v14622_v34  ;;  %14775 = vst [vmem:[#allocation57_spill] sm:$0xff] %v14774_v4  ;;  %vm10439_vm9 = vmand %vm14780_vm3, %vm14779_vm11  ;;  %vm14784_vm3 = vcmp.eq.s32.totalorder %v4820_v54, %v9677_v40  ;;  %v14793_v54 = vmov 0  ;;  %vm3525_vm1 = vcmp.lt.s32.totalorder %v10431_v49, %v10415_v50  ;;  %v10670_v51 = vmul.u32 8, %v14676_v3 }
 0x29b   : > { %6976 = vmatpush.msk.msra.mxu2 %vm14776_vm7, %v14622_v34  ;;  %14778 = vst [vmem:[#allocation58_spill] sm:$0xff] %v10431_v49  ;;  %v14782_v26 = vsel %vm10439_vm9, 4294967295, %v14781_v26  ;;  %vm3356_vm14 = vcmp.ge.s32.totalorder %v14742_v22, %v10511_v14  ;;  %v14881_v42 = vmov 0 }
 0x29c   : > { %7015 = vmatpush.msk.msra.mxu0 %vm10355_vm10, %v14622_v34  ;;  %6983 = vmatpush.msk.msra.mxu3 %vm14777_vm2, %v14622_v34  ;;  %14783 = vst [vmem:[#allocation59_spill] sm:$0xff] %v14782_v26  ;;  %vm14785_vm2 = vcmp.eq.s32.totalorder %v4845_v35, %v9677_v40  ;;  %v4841_v35 = vadd.s32 952, %v14676_v3  ;;  %v14836_v26 = vmov 0 }
 0x29d   : > { %6977 = vmatpush.msk.msra.mxu2 %vm14784_vm3, %v14622_v34  ;;  %vm3522_vm3 = vcmp.lt.s32.totalorder %v14663_v21, %v10415_v50 }
 0x29e   : > { %7016 = vmatpush.msk.msra.mxu0 %vm10379_vm13, %v14622_v34  ;;  %6984 = vmatpush.msk.msra.mxu3 %vm14785_vm2, %v14622_v34  ;;  %vm14786_vm13 = vcmp.lt.s32.totalorder %v14742_v22, %v10197_v59  ;;  %vm14797_vm2 = vcmp.eq.s32.totalorder %v4844_v41, %v9677_v40  ;;  %v14804_v41 = vmov 0 }
 0x2a0   : > { %7017 = vmatpush.msk.msra.mxu0 %vm10407_vm8, %v14622_v34  ;;  %vm14787_vm8 = vcmp.ge.s32.totalorder %v14742_v22, %v10195_v15  ;;  %6985 = vmatpush.msk.msra.mxu3 %vm14797_vm2, %v14622_v34 }
 0x2a1   : > { %vm10469_vm7 = vmand %vm14787_vm8, %vm14786_vm13  ;;  %vm14791_vm13 = vcmp.lt.s32.totalorder %v14742_v22, %v10214_v6  ;;  %vm14792_vm8 = vcmp.ge.s32.totalorder %v14742_v22, %v10212_v47 }
 0x2a2   : > { %7018 = vmatpush.msk.msra.mxu0 %vm10439_vm9, %v14622_v34  ;;  %v14789_v58 = vsel %vm10469_vm7, 4294967295, %v14788_v58  ;;  %vm10491_vm11 = vmand %vm14792_vm8, %vm14791_vm13  ;;  %vm14796_vm9 = vcmp.eq.s32.totalorder %v4819_v44, %v9677_v40  ;;  %vm3531_vm8 = vcmp.lt.s32.totalorder %v14742_v22, %v10286_v25  ;;  %v3460_v44 = vadd.s32 1, %v14692_v7 }
 0x2a3   : > { %14790 = vst [vmem:[#allocation60_spill] sm:$0xff] %v14789_v58  ;;  %v14794_v54 = vsel %vm10491_vm11, 4294967295, %v14793_v54  ;;  %6978 = vmatpush.msk.msra.mxu2 %vm14796_vm9, %v14622_v34  ;;  %v14799_v58 = vmov 0  ;;  %vm14802_vm9 = vcmp.lt.s32.totalorder %v14742_v22, %v10245_v60  ;;  %vm14807_vm13 = vcmp.eq.s32.totalorder %v4818_v52, %v9677_v40 }
 0x2a4   : > { %7019 = vmatpush.msk.msra.mxu0 %vm10469_vm7, %v14622_v34  ;;  %14795 = vst [vmem:[#allocation61_spill] sm:$0xff] %v14794_v54  ;;  %vm14798_vm7 = vcmp.ge.s32.totalorder %v14663_v21, %v10394_v53  ;;  %v10557_v52 = vmul.u32 8, %v14692_v7  ;;  %v14827_v7 = vmov 0  ;;  %v14833_v54 = vmov 0 }
 0x2a5   : > { %vm10506_vm10 = vmand %vm14798_vm7, %vm3522_vm3  ;;  %vm14803_vm7 = vcmp.ge.s32.totalorder %v14742_v22, %v10232_v31  ;;  %6979 = vmatpush.msk.msra.mxu2 %vm14807_vm13, %v14622_v34  ;;  %vm4970_vm13 = vcmp.eq.s32.totalorder %v4841_v35, %v9677_v40  ;;  %v14821_v35 = vmov 0 }
 0x2a6   : > { %v14800_v58 = vsel %vm10506_vm10, 4294967295, %v14799_v58  ;;  %7020 = vmatpush.msk.msra.mxu0 %vm10491_vm11, %v14622_v34  ;;  %vm10524_vm3 = vmand %vm14803_vm7, %vm14802_vm9  ;;  %7007 = vmatpush.msk.msra.mxu1 %vm10506_vm10, %v14622_v34  ;;  %vm14808_vm9 = vcmp.eq.s32.totalorder %v4843_v20, %v9677_v40  ;;  %vm14809_vm7 = vcmp.ge.s32.totalorder %v10431_v49, %v10394_v53  ;;  %vm3355_vm10 = vcmp.ge.s32.totalorder %v14663_v21, %v10511_v14 }
 0x2a7   : > { %14801 = vst [vmem:[#allocation62_spill] sm:$0xff] %v14800_v58  ;;  %v14805_v41 = vsel %vm10524_vm3, 4294967295, %v14804_v41  ;;  %6986 = vmatpush.msk.msra.mxu3 %vm14808_vm9, %v14622_v34  ;;  %vm10548_vm2 = vmand %vm14809_vm7, %vm3525_vm1  ;;  %v10554_v58 = vmul.u32 8, %v3461_v46  ;;  %vm3364_vm1 = vcmp.ge.s32.totalorder %v14742_v22, %v10394_v53  ;;  %vm3523_vm9 = vcmp.lt.s32.totalorder %v14742_v22, %v10415_v50 }
 0x2a8   : > { %14806 = vst [vmem:[#allocation63_spill] sm:$0xff] %v14805_v41  ;;  %v14811_v5 = vsel %vm10548_vm2, 4294967295, %v14810_v5  ;;  %7021 = vmatpush.msk.msra.mxu0 %vm10524_vm3, %v14622_v34  ;;  %vm14813_vm7 = vcmp.eq.s32.totalorder %v4842_v37, %v9677_v40  ;;  %vm14814_vm11 = vcmp.ge.s32.totalorder %v14742_v22, %v10266_v27  ;;  %v14815_v46 = vmov 0  ;;  %vm10597_vm6 = vmand %vm3364_vm1, %vm3523_vm9 }
 0x2a9   : > { %14812 = vst [vmem:[#allocation64_spill] sm:$0xff] %v14811_v5  ;;  %6987 = vmatpush.msk.msra.mxu3 %vm14813_vm7, %v14622_v34  ;;  %vm10573_vm4 = vmand %vm14814_vm11, %vm3531_vm8  ;;  %vm3514_vm3 = vcmp.lt.s32.totalorder %v14663_v21, %v10554_v58  ;;  %vm3515_vm5 = vcmp.lt.s32.totalorder %v14742_v22, %v10554_v58  ;;  %v14818_v20 = vmov 0  ;;  %vm3358_vm11 = vcmp.ge.s32.totalorder %v10431_v49, %v10511_v14 }
 0x2aa   : > { %v14816_v46 = vsel %vm10573_vm4, 4294967295, %v14815_v46  ;;  %7022 = vmatpush.msk.msra.mxu0 %vm10573_vm4, %v14622_v34  ;;  %vm10586_vm7 = vmand %vm3355_vm10, %vm3514_vm3  ;;  %vm3517_vm8 = vcmp.lt.s32.totalorder %v10431_v49, %v10554_v58  ;;  %v10594_v37 = vmul.u32 8, %v3460_v44  ;;  %v14822_v35 = vsel %vm10597_vm6, 4294967295, %v14821_v35 }
 0x2ab   : > { %14817 = vst [vmem:[#allocation65_spill] sm:$0xff] %v14816_v46  ;;  %v14819_v20 = vsel %vm10586_vm7, 4294967295, %v14818_v20  ;;  %6988 = vmatpush.msk.msra.mxu3 %vm4970_vm13, %v14622_v34  ;;  %7008 = vmatpush.msk.msra.mxu1 %vm10586_vm7, %v14622_v34  ;;  %vm3347_vm10 = vcmp.ge.s32.totalorder %v14663_v21, %v10557_v52  ;;  %vm10609_vm3 = vmand %vm3356_vm14, %vm3515_vm5  ;;  %v14824_v44 = vmov 0  ;;  %vm3348_vm1 = vcmp.ge.s32.totalorder %v14742_v22, %v10557_v52 }
 0x2ac   : > { %14820 = vst [vmem:[#allocation66_spill] sm:$0xff] %v14819_v20  ;;  %7023 = vmatpush.msk.msra.mxu0 %vm10597_vm6, %v14622_v34  ;;  %v14825_v44 = vsel %vm10609_vm3, 4294967295, %v14824_v44  ;;  %vm3506_vm13 = vcmp.lt.s32.totalorder %v14663_v21, %v10594_v37  ;;  %vm3507_vm9 = vcmp.lt.s32.totalorder %v14742_v22, %v10594_v37  ;;  %vm10619_vm7 = vmand %vm3358_vm11, %vm3517_vm8  ;;  %vm3350_vm6 = vcmp.ge.s32.totalorder %v10431_v49, %v10557_v52 }
 0x2ad   : > { %14823 = vst [vmem:[#allocation67_spill] sm:$0xff] %v14822_v35  ;;  %v14828_v7 = vsel %vm10619_vm7, 4294967295, %v14827_v7  ;;  %v4840_v20 = vadd.s32 944, %v14676_v3  ;;  %v4839_v35 = vadd.s32 936, %v14676_v3  ;;  %v4838_v46 = vadd.s32 928, %v14676_v3  ;;  %vm10631_vm5 = vmand %vm3347_vm10, %vm3506_vm13 }
 0x2ae   : > { %14826 = vst [vmem:[#allocation68_spill] sm:$0xff] %v14825_v44  ;;  %7024 = vmatpush.msk.msra.mxu0 %vm10609_vm3, %v14622_v34  ;;  %v14830_v41 = vmov 0  ;;  %vm3509_vm14 = vcmp.lt.s32.totalorder %v10431_v49, %v10594_v37  ;;  %7009 = vmatpush.msk.msra.mxu1 %vm10631_vm5, %v14622_v34  ;;  %vm10640_vm11 = vmand %vm3348_vm1, %vm3507_vm9  ;;  %v4837_v44 = vadd.s32 920, %v14676_v3 }
 0x2af   : > { %14829 = vst [vmem:[#allocation69_spill] sm:$0xff] %v14828_v7  ;;  %v14831_v41 = vsel %vm10631_vm5, 4294967295, %v14830_v41  ;;  %v14834_v54 = vsel %vm10640_vm11, 4294967295, %v14833_v54  ;;  %vm4969_vm8 = vcmp.eq.s32.totalorder %v4840_v20, %v9677_v40  ;;  %vm4968_vm4 = vcmp.eq.s32.totalorder %v4839_v35, %v9677_v40  ;;  %vm10651_vm10 = vmand %vm3350_vm6, %vm3509_vm14 }
 0x2b0   : > { %14832 = vst [vmem:[#allocation70_spill] sm:$0xff] %v14831_v41  ;;  %7025 = vmatpush.msk.msra.mxu0 %vm10640_vm11, %v14622_v34  ;;  %6989 = vmatpush.msk.msra.mxu3 %vm4969_vm8, %v14622_v34  ;;  %v14837_v26 = vsel %vm10651_vm10, 4294967295, %v14836_v26  ;;  %v10656_v41 = vmul.u32 8, %v14694_v17  ;;  %vm4967_vm13 = vcmp.eq.s32.totalorder %v4838_v46, %v9677_v40  ;;  %v4836_v20 = vadd.s32 912, %v14676_v3 }
 0x2b1   : > { %14835 = vst [vmem:[#allocation71_spill] sm:$0xff] %v14834_v54  ;;  %v3459_v54 = vadd.s32 1, %v14694_v17  ;;  %vm4966_vm6 = vcmp.eq.s32.totalorder %v4837_v44, %v9677_v40  ;;  %v4834_v17 = vadd.s32 896, %v14676_v3  ;;  %vm3331_vm5 = vcmp.ge.s32.totalorder %v14663_v21, %v10670_v51 }
 0x2b2   : > { %14838 = vst [vmem:[#allocation72_spill] sm:$0xff] %v14837_v26  ;;  %6990 = vmatpush.msk.msra.mxu3 %vm4968_vm4, %v14622_v34  ;;  %vm3339_vm1 = vcmp.ge.s32.totalorder %v14663_v21, %v10656_v41  ;;  %vm4965_vm4 = vcmp.eq.s32.totalorder %v4836_v20, %v9677_v40  ;;  %vm3340_vm9 = vcmp.ge.s32.totalorder %v14742_v22, %v10656_v41  ;;  %v14853_v44 = vmov 0 }
 0x2b3   : > { %v3214_v35 = vpop.f32.mrf.mxu1  ;;  %v3234_v28 = vpop.f32.mrf.mxu0  ;;  %v10667_v46 = vmul.u32 8, %v3459_v54  ;;  %vm4963_vm3 = vcmp.eq.s32.totalorder %v4834_v17, %v9677_v40  ;;  %v14850_v17 = vmov 0  ;;  %v14856_v20 = vmov 0 }
 0x2b4   : > { %v3235_v4 = vadd.f32 %v3234_v28, %v3214_v35  ;;  %6991 = vmatpush.msk.msra.mxu3 %vm4967_vm13, %v14622_v34  ;;  %v14839_v28 = vld [vmem:[#allocation37_spill] sm:$0xff]  ;;  %vm4964_vm13 = vcmp.eq.s32.totalorder %v4835_v0, %v9677_v40  ;;  %v14847_v40 = vmov 0  ;;  %v14859_v35 = vmov 0 }
 0x2b5   : > { %vm3498_vm14 = vcmp.lt.s32.totalorder %v14663_v21, %v10667_v46  ;;  %vm3499_vm8 = vcmp.lt.s32.totalorder %v14742_v22, %v10667_v46  ;;  %v10682_v54 = vmul.u32 8, %v14839_v28  ;;  %v10764_v28 = vadd.s32 512, %v14663_v21 }
 0x2b6   : > { %v3291_v61 = vadd.f32 %v3283_v16, %v3235_v4  ;;  %6992 = vmatpush.msk.msra.mxu3 %vm4966_vm6, %v14622_v34  ;;  %vm10685_vm11 = vmand %vm3339_vm1, %vm3498_vm14  ;;  %v14840_v16 = vmov 0  ;;  %v14843_v4 = vmov 0  ;;  %vm3332_vm1 = vcmp.ge.s32.totalorder %v14742_v22, %v10670_v51 }
 0x2b7   : > { %v14841_v16 = vsel %vm10685_vm11, 4294967295, %v14840_v16  ;;  %7010 = vmatpush.msk.msra.mxu1 %vm10685_vm11, %v14622_v34  ;;  %vm10693_vm6 = vmand %vm3340_vm9, %vm3499_vm8  ;;  %14862 = vst [vmem:[#allocation80_spill] sm:$0xff] %v10764_v28  ;;  %v14867_v3 = vmov 0  ;;  %vm3510_vm7 = vcmp.lt.s32.totalorder %v10764_v28, %v10594_v37 }
 0x2b8   : > { %3299 = vst [vmem:[#allocation2 + $0x28] sm:$0x7f] %v3291_v61  ;;  %6993 = vmatpush.msk.msra.mxu3 %vm4965_vm4, %v14622_v34  ;;  %v14844_v4 = vsel %vm10693_vm6, 4294967295, %v14843_v4  ;;  %v10701_v61 = vadd.s32 256, %v14663_v21  ;;  %7026 = vmatpush.msk.msra.mxu0 %vm10693_vm6, %v14622_v34  ;;  %vm3490_vm4 = vcmp.lt.s32.totalorder %v14663_v21, %v10682_v54  ;;  %vm3491_vm6 = vcmp.lt.s32.totalorder %v14742_v22, %v10682_v54 }
 0x2b9   : > { %14842 = vst [vmem:[#allocation37_spill] sm:$0xff] %v14841_v16  ;;  %vm10715_vm8 = vmand %vm3331_vm5, %vm3490_vm4  ;;  %v10775_v22 = vadd.s32 640, %v14663_v21  ;;  %v10809_v16 = vadd.s32 896, %v14663_v21 }
 0x2ba   : > { %14845 = vst [vmem:[#allocation73_spill] sm:$0xff] %v14844_v4  ;;  %6994 = vmatpush.msk.msra.mxu3 %vm4964_vm13, %v14622_v34  ;;  %vm3453_vm9 = vcmp.ge.s32.totalorder %v10701_v61, %v10063_v19  ;;  %vm3612_vm14 = vcmp.lt.s32.totalorder %v10701_v61, %v10065_v10  ;;  %v14848_v40 = vsel %vm10715_vm8, 4294967295, %v14847_v40  ;;  %vm3445_vm13 = vcmp.ge.s32.totalorder %v10701_v61, %v10072_v29  ;;  %vm10729_vm15 = vmand %vm3332_vm1, %vm3491_vm6 }
 0x2bb   : > { %14846 = vst [vmem:[#allocation74_spill] sm:$0xff] %v10701_v61  ;;  %vm3604_vm11 = vcmp.lt.s32.totalorder %v10701_v61, %v10087_v9  ;;  %7011 = vmatpush.msk.msra.mxu1 %vm10715_vm8, %v14622_v34  ;;  %v14851_v17 = vsel %vm10729_vm15, 4294967295, %v14850_v17  ;;  %vm3437_vm5 = vcmp.ge.s32.totalorder %v10701_v61, %v10080_v11  ;;  %7027 = vmatpush.msk.msra.mxu0 %vm10729_vm15, %v14622_v34  ;;  %vm10740_vm4 = vmand %vm3453_vm9, %vm3612_vm14  ;;  %v14874_v4 = vmov 0 }
 0x2bc   : > { %14849 = vst [vmem:[#allocation75_spill] sm:$0xff] %v14848_v40  ;;  %6995 = vmatpush.msk.msra.mxu3 %vm4963_vm3, %v14622_v34  ;;  %vm3596_vm3 = vcmp.lt.s32.totalorder %v10701_v61, %v10082_v39  ;;  %v14854_v44 = vsel %vm10740_vm4, 4294967295, %v14853_v44  ;;  %vm3429_vm6 = vcmp.ge.s32.totalorder %v10701_v61, %v10094_v18  ;;  %vm3588_vm1 = vcmp.lt.s32.totalorder %v10701_v61, %v10096_v45  ;;  %vm10748_vm8 = vmand %vm3445_vm13, %vm3604_vm11 }
 0x2bd   : > { %14852 = vst [vmem:[#allocation76_spill] sm:$0xff] %v14851_v17  ;;  %v14857_v20 = vsel %vm10748_vm8, 4294967295, %v14856_v20  ;;  %vm3421_vm12 = vcmp.ge.s32.totalorder %v10701_v61, %v10125_v57  ;;  %vm3580_vm9 = vcmp.lt.s32.totalorder %v10701_v61, %v10127_v38  ;;  %vm10759_vm14 = vmand %vm3437_vm5, %vm3596_vm3  ;;  %vm3413_vm13 = vcmp.ge.s32.totalorder %v10701_v61, %v10146_v43 }
 0x2be   : > { %14855 = vst [vmem:[#allocation77_spill] sm:$0xff] %v14854_v44  ;;  %v14860_v35 = vsel %vm10759_vm14, 4294967295, %v14859_v35  ;;  %vm10766_vm11 = vmand %vm3429_vm6, %vm3588_vm1  ;;  %vm3572_vm15 = vcmp.lt.s32.totalorder %v10701_v61, %v10148_v56  ;;  %v10785_v17 = vadd.s32 768, %v14663_v21  ;;  %vm3367_vm3 = vcmp.ge.s32.totalorder %v10764_v28, %v10394_v53 }
 0x2bf   : > { %v3307_v0 = vld [vmem:[#allocation2 + $0x28] sm:$0x7f]  ;;  %14858 = vst [vmem:[#allocation78_spill] sm:$0xff] %v14857_v20  ;;  %vm10780_vm5 = vmand %vm3421_vm12, %vm3580_vm9  ;;  %vm3526_vm6 = vcmp.lt.s32.totalorder %v10764_v28, %v10415_v50  ;;  %vm3405_vm1 = vcmp.ge.s32.totalorder %v10701_v61, %v10163_v62  ;;  %v14871_v40 = vmov 0  ;;  %vm3368_vm12 = vcmp.ge.s32.totalorder %v10775_v22, %v10394_v53 }
 0x2c0   : > { %5371 = vmatmul.f32.vlgmr.msra.gmra.mxu2 %v3307_v0  ;;  %14861 = vst [vmem:[#allocation79_spill] sm:$0xff] %v14860_v35  ;;  %v14863_v0 = vmov 0  ;;  %v14868_v3 = vsel %vm10780_vm5, 4294967295, %v14867_v3  ;;  %vm10804_vm9 = vmand %vm3413_vm13, %vm3572_vm15  ;;  %vm3528_vm13 = vcmp.lt.s32.totalorder %v10785_v17, %v10415_v50  ;;  %v14884_v21 = vmov 0 }
 0x2c1   : > { %7028 = vmatpush.msk.msra.mxu2 %vm10740_vm4, %v14622_v34  ;;  %v14864_v0 = vsel %vm10766_vm11, 4294967295, %v14863_v0  ;;  %14866 = vst [vmem:[#allocation82_spill] sm:$0xff] %v10775_v22  ;;  %vm3564_vm4 = vcmp.lt.s32.totalorder %v10701_v61, %v10165_v30  ;;  %v14875_v4 = vsel %vm10804_vm9, 4294967295, %v14874_v4 }
 0x2c2   : > { %14865 = vst [vmem:[#allocation81_spill] sm:$0xff] %v14864_v0  ;;  %vm10822_vm15 = vmand %vm3405_vm1, %vm3564_vm4  ;;  %vm3529_vm4 = vcmp.lt.s32.totalorder %v10809_v16, %v10415_v50  ;;  %v3284_v0 = vld [vmem:[#allocation2 + $0x38] sm:$0x7f]  ;;  %vm3540_vm1 = vcmp.lt.s32.totalorder %v10701_v61, %v10245_v60 }
 0x2c3   : > { %7029 = vmatpush.msk.msra.mxu2 %vm10748_vm8, %v14622_v34  ;;  %14869 = vst [vmem:[#allocation83_spill] sm:$0xff] %v14868_v3  ;;  %vm10795_vm8 = vmand %vm3367_vm3, %vm3526_vm6  ;;  %vm3527_vm3 = vcmp.lt.s32.totalorder %v10775_v22, %v10415_v50  ;;  %vm3369_vm6 = vcmp.ge.s32.totalorder %v10785_v17, %v10394_v53  ;;  %v14882_v42 = vsel %vm10822_vm15, 4294967295, %v14881_v42  ;;  %v14890_v3 = vmov 0 }
 0x2c4   : > { %14870 = vst [vmem:[#allocation84_spill] sm:$0xff] %v10785_v17  ;;  %v14872_v40 = vsel %vm10795_vm8, 4294967295, %v14871_v40  ;;  %vm10815_vm8 = vmand %vm3368_vm12, %vm3527_vm3  ;;  %vm3548_vm12 = vcmp.lt.s32.totalorder %v10701_v61, %v10214_v6 }
 0x2c5   : > { %14873 = vst [vmem:[#allocation85_spill] sm:$0xff] %v14872_v40  ;;  %7030 = vmatpush.msk.msra.mxu2 %vm10759_vm14, %v14622_v34  ;;  %v14878_v40 = vmov 0  ;;  %vm3370_vm14 = vcmp.ge.s32.totalorder %v10809_v16, %v10394_v53 }
 0x2c6   : > { %14876 = vst [vmem:[#allocation86_spill] sm:$0xff] %v14875_v4  ;;  %v14879_v40 = vsel %vm10815_vm8, 4294967295, %v14878_v40  ;;  %vm10834_vm8 = vmand %vm3369_vm6, %vm3528_vm13  ;;  %vm3359_vm6 = vcmp.ge.s32.totalorder %v10764_v28, %v10511_v14  ;;  %vm3518_vm13 = vcmp.lt.s32.totalorder %v10764_v28, %v10554_v58 }
 0x2c7   : > { %14877 = vst [vmem:[#allocation87_spill] sm:$0xff] %v10809_v16  ;;  %v3254_v1 = vpop.f32.mrf.mxu2  ;;  %7031 = vmatpush.msk.msra.mxu2 %vm10766_vm11, %v14622_v34  ;;  %v14885_v21 = vsel %vm10834_vm8, 4294967295, %v14884_v21  ;;  %vm10847_vm3 = vmand %vm3370_vm14, %vm3529_vm4  ;;  %vm3381_vm8 = vcmp.ge.s32.totalorder %v10701_v61, %v10232_v31  ;;  %vm3454_vm14 = vcmp.ge.s32.totalorder %v10431_v49, %v10063_v19  ;;  %vm3613_vm4 = vcmp.lt.s32.totalorder %v10431_v49, %v10065_v10 }
 0x2c8   : > { %14880 = vst [vmem:[#allocation88_spill] sm:$0xff] %v14879_v40  ;;  %v14888_v55 = vsel %vm10847_vm3, 4294967295, %v14887_v55  ;;  %vm14893_vm3 = vcmp.lt.s32.totalorder %v10701_v61, %v10197_v59  ;;  %vm14894_vm11 = vcmp.ge.s32.totalorder %v10701_v61, %v10195_v15 }
 0x2c9   : > { %14883 = vst [vmem:[#allocation89_spill] sm:$0xff] %v14882_v42  ;;  %v3274_v40 = vpop.f32.mrf.mxu3  ;;  %7032 = vmatpush.msk.msra.mxu2 %vm10780_vm5, %v14622_v34  ;;  %vm10859_vm5 = vmand %vm3359_vm6, %vm3518_vm13  ;;  %vm3360_vm13 = vcmp.ge.s32.totalorder %v10775_v22, %v10511_v14 }
 0x2ca   : > { %14886 = vst [vmem:[#allocation90_spill] sm:$0xff] %v14885_v21  ;;  %v3275_v21 = vadd.f32 %v3274_v40, %v3254_v1  ;;  %v14891_v3 = vsel %vm10859_vm5, 4294967295, %v14890_v3  ;;  %vm10876_vm6 = vmand %vm14894_vm11, %vm14893_vm3  ;;  %v14895_v1 = vmov 0  ;;  %vm14898_vm5 = vcmp.ge.s32.totalorder %v10701_v61, %v10212_v47 }
 0x2cb   : > { %14889 = vst [vmem:[#allocation91_spill] sm:$0xff] %v14888_v55  ;;  %7033 = vmatpush.msk.msra.mxu2 %vm10804_vm9, %v14622_v34  ;;  %v14896_v1 = vsel %vm10876_vm6, 4294967295, %v14895_v1  ;;  %vm10885_vm0 = vmand %vm14898_vm5, %vm3548_vm12  ;;  %v14901_v55 = vmov 0  ;;  %vm3519_vm11 = vcmp.lt.s32.totalorder %v10775_v22, %v10554_v58  ;;  %vm3361_vm3 = vcmp.ge.s32.totalorder %v10785_v17, %v10511_v14 }
 0x2cc   : > { %14892 = vst [vmem:[#allocation92_spill] sm:$0xff] %v14891_v3  ;;  %v3292_v40 = vadd.f32 %v3284_v0, %v3275_v21  ;;  %v14899_v3 = vmov 0  ;;  %vm10892_vm9 = vmand %vm3381_vm8, %vm3540_vm1  ;;  %vm3520_vm5 = vcmp.lt.s32.totalorder %v10785_v17, %v10554_v58  ;;  %v14904_v21 = vmov 0 }
 0x2cd   : > { %14897 = vst [vmem:[#allocation93_spill] sm:$0xff] %v14896_v1  ;;  %v14900_v3 = vsel %vm10885_vm0, 4294967295, %v14899_v3  ;;  %7034 = vmatpush.msk.msra.mxu2 %vm10822_vm15, %v14622_v34  ;;  %v14902_v55 = vsel %vm10892_vm9, 4294967295, %v14901_v55  ;;  %vm10902_vm12 = vmand %vm3454_vm14, %vm3613_vm4  ;;  %v14907_v0 = vmov 0  ;;  %vm3362_vm8 = vcmp.ge.s32.totalorder %v10809_v16, %v10511_v14 }
 0x2ce   : > { %14903 = vst [vmem:[#allocation94_spill] sm:$0xff] %v14902_v55  ;;  %v14905_v21 = vsel %vm10902_vm12, 4294967295, %v14904_v21  ;;  %vm10906_vm10 = vmand %vm3360_vm13, %vm3519_vm11  ;;  %vm3521_vm1 = vcmp.lt.s32.totalorder %v10809_v16, %v10554_v58  ;;  %vm3351_vm15 = vcmp.ge.s32.totalorder %v10764_v28, %v10557_v52  ;;  %vm3352_vm4 = vcmp.ge.s32.totalorder %v10775_v22, %v10557_v52 }
 0x2cf   : > { %3300 = vst [vmem:[#allocation2 + $0x38] sm:$0x7f] %v3292_v40  ;;  %v14908_v0 = vsel %vm10906_vm10, 4294967295, %v14907_v0  ;;  %7035 = vmatpush.msk.msra.mxu2 %vm10876_vm6, %v14622_v34  ;;  %vm10921_vm14 = vmand %vm3361_vm3, %vm3520_vm5  ;;  %v14910_v40 = vmov 0  ;;  %vm3511_vm13 = vcmp.lt.s32.totalorder %v10775_v22, %v10594_v37  ;;  %vm3353_vm10 = vcmp.ge.s32.totalorder %v10785_v17, %v10557_v52 }
 0x2d0   : > { %14906 = vst [vmem:[#allocation95_spill] sm:$0xff] %v14905_v21  ;;  %v14911_v40 = vsel %vm10921_vm14, 4294967295, %v14910_v40  ;;  %vm10929_vm11 = vmand %vm3362_vm8, %vm3521_vm1  ;;  %vm3512_vm6 = vcmp.lt.s32.totalorder %v10785_v17, %v10594_v37  ;;  %vm3373_vm3 = vcmp.ge.s32.totalorder %v10701_v61, %v10266_v27  ;;  %vm3532_vm5 = vcmp.lt.s32.totalorder %v10701_v61, %v10286_v25 }
 0x2d1   : > { %14909 = vst [vmem:[#allocation96_spill] sm:$0xff] %v14908_v0  ;;  %v14913_v0 = vmov 0  ;;  %7036 = vmatpush.msk.msra.mxu2 %vm10885_vm0, %v14622_v34  ;;  %vm10944_vm8 = vmand %vm3351_vm15, %vm3510_vm7  ;;  %vm3446_vm1 = vcmp.ge.s32.totalorder %v10431_v49, %v10072_v29  ;;  %vm3365_vm7 = vcmp.ge.s32.totalorder %v10701_v61, %v10394_v53  ;;  %vm3524_vm15 = vcmp.lt.s32.totalorder %v10701_v61, %v10415_v50 }
 0x2d2   : > { %14912 = vst [vmem:[#allocation97_spill] sm:$0xff] %v14911_v40  ;;  %v14914_v0 = vsel %vm10929_vm11, 4294967295, %v14913_v0  ;;  %v14916_v40 = vmov 0  ;;  %vm3605_vm11 = vcmp.lt.s32.totalorder %v10431_v49, %v10087_v9  ;;  %vm10952_vm14 = vmand %vm3352_vm4, %vm3511_vm13  ;;  %v14925_v9 = vmov 0 }
 0x2d3   : > { %14915 = vst [vmem:[#allocation98_spill] sm:$0xff] %v14914_v0  ;;  %v14917_v40 = vsel %vm10944_vm8, 4294967295, %v14916_v40  ;;  %v14919_v0 = vmov 0  ;;  %7037 = vmatpush.msk.msra.mxu2 %vm10892_vm9, %v14622_v34  ;;  %vm10963_vm8 = vmand %vm3353_vm10, %vm3512_vm6  ;;  %vm3513_vm13 = vcmp.lt.s32.totalorder %v10809_v16, %v10594_v37  ;;  %v14928_v53 = vmov 0 }
 0x2d4   : > { %14918 = vst [vmem:[#allocation99_spill] sm:$0xff] %v14917_v40  ;;  %v14920_v0 = vsel %vm10952_vm14, 4294967295, %v14919_v0  ;;  %v14922_v40 = vmov 0  ;;  %vm10967_vm0 = vmand %vm3373_vm3, %vm3532_vm5  ;;  %vm3357_vm10 = vcmp.ge.s32.totalorder %v10701_v61, %v10511_v14  ;;  %vm3516_vm6 = vcmp.lt.s32.totalorder %v10701_v61, %v10554_v58 }
 0x2d5   : > { %14921 = vst [vmem:[#allocation100_spill] sm:$0xff] %v14920_v0  ;;  %v14923_v40 = vsel %vm10963_vm8, 4294967295, %v14922_v40  ;;  %v14926_v9 = vsel %vm10967_vm0, 4294967295, %v14925_v9  ;;  %vm10975_vm14 = vmand %vm3446_vm1, %vm3605_vm11  ;;  %7038 = vmatpush.msk.msra.mxu2 %vm10967_vm0, %v14622_v34  ;;  %vm3438_vm3 = vcmp.ge.s32.totalorder %v10431_v49, %v10080_v11  ;;  %vm3597_vm11 = vcmp.lt.s32.totalorder %v10431_v49, %v10082_v39 }
 0x2d6   : > { %14924 = vst [vmem:[#allocation101_spill] sm:$0xff] %v14923_v40  ;;  %v3308_v0 = vld [vmem:[#allocation2 + $0x38] sm:$0x7f]  ;;  %v14929_v53 = vsel %vm10975_vm14, 4294967295, %v14928_v53  ;;  %vm10990_vm5 = vmand %vm3365_vm7, %vm3524_vm15  ;;  %v14931_v50 = vmov 0  ;;  %vm3349_vm1 = vcmp.ge.s32.totalorder %v10701_v61, %v10557_v52  ;;  %vm3508_vm4 = vcmp.lt.s32.totalorder %v10701_v61, %v10594_v37 }
 0x2d7   : > { %14927 = vst [vmem:[#allocation102_spill] sm:$0xff] %v14926_v9  ;;  %5391 = vmatmul.f32.vlgmr.msra.gmra.mxu3 %v3308_v0  ;;  %v14932_v50 = vsel %vm10990_vm5, 4294967295, %v14931_v50  ;;  %7039 = vmatpush.msk.msra.mxu2 %vm10990_vm5, %v14622_v34  ;;  %vm14934_vm7 = vcmp.ge.s32.totalorder %v10809_v16, %v10557_v52  ;;  %v14935_v14 = vmov 0  ;;  %vm3430_vm8 = vcmp.ge.s32.totalorder %v10431_v49, %v10094_v18  ;;  %vm11015_vm5 = vmand %vm3357_vm10, %vm3516_vm6 }
 0x2d8   : > { %14930 = vst [vmem:[#allocation103_spill] sm:$0xff] %v14929_v53  ;;  %7044 = vmatpush.msk.msra.mxu3 %vm10902_vm12, %v14622_v34  ;;  %vm11007_vm15 = vmand %vm14934_vm7, %vm3513_vm13  ;;  %vm3589_vm0 = vcmp.lt.s32.totalorder %v10431_v49, %v10096_v45  ;;  %v14938_v58 = vmov 0  ;;  %v14941_v52 = vmov 0  ;;  %vm3341_vm13 = vcmp.ge.s32.totalorder %v10701_v61, %v10656_v41 }
 0x2d9   : > { %14933 = vst [vmem:[#allocation104_spill] sm:$0xff] %v14932_v50  ;;  %v14936_v14 = vsel %vm11007_vm15, 4294967295, %v14935_v14  ;;  %v14939_v58 = vsel %vm11015_vm5, 4294967295, %v14938_v58  ;;  %vm11022_vm9 = vmand %vm3438_vm3, %vm3597_vm11  ;;  %7040 = vmatpush.msk.msra.mxu2 %vm11015_vm5, %v14622_v34  ;;  %vm3500_vm10 = vcmp.lt.s32.totalorder %v10701_v61, %v10667_v46  ;;  %vm3422_vm6 = vcmp.ge.s32.totalorder %v10431_v49, %v10125_v57 }
 0x2da   : > { %14937 = vst [vmem:[#allocation105_spill] sm:$0xff] %v14936_v14  ;;  %7045 = vmatpush.msk.msra.mxu3 %vm10975_vm14, %v14622_v34  ;;  %v14942_v52 = vsel %vm11022_vm9, 4294967295, %v14941_v52  ;;  %vm3581_vm7 = vcmp.lt.s32.totalorder %v10431_v49, %v10127_v38  ;;  %vm11037_vm3 = vmand %vm3349_vm1, %vm3508_vm4  ;;  %v14944_v37 = vmov 0  ;;  %v14947_v0 = vmov 0 }
 0x2db   : > { %14940 = vst [vmem:[#allocation106_spill] sm:$0xff] %v14939_v58  ;;  %v14945_v37 = vsel %vm11037_vm3, 4294967295, %v14944_v37  ;;  %vm11044_vm11 = vmand %vm3430_vm8, %vm3589_vm0  ;;  %7041 = vmatpush.msk.msra.mxu2 %vm11037_vm3, %v14622_v34  ;;  %vm3333_vm15 = vcmp.ge.s32.totalorder %v10701_v61, %v10670_v51  ;;  %vm3492_vm4 = vcmp.lt.s32.totalorder %v10701_v61, %v10682_v54  ;;  %vm3414_vm1 = vcmp.ge.s32.totalorder %v10431_v49, %v10146_v43 }
 0x2dc   : > { %14943 = vst [vmem:[#allocation107_spill] sm:$0xff] %v14942_v52  ;;  %7046 = vmatpush.msk.msra.mxu3 %vm11022_vm9, %v14622_v34  ;;  %v14948_v0 = vsel %vm11044_vm11, 4294967295, %v14947_v0  ;;  %vm3573_vm5 = vcmp.lt.s32.totalorder %v10431_v49, %v10148_v56  ;;  %vm11059_vm0 = vmand %vm3341_vm13, %vm3500_vm10  ;;  %v14950_v14 = vmov 0  ;;  %v14953_v40 = vmov 0 }
 0x2dd   : > { %14946 = vst [vmem:[#allocation108_spill] sm:$0xff] %v14945_v37  ;;  %v14951_v14 = vsel %vm11059_vm0, 4294967295, %v14950_v14  ;;  %vm11066_vm8 = vmand %vm3422_vm6, %vm3581_vm7  ;;  %vm3406_vm3 = vcmp.ge.s32.totalorder %v10431_v49, %v10163_v62  ;;  %vm3565_vm9 = vcmp.lt.s32.totalorder %v10431_v49, %v10165_v30  ;;  %7042 = vmatpush.msk.msra.mxu2 %vm11059_vm0, %v14622_v34  ;;  %vm3398_vm13 = vcmp.ge.s32.totalorder %v10431_v49, %v10195_v15 }
 0x2de   : > { %14949 = vst [vmem:[#allocation109_spill] sm:$0xff] %v14948_v0  ;;  %7047 = vmatpush.msk.msra.mxu3 %vm11044_vm11, %v14622_v34  ;;  %v14954_v40 = vsel %vm11066_vm8, 4294967295, %v14953_v40  ;;  %vm3557_vm10 = vcmp.lt.s32.totalorder %v10431_v49, %v10197_v59  ;;  %vm11081_vm6 = vmand %vm3333_vm15, %vm3492_vm4  ;;  %v14956_v61 = vmov 0  ;;  %v14959_v37 = vmov 0 }
 0x2df   : > { %14952 = vst [vmem:[#allocation110_spill] sm:$0xff] %v14951_v14  ;;  %v14957_v61 = vsel %vm11081_vm6, 4294967295, %v14956_v61  ;;  %vm11088_vm7 = vmand %vm3414_vm1, %vm3573_vm5  ;;  %vm3390_vm0 = vcmp.ge.s32.totalorder %v10431_v49, %v10212_v47  ;;  %vm3549_vm11 = vcmp.lt.s32.totalorder %v10431_v49, %v10214_v6  ;;  %7043 = vmatpush.msk.msra.mxu2 %vm11081_vm6, %v14622_v34  ;;  %v14962_v14 = vmov 0 }
 0x2e0   : > { %14955 = vst [vmem:[#allocation111_spill] sm:$0xff] %v14954_v40  ;;  %7048 = vmatpush.msk.msra.mxu3 %vm11066_vm8, %v14622_v34  ;;  %v14960_v37 = vsel %vm11088_vm7, 4294967295, %v14959_v37  ;;  %vm11099_vm15 = vmand %vm3406_vm3, %vm3565_vm9  ;;  %vm3382_vm5 = vcmp.ge.s32.totalorder %v10431_v49, %v10232_v31  ;;  %vm3541_vm4 = vcmp.lt.s32.totalorder %v10431_v49, %v10245_v60  ;;  %v14965_v58 = vmov 0 }
 0x2e1   : > { %14958 = vst [vmem:[#allocation112_spill] sm:$0xff] %v14957_v61  ;;  %v14963_v14 = vsel %vm11099_vm15, 4294967295, %v14962_v14  ;;  %vm11110_vm1 = vmand %vm3398_vm13, %vm3557_vm10  ;;  %vm3374_vm9 = vcmp.ge.s32.totalorder %v10431_v49, %v10266_v27  ;;  %vm3533_vm3 = vcmp.lt.s32.totalorder %v10431_v49, %v10286_v25  ;;  %v14968_v61 = vmov 0 }
 0x2e2   : > { %14961 = vst [vmem:[#allocation113_spill] sm:$0xff] %v14960_v37  ;;  %7049 = vmatpush.msk.msra.mxu3 %vm11088_vm7, %v14622_v34  ;;  %v14966_v58 = vsel %vm11110_vm1, 4294967295, %v14965_v58  ;;  %vm11118_vm6 = vmand %vm3390_vm0, %vm3549_vm11  ;;  %vm3343_vm8 = vcmp.ge.s32.totalorder %v10764_v28, %v10656_v41  ;;  %v14971_v60 = vmov 0  ;;  %vm3502_vm10 = vcmp.lt.s32.totalorder %v10764_v28, %v10667_v46 }
 0x2e3   : > { %14964 = vst [vmem:[#allocation114_spill] sm:$0xff] %v14963_v14  ;;  %v14969_v61 = vsel %vm11118_vm6, 4294967295, %v14968_v61  ;;  %vm11127_vm13 = vmand %vm3382_vm5, %vm3541_vm4  ;;  %v14974_v50 = vmov 0  ;;  %vm3344_vm11 = vcmp.ge.s32.totalorder %v10775_v22, %v10656_v41  ;;  %vm3503_vm0 = vcmp.lt.s32.totalorder %v10775_v22, %v10667_v46 }
 0x2e4   : > { %14967 = vst [vmem:[#allocation115_spill] sm:$0xff] %v14966_v58  ;;  %7050 = vmatpush.msk.msra.mxu3 %vm11099_vm15, %v14622_v34  ;;  %v14972_v60 = vsel %vm11127_vm13, 4294967295, %v14971_v60  ;;  %vm11133_vm7 = vmand %vm3374_vm9, %vm3533_vm3  ;;  %v14977_v25 = vmov 0  ;;  %vm3345_vm4 = vcmp.ge.s32.totalorder %v10785_v17, %v10656_v41  ;;  %vm3504_vm9 = vcmp.lt.s32.totalorder %v10785_v17, %v10667_v46 }
 0x2e5   : > { %14970 = vst [vmem:[#allocation116_spill] sm:$0xff] %v14969_v61  ;;  %v14975_v50 = vsel %vm11133_vm7, 4294967295, %v14974_v50  ;;  %vm11144_vm5 = vmand %vm3343_vm8, %vm3502_vm10  ;;  %v14980_v27 = vmov 0  ;;  %vm3346_vm15 = vcmp.ge.s32.totalorder %v10809_v16, %v10656_v41  ;;  %vm3335_vm10 = vcmp.ge.s32.totalorder %v10764_v28, %v10670_v51 }
 0x2e6   : > { %14973 = vst [vmem:[#allocation117_spill] sm:$0xff] %v14972_v60  ;;  %7051 = vmatpush.msk.msra.mxu3 %vm11110_vm1, %v14622_v34  ;;  %v14978_v25 = vsel %vm11144_vm5, 4294967295, %v14977_v25  ;;  %vm11152_vm3 = vmand %vm3344_vm11, %vm3503_vm0  ;;  %vm3505_vm1 = vcmp.lt.s32.totalorder %v10809_v16, %v10667_v46  ;;  %vm3494_vm11 = vcmp.lt.s32.totalorder %v10764_v28, %v10682_v54  ;;  %vm3495_vm5 = vcmp.lt.s32.totalorder %v10775_v22, %v10682_v54 }
 0x2e7   : > { %14976 = vst [vmem:[#allocation118_spill] sm:$0xff] %v14975_v50  ;;  %v14981_v27 = vsel %vm11152_vm3, 4294967295, %v14980_v27  ;;  %vm11163_vm8 = vmand %vm3345_vm4, %vm3504_vm9  ;;  %vm3336_vm3 = vcmp.ge.s32.totalorder %v10775_v22, %v10670_v51  ;;  %v14992_v45 = vmov 0  ;;  %vm3496_vm9 = vcmp.lt.s32.totalorder %v10785_v17, %v10682_v54 }
 0x2e8   : > { %14979 = vst [vmem:[#allocation119_spill] sm:$0xff] %v14978_v25  ;;  %7052 = vmatpush.msk.msra.mxu3 %vm11118_vm6, %v14622_v34  ;;  %v14983_v25 = vmov 0  ;;  %vm11171_vm0 = vmand %vm3346_vm15, %vm3505_vm1  ;;  %vm3337_vm15 = vcmp.ge.s32.totalorder %v10785_v17, %v10670_v51  ;;  %v4125_v47 = vsel %vm10902_vm12, %v14665_v8, 0  ;;  %v4117_v38 = vsel %vm10975_vm14, %v14667_v23, 0 }
 0x2e9   : > { %14982 = vst [vmem:[#allocation120_spill] sm:$0xff] %v14981_v27  ;;  %v14984_v25 = vsel %vm11163_vm8, 4294967295, %v14983_v25  ;;  %v14986_v27 = vmov 0  ;;  %vm11182_vm4 = vmand %vm3335_vm10, %vm3494_vm11  ;;  %vm15001_vm11 = vnez %v14828_v7  ;;  %vm15025_vm8 = vnez %v14857_v20 }
 0x2ea   : > { %14985 = vst [vmem:[#allocation121_spill] sm:$0xff] %v14984_v25  ;;  %v14987_v27 = vsel %vm11171_vm0, 4294967295, %v14986_v27  ;;  %7053 = vmatpush.msk.msra.mxu3 %vm11127_vm13, %v14622_v34  ;;  %v14989_v25 = vmov 0  ;;  %vm11188_vm1 = vmand %vm3336_vm3, %vm3495_vm5  ;;  %vm3338_vm0 = vcmp.ge.s32.totalorder %v10809_v16, %v10670_v51  ;;  %vm3497_vm5 = vcmp.lt.s32.totalorder %v10809_v16, %v10682_v54 }
 0x2eb   : > { %14988 = vst [vmem:[#allocation122_spill] sm:$0xff] %v14987_v27  ;;  %v14990_v25 = vsel %vm11182_vm4, 4294967295, %v14989_v25  ;;  %v14993_v45 = vsel %vm11188_vm1, 4294967295, %v14992_v45  ;;  %vm11199_vm10 = vmand %vm3337_vm15, %vm3496_vm9  ;;  %v14995_v27 = vmov 0  ;;  %vm3342_vm15 = vcmp.ge.s32.totalorder %v10431_v49, %v10656_v41 }
 0x2ec   : > { %14991 = vst [vmem:[#allocation123_spill] sm:$0xff] %v14990_v25  ;;  %7054 = vmatpush.msk.msra.mxu3 %vm11133_vm7, %v14622_v34  ;;  %v14996_v27 = vsel %vm11199_vm10, 4294967295, %v14995_v27  ;;  %vm11205_vm3 = vmand %vm3338_vm0, %vm3497_vm5  ;;  %v14998_v25 = vmov 0  ;;  %vm3501_vm9 = vcmp.lt.s32.totalorder %v10431_v49, %v10667_v46  ;;  %vm15002_vm0 = vnez %v14837_v26  ;;  %v11242_v46 = vpop.permute.xlu2 %4342 }
 0x2ed   : > { %14994 = vst [vmem:[#allocation124_spill] sm:$0xff] %v14993_v45  ;;  %v14999_v25 = vsel %vm11205_vm3, 4294967295, %v14998_v25  ;;  %vm3334_vm5 = vcmp.ge.s32.totalorder %v10431_v49, %v10670_v51  ;;  %vm3493_vm3 = vcmp.lt.s32.totalorder %v10431_v49, %v10682_v54  ;;  %vm11226_vm10 = vmand %vm3342_vm15, %vm3501_vm9  ;;  %v15006_v41 = vmov 0  ;;  %v11240_v51 = vpop.permute.xlu1 %4337  ;;  %v11244_v54 = vpop.permute.xlu0 %4332 }
 0x2ee   : > { %14997 = vst [vmem:[#allocation125_spill] sm:$0xff] %v14996_v27  ;;  %7055 = vmatpush.msk.msra.mxu3 %vm10548_vm2, %v14622_v34  ;;  %vm11233_vm1 = vmand %vm3334_vm5, %vm3493_vm3  ;;  %vm15019_vm3 = vnez %v14703_v63  ;;  %vm15020_vm15 = vnez %v14748_v36  ;;  %vm15021_vm9 = vnez %v14708_v13  ;;  %vm15022_vm5 = vnez %v14751_v32 }
 0x2ef   : > { %15000 = vst [vmem:[#allocation126_spill] sm:$0xff] %v14999_v25  ;;  %v15003_v25 = vmov 0  ;;  %v15007_v41 = vsel %vm11233_vm1, 4294967295, %v15006_v41  ;;  %v4114_v18 = vsel %vm15021_vm9, %v14667_v23, 0  ;;  %vm15024_vm4 = vnez %v14854_v44 }
 0x2f0   : > { %7056 = vmatpush.msk.msra.mxu3 %vm15001_vm11, %v14622_v34  ;;  %v15004_v25 = vsel %vm11226_vm10, 4294967295, %v15003_v25  ;;  %15008 = vst [vmem:[#allocation128_spill] sm:$0xff] %v15007_v41  ;;  %v4124_v56 = vsel %vm15024_vm4, %v14665_v8, 0  ;;  %v4116_v6 = vsel %vm15025_vm8, %v14667_v23, 0  ;;  %vm15028_vm11 = vnez %v14757_v12 }
 0x2f1   : > { %15005 = vst [vmem:[#allocation127_spill] sm:$0xff] %v15004_v25  ;;  %v6711_v12 = vsel %vm10975_vm14, 1.0, %v14625_v24  ;;  %v4193_v30 = vadd.s32 %v4125_v47, %v4117_v38  ;;  %v15160_v50 = vmov 0  ;;  %v15185_v53 = vmov 1.0  }
 0x2f2   : > { %7057 = vmatpush.msk.msra.mxu3 %vm15002_vm0, %v14622_v34  ;;  %15009 = vst [vmem:[#allocation129_spill] sm:$0xff] %v11240_v51  ;;  %vm15027_vm0 = vnez %v14713_v48  ;;  %v4173_v48 = vadd.s32 %v4124_v56, %v4116_v6  ;;  %v15212_v21 = vmov 0  ;;  %v15284_v36 = vmov 0 }
 0x2f3   : > { %15010 = vst [vmem:[#allocation130_spill] sm:$0xff] %v11242_v46  ;;  %v4122_v46 = vsel %vm15019_vm3, %v14665_v8, 0  ;;  %v6700_v15 = vsel %vm15027_vm0, 1.0, %v14625_v24  ;;  %v4106_v57 = vsel %vm15027_vm0, %v14669_v2, 0 }
 0x2f4   : > { %7058 = vmatpush.msk.msra.mxu3 %vm11226_vm10, %v14622_v34  ;;  %15011 = vst [vmem:[#allocation131_spill] sm:$0xff] %v11244_v54  ;;  %v11248_v27 = vpop.permute.xlu2 %4352  ;;  %v4123_v54 = vsel %vm15020_vm15, %v14665_v8, 0  ;;  %v4132_v39 = vadd.s32 %v4122_v46, %v4114_v18  ;;  %v6701_v8 = vsel %vm15028_vm11, 1.0, %v14625_v24  ;;  %v6708_v46 = vsel %vm15021_vm9, 1.0, %v14625_v24 }
 0x2f5   : > { %v11246_v49 = vpop.permute.xlu1 %4347  ;;  %v11250_v45 = vpop.permute.xlu0 %4357 }
 0x2f6   : > { %7059 = vmatpush.msk.msra.mxu3 %vm11233_vm1, %v14622_v34  ;;  %15012 = vst [vmem:[#allocation132_spill] sm:$0xff] %v11250_v45  ;;  %v4115_v34 = vsel %vm15022_vm5, %v14667_v23, 0  ;;  %v6710_v23 = vsel %vm15025_vm8, 1.0, %v14625_v24  ;;  %v4133_v32 = vadd.s32 %v4132_v39, %v4106_v57  ;;  %vm15047_vm8 = vnez %v14948_v0 }
 0x2f7   : > { %v4152_v11 = vadd.s32 %v4123_v54, %v4115_v34  ;;  %v4107_v34 = vsel %vm15028_vm11, %v14669_v2, 0  ;;  %v6709_v54 = vsel %vm15022_vm5, 1.0, %v14625_v24  ;;  %vm15030_vm11 = vnez %v14860_v35 }
 0x2f8   : > { %v6702_v43 = vsel %vm15030_vm11, 1.0, %v14625_v24  ;;  %v4108_v13 = vsel %vm15030_vm11, %v14669_v2, 0  ;;  %vm15036_vm11 = vnez %v14942_v52  ;;  %v15163_v52 = vld [vmem:[#allocation27_spill] sm:$0xff]  ;;  %v15166_v35 = vmov 0 }
 0x2f9   : > { %v4153_v20 = vadd.s32 %v4152_v11, %v4107_v34  ;;  %v4109_v39 = vsel %vm15036_vm11, %v14669_v2, 0  ;;  %v4174_v11 = vadd.s32 %v4173_v48, %v4108_v13  ;;  %v6718_v13 = vsel %vm15024_vm4, 1.0, %v14625_v24  ;;  %v15307_v63 = vld [vmem:[#allocation127_spill] sm:$0xff] }
 0x2fa   : > { %v4194_v48 = vadd.s32 %v4193_v30, %v4109_v39  ;;  %v15045_v30 = vld [vmem:[#allocation81_spill] sm:$0xff]  ;;  %vm15101_vm4 = vnez %v14900_v3 }
 0x2fb   : > { %vm15046_vm14 = vnez %v15045_v30  ;;  %v15155_v30 = vld [vmem:[#allocation6_spill] sm:$0xff] }
 0x2fc   : > { %v11254_v7 = vpop.permute.xlu2 %4367 }
 0x2fd   : > { %v11252_v26 = vpop.permute.xlu1 %4362  ;;  %15014 = vst [vmem:[#allocation134_spill] sm:$0xff] %v11254_v7  ;;  %v11256_v25 = vpop.permute.xlu0 %4372 }
 0x2fe   : > { %15013 = vst [vmem:[#allocation133_spill] sm:$0xff] %v11252_v26 }
 0x2ff   : > { %15015 = vst [vmem:[#allocation135_spill] sm:$0xff] %v11256_v25 }
 0x304   : > { %v11260_v5 = vpop.permute.xlu2 %4382 }
 0x305   : > { %v11258_v41 = vpop.permute.xlu1 %4377  ;;  %15017 = vst [vmem:[#allocation137_spill] sm:$0xff] %v11260_v5  ;;  %v11262_v51 = vpop.permute.xlu0 %4387 }
 0x306   : > { %15016 = vst [vmem:[#allocation136_spill] sm:$0xff] %v11258_v41 }
 0x307   : > { %15018 = vst [vmem:[#allocation138_spill] sm:$0xff] %v11262_v51 }
 0x30c   : > { %v11290_v59 = vpop.permute.xlu2 %4397 }
 0x30d   : > { %v11276_v31 = vpop.permute.xlu1 %4392  ;;  %15026 = vst [vmem:[#allocation140_spill] sm:$0xff] %v11290_v59  ;;  %v11304_v18 = vpop.permute.xlu0 %4402  ;;  %v11325_v62 = vmul.f32 %v6700_v15, %v11290_v59  ;;  %v11328_v56 = vmul.f32 %v6701_v8, %v11290_v59  ;;  %v11346_v8 = vmul.f32 %v6702_v43, %v11290_v59  ;;  %v6703_v15 = vsel %vm15036_vm11, 1.0, %v14625_v24 }
 0x30e   : > { %15023 = vst [vmem:[#allocation139_spill] sm:$0xff] %v11276_v31  ;;  %v11331_v6 = vmul.f32 %v6708_v46, %v11304_v18  ;;  %v11334_v38 = vmul.f32 %v6709_v54, %v11304_v18  ;;  %v11337_v47 = vmul.f32 %v6710_v23, %v11304_v18  ;;  %v11343_v57 = vmul.f32 %v6711_v12, %v11304_v18  ;;  %v15041_v54 = vld [vmem:[#allocation12_spill] sm:$0xff] }
 0x30f   : > { %15029 = vst [vmem:[#allocation141_spill] sm:$0xff] %v11304_v18  ;;  %v6716_v23 = vsel %vm15019_vm3, 1.0, %v14625_v24  ;;  %v6717_v46 = vsel %vm15020_vm15, 1.0, %v14625_v24  ;;  %v6719_v43 = vsel %vm10902_vm12, 1.0, %v14625_v24  ;;  %vm15040_vm11 = vnez %v14718_v33  ;;  %v15156_v33 = vld [vmem:[#allocation9_spill] sm:$0xff] }
 0x310   : > { %15031 = vst [vmem:[#allocation142_spill] sm:$0xff] %v11325_v62  ;;  %v6692_v12 = vsel %vm15040_vm11, 1.0, %v14625_v24  ;;  %v4100_v39 = vsel %vm15046_vm14, %v15041_v54, 0  ;;  %v4101_v18 = vsel %vm15047_vm8, %v15041_v54, 0  ;;  %vm15113_vm3 = vnez %v14902_v55 }
 0x311   : > { %15032 = vst [vmem:[#allocation143_spill] sm:$0xff] %v11328_v56  ;;  %v11399_v2 = vmul.f32 %v6692_v12, %v11276_v31 }
 0x312   : > { %15033 = vst [vmem:[#allocation144_spill] sm:$0xff] %v11331_v6 }
 0x313   : > { %15034 = vst [vmem:[#allocation145_spill] sm:$0xff] %v11334_v38 }
 0x314   : > { %15035 = vst [vmem:[#allocation146_spill] sm:$0xff] %v11337_v47  ;;  %v15042_v47 = vld [vmem:[#allocation55_spill] sm:$0xff] }
 0x315   : > { %15037 = vst [vmem:[#allocation147_spill] sm:$0xff] %v11343_v57  ;;  %v11351_v34 = vpop.permute.xlu1 %4407  ;;  %v4098_v57 = vsel %vm15040_vm11, %v15041_v54, 0  ;;  %vm15043_vm0 = vnez %v15042_v47 }
 0x316   : > { %15038 = vst [vmem:[#allocation148_spill] sm:$0xff] %v11346_v8  ;;  %v4099_v38 = vsel %vm15043_vm0, %v15041_v54, 0  ;;  %v11375_v8 = vmul.f32 %v6703_v15, %v11290_v59  ;;  %v6693_v56 = vsel %vm15043_vm0, 1.0, %v14625_v24  ;;  %v11387_v6 = vmul.f32 %v6716_v23, %v11351_v34 }
 0x317   : > { %15039 = vst [vmem:[#allocation149_spill] sm:$0xff] %v11351_v34  ;;  %v11390_v62 = vmul.f32 %v6717_v46, %v11351_v34  ;;  %v11393_v15 = vmul.f32 %v6718_v13, %v11351_v34  ;;  %v4134_v59 = vadd.s32 %v4133_v32, %v4098_v57  ;;  %v4154_v47 = vadd.s32 %v4153_v20, %v4099_v38  ;;  %v15053_v13 = vld [vmem:[#allocation14_spill] sm:$0xff]  ;;  %v15056_v20 = vld [vmem:[#allocation56_spill] sm:$0xff] }
 0x318   : > { %15044 = vst [vmem:[#allocation150_spill] sm:$0xff] %v11375_v8  ;;  %v11396_v8 = vmul.f32 %v6719_v43, %v11351_v34  ;;  %v6694_v54 = vsel %vm15046_vm14, 1.0, %v14625_v24  ;;  %v4175_v23 = vadd.s32 %v4174_v11, %v4100_v39  ;;  %v6695_v46 = vsel %vm15047_vm8, 1.0, %v14625_v24  ;;  %v15058_v11 = vld [vmem:[#allocation83_spill] sm:$0xff] }
 0x319   : > { %15048 = vst [vmem:[#allocation151_spill] sm:$0xff] %v11387_v6  ;;  %vm15057_vm11 = vnez %v15056_v20  ;;  %vm15059_vm8 = vnez %v15058_v11  ;;  %v11435_v34 = vmul.f32 %v6694_v54, %v11276_v31  ;;  %v11438_v6 = vmul.f32 %v6695_v46, %v11276_v31 }
 0x31a   : > { %15049 = vst [vmem:[#allocation152_spill] sm:$0xff] %v11390_v62  ;;  %v4195_v62 = vadd.s32 %v4194_v48, %v4101_v18  ;;  %v6685_v38 = vsel %vm15057_vm11, 1.0, %v14625_v24  ;;  %v4091_v57 = vsel %vm15057_vm11, %v15053_v13, 0  ;;  %v4092_v18 = vsel %vm15059_vm8, %v15053_v13, 0 }
 0x31b   : > { %15050 = vst [vmem:[#allocation153_spill] sm:$0xff] %v11393_v15  ;;  %v15054_v15 = vld [vmem:[#allocation39_spill] sm:$0xff]  ;;  %v11423_v48 = vmul.f32 %v6693_v56, %v11276_v31  ;;  %v6686_v12 = vsel %vm15059_vm8, 1.0, %v14625_v24  ;;  %v4155_v20 = vadd.s32 %v4154_v47, %v4091_v57  ;;  %vm15073_vm8 = vnez %v14875_v4  ;;  %v15088_v4 = vld [vmem:[#allocation18_spill] sm:$0xff] }
 0x31c   : > { %15051 = vst [vmem:[#allocation154_spill] sm:$0xff] %v11396_v8  ;;  %vm15055_vm0 = vnez %v15054_v15  ;;  %v11447_v15 = vmul.f32 %v6685_v38, %v11262_v51  ;;  %v6678_v47 = vsel %vm15073_vm8, 1.0, %v14625_v24  ;;  %vm15074_vm14 = vnez %v14960_v37 }
 0x31d   : > { %15052 = vst [vmem:[#allocation155_spill] sm:$0xff] %v11399_v2  ;;  %v4090_v43 = vsel %vm15055_vm0, %v15053_v13, 0  ;;  %v6684_v32 = vsel %vm15055_vm0, 1.0, %v14625_v24  ;;  %vm15061_vm0 = vnez %v14954_v40  ;;  %v4176_v40 = vadd.s32 %v4175_v23, %v4092_v18 }
 0x31e   : > { %15060 = vst [vmem:[#allocation156_spill] sm:$0xff] %v11423_v48  ;;  %v6687_v39 = vsel %vm15061_vm0, 1.0, %v14625_v24  ;;  %v4093_v8 = vsel %vm15061_vm0, %v15053_v13, 0  ;;  %v4135_v56 = vadd.s32 %v4134_v59, %v4090_v43  ;;  %v15064_v48 = vld [vmem:[#allocation42_spill] sm:$0xff]  ;;  %v11444_v11 = vmul.f32 %v6684_v32, %v11262_v51  ;;  %v15070_v59 = vld [vmem:[#allocation57_spill] sm:$0xff]  ;;  %v15077_v32 = vld [vmem:[#allocation16_spill] sm:$0xff] }
 0x31f   : > { %15062 = vst [vmem:[#allocation157_spill] sm:$0xff] %v11435_v34  ;;  %vm15065_vm11 = vnez %v15064_v48  ;;  %v11450_v13 = vmul.f32 %v6686_v12, %v11262_v51  ;;  %v4196_v54 = vadd.s32 %v4195_v62, %v4093_v8  ;;  %v11453_v46 = vmul.f32 %v6687_v39, %v11262_v51  ;;  %v15075_v62 = vld [vmem:[#allocation44_spill] sm:$0xff]  ;;  %v15079_v39 = vld [vmem:[#allocation59_spill] sm:$0xff]  ;;  %v5292_v48 = vpop.f32.mrf.mxu2 }
 0x320   : > { %15063 = vst [vmem:[#allocation158_spill] sm:$0xff] %v11438_v6  ;;  %v6676_v2 = vsel %vm15065_vm11, 1.0, %v14625_v24  ;;  %vm15071_vm0 = vnez %v15070_v59  ;;  %v6679_v23 = vsel %vm15074_vm14, 1.0, %v14625_v24  ;;  %vm15076_vm5 = vnez %v15075_v62 }
 0x321   : > { %15066 = vst [vmem:[#allocation159_spill] sm:$0xff] %v11444_v11  ;;  %v6677_v43 = vsel %vm15071_vm0, 1.0, %v14625_v24  ;;  %v11459_v6 = vmul.f32 %v6676_v2, %v11260_v5  ;;  %v6668_v8 = vsel %vm15076_vm5, 1.0, %v14625_v24  ;;  %v4082_v38 = vsel %vm15065_vm11, %v15077_v32, 0 }
 0x322   : > { %15067 = vst [vmem:[#allocation160_spill] sm:$0xff] %v11447_v15  ;;  %v4083_v2 = vsel %vm15071_vm0, %v15077_v32, 0  ;;  %v4084_v57 = vsel %vm15073_vm8, %v15077_v32, 0  ;;  %v4085_v18 = vsel %vm15074_vm14, %v15077_v32, 0  ;;  %v11483_v12 = vmul.f32 %v6677_v43, %v11260_v5 }
 0x323   : > { %15068 = vst [vmem:[#allocation161_spill] sm:$0xff] %v11450_v13  ;;  %vm15080_vm9 = vnez %v15079_v39  ;;  %vm15081_vm11 = vnez %v14882_v42  ;;  %vm15082_vm0 = vnez %v14963_v14  ;;  %v11495_v15 = vmul.f32 %v6678_v47, %v11260_v5 }
 0x324   : > { %15069 = vst [vmem:[#allocation162_spill] sm:$0xff] %v11453_v46  ;;  %v6669_v46 = vsel %vm15080_vm9, 1.0, %v14625_v24  ;;  %v6670_v34 = vsel %vm15081_vm11, 1.0, %v14625_v24  ;;  %v6671_v13 = vsel %vm15082_vm0, 1.0, %v14625_v24  ;;  %v11498_v31 = vmul.f32 %v6679_v23, %v11260_v5 }
 0x325   : > { %15072 = vst [vmem:[#allocation163_spill] sm:$0xff] %v11459_v6  ;;  %v11501_v43 = vmul.f32 %v6668_v8, %v11258_v41  ;;  %v4136_v6 = vadd.s32 %v4135_v56, %v4082_v38  ;;  %v4156_v32 = vadd.s32 %v4155_v20, %v4083_v2  ;;  %v4177_v51 = vadd.s32 %v4176_v40, %v4084_v57  ;;  %v15097_v2 = vld [vmem:[#allocation47_spill] sm:$0xff]  ;;  %v15099_v57 = vld [vmem:[#allocation61_spill] sm:$0xff] }
 0x326   : > { %15078 = vst [vmem:[#allocation164_spill] sm:$0xff] %v11483_v12  ;;  %v15086_v12 = vld [vmem:[#allocation46_spill] sm:$0xff]  ;;  %v4197_v37 = vadd.s32 %v4196_v54, %v4085_v18  ;;  %v4075_v59 = vsel %vm15080_vm9, %v15088_v4, 0  ;;  %v11510_v47 = vmul.f32 %v6669_v46, %v11258_v41  ;;  %v11513_v23 = vmul.f32 %v6670_v34, %v11258_v41  ;;  %v15093_v54 = vld [vmem:[#allocation60_spill] sm:$0xff] }
 0x327   : > { %15083 = vst [vmem:[#allocation165_spill] sm:$0xff] %v11495_v15  ;;  %vm15087_vm14 = vnez %v15086_v12  ;;  %v11516_v8 = vmul.f32 %v6671_v13, %v11258_v41  ;;  %v4074_v56 = vsel %vm15076_vm5, %v15088_v4, 0  ;;  %v4077_v40 = vsel %vm15082_vm0, %v15088_v4, 0  ;;  %v15102_v15 = vld [vmem:[#allocation49_spill] sm:$0xff] }
 0x328   : > { %15084 = vst [vmem:[#allocation166_spill] sm:$0xff] %v11498_v31  ;;  %v6660_v11 = vsel %vm15087_vm14, 1.0, %v14625_v24  ;;  %vm15094_vm9 = vnez %v15093_v54  ;;  %v4076_v34 = vsel %vm15081_vm11, %v15088_v4, 0  ;;  %vm15095_vm8 = vnez %v14896_v1 }
 0x329   : > { %15085 = vst [vmem:[#allocation167_spill] sm:$0xff] %v11501_v43  ;;  %v11525_v20 = vmul.f32 %v6660_v11, %v11256_v25  ;;  %v6661_v46 = vsel %vm15094_vm9, 1.0, %v14625_v24  ;;  %v6662_v13 = vsel %vm15095_vm8, 1.0, %v14625_v24  ;;  %vm15096_vm5 = vnez %v14966_v58  ;;  %v5272_v43 = vpop.f32.mrf.mxu0 }
 0x32a   : > { %15089 = vst [vmem:[#allocation168_spill] sm:$0xff] %v11510_v47  ;;  %v6663_v38 = vsel %vm15096_vm5, 1.0, %v14625_v24  ;;  %vm15098_vm0 = vnez %v15097_v2  ;;  %vm15100_vm12 = vnez %v15099_v57  ;;  %v6654_v31 = vsel %vm15101_vm4, 1.0, %v14625_v24  ;;  %v5252_v47 = vpop.f32.mrf.mxu1 }
 0x32b   : > { %15090 = vst [vmem:[#allocation169_spill] sm:$0xff] %v11513_v23  ;;  %v6652_v11 = vsel %vm15098_vm0, 1.0, %v14625_v24  ;;  %v6653_v18 = vsel %vm15100_vm12, 1.0, %v14625_v24  ;;  %vm15103_vm11 = vnez %v15102_v15  ;;  %v4137_v4 = vadd.s32 %v4136_v6, %v4074_v56 }
 0x32c   : > { %15091 = vst [vmem:[#allocation170_spill] sm:$0xff] %v11516_v8  ;;  %v6655_v8 = vsel %vm11118_vm6, 1.0, %v14625_v24  ;;  %v6644_v23 = vsel %vm15103_vm11, 1.0, %v14625_v24  ;;  %v4198_v41 = vadd.s32 %v4197_v37, %v4077_v40  ;;  %v11555_v5 = vmul.f32 %v6661_v46, %v11256_v25  ;;  %v15114_v46 = vld [vmem:[#allocation20_spill] sm:$0xff] }
 0x32d   : > { %15092 = vst [vmem:[#allocation171_spill] sm:$0xff] %v11525_v20  ;;  %v4157_v20 = vadd.s32 %v4156_v32, %v4075_v59  ;;  %v4178_v14 = vadd.s32 %v4177_v51, %v4076_v34  ;;  %v11558_v42 = vmul.f32 %v6662_v13, %v11256_v25  ;;  %v11561_v39 = vmul.f32 %v6663_v38, %v11256_v25  ;;  %v15111_v32 = vld [vmem:[#allocation63_spill] sm:$0xff]  ;;  %v15115_v13 = vld [vmem:[#allocation53_spill] sm:$0xff] }
 0x32e   : > { %15104 = vst [vmem:[#allocation47_spill] sm:$0xff] %v11555_v5  ;;  %v11564_v62 = vmul.f32 %v6652_v11, %v11254_v7  ;;  %v11567_v0 = vmul.f32 %v6653_v18, %v11254_v7  ;;  %v11570_v6 = vmul.f32 %v6654_v31, %v11254_v7  ;;  %v11573_v37 = vmul.f32 %v6655_v8, %v11254_v7  ;;  %v15117_v11 = vld [vmem:[#allocation65_spill] sm:$0xff] }
 0x32f   : > { %15105 = vst [vmem:[#allocation61_spill] sm:$0xff] %v11558_v42  ;;  %v11576_v51 = vmul.f32 %v6644_v23, %v11252_v26  ;;  %v5273_v59 = vadd.f32 %v5272_v43, %v5252_v47  ;;  %vm15112_vm15 = vnez %v15111_v32  ;;  %v6646_v40 = vsel %vm15113_vm3, 1.0, %v14625_v24  ;;  %v15151_v7 = vld [vmem:[#allocation21_spill] sm:$0xff] }
 0x330   : > { %15106 = vst [vmem:[#allocation49_spill] sm:$0xff] %v11561_v39  ;;  %v6645_v56 = vsel %vm15112_vm15, 1.0, %v14625_v24  ;;  %v6647_v31 = vsel %vm11127_vm13, 1.0, %v14625_v24  ;;  %v4066_v8 = vsel %vm15087_vm14, %v15114_v46, 0  ;;  %v4067_v43 = vsel %vm15094_vm9, %v15114_v46, 0 }
 0x331   : > { %15107 = vst [vmem:[#allocation172_spill] sm:$0xff] %v11564_v62  ;;  %v4068_v47 = vsel %vm15095_vm8, %v15114_v46, 0  ;;  %v4069_v23 = vsel %vm15096_vm5, %v15114_v46, 0  ;;  %v5293_v34 = vadd.f32 %v5292_v48, %v5273_v59  ;;  %vm15116_vm3 = vnez %v15115_v13 }
 0x332   : > { %15108 = vst [vmem:[#allocation173_spill] sm:$0xff] %v11567_v0  ;;  %v6636_v38 = vsel %vm15116_vm3, 1.0, %v14625_v24  ;;  %vm15118_vm14 = vnez %v15117_v11  ;;  %vm15119_vm9 = vnez %v14926_v9  ;;  %v11609_v42 = vmul.f32 %v6645_v56, %v11252_v26  ;;  %v5312_v56 = vpop.f32.mrf.mxu3  ;;  %v5332_v54 = vpop.f32.mrf.mxu1  ;;  %v15169_v11 = vld [vmem:[#allocation43_spill] sm:$0xff] }
 0x333   : > { %15109 = vst [vmem:[#allocation174_spill] sm:$0xff] %v11570_v6  ;;  %v6637_v18 = vsel %vm15118_vm14, 1.0, %v14625_v24  ;;  %v6638_v39 = vsel %vm15119_vm9, 1.0, %v14625_v24  ;;  %v11612_v5 = vmul.f32 %v6646_v40, %v11252_v26  ;;  %v11615_v48 = vmul.f32 %v6647_v31, %v11252_v26  ;;  %v15146_v26 = vld [vmem:[#allocation38_spill] sm:$0xff]  ;;  %v15192_v6 = vld [vmem:[#allocation15_spill] sm:$0xff] }
 0x334   : > { %15110 = vst [vmem:[#allocation175_spill] sm:$0xff] %v11573_v37  ;;  %v6639_v59 = vsel %vm11133_vm7, 1.0, %v14625_v24  ;;  %v11620_v46 = vadd.s32 %v4137_v4, %v4066_v8  ;;  %v11622_v25 = vadd.s32 %v4157_v20, %v4067_v43  ;;  %v11624_v58 = vadd.s32 %v4178_v14, %v4068_v47  ;;  %v15121_v4 = vld [vmem:[#allocation62_spill] sm:$0xff] }
 0x335   : > { %15120 = vst [vmem:[#allocation63_spill] sm:$0xff] %v11615_v48  ;;  %v11626_v1 = vadd.s32 %v4198_v41, %v4069_v23  ;;  %v11629_v40 = vmul.f32 %v6636_v38, %v11250_v45  ;;  %v11632_v31 = vmul.f32 %v6637_v18, %v11250_v45  ;;  %v11635_v12 = vmul.f32 %v6638_v39, %v11250_v45  ;;  %v15124_v41 = vld [vmem:[#allocation67_spill] sm:$0xff]  ;;  %v15126_v47 = vld [vmem:[#allocation66_spill] sm:$0xff]  ;;  %v5352_v38 = vpop.f32.mrf.mxu0 }
 0x336   : > { %vm15122_vm5 = vnez %v15121_v4  ;;  %v5313_v8 = vadd.f32 %v5312_v56, %v5293_v34  ;;  %v11641_v14 = vmul.f32 %v6639_v59, %v11250_v45  ;;  %vm15125_vm8 = vnez %v15124_v41  ;;  %v15144_v41 = vld [vmem:[#allocation19_spill] sm:$0xff]  ;;  %v15145_v4 = vld [vmem:[#allocation36_spill] sm:$0xff]  ;;  %v15191_v45 = vld [vmem:[#allocation13_spill] sm:$0xff] }
 0x337   : > { %v6628_v20 = vsel %vm15122_vm5, 1.0, %v14625_v24  ;;  %v6629_v43 = vsel %vm15125_vm8, 1.0, %v14625_v24  ;;  %vm15127_vm9 = vnez %v15126_v47  ;;  %vm3455_vm7 = vcmp.ge.s32.totalorder %v10764_v28, %v10063_v19 }
 0x338   : > { %15123 = vst [vmem:[#allocation176_spill] sm:$0xff] %v11641_v14  ;;  %v6620_v23 = vsel %vm15127_vm9, 1.0, %v14625_v24  ;;  %vm3614_vm14 = vcmp.lt.s32.totalorder %v10764_v28, %v10065_v10  ;;  %vm3458_vm5 = vcmp.ge.s32.totalorder %v10809_v16, %v10063_v19  ;;  %vm3617_vm3 = vcmp.lt.s32.totalorder %v10809_v16, %v10065_v10 }
 0x339   : > { %v5333_v39 = vadd.f32 %v5332_v54, %v5313_v8  ;;  %v11658_v34 = vmul.f32 %v6628_v20, %v11248_v27  ;;  %vm3456_vm9 = vcmp.ge.s32.totalorder %v10775_v22, %v10063_v19  ;;  %vm3615_vm8 = vcmp.lt.s32.totalorder %v10775_v22, %v10065_v10  ;;  %vm11674_vm15 = vmand %vm3455_vm7, %vm3614_vm14 }
 0x33a   : > { %v11665_v59 = vmul.f32 %v6629_v43, %v11248_v27  ;;  %v11668_v56 = vmul.f32 %v6620_v23, %v11246_v49  ;;  %vm3457_vm11 = vcmp.ge.s32.totalorder %v10785_v17, %v10063_v19  ;;  %vm3616_vm13 = vcmp.lt.s32.totalorder %v10785_v17, %v10065_v10  ;;  %vm11678_vm4 = vmand %vm3458_vm5, %vm3617_vm3  ;;  %v15134_v43 = vld [vmem:[#allocation11_spill] sm:$0xff]  ;;  %v15139_v10 = vld [vmem:[#allocation25_spill] sm:$0xff] }
 0x33b   : > { %v5353_v54 = vadd.f32 %v5352_v38, %v5333_v39  ;;  %v15128_v20 = vmov 0  ;;  %v15131_v8 = vmov 0  ;;  %vm3606_vm6 = vcmp.lt.s32.totalorder %v10764_v28, %v15134_v43  ;;  %v15135_v23 = vld [vmem:[#allocation31_spill] sm:$0xff]  ;;  %vm11688_vm1 = vmand %vm3456_vm9, %vm3615_vm8  ;;  %v15140_v38 = vld [vmem:[#allocation33_spill] sm:$0xff] }
 0x33c   : > { %v15129_v20 = vsel %vm11674_vm15, 4294967295, %v15128_v20  ;;  %v15132_v8 = vsel %vm11678_vm4, 4294967295, %v15131_v8  ;;  %v15136_v19 = vmov 0  ;;  %vm3448_vm14 = vcmp.ge.s32.totalorder %v10775_v22, %v10072_v29  ;;  %vm11700_vm0 = vmand %vm3457_vm11, %vm3616_vm13 }
 0x33d   : > { %15130 = vst [vmem:[#allocation177_spill] sm:$0xff] %v15129_v20  ;;  %v15137_v19 = vsel %vm11688_vm1, 4294967295, %v15136_v19  ;;  %vm3607_vm7 = vcmp.lt.s32.totalorder %v10775_v22, %v15134_v43  ;;  %v15141_v47 = vmov 0  ;;  %vm3608_vm9 = vcmp.lt.s32.totalorder %v10785_v17, %v15134_v43  ;;  %v15194_v20 = vld [vmem:[#allocation50_spill] sm:$0xff] }
 0x33e   : > { %15133 = vst [vmem:[#allocation178_spill] sm:$0xff] %v15132_v8  ;;  %v15142_v47 = vsel %vm11700_vm0, 4294967295, %v15141_v47  ;;  %vm15147_vm13 = vcmp.ge.s32.totalorder %v10764_v28, %v10072_v29  ;;  %v15152_v9 = vmov 0  ;;  %vm15176_vm10 = vcmp.ge.s32.totalorder %v10764_v28, %v15144_v41 }
 0x33f   : > { %15138 = vst [vmem:[#allocation11_spill] sm:$0xff] %v15137_v19  ;;  %vm11720_vm11 = vmand %vm15147_vm13, %vm3606_vm6  ;;  %v15182_v13 = vmov 0  ;;  %v15188_v48 = vmov 0  ;;  %v15193_v19 = vld [vmem:[#allocation48_spill] sm:$0xff]  ;;  %v15197_v0 = vmov 0  ;;  %vm15201_vm5 = vcmp.ge.s32.totalorder %v10764_v28, %v15139_v10 }
 0x340   : > { %15143 = vst [vmem:[#allocation31_spill] sm:$0xff] %v15142_v47  ;;  %vm11740_vm6 = vmand %vm3448_vm14, %vm3607_vm7  ;;  %vm15159_vm7 = vcmp.ge.s32.totalorder %v10785_v17, %v10072_v29  ;;  %vm15175_vm14 = vcmp.lt.s32.totalorder %v10764_v28, %v15151_v7  ;;  %v15202_v8 = vmov 0  ;;  %v15207_v47 = vmov 0 }
 0x341   : > { %v15153_v9 = vsel %vm11740_vm6, 4294967295, %v15152_v9  ;;  %vm11762_vm13 = vmand %vm15159_vm7, %vm3608_vm9  ;;  %vm15164_vm9 = vcmp.lt.s32.totalorder %v10809_v16, %v15134_v43  ;;  %vm15165_vm7 = vcmp.ge.s32.totalorder %v10809_v16, %v10072_v29  ;;  %v15172_v29 = vmov 0 }
 0x342   : > { %15154 = vst [vmem:[#allocation33_spill] sm:$0xff] %v15153_v9  ;;  %v15161_v50 = vsel %vm11762_vm13, 4294967295, %v15160_v50  ;;  %vm11782_vm8 = vmand %vm15165_vm7, %vm15164_vm9  ;;  %vm15170_vm9 = vcmp.lt.s32.totalorder %v10764_v28, %v15156_v33  ;;  %vm15171_vm7 = vcmp.ge.s32.totalorder %v10764_v28, %v15155_v30  ;;  %v15177_v43 = vmov 0 }
 0x343   : > { %v5372_v18 = vpop.f32.mrf.mxu2  ;;  %15162 = vst [vmem:[#allocation19_spill] sm:$0xff] %v15161_v50  ;;  %v15167_v35 = vsel %vm11782_vm8, 4294967295, %v15166_v35  ;;  %vm11802_vm3 = vmand %vm15171_vm7, %vm15170_vm9  ;;  %vm15180_vm9 = vcmp.lt.s32.totalorder %v10775_v22, %v15151_v7  ;;  %vm15181_vm7 = vcmp.ge.s32.totalorder %v10775_v22, %v15144_v41  ;;  %v15230_v50 = vld [vmem:[#allocation104_spill] sm:$0xff]  ;;  %v15258_v62 = vmov 0 }
 0x344   : > { %v5373_v39 = vadd.f32 %v5372_v18, %v5353_v54  ;;  %v15148_v54 = vmov 0  ;;  %15168 = vst [vmem:[#allocation36_spill] sm:$0xff] %v15167_v35  ;;  %v15173_v29 = vsel %vm11802_vm3, 4294967295, %v15172_v29  ;;  %vm11816_vm2 = vmand %vm15176_vm10, %vm15175_vm14  ;;  %vm15186_vm10 = vcmp.lt.s32.totalorder %v10775_v22, %v15156_v33 }
 0x345   : > { %v15149_v54 = vsel %vm11720_vm11, 4294967295, %v15148_v54  ;;  %15174 = vst [vmem:[#allocation38_spill] sm:$0xff] %v15173_v29  ;;  %v15178_v43 = vsel %vm11816_vm2, 4294967295, %v15177_v43  ;;  %vm11826_vm12 = vmand %vm15181_vm7, %vm15180_vm9  ;;  %vm15187_vm14 = vcmp.ge.s32.totalorder %v10775_v22, %v15155_v30  ;;  %vm15200_vm7 = vcmp.lt.s32.totalorder %v10764_v28, %v15163_v52 }
 0x346   : > { %15150 = vst [vmem:[#allocation25_spill] sm:$0xff] %v15149_v54  ;;  %v15183_v13 = vsel %vm11826_vm12, 4294967295, %v15182_v13  ;;  %vm11844_vm9 = vmand %vm15187_vm14, %vm15186_vm10  ;;  %vm15195_vm10 = vcmp.lt.s32.totalorder %v10785_v17, %v15156_v33  ;;  %vm15196_vm14 = vcmp.ge.s32.totalorder %v10785_v17, %v15155_v30  ;;  %v15227_v35 = vmov 0 }
 0x347   : > { %15179 = vst [vmem:[#allocation21_spill] sm:$0xff] %v15178_v43  ;;  %v15189_v48 = vsel %vm11844_vm9, 4294967295, %v15188_v48  ;;  %v15234_v54 = vmov 0  ;;  %v15294_v43 = vld [vmem:[#allocation110_spill] sm:$0xff] }
 0x348   : > { %15184 = vst [vmem:[#allocation6_spill] sm:$0xff] %v15183_v13 }
 0x349   : > { %15190 = vst [vmem:[#allocation9_spill] sm:$0xff] %v15189_v48  ;;  %v15237_v48 = vld [vmem:[#allocation64_spill] sm:$0xff] }
 0x35a   : > { %v5392_v18 = vpop.f32.mrf.mxu3 }
 0x35b   : > { %v11732_v37 = vadd.f32 %v5392_v18, %v5373_v39  ;;  %v15157_v39 = vld [vmem:[#allocation40_spill] sm:$0xff]  ;;  %v15158_v18 = vld [vmem:[#allocation41_spill] sm:$0xff] }
 0x35d   : > { %5411 = vmatmul.f32.vlgmr.msra.gmra.mxu1 %v11732_v37  ;;  %5431 = vmatmul.f32.vlgmr.msra.gmra.mxu0 %v11732_v37 }
 0x35e   : > { %5451 = vmatmul.f32.vlgmr.msra.gmra.mxu2 %v11732_v37  ;;  %5471 = vmatmul.f32.vlgmr.msra.gmra.mxu3 %v11732_v37 }
 0x35f   : > { %7060 = vmatpush.msk.msra.mxu1 %vm11674_vm15, %v15185_v53  ;;  %7076 = vmatpush.msk.msra.mxu0 %vm11688_vm1, %v15185_v53  ;;  %vm11870_vm15 = vmand %vm15196_vm14, %vm15195_vm10  ;;  %vm15205_vm10 = vcmp.lt.s32.totalorder %v10775_v22, %v15163_v52  ;;  %vm15206_vm14 = vcmp.ge.s32.totalorder %v10775_v22, %v15139_v10 }
 0x360   : > { %7092 = vmatpush.msk.msra.mxu2 %vm11700_vm0, %v15185_v53  ;;  %7108 = vmatpush.msk.msra.mxu3 %vm11678_vm4, %v15185_v53  ;;  %v15198_v0 = vsel %vm11870_vm15, 4294967295, %v15197_v0  ;;  %vm11884_vm4 = vmand %vm15201_vm5, %vm15200_vm7  ;;  %vm15210_vm5 = vcmp.lt.s32.totalorder %v10809_v16, %v15156_v33  ;;  %vm15211_vm7 = vcmp.ge.s32.totalorder %v10809_v16, %v15155_v30  ;;  %v15217_v33 = vmov 0 }
 0x361   : > { %15199 = vst [vmem:[#allocation40_spill] sm:$0xff] %v15198_v0  ;;  %v15203_v8 = vsel %vm11884_vm4, 4294967295, %v15202_v8  ;;  %vm11894_vm1 = vmand %vm15206_vm14, %vm15205_vm10  ;;  %7061 = vmatpush.msk.msra.mxu1 %vm11720_vm11, %v15185_v53  ;;  %7077 = vmatpush.msk.msra.mxu0 %vm11740_vm6, %v15185_v53  ;;  %v15222_v30 = vmov 0  ;;  %vm15231_vm11 = vnez %v15230_v50  ;;  %v15241_v50 = vmov 0 }
 0x362   : > { %15204 = vst [vmem:[#allocation41_spill] sm:$0xff] %v15203_v8  ;;  %v15208_v47 = vsel %vm11894_vm1, 4294967295, %v15207_v47  ;;  %vm11912_vm10 = vmand %vm15211_vm7, %vm15210_vm5  ;;  %7093 = vmatpush.msk.msra.mxu2 %vm11762_vm13, %v15185_v53  ;;  %7109 = vmatpush.msk.msra.mxu3 %vm11782_vm8, %v15185_v53  ;;  %vm15215_vm5 = vcmp.lt.s32.totalorder %v10764_v28, %v15192_v6  ;;  %vm15216_vm7 = vcmp.ge.s32.totalorder %v10764_v28, %v15191_v45  ;;  %v11967_v9 = vsel %vm15231_vm11, 1.0, %v14625_v24 }
 0x363   : > { %15209 = vst [vmem:[#allocation27_spill] sm:$0xff] %v15208_v47  ;;  %v15213_v21 = vsel %vm11912_vm10, 4294967295, %v15212_v21  ;;  %vm11934_vm14 = vmand %vm15216_vm7, %vm15215_vm5  ;;  %vm15220_vm13 = vcmp.lt.s32.totalorder %v10764_v28, %v15140_v38  ;;  %vm15221_vm8 = vcmp.ge.s32.totalorder %v10764_v28, %v15135_v23  ;;  %vm15225_vm5 = vcmp.lt.s32.totalorder %v10775_v22, %v15140_v38  ;;  %7062 = vmatpush.msk.msra.mxu1 %vm11802_vm3, %v15185_v53  ;;  %v15314_v47 = vld [vmem:[#allocation75_spill] sm:$0xff] }
 0x364   : > { %15214 = vst [vmem:[#allocation43_spill] sm:$0xff] %v15213_v21  ;;  %v15218_v33 = vsel %vm11934_vm14, 4294967295, %v15217_v33  ;;  %vm11948_vm6 = vmand %vm15221_vm8, %vm15220_vm13  ;;  %vm15226_vm7 = vcmp.ge.s32.totalorder %v10775_v22, %v15135_v23  ;;  %7078 = vmatpush.msk.msra.mxu0 %vm11844_vm9, %v15185_v53  ;;  %vm15232_vm8 = vcmp.lt.s32.totalorder %v10775_v22, %v15192_v6  ;;  %vm15233_vm13 = vcmp.ge.s32.totalorder %v10775_v22, %v15191_v45 }
 0x365   : > { %15219 = vst [vmem:[#allocation13_spill] sm:$0xff] %v15218_v33  ;;  %v15223_v30 = vsel %vm11948_vm6, 4294967295, %v15222_v30  ;;  %vm11958_vm0 = vmand %vm15226_vm7, %vm15225_vm5  ;;  %vm15238_vm9 = vnez %v15237_v48  ;;  %7094 = vmatpush.msk.msra.mxu2 %vm11870_vm15, %v15185_v53  ;;  %7110 = vmatpush.msk.msra.mxu3 %vm11912_vm10, %v15185_v53  ;;  %vm15244_vm15 = vcmp.lt.s32.totalorder %v10764_v28, %v15146_v26  ;;  %vm15245_vm10 = vcmp.ge.s32.totalorder %v10764_v28, %v15145_v4  ;;  %v15254_v48 = vld [vmem:[#allocation68_spill] sm:$0xff]  ;;  %v15261_v33 = vld [vmem:[#allocation45_spill] sm:$0xff] }
 0x366   : > { %15224 = vst [vmem:[#allocation15_spill] sm:$0xff] %v15223_v30  ;;  %v15228_v35 = vsel %vm11958_vm0, 4294967295, %v15227_v35  ;;  %vm11981_vm5 = vmand %vm15233_vm13, %vm15232_vm8  ;;  %v11994_v29 = vsel %vm15238_vm9, 1.0, %v14625_v24  ;;  %vm15239_vm8 = vcmp.lt.s32.totalorder %v10785_v17, %v15192_v6  ;;  %vm15240_vm13 = vcmp.ge.s32.totalorder %v10785_v17, %v15191_v45  ;;  %7063 = vmatpush.msk.msra.mxu1 %vm11934_vm14, %v15185_v53 }
 0x367   : > { %15229 = vst [vmem:[#allocation48_spill] sm:$0xff] %v15228_v35  ;;  %v15235_v54 = vsel %vm11981_vm5, 4294967295, %v15234_v54  ;;  %vm12008_vm3 = vmand %vm15240_vm13, %vm15239_vm8  ;;  %v15246_v21 = vmov 0  ;;  %vm15249_vm8 = vcmp.lt.s32.totalorder %v10775_v22, %v15146_v26  ;;  %vm15250_vm13 = vcmp.ge.s32.totalorder %v10775_v22, %v15145_v4  ;;  %7079 = vmatpush.msk.msra.mxu0 %vm11981_vm5, %v15185_v53 }
 0x368   : > { %15236 = vst [vmem:[#allocation50_spill] sm:$0xff] %v15235_v54  ;;  %v15242_v50 = vsel %vm12008_vm3, 4294967295, %v15241_v50  ;;  %vm12022_vm9 = vmand %vm15245_vm10, %vm15244_vm15  ;;  %v15251_v0 = vmov 0  ;;  %vm15255_vm11 = vnez %v15254_v48  ;;  %vm15256_vm15 = vcmp.lt.s32.totalorder %v10809_v16, %v15192_v6  ;;  %v15262_v54 = vld [vmem:[#allocation37_spill] sm:$0xff]  ;;  %7095 = vmatpush.msk.msra.mxu2 %vm12008_vm3, %v15185_v53  ;;  %7064 = vmatpush.msk.msra.mxu1 %vm11816_vm2, %v15185_v53 }
 0x369   : > { %15243 = vst [vmem:[#allocation179_spill] sm:$0xff] %v15242_v50  ;;  %v15247_v21 = vsel %vm12022_vm9, 4294967295, %v15246_v21  ;;  %vm12032_vm7 = vmand %vm15250_vm13, %vm15249_vm8  ;;  %v12041_v44 = vsel %vm15255_vm11, 1.0, %v14625_v24  ;;  %vm15257_vm10 = vcmp.ge.s32.totalorder %v10809_v16, %v15191_v45  ;;  %vm15263_vm5 = vnez %v15262_v54  ;;  %v15279_v54 = vld [vmem:[#allocation73_spill] sm:$0xff] }
 0x36a   : > { %15248 = vst [vmem:[#allocation180_spill] sm:$0xff] %v15247_v21  ;;  %v15252_v0 = vsel %vm12032_vm7, 4294967295, %v15251_v0  ;;  %vm12055_vm8 = vmand %vm15257_vm10, %vm15256_vm15  ;;  %v6604_v6 = vsel %vm15263_vm5, 1.0, %v14625_v24  ;;  %vm15264_vm15 = vcmp.lt.s32.totalorder %v10785_v17, %v15151_v7  ;;  %vm15265_vm10 = vcmp.ge.s32.totalorder %v10785_v17, %v15144_v41  ;;  %7065 = vmatpush.msk.msra.mxu1 %vm11884_vm4, %v15185_v53 }
 0x36b   : > { %15253 = vst [vmem:[#allocation181_spill] sm:$0xff] %v15252_v0  ;;  %v15259_v62 = vsel %vm12055_vm8, 4294967295, %v15258_v62  ;;  %7111 = vmatpush.msk.msra.mxu3 %vm12055_vm8, %v15185_v53  ;;  %vm12080_vm13 = vmand %vm15265_vm10, %vm15264_vm15  ;;  %v15266_v45 = vmov 0  ;;  %vm15269_vm3 = vcmp.lt.s32.totalorder %v10764_v28, %v15158_v18  ;;  %vm15270_vm8 = vcmp.ge.s32.totalorder %v10764_v28, %v15157_v39 }
 0x36c   : > { %15260 = vst [vmem:[#allocation182_spill] sm:$0xff] %v15259_v62  ;;  %v15267_v45 = vsel %vm12080_vm13, 4294967295, %v15266_v45  ;;  %vm12094_vm5 = vmand %vm15270_vm8, %vm15269_vm3  ;;  %v15271_v62 = vmov 0  ;;  %vm15274_vm15 = vcmp.lt.s32.totalorder %v10775_v22, %v15158_v18  ;;  %vm15275_vm10 = vcmp.ge.s32.totalorder %v10775_v22, %v15157_v39  ;;  %7096 = vmatpush.msk.msra.mxu2 %vm12080_vm13, %v15185_v53  ;;  %7066 = vmatpush.msk.msra.mxu1 %vm11948_vm6, %v15185_v53 }
 0x36d   : > { %15268 = vst [vmem:[#allocation45_spill] sm:$0xff] %v15267_v45  ;;  %v15272_v62 = vsel %vm12094_vm5, 4294967295, %v15271_v62  ;;  %vm12104_vm14 = vmand %vm15275_vm10, %vm15274_vm15  ;;  %v15276_v50 = vmov 0  ;;  %vm15280_vm11 = vnez %v15279_v54  ;;  %vm15282_vm8 = vcmp.lt.s32.totalorder %v10809_v16, %v15151_v7  ;;  %v15306_v45 = vld [vmem:[#allocation129_spill] sm:$0xff] }
 0x36e   : > { %15273 = vst [vmem:[#allocation183_spill] sm:$0xff] %v15272_v62  ;;  %v15277_v50 = vsel %vm12104_vm14, 4294967295, %v15276_v50  ;;  %v6605_v48 = vsel %vm15280_vm11, 1.0, %v14625_v24  ;;  %vm15281_vm3 = vmmov %vm11826_vm12  ;;  %vm15283_vm15 = vcmp.ge.s32.totalorder %v10809_v16, %v15144_v41  ;;  %vm15287_vm11 = vcmp.lt.s32.totalorder %v10785_v17, %v15158_v18  ;;  %v15292_v41 = vld [vmem:[#allocation106_spill] sm:$0xff]  ;;  %7067 = vmatpush.msk.msra.mxu1 %vm12022_vm9, %v15185_v53 }
 0x36f   : > { %15278 = vst [vmem:[#allocation184_spill] sm:$0xff] %v15277_v50  ;;  %7080 = vmatpush.msk.msra.mxu0 %vm15281_vm3, %v15185_v53  ;;  %vm12125_vm10 = vmand %vm15283_vm15, %vm15282_vm8  ;;  %vm15288_vm3 = vcmp.ge.s32.totalorder %v10785_v17, %v15157_v39  ;;  %v15289_v7 = vmov 0  ;;  %vm15293_vm15 = vnez %v15292_v41  ;;  %vm15295_vm12 = vnez %v15294_v43 }
 0x370   : > { %v15285_v36 = vsel %vm12125_vm10, 4294967295, %v15284_v36  ;;  %vm12139_vm14 = vmand %vm15288_vm3, %vm15287_vm11  ;;  %v12148_v13 = vsel %vm15293_vm15, 1.0, %v14625_v24  ;;  %v6606_v54 = vsel %vm15295_vm12, 1.0, %v14625_v24  ;;  %7112 = vmatpush.msk.msra.mxu3 %vm12125_vm10, %v15185_v53  ;;  %vm15296_vm11 = vcmp.lt.s32.totalorder %v10785_v17, %v15163_v52  ;;  %7068 = vmatpush.msk.msra.mxu1 %vm12094_vm5, %v15185_v53 }
 0x371   : > { %15286 = vst [vmem:[#allocation185_spill] sm:$0xff] %v15285_v36  ;;  %v15290_v7 = vsel %vm12139_vm14, 4294967295, %v15289_v7  ;;  %vm15297_vm3 = vcmp.ge.s32.totalorder %v10785_v17, %v15139_v10  ;;  %v15298_v41 = vmov 0  ;;  %vm15301_vm12 = vcmp.lt.s32.totalorder %v10764_v28, %v15261_v33  ;;  %7081 = vmatpush.msk.msra.mxu0 %vm11894_vm1, %v15185_v53 }
 0x372   : > { %15291 = vst [vmem:[#allocation186_spill] sm:$0xff] %v15290_v7  ;;  %vm12165_vm8 = vmand %vm15297_vm3, %vm15296_vm11  ;;  %vm15302_vm10 = vcmp.ge.s32.totalorder %v10764_v28, %v15169_v11  ;;  %v15303_v36 = vmov 0  ;;  %v4418_v43 = vmul.f32 %v6604_v6, %v15306_v45  ;;  %vm15308_vm11 = vnez %v15307_v63 }
 0x373   : > { %v15299_v41 = vsel %vm12165_vm8, 4294967295, %v15298_v41  ;;  %vm12179_vm15 = vmand %vm15302_vm10, %vm15301_vm12  ;;  %v6607_v14 = vsel %vm15308_vm11, 1.0, %v14625_v24  ;;  %vm15309_vm12 = vcmp.lt.s32.totalorder %v10809_v16, %v15163_v52  ;;  %vm15310_vm10 = vcmp.ge.s32.totalorder %v10809_v16, %v15139_v10  ;;  %7097 = vmatpush.msk.msra.mxu2 %vm12165_vm8, %v15185_v53  ;;  %7082 = vmatpush.msk.msra.mxu0 %vm11958_vm0, %v15185_v53 }
 0x374   : > { %15300 = vst [vmem:[#allocation187_spill] sm:$0xff] %v15299_v41  ;;  %v15304_v36 = vsel %vm12179_vm15, 4294967295, %v15303_v36  ;;  %vm12199_vm3 = vmand %vm15310_vm10, %vm15309_vm12  ;;  %v15311_v6 = vmov 0  ;;  %v4419_v63 = vmul.f32 %v6605_v48, %v15306_v45  ;;  %vm15315_vm11 = vnez %v15314_v47  ;;  %v15338_v41 = vld [vmem:[#allocation112_spill] sm:$0xff]  ;;  %7069 = vmatpush.msk.msra.mxu1 %vm12179_vm15, %v15185_v53 }
 0x375   : > { %15305 = vst [vmem:[#allocation188_spill] sm:$0xff] %v15304_v36  ;;  %v15312_v6 = vsel %vm12199_vm3, 4294967295, %v15311_v6  ;;  %v6596_v8 = vsel %vm15315_vm11, 1.0, %v14625_v24  ;;  %7113 = vmatpush.msk.msra.mxu3 %vm12199_vm3, %v15185_v53  ;;  %vm15316_vm12 = vcmp.lt.s32.totalorder %v10785_v17, %v15140_v38  ;;  %vm15317_vm10 = vcmp.ge.s32.totalorder %v10785_v17, %v15135_v23  ;;  %7083 = vmatpush.msk.msra.mxu0 %vm12032_vm7, %v15185_v53 }
 0x376   : > { %15313 = vst [vmem:[#allocation129_spill] sm:$0xff] %v15312_v6  ;;  %vm12223_vm2 = vmand %vm15317_vm10, %vm15316_vm12  ;;  %v15318_v52 = vmov 0  ;;  %vm15321_vm8 = vcmp.lt.s32.totalorder %v10764_v28, %v15194_v20  ;;  %vm15322_vm3 = vcmp.ge.s32.totalorder %v10764_v28, %v15193_v19  ;;  %v15323_v48 = vmov 0  ;;  %v15331_v6 = vld [vmem:[#allocation76_spill] sm:$0xff] }
 0x377   : > { %v15319_v52 = vsel %vm12223_vm2, 4294967295, %v15318_v52  ;;  %vm12237_vm1 = vmand %vm15322_vm3, %vm15321_vm8  ;;  %vm15326_vm12 = vcmp.lt.s32.totalorder %v10775_v22, %v15194_v20  ;;  %vm15327_vm10 = vcmp.ge.s32.totalorder %v10775_v22, %v15193_v19  ;;  %v15328_v10 = vmov 0  ;;  %7098 = vmatpush.msk.msra.mxu2 %vm12223_vm2, %v15185_v53 }
 0x378   : > { %15320 = vst [vmem:[#allocation189_spill] sm:$0xff] %v15319_v52  ;;  %v15324_v48 = vsel %vm12237_vm1, 4294967295, %v15323_v48  ;;  %vm12247_vm13 = vmand %vm15327_vm10, %vm15326_vm12  ;;  %v4420_v47 = vmul.f32 %v6606_v54, %v15306_v45  ;;  %vm15332_vm11 = vnez %v15331_v6  ;;  %vm15333_vm8 = vcmp.lt.s32.totalorder %v10809_v16, %v15140_v38  ;;  %7070 = vmatpush.msk.msra.mxu1 %vm12237_vm1, %v15185_v53 }
 0x379   : > { %15325 = vst [vmem:[#allocation190_spill] sm:$0xff] %v15324_v48  ;;  %v15329_v10 = vsel %vm12247_vm13, 4294967295, %v15328_v10  ;;  %v6597_v28 = vsel %vm15332_vm11, 1.0, %v14625_v24  ;;  %vm15334_vm3 = vcmp.ge.s32.totalorder %v10809_v16, %v15135_v23  ;;  %v15335_v54 = vmov 0  ;;  %v15345_v23 = vld [vmem:[#allocation70_spill] sm:$0xff] }
 0x37a   : > { %15330 = vst [vmem:[#allocation191_spill] sm:$0xff] %v15329_v10  ;;  %vm12267_vm12 = vmand %vm15334_vm3, %vm15333_vm8  ;;  %v4421_v6 = vmul.f32 %v6607_v14, %v15306_v45  ;;  %vm15339_vm0 = vnez %v15338_v41  ;;  %vm15340_vm8 = vcmp.lt.s32.totalorder %v10785_v17, %v15146_v26  ;;  %vm15341_vm3 = vcmp.ge.s32.totalorder %v10785_v17, %v15145_v4  ;;  %v15347_v41 = vld [vmem:[#allocation131_spill] sm:$0xff] }
 0x37b   : > { %v15336_v54 = vsel %vm12267_vm12, 4294967295, %v15335_v54  ;;  %v6598_v35 = vsel %vm15339_vm0, 1.0, %v14625_v24  ;;  %7114 = vmatpush.msk.msra.mxu3 %vm12267_vm12, %v15185_v53  ;;  %vm12291_vm10 = vmand %vm15341_vm3, %vm15340_vm8  ;;  %v15342_v14 = vmov 0  ;;  %vm15346_vm2 = vnez %v15345_v23 }
 0x37c   : > { %15337 = vst [vmem:[#allocation192_spill] sm:$0xff] %v15336_v54  ;;  %v15343_v14 = vsel %vm12291_vm10, 4294967295, %v15342_v14  ;;  %v6612_v38 = vsel %vm15346_vm2, 1.0, %v14625_v24  ;;  %v4410_v54 = vmul.f32 %v6596_v8, %v15347_v41  ;;  %vm15348_vm8 = vcmp.lt.s32.totalorder %v10809_v16, %v15146_v26  ;;  %v15353_v8 = vld [vmem:[#allocation71_spill] sm:$0xff]  ;;  %7099 = vmatpush.msk.msra.mxu2 %vm12291_vm10, %v15185_v53 }
 0x37d   : > { %15344 = vst [vmem:[#allocation193_spill] sm:$0xff] %v15343_v14  ;;  %vm15349_vm3 = vcmp.ge.s32.totalorder %v10809_v16, %v15145_v4  ;;  %v15350_v52 = vmov 0  ;;  %vm15354_vm2 = vnez %v15353_v8  ;;  %v4411_v30 = vmul.f32 %v6597_v28, %v15347_v41  ;;  %v15360_v4 = vld [vmem:[#allocation128_spill] sm:$0xff] }
 0x37e   : > { %vm12315_vm11 = vmand %vm15349_vm3, %vm15348_vm8  ;;  %v6613_v23 = vsel %vm15354_vm2, 1.0, %v14625_v24  ;;  %vm15355_vm8 = vcmp.lt.s32.totalorder %v10809_v16, %v15158_v18  ;;  %vm15356_vm3 = vcmp.ge.s32.totalorder %v10809_v16, %v15157_v39  ;;  %v15357_v26 = vmov 0  ;;  %v15368_v39 = vld [vmem:[#allocation108_spill] sm:$0xff]  ;;  %7100 = vmatpush.msk.msra.mxu2 %vm12139_vm14, %v15185_v53 }
 0x37f   : > { %v15351_v52 = vsel %vm12315_vm11, 4294967295, %v15350_v52  ;;  %7115 = vmatpush.msk.msra.mxu3 %vm12315_vm11, %v15185_v53  ;;  %vm12339_vm0 = vmand %vm15356_vm3, %vm15355_vm8  ;;  %v4412_v28 = vmul.f32 %v6598_v35, %v15347_v41  ;;  %vm15361_vm6 = vnez %v15360_v4  ;;  %vm15362_vm8 = vnez %v15277_v50 }
 0x380   : > { %15352 = vst [vmem:[#allocation131_spill] sm:$0xff] %v15351_v52  ;;  %v15358_v26 = vsel %vm12339_vm0, 4294967295, %v15357_v26  ;;  %v6599_v8 = vsel %vm15361_vm6, 1.0, %v14625_v24  ;;  %7084 = vmatpush.msk.msra.mxu0 %vm15362_vm8, %v15185_v53  ;;  %vm15363_vm3 = vcmp.lt.s32.totalorder %v10775_v22, %v15261_v33  ;;  %vm15364_vm12 = vcmp.ge.s32.totalorder %v10775_v22, %v15169_v11 }
 0x381   : > { %15359 = vst [vmem:[#allocation194_spill] sm:$0xff] %v15358_v26  ;;  %vm12363_vm2 = vmand %vm15364_vm12, %vm15363_vm3  ;;  %v15365_v35 = vmov 0  ;;  %vm15369_vm11 = vnez %v15368_v39  ;;  %v4538_v4 = vadd.f32 %v4418_v43, %v4410_v54  ;;  %7116 = vmatpush.msk.msra.mxu3 %vm12339_vm0, %v15185_v53  ;;  %vm15370_vm12 = vcmp.lt.s32.totalorder %v10785_v17, %v15261_v33  ;;  %v15375_v54 = vld [vmem:[#allocation69_spill] sm:$0xff] }
 0x382   : > { %v15366_v35 = vsel %vm12363_vm2, 4294967295, %v15365_v35  ;;  %v6614_v18 = vsel %vm15369_vm11, 1.0, %v14625_v24  ;;  %vm15371_vm3 = vcmp.ge.s32.totalorder %v10785_v17, %v15169_v11  ;;  %v15372_v22 = vmov 0  ;;  %7085 = vmatpush.msk.msra.mxu0 %vm12363_vm2, %v15185_v53 }
 0x383   : > { %15367 = vst [vmem:[#allocation195_spill] sm:$0xff] %v15366_v35  ;;  %vm12386_vm6 = vmand %vm15371_vm3, %vm15370_vm12  ;;  %v4435_v43 = vmul.f32 %v12041_v44, %v11246_v49  ;;  %vm15376_vm10 = vnez %v15375_v54  ;;  %v4559_v52 = vadd.f32 %v4419_v63, %v4411_v30  ;;  %v4580_v14 = vadd.f32 %v4420_v47, %v4412_v28  ;;  %v15382_v63 = vld [vmem:[#allocation22_spill] sm:$0xff] }
 0x384   : > { %v15373_v22 = vsel %vm12386_vm6, 4294967295, %v15372_v22  ;;  %v6623_v39 = vsel %vm15376_vm10, 1.0, %v14625_v24  ;;  %vm15377_vm12 = vcmp.lt.s32.totalorder %v10809_v16, %v15261_v33  ;;  %vm15378_vm3 = vcmp.ge.s32.totalorder %v10809_v16, %v15169_v11  ;;  %v15384_v28 = vld [vmem:[#allocation130_spill] sm:$0xff]  ;;  %7101 = vmatpush.msk.msra.mxu2 %vm12386_vm6, %v15185_v53  ;;  %7086 = vmatpush.msk.msra.mxu0 %vm12247_vm13, %v15185_v53 }
 0x385   : > { %15374 = vst [vmem:[#allocation196_spill] sm:$0xff] %v15373_v22  ;;  %vm12411_vm4 = vmand %vm15378_vm3, %vm15377_vm12  ;;  %v15379_v44 = vmov 0  ;;  %vm15383_vm11 = vnez %v15099_v57  ;;  %v4436_v30 = vmul.f32 %v12148_v13, %v11246_v49  ;;  %v4426_v54 = vmul.f32 %v6612_v38, %v15384_v28 }
 0x386   : > { %v15380_v44 = vsel %vm12411_vm4, 4294967295, %v15379_v44  ;;  %v4059_v47 = vsel %vm15383_vm11, %v15382_v63, 0  ;;  %v4413_v0 = vmul.f32 %v6599_v8, %v15347_v41  ;;  %7117 = vmatpush.msk.msra.mxu3 %vm12411_vm4, %v15185_v53  ;;  %vm15385_vm12 = vcmp.lt.s32.totalorder %v10785_v17, %v15194_v20  ;;  %v15391_v8 = vld [vmem:[#allocation72_spill] sm:$0xff] }
 0x387   : > { %15381 = vst [vmem:[#allocation197_spill] sm:$0xff] %v15380_v44  ;;  %vm15386_vm3 = vcmp.ge.s32.totalorder %v10785_v17, %v15193_v19  ;;  %v15387_v13 = vmov 0  ;;  %vm15390_vm7 = vnez %v14969_v61  ;;  %v4427_v33 = vmul.f32 %v6613_v23, %v15384_v28 }
 0x388   : > { %vm12434_vm10 = vmand %vm15386_vm3, %vm15385_vm12  ;;  %v4061_v11 = vsel %vm15390_vm7, %v15382_v63, 0  ;;  %v4428_v38 = vmul.f32 %v6614_v18, %v15384_v28  ;;  %vm15392_vm9 = vnez %v15391_v8  ;;  %vm15393_vm12 = vcmp.lt.s32.totalorder %v10809_v16, %v15194_v20 }
 0x389   : > { %v15388_v13 = vsel %vm12434_vm10, 4294967295, %v15387_v13  ;;  %v6615_v21 = vsel %vm15392_vm9, 1.0, %v14625_v24  ;;  %vm15394_vm3 = vcmp.ge.s32.totalorder %v10809_v16, %v15193_v19  ;;  %v15395_v23 = vmov 0  ;;  %7102 = vmatpush.msk.msra.mxu2 %vm12434_vm10, %v15185_v53 }
 0x38a   : > { %15389 = vst [vmem:[#allocation130_spill] sm:$0xff] %v15388_v13  ;;  %vm12458_vm7 = vmand %vm15394_vm3, %vm15393_vm12  ;;  %vm15398_vm9 = vnez %v15097_v2  ;;  %v4437_v17 = vmul.f32 %v6623_v39, %v11246_v49  ;;  %v4539_v8 = vadd.f32 %v4538_v4, %v4426_v54  ;;  %v4601_v61 = vadd.f32 %v4421_v6, %v4413_v0  ;;  %v15400_v39 = vld [vmem:[#allocation85_spill] sm:$0xff]  ;;  %v15402_v0 = vld [vmem:[#allocation88_spill] sm:$0xff] }
 0x38b   : > { %v15396_v23 = vsel %vm12458_vm7, 4294967295, %v15395_v23  ;;  %v4058_v18 = vsel %vm15398_vm9, %v15382_v63, 0  ;;  %7118 = vmatpush.msk.msra.mxu3 %vm12458_vm7, %v15185_v53  ;;  %v4159_v20 = vadd.s32 %v11622_v25, %v4059_v47  ;;  %vm15399_vm12 = vnez %v14900_v3  ;;  %v15404_v4 = vld [vmem:[#allocation24_spill] sm:$0xff]  ;;  %v15496_v13 = vld [vmem:[#allocation39_spill] sm:$0xff] }
 0x38c   : > { %15397 = vst [vmem:[#allocation198_spill] sm:$0xff] %v15396_v23  ;;  %v4060_v19 = vsel %vm15399_vm12, %v15382_v63, 0  ;;  %v4560_v16 = vadd.f32 %v4559_v52, %v4427_v33  ;;  %v4581_v44 = vadd.f32 %v4580_v14, %v4428_v38  ;;  %vm15401_vm3 = vnez %v15400_v39  ;;  %v15406_v52 = vld [vmem:[#allocation90_spill] sm:$0xff]  ;;  %v15408_v14 = vld [vmem:[#allocation91_spill] sm:$0xff] }
 0x38d   : > { %7071 = vmatpush.msk.msra.mxu1 %vm15401_vm3, %v15185_v53  ;;  %vm15403_vm4 = vnez %v15402_v0  ;;  %v4200_v6 = vadd.s32 %v11626_v1, %v4061_v11  ;;  %vm15405_vm6 = vnez %v15111_v32  ;;  %v4429_v54 = vmul.f32 %v6615_v21, %v15384_v28  ;;  %v15411_v21 = vld [vmem:[#allocation92_spill] sm:$0xff] }
 0x38e   : > { %7087 = vmatpush.msk.msra.mxu0 %vm15403_vm4, %v15185_v53  ;;  %v4051_v25 = vsel %vm15405_vm6, %v15404_v4, 0  ;;  %v4540_v47 = vadd.f32 %v4539_v8, %v11668_v56  ;;  %vm15407_vm12 = vnez %v15406_v52  ;;  %vm15409_vm11 = vnez %v15408_v14  ;;  %v15413_v56 = vld [vmem:[#allocation96_spill] sm:$0xff] }
 0x38f   : > { %7103 = vmatpush.msk.msra.mxu2 %vm15407_vm12, %v15185_v53  ;;  %7119 = vmatpush.msk.msra.mxu3 %vm15409_vm11, %v15185_v53  ;;  %v4139_v33 = vadd.s32 %v11620_v46, %v4058_v18  ;;  %vm15410_vm9 = vnez %v14972_v60  ;;  %v4561_v11 = vadd.f32 %v4560_v16, %v4435_v43  ;;  %v4582_v38 = vadd.f32 %v4581_v44, %v4436_v30  ;;  %v15416_v16 = vld [vmem:[#allocation97_spill] sm:$0xff]  ;;  %v15418_v43 = vld [vmem:[#allocation98_spill] sm:$0xff]  ;;  %v15459_v14 = vld [vmem:[#allocation132_spill] sm:$0xff] }
 0x390   : > { %v4053_v1 = vsel %vm15410_vm9, %v15404_v4, 0  ;;  %vm15412_vm6 = vnez %v15411_v21  ;;  %vm15414_vm2 = vnez %v15413_v56  ;;  %v4180_v8 = vadd.s32 %v11624_v58, %v4060_v19  ;;  %v15423_v19 = vld [vmem:[#allocation100_spill] sm:$0xff] }
 0x391   : > { %7072 = vmatpush.msk.msra.mxu1 %vm15412_vm6, %v15185_v53  ;;  %7088 = vmatpush.msk.msra.mxu0 %vm15414_vm2, %v15185_v53  ;;  %vm15415_vm0 = vnez %v15102_v15  ;;  %v4444_v18 = vmul.f32 %v11967_v9, %v11248_v27  ;;  %v4602_v63 = vadd.f32 %v4601_v61, %v4429_v54  ;;  %vm15417_vm9 = vnez %v15416_v16  ;;  %v15421_v61 = vld [vmem:[#allocation99_spill] sm:$0xff] }
 0x392   : > { %v4050_v46 = vsel %vm15415_vm0, %v15404_v4, 0  ;;  %7104 = vmatpush.msk.msra.mxu2 %vm15417_vm9, %v15185_v53  ;;  %vm15419_vm14 = vnez %v15418_v43  ;;  %v12516_v44 = vadd.s32 %v4159_v20, %v4051_v25  ;;  %vm15420_vm8 = vnez %v14902_v55 }
 0x393   : > { %7120 = vmatpush.msk.msra.mxu3 %vm15419_vm14, %v15185_v53  ;;  %v4052_v58 = vsel %vm15420_vm8, %v15404_v4, 0  ;;  %v4445_v30 = vmul.f32 %v11994_v29, %v11248_v27  ;;  %v6632_v9 = vsel %vm15401_vm3, 1.0, %v14625_v24  ;;  %vm15422_vm0 = vnez %v15421_v61  ;;  %v15425_v4 = vld [vmem:[#allocation101_spill] sm:$0xff]  ;;  %v15457_v61 = vld [vmem:[#allocation174_spill] sm:$0xff] }
 0x394   : > { %7073 = vmatpush.msk.msra.mxu1 %vm15422_vm0, %v15185_v53  ;;  %vm15424_vm15 = vnez %v15423_v19  ;;  %v12532_v20 = vadd.s32 %v4200_v6, %v4053_v1  ;;  %v4541_v25 = vadd.f32 %v4540_v47, %v11658_v34  ;;  %v4603_v54 = vadd.f32 %v4602_v63, %v4437_v17  ;;  %v15427_v29 = vld [vmem:[#allocation105_spill] sm:$0xff]  ;;  %v15429_v34 = vld [vmem:[#allocation119_spill] sm:$0xff]  ;;  %v15431_v17 = vld [vmem:[#allocation120_spill] sm:$0xff] }
 0x395   : > { %7089 = vmatpush.msk.msra.mxu0 %vm15424_vm15, %v15185_v53  ;;  %vm15426_vm8 = vnez %v15425_v4  ;;  %vm15428_vm3 = vnez %v15427_v29  ;;  %v12541_v39 = vadd.s32 %v4139_v33, %v4050_v46  ;;  %v4562_v60 = vadd.f32 %v4561_v11, %v11665_v59  ;;  %v15433_v1 = vld [vmem:[#allocation121_spill] sm:$0xff]  ;;  %v15435_v11 = vld [vmem:[#allocation122_spill] sm:$0xff] }
 0x396   : > { %7105 = vmatpush.msk.msra.mxu2 %vm15426_vm8, %v15185_v53  ;;  %7121 = vmatpush.msk.msra.mxu3 %vm15428_vm3, %v15185_v53  ;;  %v4583_v55 = vadd.f32 %v4582_v38, %v4444_v18  ;;  %v6633_v6 = vsel %vm15403_vm4, 1.0, %v14625_v24  ;;  %vm15430_vm5 = vnez %v15429_v34  ;;  %vm15432_vm7 = vnez %v15431_v17  ;;  %v15437_v18 = vld [vmem:[#allocation123_spill] sm:$0xff]  ;;  %v15483_v34 = vld [vmem:[#allocation118_spill] sm:$0xff] }
 0x397   : > { %7074 = vmatpush.msk.msra.mxu1 %vm15430_vm5, %v15185_v53  ;;  %7090 = vmatpush.msk.msra.mxu0 %vm15432_vm7, %v15185_v53  ;;  %v12553_v63 = vadd.s32 %v4180_v8, %v4052_v58  ;;  %v4542_v47 = vadd.f32 %v4541_v25, %v11629_v40  ;;  %v12557_v33 = vmul.f32 %v6632_v9, %v11248_v27  ;;  %v6634_v59 = vsel %vm15407_vm12, 1.0, %v14625_v24  ;;  %v15439_v58 = vld [vmem:[#allocation124_spill] sm:$0xff]  ;;  %v15441_v9 = vld [vmem:[#allocation125_spill] sm:$0xff]  ;;  %v15443_v25 = vld [vmem:[#allocation126_spill] sm:$0xff] }
 0x398   : > { %vm15434_vm4 = vnez %v15433_v1  ;;  %vm15436_vm3 = vnez %v15435_v11  ;;  %v4563_v38 = vadd.f32 %v4562_v60, %v11632_v31  ;;  %v4584_v8 = vadd.f32 %v4583_v55, %v11635_v12  ;;  %v15479_v17 = vld [vmem:[#allocation79_spill] sm:$0xff] }
 0x399   : > { %7106 = vmatpush.msk.msra.mxu2 %vm15434_vm4, %v15185_v53  ;;  %7122 = vmatpush.msk.msra.mxu3 %vm15436_vm3, %v15185_v53  ;;  %v6635_v40 = vsel %vm15409_vm11, 1.0, %v14625_v24  ;;  %v6624_v46 = vsel %vm15412_vm6, 1.0, %v14625_v24  ;;  %vm15438_vm12 = vnez %v15437_v18  ;;  %vm15440_vm4 = vnez %v15439_v58 }
 0x39a   : > { %7075 = vmatpush.msk.msra.mxu1 %vm15438_vm12, %v15185_v53  ;;  %7091 = vmatpush.msk.msra.mxu0 %vm15440_vm4, %v15185_v53  ;;  %v4543_v60 = vadd.f32 %v4542_v47, %v11576_v51  ;;  %v4604_v31 = vadd.f32 %v4603_v54, %v4445_v30  ;;  %v12584_v55 = vmul.f32 %v6633_v6, %v11248_v27  ;;  %v6625_v12 = vsel %vm15414_vm2, 1.0, %v14625_v24 }
 0x39b   : > { %vm15442_vm6 = vnez %v15441_v9  ;;  %vm15444_vm11 = vnez %v15443_v25  ;;  %v4564_v21 = vadd.f32 %v4563_v38, %v11609_v42  ;;  %v4585_v51 = vadd.f32 %v4584_v8, %v11612_v5  ;;  %5491 = vmatmul.f32.vlgmr.msra.gmra.mxu1 %v11732_v37  ;;  %5511 = vmatmul.f32.vlgmr.msra.gmra.mxu0 %v11732_v37  ;;  %v15445_v38 = vld [vmem:[#allocation176_spill] sm:$0xff] }
 0x39c   : > { %7107 = vmatpush.msk.msra.mxu2 %vm15442_vm6, %v15185_v53  ;;  %7123 = vmatpush.msk.msra.mxu3 %vm15444_vm11, %v15185_v53  ;;  %v6626_v30 = vsel %vm15417_vm9, 1.0, %v14625_v24  ;;  %v6627_v54 = vsel %vm15419_vm14, 1.0, %v14625_v24  ;;  %v6640_v6 = vsel %vm12237_vm1, 1.0, %v14625_v24  ;;  %v12609_v42 = vmul.f32 %v6634_v59, %v11248_v27  ;;  %v15446_v59 = vld [vmem:[#allocation17_spill] sm:$0xff] }
 0x39d   : > { %v12612_v5 = vmul.f32 %v6635_v40, %v11248_v27  ;;  %v12615_v47 = vmul.f32 %v6624_v46, %v11246_v49  ;;  %5531 = vmatmul.f32.vlgmr.msra.gmra.mxu2 %v11732_v37  ;;  %5551 = vmatmul.f32.vlgmr.msra.gmra.mxu3 %v11732_v37  ;;  %v4605_v8 = vadd.f32 %v4604_v31, %v15445_v38  ;;  %v6641_v43 = vsel %vm12247_vm13, 1.0, %v14625_v24  ;;  %v15448_v40 = vld [vmem:[#allocation51_spill] sm:$0xff]  ;;  %v15450_v37 = vld [vmem:[#allocation172_spill] sm:$0xff] }
 0x39e   : > { %v12624_v16 = vmul.f32 %v6625_v12, %v11246_v49  ;;  %v6616_v27 = vsel %vm15422_vm0, 1.0, %v14625_v24  ;;  %vm15447_vm14 = vnez %v15446_v59  ;;  %vm15449_vm9 = vnez %v15448_v40  ;;  %v15451_v59 = vld [vmem:[#allocation77_spill] sm:$0xff]  ;;  %v15453_v40 = vld [vmem:[#allocation95_spill] sm:$0xff] }
 0x39f   : > { %7124 = vmatpush.msk.msra.mxu1 %vm15447_vm14, %v15185_v53  ;;  %7140 = vmatpush.msk.msra.mxu0 %vm15449_vm9, %v15185_v53  ;;  %v12636_v46 = vadd.f32 %v4543_v60, %v15450_v37  ;;  %v6642_v31 = vsel %vm12434_vm10, 1.0, %v14625_v24  ;;  %v12642_v12 = vmul.f32 %v6626_v30, %v11246_v49  ;;  %v12645_v38 = vmul.f32 %v6627_v54, %v11246_v49  ;;  %v15455_v60 = vld [vmem:[#allocation173_spill] sm:$0xff]  ;;  %v15460_v49 = vld [vmem:[#allocation23_spill] sm:$0xff]  ;;  %v15462_v54 = vld [vmem:[#allocation52_spill] sm:$0xff] }
 0x3a0   : > { %vm15452_vm14 = vnez %v15451_v59  ;;  %vm15454_vm9 = vnez %v15453_v40  ;;  %v12654_v37 = vadd.f32 %v4564_v21, %v15455_v60  ;;  %v12657_v56 = vadd.f32 %v4585_v51, %v15457_v61  ;;  %v15464_v59 = vld [vmem:[#allocation63_spill] sm:$0xff]  ;;  %v15465_v51 = vld [vmem:[#allocation78_spill] sm:$0xff] }
 0x3a1   : > { %7156 = vmatpush.msk.msra.mxu2 %vm15452_vm14, %v15185_v53  ;;  %7172 = vmatpush.msk.msra.mxu3 %vm15454_vm9, %v15185_v53  ;;  %v12660_v30 = vmul.f32 %v6640_v6, %v15459_v14  ;;  %vm15461_vm0 = vnez %v15460_v49  ;;  %vm15463_vm14 = vnez %v15462_v54  ;;  %v4606_v40 = vadd.f32 %v4605_v8, %v15464_v59  ;;  %v15467_v6 = vld [vmem:[#allocation103_spill] sm:$0xff]  ;;  %v15469_v60 = vld [vmem:[#allocation26_spill] sm:$0xff]  ;;  %v15470_v8 = vld [vmem:[#allocation53_spill] sm:$0xff] }
 0x3a2   : > { %15456 = vst [vmem:[#allocation176_spill] sm:$0xff] %v12654_v37  ;;  %7125 = vmatpush.msk.msra.mxu1 %vm15461_vm0, %v15185_v53  ;;  %7141 = vmatpush.msk.msra.mxu0 %vm15463_vm14, %v15185_v53  ;;  %v12670_v52 = vmul.f32 %v6641_v43, %v15459_v14  ;;  %v12673_v21 = vmul.f32 %v6616_v27, %v15384_v28  ;;  %v6608_v61 = vsel %vm15430_vm5, 1.0, %v14625_v24  ;;  %vm15466_vm9 = vnez %v15465_v51  ;;  %v15472_v59 = vld [vmem:[#allocation29_spill] sm:$0xff]  ;;  %v15474_v51 = vld [vmem:[#allocation54_spill] sm:$0xff] }
 0x3a3   : > { %15458 = vst [vmem:[#allocation17_spill] sm:$0xff] %v12657_v56  ;;  %7157 = vmatpush.msk.msra.mxu2 %vm15466_vm9, %v15185_v53  ;;  %vm15468_vm0 = vnez %v15467_v6  ;;  %vm15471_vm14 = vnez %v15470_v8  ;;  %v12688_v49 = vmul.f32 %v6642_v31, %v15459_v14  ;;  %v6617_v27 = vsel %vm15424_vm15, 1.0, %v14625_v24  ;;  %v15476_v6 = vld [vmem:[#allocation65_spill] sm:$0xff] }
 0x3a4   : > { %7173 = vmatpush.msk.msra.mxu3 %vm15468_vm0, %v15185_v53  ;;  %v4042_v43 = vsel %vm15471_vm14, %v15469_v60, 0  ;;  %v6609_v54 = vsel %vm15432_vm7, 1.0, %v14625_v24  ;;  %vm15473_vm9 = vnez %v15472_v59  ;;  %vm15475_vm0 = vnez %v15474_v51  ;;  %v15481_v51 = vld [vmem:[#allocation107_spill] sm:$0xff]  ;;  %v15564_v8 = vld [vmem:[#allocation41_spill] sm:$0xff] }
 0x3a5   : > { %7126 = vmatpush.msk.msra.mxu1 %vm15473_vm9, %v15185_v53  ;;  %7142 = vmatpush.msk.msra.mxu0 %vm15475_vm0, %v15185_v53  ;;  %vm15477_vm5 = vnez %v15476_v6  ;;  %v6618_v56 = vsel %vm15426_vm8, 1.0, %v14625_v24  ;;  %vm15478_vm15 = vnez %v15433_v1  ;;  %v6600_v59 = vsel %vm15438_vm12, 1.0, %v14625_v24 }
 0x3a6   : > { %v4043_v31 = vsel %vm15477_vm5, %v15469_v60, 0  ;;  %v6610_v37 = vsel %vm15478_vm15, 1.0, %v14625_v24  ;;  %vm15480_vm9 = vnez %v15479_v17  ;;  %vm15482_vm0 = vnez %v15481_v51  ;;  %v15485_v17 = vld [vmem:[#allocation35_spill] sm:$0xff] }
 0x3a7   : > { %7158 = vmatpush.msk.msra.mxu2 %vm15480_vm9, %v15185_v53  ;;  %7174 = vmatpush.msk.msra.mxu3 %vm15482_vm0, %v15185_v53  ;;  %vm15484_vm7 = vnez %v15483_v34  ;;  %v4422_v19 = vmul.f32 %v6608_v61, %v15306_v45  ;;  %v6611_v1 = vsel %vm15436_vm3, 1.0, %v14625_v24  ;;  %v6601_v18 = vsel %vm15440_vm4, 1.0, %v14625_v24  ;;  %v15487_v51 = vld [vmem:[#allocation55_spill] sm:$0xff] }
 0x3a8   : > { %v4045_v4 = vsel %vm15484_vm7, %v15469_v60, 0  ;;  %vm15486_vm9 = vnez %v15485_v17  ;;  %vm15488_vm0 = vnez %v15487_v51  ;;  %v12737_v0 = vadd.s32 %v12541_v39, %v4042_v43  ;;  %v15490_v17 = vld [vmem:[#allocation81_spill] sm:$0xff]  ;;  %v15494_v39 = vld [vmem:[#allocation102_spill] sm:$0xff]  ;;  %v15571_v34 = vld [vmem:[#allocation15_spill] sm:$0xff] }
 0x3a9   : > { %7127 = vmatpush.msk.msra.mxu1 %vm15486_vm9, %v15185_v53  ;;  %7143 = vmatpush.msk.msra.mxu0 %vm15488_vm0, %v15185_v53  ;;  %vm15489_vm12 = vnez %v15396_v23  ;;  %v4423_v11 = vmul.f32 %v6609_v54, %v15306_v45  ;;  %v6602_v58 = vsel %vm15442_vm6, 1.0, %v14625_v24  ;;  %vm15491_vm9 = vnez %v15490_v17  ;;  %v15492_v51 = vld [vmem:[#allocation109_spill] sm:$0xff]  ;;  %v15498_v17 = vld [vmem:[#allocation56_spill] sm:$0xff] }
 0x3aa   : > { %v6643_v61 = vsel %vm15489_vm12, 1.0, %v14625_v24  ;;  %7159 = vmatpush.msk.msra.mxu2 %vm15491_vm9, %v15185_v53  ;;  %vm15493_vm0 = vnez %v15492_v51  ;;  %vm15495_vm4 = vnez %v15494_v39  ;;  %v4424_v23 = vmul.f32 %v6610_v37, %v15306_v45  ;;  %v15569_v39 = vld [vmem:[#allocation67_spill] sm:$0xff] }
 0x3ab   : > { %7175 = vmatpush.msk.msra.mxu3 %vm15493_vm0, %v15185_v53  ;;  %v4044_v43 = vsel %vm15495_vm4, %v15469_v60, 0  ;;  %v4414_v54 = vmul.f32 %v6600_v59, %v15347_v41  ;;  %v6603_v9 = vsel %vm15444_vm11, 1.0, %v14625_v24  ;;  %vm15497_vm6 = vnez %v15496_v13  ;;  %v15501_v60 = vld [vmem:[#allocation83_spill] sm:$0xff] }
 0x3ac   : > { %7128 = vmatpush.msk.msra.mxu1 %vm15497_vm6, %v15185_v53  ;;  %vm15499_vm9 = vnez %v15498_v17  ;;  %v12767_v51 = vadd.s32 %v12516_v44, %v4043_v31  ;;  %vm15500_vm0 = vnez %v15272_v62  ;;  %v4425_v59 = vmul.f32 %v6611_v1, %v15306_v45  ;;  %v15503_v13 = vld [vmem:[#allocation111_spill] sm:$0xff]  ;;  %v15506_v1 = vld [vmem:[#allocation42_spill] sm:$0xff] }
 0x3ad   : > { %7144 = vmatpush.msk.msra.mxu0 %vm15499_vm9, %v15185_v53  ;;  %v6656_v37 = vsel %vm15500_vm0, 1.0, %v14625_v24  ;;  %v4415_v25 = vmul.f32 %v6601_v18, %v15347_v41  ;;  %vm15502_vm11 = vnez %v15501_v60  ;;  %vm15504_vm6 = vnez %v15503_v13  ;;  %v15508_v18 = vld [vmem:[#allocation57_spill] sm:$0xff]  ;;  %v15515_v13 = vld [vmem:[#allocation175_spill] sm:$0xff] }
 0x3ae   : > { %7160 = vmatpush.msk.msra.mxu2 %vm15502_vm11, %v15185_v53  ;;  %7176 = vmatpush.msk.msra.mxu3 %vm15504_vm6, %v15185_v53  ;;  %v12781_v17 = vadd.s32 %v12532_v20, %v4045_v4  ;;  %vm15505_vm9 = vnez %v15304_v36  ;;  %v4622_v31 = vadd.f32 %v4422_v19, %v4414_v54  ;;  %v4416_v45 = vmul.f32 %v6602_v58, %v15347_v41  ;;  %v15511_v58 = vld [vmem:[#allocation86_spill] sm:$0xff]  ;;  %v15513_v54 = vld [vmem:[#allocation113_spill] sm:$0xff] }
 0x3af   : > { %v6648_v44 = vsel %vm15505_vm9, 1.0, %v14625_v24  ;;  %vm15507_vm3 = vnez %v15506_v1  ;;  %vm15509_vm11 = vnez %v15508_v18  ;;  %v12794_v60 = vadd.s32 %v12553_v63, %v4044_v43  ;;  %v15517_v63 = vld [vmem:[#allocation134_spill] sm:$0xff]  ;;  %v15523_v18 = vld [vmem:[#allocation133_spill] sm:$0xff] }
 0x3b0   : > { %7129 = vmatpush.msk.msra.mxu1 %vm15507_vm3, %v15185_v53  ;;  %7145 = vmatpush.msk.msra.mxu0 %vm15509_vm11, %v15185_v53  ;;  %vm15510_vm6 = vnez %v15277_v50  ;;  %v4643_v20 = vadd.f32 %v4423_v11, %v4415_v25  ;;  %v4417_v19 = vmul.f32 %v6603_v9, %v15347_v41  ;;  %vm15512_vm15 = vnez %v15511_v58  ;;  %v15519_v41 = vld [vmem:[#allocation44_spill] sm:$0xff]  ;;  %v15521_v9 = vld [vmem:[#allocation59_spill] sm:$0xff] }
 0x3b1   : > { %v6657_v4 = vsel %vm15510_vm6, 1.0, %v14625_v24  ;;  %7161 = vmatpush.msk.msra.mxu2 %vm15512_vm15, %v15185_v53  ;;  %vm15514_vm3 = vnez %v15513_v54  ;;  %v12807_v1 = vadd.f32 %v4606_v40, %v15515_v13  ;;  %v12810_v43 = vmul.f32 %v6656_v37, %v15517_v63  ;;  %v15524_v54 = vld [vmem:[#allocation89_spill] sm:$0xff]  ;;  %v15639_v50 = vld [vmem:[#allocation128_spill] sm:$0xff] }
 0x3b2   : > { %7177 = vmatpush.msk.msra.mxu3 %vm15514_vm3, %v15185_v53  ;;  %vm15518_vm11 = vnez %v15427_v29  ;;  %v4664_v25 = vadd.f32 %v4424_v23, %v4416_v45  ;;  %vm15520_vm8 = vnez %v15519_v41  ;;  %vm15522_vm15 = vnez %v15521_v9  ;;  %v15526_v23 = vld [vmem:[#allocation114_spill] sm:$0xff] }
 0x3b3   : > { %15516 = vst [vmem:[#allocation51_spill] sm:$0xff] %v12807_v1  ;;  %v6619_v11 = vsel %vm15518_vm11, 1.0, %v14625_v24  ;;  %7130 = vmatpush.msk.msra.mxu1 %vm15520_vm8, %v15185_v53  ;;  %7146 = vmatpush.msk.msra.mxu0 %vm15522_vm15, %v15185_v53  ;;  %v12822_v58 = vmul.f32 %v6648_v44, %v15523_v18  ;;  %v4431_v40 = vmul.f32 %v6617_v27, %v15384_v28  ;;  %vm15525_vm3 = vnez %v15524_v54  ;;  %v15528_v44 = vld [vmem:[#allocation46_spill] sm:$0xff]  ;;  %v15530_v27 = vld [vmem:[#allocation60_spill] sm:$0xff] }
 0x3b4   : > { %v4685_v37 = vadd.f32 %v4425_v59, %v4417_v19  ;;  %7162 = vmatpush.msk.msra.mxu2 %vm15525_vm3, %v15185_v53  ;;  %vm15527_vm11 = vnez %v15526_v23  ;;  %v12832_v45 = vmul.f32 %v6657_v4, %v15517_v63  ;;  %v4432_v13 = vmul.f32 %v6618_v56, %v15384_v28  ;;  %v15533_v56 = vld [vmem:[#allocation93_spill] sm:$0xff] }
 0x3b5   : > { %7178 = vmatpush.msk.msra.mxu3 %vm15527_vm11, %v15185_v53  ;;  %v4623_v41 = vadd.f32 %v4622_v31, %v12673_v21  ;;  %vm15529_vm8 = vnez %v15528_v44  ;;  %vm15531_vm15 = vnez %v15530_v27  ;;  %vm15532_vm3 = vnez %v15290_v7  ;;  %v15535_v21 = vld [vmem:[#allocation115_spill] sm:$0xff]  ;;  %v15549_v23 = vld [vmem:[#allocation181_spill] sm:$0xff]  ;;  %v15637_v7 = vld [vmem:[#allocation112_spill] sm:$0xff] }
 0x3b6   : > { %7131 = vmatpush.msk.msra.mxu1 %vm15529_vm8, %v15185_v53  ;;  %7147 = vmatpush.msk.msra.mxu0 %vm15531_vm15, %v15185_v53  ;;  %v6658_v59 = vsel %vm15532_vm3, 1.0, %v14625_v24  ;;  %v4457_v19 = vmul.f32 %v6643_v61, %v15459_v14  ;;  %v4433_v4 = vmul.f32 %v6619_v11, %v15384_v28  ;;  %v4644_v9 = vadd.f32 %v4643_v20, %v4431_v40  ;;  %v15542_v20 = vld [vmem:[#allocation197_spill] sm:$0xff] }
 0x3b7   : > { %vm15534_vm11 = vnez %v15533_v56  ;;  %vm15536_vm8 = vnez %v15535_v21  ;;  %vm15537_vm15 = vnez %v15358_v26  ;;  %vm15538_vm2 = vnez %v15366_v35  ;;  %v15562_v21 = vld [vmem:[#allocation131_spill] sm:$0xff] }
 0x3b8   : > { %7163 = vmatpush.msk.msra.mxu2 %vm15534_vm11, %v15185_v53  ;;  %7179 = vmatpush.msk.msra.mxu3 %vm15536_vm8, %v15185_v53  ;;  %v6659_v31 = vsel %vm15537_vm15, 1.0, %v14625_v24  ;;  %v6649_v54 = vsel %vm15538_vm2, 1.0, %v14625_v24  ;;  %v4624_v14 = vadd.f32 %v4623_v41, %v12615_v47  ;;  %v4665_v28 = vadd.f32 %v4664_v25, %v4432_v13 }
 0x3b9   : > { %vm15539_vm12 = vnez %v15097_v2  ;;  %vm15540_vm11 = vnez %v15099_v57  ;;  %vm15541_vm8 = vnez %v15373_v22  ;;  %vm15543_vm10 = vnez %v15542_v20  ;;  %v15545_v2 = vld [vmem:[#allocation116_spill] sm:$0xff]  ;;  %v15614_v20 = vld [vmem:[#allocation38_spill] sm:$0xff] }
 0x3ba   : > { %7132 = vmatpush.msk.msra.mxu1 %vm15539_vm12, %v15185_v53  ;;  %7148 = vmatpush.msk.msra.mxu0 %vm15540_vm11, %v15185_v53  ;;  %v6650_v61 = vsel %vm15541_vm8, 1.0, %v14625_v24  ;;  %v6651_v11 = vsel %vm15543_vm10, 1.0, %v14625_v24  ;;  %v4645_v40 = vadd.f32 %v4644_v9, %v12624_v16  ;;  %v4686_v47 = vadd.f32 %v4685_v37, %v4433_v4  ;;  %v15547_v57 = vld [vmem:[#allocation180_spill] sm:$0xff] }
 0x3bb   : > { %vm15544_vm13 = vnez %v14900_v3  ;;  %vm15546_vm12 = vnez %v15545_v2  ;;  %vm15548_vm11 = vnez %v15547_v57  ;;  %vm15550_vm1 = vnez %v15549_v23  ;;  %v15553_v3 = vld [vmem:[#allocation193_spill] sm:$0xff] }
 0x3bc   : > { %7164 = vmatpush.msk.msra.mxu2 %vm15544_vm13, %v15185_v53  ;;  %7180 = vmatpush.msk.msra.mxu3 %vm15546_vm12, %v15185_v53  ;;  %v6664_v25 = vsel %vm15548_vm11, 1.0, %v14625_v24  ;;  %v6665_v13 = vsel %vm15550_vm1, 1.0, %v14625_v24  ;;  %v12886_v41 = vmul.f32 %v6658_v59, %v15517_v63  ;;  %v4666_v16 = vadd.f32 %v4665_v28, %v12642_v12  ;;  %v15555_v12 = vld [vmem:[#allocation94_spill] sm:$0xff]  ;;  %v15579_v2 = vld [vmem:[#allocation5_spill] sm:$0xff] }
 0x3bd   : > { %vm15551_vm13 = vnez %v15102_v15  ;;  %vm15552_vm12 = vnez %v15111_v32  ;;  %vm15554_vm10 = vnez %v15553_v3  ;;  %v12899_v44 = vmul.f32 %v6659_v31, %v15517_v63  ;;  %v15557_v15 = vld [vmem:[#allocation117_spill] sm:$0xff] }
 0x3be   : > { %7133 = vmatpush.msk.msra.mxu1 %vm15551_vm13, %v15185_v53  ;;  %7149 = vmatpush.msk.msra.mxu0 %vm15552_vm12, %v15185_v53  ;;  %v6666_v37 = vsel %vm15554_vm10, 1.0, %v14625_v24  ;;  %v4463_v27 = vmul.f32 %v6649_v54, %v15523_v18  ;;  %v4687_v59 = vadd.f32 %v4686_v47, %v12645_v38  ;;  %vm15556_vm8 = vnez %v15555_v12  ;;  %v15559_v38 = vld [vmem:[#allocation135_spill] sm:$0xff]  ;;  %v15577_v47 = vld [vmem:[#allocation64_spill] sm:$0xff] }
 0x3bf   : > { %7165 = vmatpush.msk.msra.mxu2 %vm15556_vm8, %v15185_v53  ;;  %vm15558_vm13 = vnez %v15557_v15  ;;  %v12910_v32 = vmul.f32 %v6650_v61, %v15523_v18  ;;  %v12913_v4 = vmul.f32 %v6651_v11, %v15523_v18  ;;  %v4625_v63 = vadd.f32 %v4624_v14, %v12557_v33  ;;  %v15573_v61 = vld [vmem:[#allocation48_spill] sm:$0xff]  ;;  %v15588_v15 = vld [vmem:[#allocation66_spill] sm:$0xff] }
 0x3c0   : > { %7181 = vmatpush.msk.msra.mxu3 %vm15558_vm13, %v15185_v53  ;;  %7134 = vmatpush.msk.msra.mxu1 %vm15471_vm14, %v15185_v53  ;;  %v12923_v9 = vmul.f32 %v6664_v25, %v15559_v38  ;;  %v12926_v56 = vmul.f32 %v6665_v13, %v15559_v38  ;;  %vm15563_vm8 = vnez %v15562_v21  ;;  %v4646_v33 = vadd.f32 %v4645_v40, %v12584_v55  ;;  %v15567_v55 = vld [vmem:[#allocation62_spill] sm:$0xff]  ;;  %v15575_v40 = vld [vmem:[#allocation104_spill] sm:$0xff]  ;;  %v15580_v25 = vld [vmem:[#allocation177_spill] sm:$0xff] }
 0x3c1   : > { %7150 = vmatpush.msk.msra.mxu0 %vm15477_vm5, %v15185_v53  ;;  %v6667_v18 = vsel %vm15563_vm8, 1.0, %v14625_v24  ;;  %7166 = vmatpush.msk.msra.mxu2 %vm15495_vm4, %v15185_v53  ;;  %vm15565_vm5 = vnez %v15564_v8  ;;  %v12942_v31 = vmul.f32 %v6666_v37, %v15559_v38  ;;  %v4626_v54 = vadd.f32 %v4625_v63, %v12660_v30  ;;  %v15583_v37 = vld [vmem:[#allocation25_spill] sm:$0xff]  ;;  %v15590_v63 = vld [vmem:[#allocation68_spill] sm:$0xff]  ;;  %v15699_v8 = vld [vmem:[#allocation167_spill] sm:$0xff] }
 0x3c2   : > { %15560 = vst [vmem:[#allocation172_spill] sm:$0xff] %v12923_v9  ;;  %7182 = vmatpush.msk.msra.mxu3 %vm15484_vm7, %v15185_v53  ;;  %v6680_v6 = vsel %vm15565_vm5, 1.0, %v14625_v24  ;;  %v4667_v14 = vadd.f32 %v4666_v16, %v12609_v42  ;;  %vm15568_vm14 = vnez %v15567_v55  ;;  %vm15570_vm4 = vnez %v15569_v39  ;;  %v15582_v16 = vld [vmem:[#allocation8_spill] sm:$0xff]  ;;  %v15613_v55 = vld [vmem:[#allocation10_spill] sm:$0xff]  ;;  %v15642_v21 = vld [vmem:[#allocation13_spill] sm:$0xff] }
 0x3c3   : > { %15561 = vst [vmem:[#allocation77_spill] sm:$0xff] %v12926_v56  ;;  %7135 = vmatpush.msk.msra.mxu1 %vm15568_vm14, %v15185_v53  ;;  %7151 = vmatpush.msk.msra.mxu0 %vm15570_vm4, %v15185_v53  ;;  %vm15572_vm7 = vnez %v15571_v34  ;;  %vm15574_vm12 = vnez %v15573_v61  ;;  %v4647_v30 = vadd.f32 %v4646_v33, %v12670_v52  ;;  %v4688_v42 = vadd.f32 %v4687_v59, %v12612_v5  ;;  %v15585_v52 = vld [vmem:[#allocation27_spill] sm:$0xff]  ;;  %v15592_v33 = vld [vmem:[#allocation28_spill] sm:$0xff]  ;;  %v15593_v56 = vld [vmem:[#allocation137_spill] sm:$0xff] }
 0x3c4   : > { %15566 = vst [vmem:[#allocation95_spill] sm:$0xff] %v12942_v31  ;;  %v6672_v28 = vsel %vm15572_vm7, 1.0, %v14625_v24  ;;  %v6673_v11 = vsel %vm15574_vm12, 1.0, %v14625_v24  ;;  %vm15576_vm13 = vnez %v15575_v40  ;;  %vm15578_vm2 = vnez %v15577_v47  ;;  %v15599_v47 = vld [vmem:[#allocation187_spill] sm:$0xff]  ;;  %v15616_v40 = vld [vmem:[#allocation129_spill] sm:$0xff] }
 0x3c5   : > { %7167 = vmatpush.msk.msra.mxu2 %vm15576_vm13, %v15185_v53  ;;  %7183 = vmatpush.msk.msra.mxu3 %vm15578_vm2, %v15185_v53  ;;  %vm15581_vm9 = vnez %v15580_v25  ;;  %vm15584_vm15 = vnez %v15583_v37  ;;  %vm15586_vm3 = vnez %v15585_v52  ;;  %v12976_v59 = vmul.f32 %v6667_v18, %v15559_v38  ;;  %v15595_v38 = vld [vmem:[#allocation106_spill] sm:$0xff]  ;;  %v15597_v18 = vld [vmem:[#allocation69_spill] sm:$0xff]  ;;  %v15682_v25 = vld [vmem:[#allocation16_spill] sm:$0xff] }
 0x3c6   : > { %v4126_v13 = vsel %vm15581_vm9, %v15579_v2, 0  ;;  %v4118_v12 = vsel %vm15584_vm15, %v15582_v16, 0  ;;  %v6681_v5 = vsel %vm15586_vm3, 1.0, %v14625_v24  ;;  %vm15589_vm6 = vnez %v15588_v15  ;;  %v15648_v15 = vld [vmem:[#allocation3_spill] sm:$0xff] }
 0x3c7   : > { %15587 = vst [vmem:[#allocation173_spill] sm:$0xff] %v12976_v59  ;;  %7136 = vmatpush.msk.msra.mxu1 %vm15589_vm6, %v15185_v53  ;;  %vm15591_vm0 = vnez %v15590_v63  ;;  %v4037_v31 = vsel %vm15578_vm2, %v15592_v33, 0  ;;  %v12988_v9 = vmul.f32 %v6680_v6, %v15593_v56  ;;  %v4668_v1 = vadd.f32 %v4667_v14, %v12688_v49  ;;  %v15606_v14 = vld [vmem:[#allocation71_spill] sm:$0xff]  ;;  %v15641_v63 = vld [vmem:[#allocation12_spill] sm:$0xff] }
 0x3c8   : > { %7152 = vmatpush.msk.msra.mxu0 %vm15591_vm0, %v15185_v53  ;;  %v4689_v29 = vadd.f32 %v4688_v42, %v4457_v19  ;;  %vm15596_vm8 = vnez %v15595_v38  ;;  %vm15598_vm10 = vnez %v15597_v18  ;;  %v4035_v59 = vsel %vm15570_vm4, %v15592_v33, 0  ;;  %v15604_v19 = vld [vmem:[#allocation70_spill] sm:$0xff] }
 0x3c9   : > { %15594 = vst [vmem:[#allocation174_spill] sm:$0xff] %v12988_v9  ;;  %7168 = vmatpush.msk.msra.mxu2 %vm15596_vm8, %v15185_v53  ;;  %7184 = vmatpush.msk.msra.mxu3 %vm15598_vm10, %v15185_v53  ;;  %vm15600_vm2 = vnez %v15599_v47  ;;  %v15601_v9 = vld [vmem:[#allocation136_spill] sm:$0xff]  ;;  %vm15605_vm1 = vnez %v15604_v19  ;;  %vm15607_vm11 = vnez %v15606_v14  ;;  %v4034_v39 = vsel %vm15568_vm14, %v15592_v33, 0 }
 0x3ca   : > { %v6682_v6 = vsel %vm15600_vm2, 1.0, %v14625_v24  ;;  %v13004_v10 = vmul.f32 %v6672_v28, %v15601_v9  ;;  %v13007_v49 = vmul.f32 %v6673_v11, %v15601_v9  ;;  %7137 = vmatpush.msk.msra.mxu1 %vm15605_vm1, %v15185_v53  ;;  %7153 = vmatpush.msk.msra.mxu0 %vm15607_vm11, %v15185_v53  ;;  %v4036_v28 = vsel %vm15576_vm13, %v15592_v33, 0 }
 0x3cb   : > { %v4215_v42 = vadd.s32 %v4126_v13, %v4118_v12  ;;  %v13022_v11 = vmul.f32 %v6681_v5, %v15593_v56  ;;  %v4203_v48 = vadd.s32 %v12781_v17, %v4037_v31  ;;  %vm15615_vm14 = vnez %v15614_v20  ;;  %v15618_v5 = vld [vmem:[#allocation37_spill] sm:$0xff]  ;;  %v15622_v31 = vld [vmem:[#allocation30_spill] sm:$0xff] }
 0x3cc   : > { %15602 = vst [vmem:[#allocation132_spill] sm:$0xff] %v13004_v10  ;;  %v15611_v10 = vld [vmem:[#allocation72_spill] sm:$0xff]  ;;  %v4110_v22 = vsel %vm15615_vm14, %v15613_v55, 0  ;;  %vm15617_vm13 = vnez %v15616_v40  ;;  %v4627_v12 = vadd.f32 %v4626_v54, %v12822_v58  ;;  %vm15619_vm2 = vnez %v15618_v5  ;;  %v15624_v58 = vld [vmem:[#allocation110_spill] sm:$0xff]  ;;  %v15626_v54 = vld [vmem:[#allocation127_spill] sm:$0xff] }
 0x3cd   : > { %15603 = vst [vmem:[#allocation23_spill] sm:$0xff] %v13007_v49  ;;  %v15609_v49 = vld [vmem:[#allocation108_spill] sm:$0xff]  ;;  %vm15612_vm12 = vnez %v15611_v10  ;;  %v6683_v13 = vsel %vm15617_vm13, 1.0, %v14625_v24  ;;  %7138 = vmatpush.msk.msra.mxu1 %vm15619_vm2, %v15185_v53  ;;  %v4162_v17 = vadd.s32 %v12767_v51, %v4035_v59  ;;  %v4029_v33 = vsel %vm15598_vm10, %v15622_v31, 0  ;;  %v15628_v59 = vld [vmem:[#allocation189_spill] sm:$0xff] }
 0x3ce   : > { %15608 = vst [vmem:[#allocation52_spill] sm:$0xff] %v13022_v11  ;;  %vm15610_vm4 = vnez %v15609_v49  ;;  %7185 = vmatpush.msk.msra.mxu3 %vm15612_vm12, %v15185_v53  ;;  %v15620_v11 = vld [vmem:[#allocation73_spill] sm:$0xff]  ;;  %v13049_v35 = vmul.f32 %v6682_v6, %v15593_v56  ;;  %v4648_v36 = vadd.f32 %v4647_v30, %v4463_v27  ;;  %vm15625_vm13 = vnez %v15624_v58  ;;  %v15630_v6 = vld [vmem:[#allocation192_spill] sm:$0xff]  ;;  %v15632_v30 = vld [vmem:[#allocation75_spill] sm:$0xff] }
 0x3cf   : > { %7169 = vmatpush.msk.msra.mxu2 %vm15610_vm4, %v15185_v53  ;;  %vm15621_vm4 = vnez %v15620_v11  ;;  %vm15627_vm3 = vnez %v15626_v54  ;;  %v4142_v26 = vadd.s32 %v12737_v0, %v4034_v39  ;;  %v4183_v51 = vadd.s32 %v12794_v60, %v4036_v28 }
 0x3d0   : > { %7154 = vmatpush.msk.msra.mxu0 %vm15621_vm4, %v15185_v53  ;;  %15623 = vst [vmem:[#allocation63_spill] sm:$0xff] %v13049_v35  ;;  %7186 = vmatpush.msk.msra.mxu3 %vm15627_vm3, %v15185_v53  ;;  %vm15629_vm4 = vnez %v15628_v59  ;;  %vm15631_vm10 = vnez %v15630_v6  ;;  %vm15633_vm7 = vnez %v15632_v30  ;;  %v15634_v35 = vld [vmem:[#allocation76_spill] sm:$0xff]  ;;  %v4027_v0 = vsel %vm15591_vm0, %v15622_v31, 0 }
 0x3d1   : > { %7170 = vmatpush.msk.msra.mxu2 %vm15625_vm13, %v15185_v53  ;;  %v6674_v18 = vsel %vm15629_vm4, 1.0, %v14625_v24  ;;  %v6675_v27 = vsel %vm15631_vm10, 1.0, %v14625_v24  ;;  %7139 = vmatpush.msk.msra.mxu1 %vm15633_vm7, %v15185_v53  ;;  %vm15635_vm13 = vnez %v15634_v35  ;;  %v4028_v60 = vsel %vm15596_vm8, %v15622_v31, 0 }
 0x3d2   : > { %7155 = vmatpush.msk.msra.mxu0 %vm15635_vm13, %v15185_v53  ;;  %v4216_v39 = vadd.s32 %v4215_v42, %v4110_v22  ;;  %v13078_v28 = vmul.f32 %v6683_v13, %v15593_v56  ;;  %vm15638_vm10 = vnez %v15637_v7  ;;  %vm15640_vm4 = vnez %v15639_v50  ;;  %7303 = vmatmul.lmr.bf16.vlgmr.msra.gmra.1.mxu1 }
 0x3d3   : > { %7171 = vmatpush.msk.msra.mxu2 %vm15638_vm10, %v15185_v53  ;;  %7187 = vmatpush.msk.msra.mxu3 %vm15640_vm4, %v15185_v53  ;;  %v13086_v62 = vadd.s32 %v4203_v48, %v4029_v33  ;;  %vm15643_vm0 = vnez %v15642_v21  ;;  %v4669_v38 = vadd.f32 %v4668_v1, %v12910_v32  ;;  %v4690_v22 = vadd.f32 %v4689_v29, %v12913_v4  ;;  %v15647_v32 = vld [vmem:[#allocation34_spill] sm:$0xff] }
 0x3d4   : > { %15636 = vst [vmem:[#allocation78_spill] sm:$0xff] %v13078_v28  ;;  %v4102_v3 = vsel %vm15643_vm0, %v15641_v63, 0  ;;  %7278 = vmatmul.lmr.bf16.vlgmr.msra.gmra.1.mxu0  ;;  %v4026_v56 = vsel %vm15589_vm6, %v15622_v31, 0  ;;  %v13097_v42 = vmul.f32 %v6674_v18, %v15601_v9  ;;  %v13100_v48 = vmul.f32 %v6675_v27, %v15601_v9  ;;  %7328 = vmatmul.lmr.bf16.vlgmr.msra.gmra.1.mxu2  ;;  %v15654_v18 = vld [vmem:[#allocation31_spill] sm:$0xff]  ;;  %v15656_v27 = vld [vmem:[#allocation178_spill] sm:$0xff] }
 0x3d5   : > { %v13103_v33 = vadd.f32 %v4627_v12, %v12810_v43  ;;  %7353 = vmatmul.lmr.bf16.vlgmr.msra.gmra.1.mxu3  ;;  %v13105_v1 = vadd.s32 %v4162_v17, %v4027_v0  ;;  %v13107_v29 = vadd.s32 %v4183_v51, %v4028_v60  ;;  %v4010_v4 = vsel %vm15619_vm2, %v15647_v32, 0  ;;  %7188 = vmatpush.msk.msra.mxu1 %vm15581_vm9, %v15185_v53  ;;  %v15649_v43 = vld [vmem:[#allocation11_spill] sm:$0xff]  ;;  %v15651_v12 = vld [vmem:[#allocation33_spill] sm:$0xff]  ;;  %v15658_v0 = vld [vmem:[#allocation14_spill] sm:$0xff] }
 0x3d6   : > { %15644 = vst [vmem:[#allocation103_spill] sm:$0xff] %v13097_v42  ;;  %v4002_v13 = vsel %vm15633_vm7, %v15648_v15, 0  ;;  %vm15650_vm6 = vnez %v15649_v43  ;;  %vm15652_vm8 = vnez %v15651_v12  ;;  %v4217_v17 = vadd.s32 %v4216_v39, %v4102_v3  ;;  %v15659_v60 = vld [vmem:[#allocation21_spill] sm:$0xff]  ;;  %v15689_v31 = vld [vmem:[#allocation182_spill] sm:$0xff] }
 0x3d7   : > { %15645 = vst [vmem:[#allocation53_spill] sm:$0xff] %v13100_v48  ;;  %7204 = vmatpush.msk.msra.mxu0 %vm15650_vm6, %v15185_v53  ;;  %v4127_v9 = vsel %vm15650_vm6, %v15579_v2, 0  ;;  %v4119_v5 = vsel %vm15652_vm8, %v15582_v16, 0  ;;  %v13128_v51 = vadd.f32 %v4648_v36, %v12832_v45  ;;  %vm15655_vm7 = vnez %v15654_v18  ;;  %7189 = vmatpush.msk.msra.mxu1 %vm15584_vm15, %v15185_v53  ;;  %v15663_v45 = vld [vmem:[#allocation6_spill] sm:$0xff]  ;;  %v15672_v42 = vld [vmem:[#allocation9_spill] sm:$0xff] }
 0x3d8   : > { %15646 = vst [vmem:[#allocation29_spill] sm:$0xff] %v13103_v33  ;;  %7220 = vmatpush.msk.msra.mxu2 %vm15655_vm7, %v15185_v53  ;;  %vm15657_vm2 = vnez %v15656_v27  ;;  %v4143_v30 = vadd.s32 %v4142_v26, %v4026_v56  ;;  %vm15660_vm6 = vnez %v15659_v60  ;;  %v13140_v43 = vadd.f32 %v4669_v38, %v12886_v41  ;;  %v15667_v38 = vld [vmem:[#allocation19_spill] sm:$0xff]  ;;  %v15671_v56 = vld [vmem:[#allocation32_spill] sm:$0xff]  ;;  %v15678_v33 = vld [vmem:[#allocation138_spill] sm:$0xff] }
 0x3d9   : > { %15653 = vst [vmem:[#allocation54_spill] sm:$0xff] %v13128_v51  ;;  %7236 = vmatpush.msk.msra.mxu3 %vm15657_vm2, %v15185_v53  ;;  %v4094_v28 = vsel %vm15660_vm6, %v15658_v0, 0  ;;  %v13143_v3 = vadd.f32 %v4690_v22, %v12899_v44  ;;  %7205 = vmatpush.msk.msra.mxu0 %vm15652_vm8, %v15185_v53  ;;  %v4130_v36 = vadd.s32 %v4010_v4, %v4002_v13  ;;  %v6688_v26 = vsel %vm15660_vm6, 1.0, %v14625_v24  ;;  %v15665_v44 = vld [vmem:[#allocation45_spill] sm:$0xff]  ;;  %v15669_v22 = vld [vmem:[#allocation36_spill] sm:$0xff]  ;;  %v15676_v51 = vld [vmem:[#allocation43_spill] sm:$0xff] }
 0x3da   : > { %15661 = vst [vmem:[#allocation65_spill] sm:$0xff] %v13140_v43  ;;  %vm15664_vm9 = vnez %v15663_v45  ;;  %vm15666_vm4 = vnez %v15665_v44  ;;  %vm15668_vm15 = vnez %v15667_v38  ;;  %vm15670_vm8 = vnez %v15669_v22  ;;  %7190 = vmatpush.msk.msra.mxu1 %vm15615_vm14, %v15185_v53  ;;  %v15674_v43 = vld [vmem:[#allocation40_spill] sm:$0xff]  ;;  %v15691_v60 = vld [vmem:[#allocation171_spill] sm:$0xff]  ;;  %v15717_v44 = vld [vmem:[#allocation186_spill] sm:$0xff] }
 0x3db   : > { %15662 = vst [vmem:[#allocation79_spill] sm:$0xff] %v13143_v3  ;;  %v6689_v41 = vsel %vm15664_vm9, 1.0, %v14625_v24  ;;  %v6690_v39 = vsel %vm15666_vm4, 1.0, %v14625_v24  ;;  %7221 = vmatpush.msk.msra.mxu2 %vm15668_vm15, %v15185_v53  ;;  %7237 = vmatpush.msk.msra.mxu3 %vm15670_vm8, %v15185_v53  ;;  %v4018_v4 = vsel %vm15605_vm1, %v15671_v56, 0  ;;  %v4128_v13 = vsel %vm15655_vm7, %v15579_v2, 0  ;;  %v15705_v45 = vld [vmem:[#allocation20_spill] sm:$0xff] }
 0x3dc   : > { %v4236_v48 = vadd.s32 %v4127_v9, %v4119_v5  ;;  %v4120_v3 = vsel %vm15668_vm15, %v15582_v16, 0  ;;  %vm15673_vm10 = vnez %v15672_v42  ;;  %v4129_v19 = vsel %vm15657_vm2, %v15579_v2, 0  ;;  %7191 = vmatpush.msk.msra.mxu1 %vm15643_vm0, %v15185_v53 }
 0x3dd   : > { %7206 = vmatpush.msk.msra.mxu0 %vm15673_vm10, %v15185_v53  ;;  %v4121_v9 = vsel %vm15670_vm8, %v15582_v16, 0  ;;  %v4111_v5 = vsel %vm15673_vm10, %v15613_v55, 0  ;;  %v4218_v18 = vadd.s32 %v4217_v17, %v4094_v28  ;;  %vm15675_vm1 = vnez %v15674_v43  ;;  %v15683_v17 = vld [vmem:[#allocation50_spill] sm:$0xff]  ;;  %v15728_v43 = vld [vmem:[#allocation196_spill] sm:$0xff] }
 0x3de   : > { %7222 = vmatpush.msk.msra.mxu2 %vm15675_vm1, %v15185_v53  ;;  %vm15677_vm7 = vnez %v15676_v51  ;;  %v13197_v27 = vmul.f32 %v6688_v26, %v15678_v33  ;;  %v13200_v2 = vmul.f32 %v6689_v41, %v15678_v33  ;;  %v13203_v16 = vmul.f32 %v6690_v39, %v15678_v33  ;;  %v15685_v39 = vld [vmem:[#allocation185_spill] sm:$0xff]  ;;  %7192 = vmatpush.msk.msra.mxu1 %vm15660_vm6, %v15185_v53 }
 0x3df   : > { %7238 = vmatpush.msk.msra.mxu3 %vm15677_vm7, %v15185_v53  ;;  %v4086_v28 = vsel %vm15565_vm5, %v15682_v25, 0  ;;  %vm15684_vm2 = vnez %v15683_v17  ;;  %v4021_v26 = vsel %vm15612_vm12, %v15671_v56, 0  ;;  %v4131_v41 = vadd.s32 %v4130_v36, %v4018_v4 }
 0x3e0   : > { %15679 = vst [vmem:[#allocation107_spill] sm:$0xff] %v13197_v27  ;;  %7207 = vmatpush.msk.msra.mxu0 %vm15684_vm2, %v15185_v53  ;;  %vm15686_vm8 = vnez %v15685_v39  ;;  %v15687_v27 = vld [vmem:[#allocation179_spill] sm:$0xff]  ;;  %vm15690_vm0 = vnez %v15689_v31  ;;  %v4019_v22 = vsel %vm15607_vm11, %v15671_v56, 0  ;;  %v4277_v10 = vadd.s32 %v4129_v19, %v4121_v9  ;;  %7193 = vmatpush.msk.msra.mxu1 %vm15565_vm5, %v15185_v53  ;;  %v15722_v39 = vld [vmem:[#allocation22_spill] sm:$0xff] }
 0x3e1   : > { %15680 = vst [vmem:[#allocation118_spill] sm:$0xff] %v13200_v2  ;;  %v4257_v2 = vadd.s32 %v4128_v13, %v4120_v3  ;;  %vm15688_vm15 = vnez %v15687_v27  ;;  %7239 = vmatpush.msk.msra.mxu3 %vm15690_vm0, %v15185_v53  ;;  %v4237_v38 = vadd.s32 %v4236_v48, %v4111_v5  ;;  %v4112_v3 = vsel %vm15675_vm1, %v15613_v55, 0 }
 0x3e2   : > { %15681 = vst [vmem:[#allocation35_spill] sm:$0xff] %v13203_v16  ;;  %v6691_v16 = vsel %vm15686_vm8, 1.0, %v14625_v24  ;;  %7223 = vmatpush.msk.msra.mxu2 %vm15688_vm15, %v15185_v53  ;;  %7208 = vmatpush.msk.msra.mxu0 %vm15664_vm9, %v15185_v53  ;;  %v4113_v36 = vsel %vm15677_vm7, %v15613_v55, 0  ;;  %v4103_v14 = vsel %vm15684_vm2, %v15641_v63, 0  ;;  %v4219_v48 = vadd.s32 %v4218_v18, %v4086_v28  ;;  %v15693_v18 = vld [vmem:[#allocation18_spill] sm:$0xff] }
 0x3e3   : > { %7240 = vmatpush.msk.msra.mxu3 %vm15686_vm8, %v15185_v53  ;;  %v4545_v4 = vadd.f32 %v12636_v46, %v15691_v60  ;;  %v4205_v13 = vadd.s32 %v13086_v62, %v4021_v26  ;;  %v6704_v55 = vsel %vm15615_vm14, 1.0, %v14625_v24  ;;  %v13257_v19 = vmul.f32 %v6691_v16, %v15678_v33  ;;  %v15710_v26 = vld [vmem:[#allocation131_spill] sm:$0xff]  ;;  %v15715_v60 = vld [vmem:[#allocation184_spill] sm:$0xff] }
 0x3e4   : > { %7224 = vmatpush.msk.msra.mxu2 %vm15666_vm4, %v15185_v53  ;;  %vm15694_vm11 = vnez %v15571_v34  ;;  %vm15695_vm12 = vnez %v15585_v52  ;;  %vm15696_vm6 = vnez %v15609_v49  ;;  %v4144_v46 = vadd.s32 %v4143_v30, %v4131_v41 }
 0x3e5   : > { %15692 = vst [vmem:[#allocation55_spill] sm:$0xff] %v13257_v19  ;;  %v4078_v9 = vsel %vm15694_vm11, %v15693_v18, 0  ;;  %7209 = vmatpush.msk.msra.mxu0 %vm15695_vm12, %v15185_v53  ;;  %v4020_v62 = vsel %vm15696_vm6, %v15671_v56, 0  ;;  %v4258_v20 = vadd.s32 %v4257_v2, %v4112_v3  ;;  %vm15697_vm14 = vnez %v15599_v47  ;;  %7194 = vmatpush.msk.msra.mxu1 %vm15694_vm11, %v15185_v53 }
 0x3e6   : > { %7225 = vmatpush.msk.msra.mxu2 %vm15697_vm14, %v15185_v53  ;;  %vm15698_vm2 = vnez %v15616_v40  ;;  %v4546_v33 = vadd.f32 %v4545_v4, %v15699_v8  ;;  %v13279_v5 = vadd.s32 %v13105_v1, %v4019_v22  ;;  %v4278_v16 = vadd.s32 %v4277_v10, %v4113_v36 }
 0x3e7   : > { %7241 = vmatpush.msk.msra.mxu3 %vm15698_vm2, %v15185_v53  ;;  %v4238_v28 = vadd.s32 %v4237_v38, %v4103_v14  ;;  %v4104_v49 = vsel %vm15688_vm15, %v15641_v63, 0  ;;  %vm15700_vm5 = vnez %v15573_v61  ;;  %v4013_v30 = vsel %vm15627_vm3, %v15647_v32, 0 }
 0x3e8   : > { %7210 = vmatpush.msk.msra.mxu0 %vm15700_vm5, %v15185_v53  ;;  %v4105_v1 = vsel %vm15690_vm0, %v15641_v63, 0  ;;  %v4095_v38 = vsel %vm15664_vm9, %v15658_v0, 0  ;;  %v4220_v22 = vadd.s32 %v4219_v48, %v4078_v9  ;;  %vm15701_vm11 = vnez %v15628_v59  ;;  %v15713_v48 = vld [vmem:[#allocation183_spill] sm:$0xff]  ;;  %v15759_v59 = vld [vmem:[#allocation97_spill] sm:$0xff] }
 0x3e9   : > { %7226 = vmatpush.msk.msra.mxu2 %vm15701_vm11, %v15185_v53  ;;  %vm15702_vm6 = vnez %v15630_v6  ;;  %v13306_v34 = vadd.s32 %v13107_v29, %v4020_v62  ;;  %vm15703_vm3 = vnez %v15620_v11  ;;  %vm15704_vm0 = vnez %v15624_v58  ;;  %v15708_v58 = vld [vmem:[#allocation193_spill] sm:$0xff]  ;;  %v15719_v62 = vld [vmem:[#allocation194_spill] sm:$0xff] }
 0x3ea   : > { %7242 = vmatpush.msk.msra.mxu3 %vm15702_vm6, %v15185_v53  ;;  %v4011_v54 = vsel %vm15703_vm3, %v15647_v32, 0  ;;  %v4012_v63 = vsel %vm15704_vm0, %v15647_v32, 0  ;;  %vm15706_vm9 = vnez %v15547_v57  ;;  %vm15707_vm15 = vnez %v15549_v23  ;;  %v15712_v57 = vld [vmem:[#allocation163_spill] sm:$0xff] }
 0x3eb   : > { %v4070_v2 = vsel %vm15706_vm9, %v15705_v45, 0  ;;  %7195 = vmatpush.msk.msra.mxu1 %vm15706_vm9, %v15185_v53  ;;  %7211 = vmatpush.msk.msra.mxu0 %vm15707_vm15, %v15185_v53  ;;  %v4003_v11 = vsel %vm15635_vm13, %v15648_v15, 0  ;;  %v4259_v29 = vadd.s32 %v4258_v20, %v4104_v49  ;;  %vm15709_vm0 = vnez %v15708_v58  ;;  %v15721_v20 = vld [vmem:[#allocation159_spill] sm:$0xff] }
 0x3ec   : > { %7227 = vmatpush.msk.msra.mxu2 %vm15709_vm0, %v15185_v53  ;;  %vm15711_vm3 = vnez %v15710_v26  ;;  %v4145_v41 = vrot.slane %v4144_v46, 4  ;;  %v4547_v10 = vadd.f32 %v4546_v33, %v15712_v57  ;;  %v13333_v3 = vadd.s32 %v4205_v13, %v4013_v30  ;;  %v15725_v49 = vld [vmem:[#allocation195_spill] sm:$0xff] }
 0x3ed   : > { %7243 = vmatpush.msk.msra.mxu3 %vm15711_vm3, %v15185_v53  ;;  %v4279_v36 = vadd.s32 %v4278_v16, %v4105_v1  ;;  %v4239_v14 = vadd.s32 %v4238_v28, %v4095_v38  ;;  %v4096_v35 = vsel %vm15666_vm4, %v15658_v0, 0  ;;  %vm15714_vm13 = vnez %v15713_v48  ;;  %v15723_v28 = vld [vmem:[#allocation188_spill] sm:$0xff]  ;;  %v15730_v1 = vld [vmem:[#allocation197_spill] sm:$0xff] }
 0x3ee   : > { %7196 = vmatpush.msk.msra.mxu1 %vm15714_vm13, %v15185_v53  ;;  %vm15716_vm9 = vnez %v15715_v60  ;;  %v4097_v4 = vsel %vm15686_vm8, %v15658_v0, 0  ;;  %v4087_v13 = vsel %vm15695_vm12, %v15682_v25, 0  ;;  %v4221_v9 = vadd.s32 %v4220_v22, %v4070_v2  ;;  %v15732_v22 = vld [vmem:[#allocation155_spill] sm:$0xff]  ;;  %v15733_v2 = vld [vmem:[#allocation140_spill] sm:$0xff] }
 0x3ef   : > { %7212 = vmatpush.msk.msra.mxu0 %vm15716_vm9, %v15185_v53  ;;  %vm15718_vm4 = vnez %v15717_v44  ;;  %vm15720_vm3 = vnez %v15719_v62  ;;  %v4548_v8 = vadd.f32 %v4547_v10, %v15721_v20  ;;  %v4151_v33 = vadd.s32 %v4011_v54, %v4003_v11  ;;  %v15749_v20 = vld [vmem:[#allocation90_spill] sm:$0xff]  ;;  %v15804_v44 = vld [vmem:[#allocation141_spill] sm:$0xff] }
 0x3f0   : > { %7228 = vmatpush.msk.msra.mxu2 %vm15718_vm4, %v15185_v53  ;;  %7244 = vmatpush.msk.msra.mxu3 %vm15720_vm3, %v15185_v53  ;;  %v6705_v0 = vsel %vm15673_vm10, 1.0, %v14625_v24  ;;  %v6706_v52 = vsel %vm15675_vm1, 1.0, %v14625_v24  ;;  %v4062_v16 = vsel %vm15714_vm13, %v15722_v39, 0  ;;  %vm15724_vm8 = vnez %v15723_v28 }
 0x3f1   : > { %7197 = vmatpush.msk.msra.mxu1 %vm15724_vm8, %v15185_v53  ;;  %vm15726_vm12 = vnez %v15725_v49  ;;  %vm15727_vm3 = vnez %v15637_v7  ;;  %v4260_v30 = vadd.s32 %v4259_v29, %v4096_v35  ;;  %vm15729_vm10 = vnez %v15728_v43  ;;  %v15734_v29 = vld [vmem:[#allocation190_spill] sm:$0xff]  ;;  %v15736_v35 = vld [vmem:[#allocation191_spill] sm:$0xff] }
 0x3f2   : > { %7213 = vmatpush.msk.msra.mxu0 %vm15726_vm12, %v15185_v53  ;;  %v4004_v42 = vsel %vm15727_vm3, %v15648_v15, 0  ;;  %7229 = vmatpush.msk.msra.mxu2 %vm15729_vm10, %v15185_v53  ;;  %vm15731_vm1 = vnez %v15730_v1  ;;  %v4146_v38 = vadd.s32 %v4145_v41, %v4144_v46  ;;  %v4549_v54 = vadd.f32 %v4548_v8, %v15732_v22  ;;  %v15751_v8 = vld [vmem:[#allocation91_spill] sm:$0xff] }
 0x3f3   : > { %7245 = vmatpush.msk.msra.mxu3 %vm15731_vm1, %v15185_v53  ;;  %v13383_v11 = vmul.f32 %v6704_v55, %v15733_v2  ;;  %v4280_v57 = vadd.s32 %v4279_v36, %v4097_v4  ;;  %v4240_v10 = vadd.s32 %v4239_v14, %v4087_v13  ;;  %v4088_v7 = vsel %vm15697_vm14, %v15682_v25, 0  ;;  %v15738_v36 = vld [vmem:[#allocation130_spill] sm:$0xff]  ;;  %v15745_v4 = vld [vmem:[#allocation85_spill] sm:$0xff]  ;;  %v15747_v13 = vld [vmem:[#allocation88_spill] sm:$0xff] }
 0x3f4   : > { %vm15735_vm3 = vnez %v15734_v29  ;;  %vm15737_vm13 = vnez %v15736_v35  ;;  %v6707_v46 = vsel %vm15677_vm7, 1.0, %v14625_v24  ;;  %v4089_v55 = vsel %vm15698_vm2, %v15682_v25, 0  ;;  %v15740_v14 = vld [vmem:[#allocation198_spill] sm:$0xff]  ;;  %v15744_v25 = vld [vmem:[#allocation24_spill] sm:$0xff]  ;;  %v15775_v29 = vld [vmem:[#allocation105_spill] sm:$0xff] }
 0x3f5   : > { %7198 = vmatpush.msk.msra.mxu1 %vm15735_vm3, %v15185_v53  ;;  %7214 = vmatpush.msk.msra.mxu0 %vm15737_vm13, %v15185_v53  ;;  %v4079_v47 = vsel %vm15700_vm5, %v15693_v18, 0  ;;  %v4222_v41 = vadd.s32 %v4221_v9, %v4062_v16  ;;  %vm15739_vm14 = vnez %v15738_v36  ;;  %vm15741_vm13 = vnez %v15740_v14 }
 0x3f6   : > { %7230 = vmatpush.msk.msra.mxu2 %vm15739_vm14, %v15185_v53  ;;  %7246 = vmatpush.msk.msra.mxu3 %vm15741_vm13, %v15185_v53  ;;  %v4172_v48 = vadd.s32 %v4012_v63, %v4004_v42  ;;  %v13410_v51 = vmul.f32 %v6705_v0, %v15733_v2  ;;  %v13413_v40 = vmul.f32 %v6706_v52, %v15733_v2  ;;  %v4054_v61 = vsel %vm15724_vm8, %v15744_v25, 0  ;;  %v15753_v52 = vld [vmem:[#allocation142_spill] sm:$0xff] }
 0x3f7   : > { %vm15746_vm7 = vnez %v15745_v4  ;;  %vm15748_vm2 = vnez %v15747_v13  ;;  %v13425_v63 = vadd.s32 %v13279_v5, %v4151_v33  ;;  %v4261_v9 = vadd.s32 %v4260_v30, %v4088_v7  ;;  %v15755_v33 = vld [vmem:[#allocation92_spill] sm:$0xff]  ;;  %v15798_v4 = vld [vmem:[#allocation126_spill] sm:$0xff] }
 0x3f8   : > { %15742 = vst [vmem:[#allocation81_spill] sm:$0xff] %v13410_v51  ;;  %7199 = vmatpush.msk.msra.mxu1 %vm15746_vm7, %v15185_v53  ;;  %7215 = vmatpush.msk.msra.mxu0 %vm15748_vm2, %v15185_v53  ;;  %vm15750_vm5 = vnez %v15749_v20  ;;  %vm15752_vm13 = vnez %v15751_v8  ;;  %v4147_v0 = vrot.slane %v4146_v38, 2  ;;  %v4550_v16 = vadd.f32 %v4549_v54, %v15753_v52  ;;  %v15757_v30 = vld [vmem:[#allocation96_spill] sm:$0xff] }
 0x3f9   : > { %15743 = vst [vmem:[#allocation109_spill] sm:$0xff] %v13413_v40  ;;  %7231 = vmatpush.msk.msra.mxu2 %vm15750_vm5, %v15185_v53  ;;  %7247 = vmatpush.msk.msra.mxu3 %vm15752_vm13, %v15185_v53  ;;  %v13435_v28 = vmul.f32 %v6707_v46, %v15733_v2  ;;  %v4281_v42 = vadd.s32 %v4280_v57, %v4089_v55  ;;  %v4080_v5 = vsel %vm15701_vm11, %v15693_v18, 0  ;;  %vm15756_vm8 = vnez %v15755_v33  ;;  %v15763_v7 = vld [vmem:[#allocation144_spill] sm:$0xff]  ;;  %v15767_v55 = vld [vmem:[#allocation26_spill] sm:$0xff] }
 0x3fa   : > { %v4241_v22 = vadd.s32 %v4240_v10, %v4079_v47  ;;  %7200 = vmatpush.msk.msra.mxu1 %vm15756_vm8, %v15185_v53  ;;  %vm15758_vm5 = vnez %v15757_v30  ;;  %v4081_v54 = vsel %vm15702_vm6, %v15693_v18, 0  ;;  %v4071_v2 = vsel %vm15707_vm15, %v15705_v45, 0  ;;  %v15761_v10 = vld [vmem:[#allocation98_spill] sm:$0xff] }
 0x3fb   : > { %15754 = vst [vmem:[#allocation102_spill] sm:$0xff] %v13435_v28  ;;  %7216 = vmatpush.msk.msra.mxu0 %vm15758_vm5, %v15185_v53  ;;  %v4223_v57 = vadd.s32 %v4222_v41, %v4054_v61  ;;  %vm15760_vm11 = vnez %v15759_v59  ;;  %vm15762_vm13 = vnez %v15761_v10  ;;  %v4551_v46 = vadd.f32 %v4550_v16, %v15763_v7  ;;  %v15768_v41 = vld [vmem:[#allocation99_spill] sm:$0xff]  ;;  %v15770_v61 = vld [vmem:[#allocation100_spill] sm:$0xff] }
 0x3fc   : > { %7232 = vmatpush.msk.msra.mxu2 %vm15760_vm11, %v15185_v53  ;;  %7248 = vmatpush.msk.msra.mxu3 %vm15762_vm13, %v15185_v53  ;;  %vm15764_vm5 = vnez %v15639_v50  ;;  %vm15765_vm6 = vnez %v15642_v21  ;;  %vm15766_vm15 = vnez %v15683_v17  ;;  %v4046_v47 = vsel %vm15735_vm3, %v15767_v55, 0  ;;  %v15773_v17 = vld [vmem:[#allocation101_spill] sm:$0xff]  ;;  %v15777_v16 = vld [vmem:[#allocation151_spill] sm:$0xff] }
 0x3fd   : > { %v4005_v6 = vsel %vm15764_vm5, %v15648_v15, 0  ;;  %v6696_v23 = vsel %vm15765_vm6, 1.0, %v14625_v24  ;;  %v6697_v18 = vsel %vm15766_vm15, 1.0, %v14625_v24  ;;  %vm15769_vm13 = vnez %v15768_v41  ;;  %v15817_v41 = vld [vmem:[#allocation177_spill] sm:$0xff] }
 0x3fe   : > { %7201 = vmatpush.msk.msra.mxu1 %vm15769_vm13, %v15185_v53  ;;  %vm15771_vm11 = vnez %v15770_v61  ;;  %vm15772_vm5 = vnez %v15687_v27  ;;  %v4262_v21 = vadd.s32 %v4261_v9, %v4080_v5  ;;  %vm15774_vm6 = vnez %v15773_v17  ;;  %v15778_v9 = vld [vmem:[#allocation119_spill] sm:$0xff]  ;;  %v15780_v5 = vld [vmem:[#allocation120_spill] sm:$0xff] }
 0x3ff   : > { %7217 = vmatpush.msk.msra.mxu0 %vm15771_vm11, %v15185_v53  ;;  %v6698_v50 = vsel %vm15772_vm5, 1.0, %v14625_v24  ;;  %7233 = vmatpush.msk.msra.mxu2 %vm15774_vm6, %v15185_v53  ;;  %vm15776_vm3 = vnez %v15775_v29  ;;  %v4148_v52 = vadd.s32 %v4147_v0, %v4146_v38  ;;  %v4552_v7 = vadd.f32 %v4551_v46, %v15777_v16  ;;  %v15782_v38 = vld [vmem:[#allocation139_spill] sm:$0xff]  ;;  %v15793_v46 = vld [vmem:[#allocation124_spill] sm:$0xff] }
 0x400   : > { %7249 = vmatpush.msk.msra.mxu3 %vm15776_vm3, %v15185_v53  ;;  %v13488_v28 = vadd.s32 %v13306_v34, %v4172_v48  ;;  %v4282_v40 = vadd.s32 %v4281_v42, %v4081_v54  ;;  %v4242_v51 = vadd.s32 %v4241_v22, %v4071_v2  ;;  %v4072_v27 = vsel %vm15709_vm0, %v15705_v45, 0  ;;  %v15784_v42 = vld [vmem:[#allocation121_spill] sm:$0xff]  ;;  %v15786_v22 = vld [vmem:[#allocation122_spill] sm:$0xff] }
 0x401   : > { %vm15779_vm15 = vnez %v15778_v9  ;;  %vm15781_vm5 = vnez %v15780_v5  ;;  %v13500_v0 = vmul.f32 %v6696_v23, %v15782_v38  ;;  %vm15783_vm3 = vnez %v15710_v26  ;;  %v15790_v26 = vld [vmem:[#allocation28_spill] sm:$0xff]  ;;  %v15796_v23 = vld [vmem:[#allocation125_spill] sm:$0xff] }
 0x402   : > { %7202 = vmatpush.msk.msra.mxu1 %vm15779_vm15, %v15185_v53  ;;  %7218 = vmatpush.msk.msra.mxu0 %vm15781_vm5, %v15185_v53  ;;  %v4073_v34 = vsel %vm15783_vm3, %v15705_v45, 0  ;;  %v4063_v58 = vsel %vm15716_vm9, %v15722_v39, 0  ;;  %v4224_v48 = vadd.s32 %v4223_v57, %v4046_v47  ;;  %vm15785_vm0 = vnez %v15784_v42  ;;  %v15791_v57 = vld [vmem:[#allocation123_spill] sm:$0xff] }
 0x403   : > { %7234 = vmatpush.msk.msra.mxu2 %vm15785_vm0, %v15185_v53  ;;  %vm15787_vm6 = vnez %v15786_v22  ;;  %v13515_v54 = vadd.s32 %v13333_v3, %v4005_v6  ;;  %v13518_v2 = vmul.f32 %v6697_v18, %v15782_v38  ;;  %v13521_v45 = vmul.f32 %v6698_v50, %v15782_v38 }
 0x404   : > { %7250 = vmatpush.msk.msra.mxu3 %vm15787_vm6, %v15185_v53  ;;  %v4038_v60 = vsel %vm15746_vm7, %v15790_v26, 0  ;;  %vm15792_vm9 = vnez %v15791_v57  ;;  %vm15794_vm3 = vnez %v15793_v46  ;;  %vm15795_vm6 = vnez %v15583_v37 }
 0x405   : > { %15788 = vst [vmem:[#allocation39_spill] sm:$0xff] %v13518_v2  ;;  %7203 = vmatpush.msk.msra.mxu1 %vm15792_vm9, %v15185_v53  ;;  %7219 = vmatpush.msk.msra.mxu0 %vm15794_vm3, %v15185_v53  ;;  %v6712_v3 = vsel %vm15795_vm6, 1.0, %v14625_v24  ;;  %v4263_v6 = vadd.s32 %v4262_v21, %v4072_v27  ;;  %vm15797_vm0 = vnez %v15796_v23  ;;  %vm15799_vm7 = vnez %v15798_v4  ;;  %v15805_v27 = vld [vmem:[#allocation19_spill] sm:$0xff] }
 0x406   : > { %15789 = vst [vmem:[#allocation56_spill] sm:$0xff] %v13521_v45  ;;  %7235 = vmatpush.msk.msra.mxu2 %vm15797_vm0, %v15185_v53  ;;  %7251 = vmatpush.msk.msra.mxu3 %vm15799_vm7, %v15185_v53  ;;  %v4149_v18 = vrot.slane %v4148_v52, 1  ;;  %v4553_v47 = vrot.slane %v4552_v7, 4  ;;  %vm15800_vm5 = vnez %v15651_v12  ;;  %v4283_v16 = vadd.s32 %v4282_v40, %v4073_v34  ;;  %v15807_v34 = vld [vmem:[#allocation36_spill] sm:$0xff]  ;;  %v15810_v4 = vld [vmem:[#allocation47_spill] sm:$0xff] }
 0x407   : > { %v6713_v50 = vsel %vm15800_vm5, 1.0, %v14625_v24  ;;  %v4243_v19 = vadd.s32 %v4242_v51, %v4063_v58  ;;  %v4064_v37 = vsel %vm15718_vm4, %v15722_v39, 0  ;;  %7304 = vmatmul.lmr.bf16.vlgmr.msra.gmra.1.mxu1  ;;  %7279 = vmatmul.lmr.bf16.vlgmr.msra.gmra.1.mxu0  ;;  %vm15801_vm6 = vnez %v15689_v31 }
 0x408   : > { %v13550_v21 = vsel %vm15801_vm6, 1.0, %v14625_v24  ;;  %vm15803_vm7 = vnez %v15719_v62  ;;  %v4055_v12 = vsel %vm15726_vm12, %v15744_v25, 0  ;;  %v4225_v51 = vadd.s32 %v4224_v48, %v4038_v60  ;;  %7329 = vmatmul.lmr.bf16.vlgmr.msra.gmra.1.mxu2  ;;  %7354 = vmatmul.lmr.bf16.vlgmr.msra.gmra.1.mxu3  ;;  %v15809_v62 = vld [vmem:[#allocation30_spill] sm:$0xff] }
 0x409   : > { %15802 = vst [vmem:[#allocation83_spill] sm:$0xff] %v13550_v21  ;;  %v4065_v53 = vsel %vm15803_vm7, %v15722_v39, 0  ;;  %v13559_v40 = vmul.f32 %v6712_v3, %v15804_v44  ;;  %vm15806_vm4 = vnez %v15805_v27  ;;  %vm15808_vm5 = vnez %v15807_v34  ;;  %v15811_v34 = vld [vmem:[#allocation176_spill] sm:$0xff] }
 0x40a   : > { %v6714_v31 = vsel %vm15806_vm4, 1.0, %v14625_v24  ;;  %v13567_v58 = vsel %vm15808_vm5, 1.0, %v14625_v24  ;;  %v4030_v39 = vsel %vm15756_vm8, %v15809_v62, 0  ;;  %v13573_v49 = vmul.f32 %v6713_v50, %v15804_v44 }
 0x40b   : > { %v4264_v48 = vadd.s32 %v4263_v6, %v4064_v37  ;;  %v4150_v60 = vadd.s32 %v4149_v18, %v4148_v52  ;;  %v4554_v3 = vadd.f32 %v4553_v47, %v4552_v7  ;;  %v4284_v45 = vadd.s32 %v4283_v16, %v4065_v53  ;;  %v15813_v52 = vld [vmem:[#allocation61_spill] sm:$0xff] }
 0x40c   : > { %v4244_v2 = vadd.s32 %v4243_v19, %v4055_v12  ;;  %v4056_v27 = vsel %vm15729_vm10, %v15744_v25, 0  ;;  %v4566_v21 = vadd.f32 %v15811_v34, %v15810_v4  ;;  %v4057_v33 = vsel %vm15731_vm1, %v15744_v25, 0  ;;  %v15814_v7 = vld [vmem:[#allocation17_spill] sm:$0xff]  ;;  %v15815_v25 = vld [vmem:[#allocation168_spill] sm:$0xff] }
 0x40d   : > { %vm15812_vm12 = vnez %v15736_v35  ;;  %v4226_v6 = vadd.s32 %v4225_v51, %v4030_v39  ;;  %v4587_v18 = vadd.f32 %v15814_v7, %v15813_v52  ;;  %v4022_v19 = vsel %vm15769_vm13, %v15671_v56, 0  ;;  %v15816_v37 = vld [vmem:[#allocation169_spill] sm:$0xff]  ;;  %v15820_v52 = vld [vmem:[#allocation164_spill] sm:$0xff] }
 0x40e   : > { %v4047_v50 = vsel %vm15812_vm12, %v15767_v55, 0  ;;  %v4014_v43 = vsel %vm15779_vm15, %v15647_v32, 0  ;;  %v4006_v1 = vsel %vm15792_vm9, %v15648_v15, 0  ;;  %v4567_v4 = vadd.f32 %v4566_v21, %v15815_v25  ;;  %v15822_v25 = vld [vmem:[#allocation51_spill] sm:$0xff] }
 0x40f   : > { %v13599_v35 = vmul.f32 %v6714_v31, %v15804_v44  ;;  %v4298_v47 = vmul.u32 8, %v4150_v60  ;;  %v4555_v16 = vrot.slane %v4554_v3, 2  ;;  %v4588_v53 = vadd.f32 %v4587_v18, %v15816_v37  ;;  %v15821_v18 = vld [vmem:[#allocation49_spill] sm:$0xff] }
 0x410   : > { %vm15818_vm10 = vnez %v15817_v41  ;;  %v4265_v51 = vadd.s32 %v4264_v48, %v4056_v27  ;;  %v4285_v9 = vadd.s32 %v4284_v45, %v4057_v33  ;;  %v4245_v39 = vadd.s32 %v4244_v2, %v4047_v50  ;;  %v15823_v48 = vld [vmem:[#allocation172_spill] sm:$0xff]  ;;  %v15824_v45 = vld [vmem:[#allocation29_spill] sm:$0xff] }
 0x411   : > { %v6720_v12 = vsel %vm15818_vm10, 1.0, %v14625_v24  ;;  %v4048_v57 = vsel %vm15739_vm14, %v15767_v55, 0  ;;  %vm15819_vm1 = vnez %v15740_v14  ;;  %v4227_v31 = vadd.s32 %v4226_v6, %v4022_v19  ;;  %v15825_v27 = vld [vmem:[#allocation4_spill] sm:$0xff]  ;;  %v15826_v41 = vld [vmem:[#allocation165_spill] sm:$0xff] }
 0x412   : > { %v4049_v21 = vsel %vm15819_vm1, %v15767_v55, 0  ;;  %v4214_v60 = vadd.s32 %v4014_v43, %v4006_v1  ;;  %v4166_v34 = vrot.slane %v13425_v63, 4  ;;  %v4568_v7 = vadd.f32 %v4567_v4, %v15820_v52  ;;  %v15827_v6 = vld [vmem:[#allocation160_spill] sm:$0xff]  ;;  %v15828_v43 = vld [vmem:[#allocation170_spill] sm:$0xff] }
 0x413   : > { %v4608_v37 = vadd.f32 %v15822_v25, %v15821_v18  ;;  %v4629_v2 = vadd.f32 %v15824_v45, %v15823_v48  ;;  %v4306_v33 = vsub.s32 %v15825_v27, %v4298_v47  ;;  %v4556_v36 = vadd.f32 %v4555_v16, %v4554_v3  ;;  %v15829_v4 = vld [vmem:[#allocation132_spill] sm:$0xff]  ;;  %v15830_v45 = vld [vmem:[#allocation161_spill] sm:$0xff]  ;;  %v15836_v27 = vld [vmem:[#allocation174_spill] sm:$0xff] }
 0x414   : > { %v4187_v50 = vrot.slane %v13488_v28, 4  ;;  %v4589_v14 = vadd.f32 %v4588_v53, %v15826_v41  ;;  %v4039_v55 = vsel %vm15748_vm2, %v15790_v26, 0  ;;  %v4569_v19 = vadd.f32 %v4568_v7, %v15827_v6  ;;  %v15833_v53 = vld [vmem:[#allocation156_spill] sm:$0xff] }
 0x415   : > { %v4609_v1 = vadd.f32 %v4608_v37, %v15828_v43  ;;  %v4630_v52 = vadd.f32 %v4629_v2, %v15829_v4  ;;  %v4266_v18 = vadd.s32 %v4265_v51, %v4048_v57  ;;  %v4286_v25 = vadd.s32 %v4285_v9, %v4049_v21  ;;  %v15834_v9 = vld [vmem:[#allocation157_spill] sm:$0xff]  ;;  %v15841_v4 = vld [vmem:[#allocation148_spill] sm:$0xff] }
 0x416   : > { %v4228_v48 = vadd.s32 %v4227_v31, %v4214_v60  ;;  %v4590_v47 = vadd.f32 %v4589_v14, %v15830_v45  ;;  %vm15831_vm13 = vnez %v15749_v20  ;;  %vm15832_vm14 = vnez %v15751_v8  ;;  %v15835_v20 = vld [vmem:[#allocation166_spill] sm:$0xff] }
 0x417   : > { %v4040_v3 = vsel %vm15831_vm13, %v15790_v26, 0  ;;  %v4041_v13 = vsel %vm15832_vm14, %v15790_v26, 0  ;;  %v4167_v16 = vadd.s32 %v4166_v34, %v13425_v63  ;;  %v4570_v7 = vadd.f32 %v4569_v19, %v15833_v53 }
 0x418   : > { %v4314_v37 = vadd.s32 1, %v4306_v33  ;;  %v4557_v2 = vrot.slane %v4556_v36, 1  ;;  %v4188_v51 = vadd.s32 %v4187_v50, %v13488_v28  ;;  %v4591_v57 = vadd.f32 %v4590_v47, %v15834_v9  ;;  %v15838_v28 = vld [vmem:[#allocation143_spill] sm:$0xff]  ;;  %v15839_v50 = vld [vmem:[#allocation162_spill] sm:$0xff] }
 0x419   : > { %v4246_v21 = vadd.s32 %v4245_v39, %v4039_v55  ;;  %v4208_v31 = vrot.slane %v13515_v54, 4  ;;  %v4610_v60 = vadd.f32 %v4609_v1, %v15835_v20  ;;  %v4631_v41 = vadd.f32 %v4630_v52, %v15836_v27  ;;  %v15840_v55 = vld [vmem:[#allocation107_spill] sm:$0xff]  ;;  %v15844_v47 = vld [vmem:[#allocation158_spill] sm:$0xff]  ;;  %v15850_v27 = vld [vmem:[#allocation153_spill] sm:$0xff] }
 0x41a   : > { %v4267_v8 = vadd.s32 %v4266_v18, %v4040_v3  ;;  %v4287_v14 = vadd.s32 %v4286_v25, %v4041_v13  ;;  %vm15837_vm2 = vnez %v15757_v30  ;;  %v4229_v26 = vrot.slane %v4228_v48, 4  ;;  %v15843_v18 = vld [vmem:[#allocation145_spill] sm:$0xff]  ;;  %v15847_v13 = vld [vmem:[#allocation146_spill] sm:$0xff] }
 0x41b   : > { %v4031_v63 = vsel %vm15837_vm2, %v15809_v62, 0  ;;  %v4168_v34 = vrot.slane %v4167_v16, 2  ;;  %v4571_v33 = vadd.f32 %v4570_v7, %v15838_v28  ;;  %v4611_v39 = vadd.f32 %v4610_v60, %v15839_v50 }
 0x41c   : > { %v4632_v6 = vadd.f32 %v4631_v41, %v15840_v55  ;;  %v4322_v19 = vcvt.s32.f32 %v4314_v37  ;;  %v4558_v43 = vadd.f32 %v4557_v2, %v4556_v36  ;;  %v4189_v1 = vrot.slane %v4188_v51, 2  ;;  %v15848_v37 = vld [vmem:[#allocation149_spill] sm:$0xff] }
 0x41d   : > { %v4592_v52 = vadd.f32 %v4591_v57, %v15841_v4  ;;  %vm15842_vm8 = vnez %v15759_v59  ;;  %v4572_v25 = vadd.f32 %v4571_v33, %v15843_v18  ;;  %v4209_v45 = vadd.s32 %v4208_v31, %v13515_v54  ;;  %v15849_v57 = vld [vmem:[#allocation152_spill] sm:$0xff] }
 0x41e   : > { %v4032_v30 = vsel %vm15842_vm8, %v15809_v62, 0  ;;  %v4612_v3 = vadd.f32 %v4611_v39, %v15844_v47  ;;  %vm15846_vm15 = vnez %v15761_v10  ;;  %v4230_v59 = vadd.s32 %v4229_v26, %v4228_v48  ;;  %v5412_v48 = vpop.f32.mrf.mxu1  ;;  %v15856_v39 = vld [vmem:[#allocation147_spill] sm:$0xff] }
 0x41f   : > { %v4033_v36 = vsel %vm15846_vm15, %v15809_v62, 0  ;;  %v4593_v53 = vadd.f32 %v4592_v52, %v15847_v13  ;;  %v4633_v7 = vadd.f32 %v4632_v6, %v13500_v0  ;;  %v4534_v54 = vmul.f32 %v6720_v12, %v15848_v37  ;;  %v15851_v0 = vld [vmem:[#allocation150_spill] sm:$0xff]  ;;  %v15858_v47 = vld [vmem:[#allocation23_spill] sm:$0xff] }
 0x420   : > { %v4247_v2 = vadd.s32 %v4246_v21, %v4031_v63  ;;  %v4169_v9 = vadd.s32 %v4168_v34, %v4167_v16  ;;  %v4573_v31 = vadd.f32 %v4572_v25, %v15849_v57  ;;  %v4268_v20 = vadd.s32 %v4267_v8, %v4032_v30  ;;  %v15853_v21 = vld [vmem:[#allocation54_spill] sm:$0xff]  ;;  %v15855_v63 = vld [vmem:[#allocation65_spill] sm:$0xff] }
 0x421   : > { %vm4706_vm9 = vcmp.gt.f32.partialorder %v4322_v19, %v4558_v43  ;;  %v4190_v60 = vadd.s32 %v4189_v1, %v4188_v51  ;;  %v4594_v41 = vadd.f32 %v4593_v53, %v15850_v27  ;;  %v13668_v10 = vadd.s32 %v4287_v14, %v4033_v36  ;;  %v15852_v51 = vld [vmem:[#allocation77_spill] sm:$0xff]  ;;  %v15854_v14 = vld [vmem:[#allocation95_spill] sm:$0xff]  ;;  %v15857_v30 = vld [vmem:[#allocation154_spill] sm:$0xff]  ;;  %v13695_v27 = vpop.permute.xlu2 %5574 }
 0x422   : > { %v4023_v62 = vsel %vm15771_vm11, %v15671_v56, 0  ;;  %v4210_v26 = vrot.slane %v4209_v45, 2  ;;  %v4613_v28 = vadd.f32 %v4612_v3, %v15851_v0  ;;  %v4231_v12 = vrot.slane %v4230_v59, 2  ;;  %v15859_v36 = vld [vmem:[#allocation103_spill] sm:$0xff]  ;;  %v15860_v53 = vld [vmem:[#allocation173_spill] sm:$0xff] }
 0x423   : > { %v4634_v16 = vadd.f32 %v4633_v7, %v13383_v11  ;;  %v4650_v8 = vadd.f32 %v15853_v21, %v15852_v51  ;;  %v4671_v34 = vadd.f32 %v15855_v63, %v15854_v14  ;;  %v6724_v61 = vsel %vm4706_vm9, 1.0, %v14625_v24  ;;  %v15861_v7 = vld [vmem:[#allocation79_spill] sm:$0xff] }
 0x424   : > { %v4170_v33 = vrot.slane %v4169_v9, 1  ;;  %v4574_v50 = vrot.slane %v4573_v31, 4  ;;  %v4614_v55 = vadd.f32 %v4613_v28, %v15856_v39  ;;  %v5556_v6 = vmul.f32 %v6724_v61, %v5412_v48  ;;  %v7441_v48 = vld [vmem:[#allocation2 + $0x30] sm:$0x7f] }
 0x425   : > { %v4191_v19 = vrot.slane %v4190_v60, 1  ;;  %v4595_v1 = vrot.slane %v4594_v41, 4  ;;  %vm4730_vm11 = vcmp.eq.f32.partialorder %v4558_v43, 0.0  ;;  %v4248_v4 = vadd.s32 %v4247_v2, %v4023_v62 }
 0x426   : > { %v4211_v52 = vadd.s32 %v4210_v26, %v4209_v45  ;;  %v4615_v11 = vadd.f32 %v4614_v55, %v15857_v30  ;;  %v4635_v18 = vadd.f32 %v4634_v16, %v13559_v40  ;;  %v4232_v25 = vadd.s32 %v4231_v12, %v4230_v59  ;;  %v15868_v55 = vld [vmem:[#allocation53_spill] sm:$0xff] }
 0x427   : > { %v4651_v3 = vadd.f32 %v4650_v8, %v15858_v47  ;;  %v4672_v13 = vadd.f32 %v4671_v34, %v15859_v36  ;;  %v4692_v57 = vadd.f32 %v15861_v7, %v15860_v53  ;;  %v4171_v43 = vadd.s32 %v4170_v33, %v4169_v9  ;;  %v15872_v36 = vld [vmem:[#allocation83_spill] sm:$0xff] }
 0x428   : > { %v4575_v45 = vadd.f32 %v4574_v50, %v4573_v31  ;;  %v4636_v2 = vadd.f32 %v4635_v18, %v4534_v54  ;;  %v6732_v62 = vsel %vm4730_vm11, 1.0, %v14625_v24  ;;  %vm15862_vm7 = vnez %v15773_v17  ;;  %v15867_v50 = vld [vmem:[#allocation63_spill] sm:$0xff] }
 0x429   : > { %v4024_v40 = vsel %vm15862_vm7, %v15671_v56, 0  ;;  %v5564_v59 = vadd.f32 %v7441_v48, %v5556_v6  ;;  %v4192_v26 = vadd.s32 %v4191_v19, %v4190_v60  ;;  %v4596_v0 = vadd.f32 %v4595_v1, %v4594_v41  ;;  %v15869_v1 = vld [vmem:[#allocation7_spill] sm:$0xff] }
 0x42a   : > { %vm15863_vm6 = vnez %v15780_v5  ;;  %v4007_v9 = vsel %vm15794_vm3, %v15648_v15, 0  ;;  %v4212_v54 = vrot.slane %v4211_v52, 1  ;;  %v4616_v31 = vrot.slane %v4615_v11, 4 }
 0x42b   : > { %v4015_v28 = vsel %vm15863_vm6, %v15647_v32, 0  ;;  %vm15864_vm4 = vnez %v15784_v42  ;;  %v4008_v60 = vsel %vm15797_vm0, %v15648_v15, 0  ;;  %v4233_v41 = vrot.slane %v4232_v25, 1 }
 0x42c   : > { %v4016_v17 = vsel %vm15864_vm4, %v15647_v32, 0  ;;  %v5577_v12 = vmul.f32 %v6732_v62, %v13695_v27  ;;  %vm15865_vm5 = vnez %v15775_v29  ;;  %v4299_v16 = vmul.u32 8, %v4171_v43 }
 0x42d   : > { %v4025_v5 = vsel %vm15865_vm5, %v15671_v56, 0  ;;  %v4576_v46 = vrot.slane %v4575_v45, 2  ;;  %v4637_v51 = vrot.slane %v4636_v2, 4  ;;  %v4235_v42 = vadd.s32 %v4015_v28, %v4007_v9  ;;  %v15866_v56 = vld [vmem:[#allocation52_spill] sm:$0xff] }
 0x42e   : > { %v4300_v21 = vmul.u32 8, %v4192_v26  ;;  %v4597_v23 = vrot.slane %v4596_v0, 2  ;;  %v13723_v8 = vadd.f32 %v5577_v12, %v5564_v59  ;;  %v4269_v14 = vadd.s32 %v4268_v20, %v4024_v40  ;;  %v15876_v40 = vld [vmem:[#allocation35_spill] sm:$0xff] }
 0x42f   : > { %v4256_v63 = vadd.s32 %v4016_v17, %v4008_v60  ;;  %v4213_v34 = vadd.s32 %v4212_v54, %v4211_v52  ;;  %v4617_v61 = vadd.f32 %v4616_v31, %v4615_v11  ;;  %v4234_v29 = vadd.s32 %v4233_v41, %v4232_v25  ;;  %v15871_v11 = vld [vmem:[#allocation74_spill] sm:$0xff] }
 0x430   : > { %v4652_v33 = vadd.f32 %v4651_v3, %v15866_v56  ;;  %v4673_v39 = vadd.f32 %v4672_v13, %v15867_v50  ;;  %v4693_v6 = vadd.f32 %v4692_v57, %v15868_v55  ;;  %5801 = vst [vmem:[%s13721_s5] sm:$0x78] %v13723_v8  ;;  %v4289_v19 = vadd.s32 %v13668_v10, %v4025_v5  ;;  %v15873_v10 = vld [vmem:[#allocation11_spill] sm:$0xff]  ;;  %v15878_v54 = vld [vmem:[#allocation126_spill] sm:$0xff] }
 0x431   : > { %v4307_v30 = vsub.s32 %v15869_v1, %v4299_v16  ;;  %v4577_v18 = vadd.f32 %v4576_v46, %v4575_v45  ;;  %v4638_v47 = vadd.f32 %v4637_v51, %v4636_v2  ;;  %vm15870_vm0 = vnez %v15786_v22  ;;  %v15875_v2 = vld [vmem:[#allocation118_spill] sm:$0xff]  ;;  %v15881_v5 = vld [vmem:[#allocation31_spill] sm:$0xff]  ;;  %v15883_v46 = vld [vmem:[#allocation80_spill] sm:$0xff] }
 0x432   : > { %v4017_v20 = vsel %vm15870_vm0, %v15647_v32, 0  ;;  %v4249_v52 = vadd.s32 %v4248_v4, %v4235_v42  ;;  %v4308_v25 = vsub.s32 %v15871_v11, %v4300_v21  ;;  %v4598_v3 = vadd.f32 %v4597_v23, %v4596_v0  ;;  %v15880_v17 = vld [vmem:[#allocation58_spill] sm:$0xff]  ;;  %v15884_v42 = vld [vmem:[#allocation39_spill] sm:$0xff]  ;;  %v15885_v23 = vld [vmem:[#allocation56_spill] sm:$0xff] }
 0x433   : > { %v4513_v13 = vmul.f32 %v15872_v36, %v15782_v38  ;;  %v4270_v53 = vadd.s32 %v4269_v14, %v4256_v63  ;;  %v4301_v7 = vmul.u32 8, %v4213_v34  ;;  %v4618_v57 = vrot.slane %v4617_v61, 2  ;;  %v15877_v38 = vld [vmem:[#allocation78_spill] sm:$0xff]  ;;  %v15886_v56 = vld [vmem:[#allocation55_spill] sm:$0xff] }
 0x434   : > { %vm15874_vm3 = vnez %v15873_v10  ;;  %v4302_v45 = vmul.u32 8, %v4234_v29  ;;  %v4653_v62 = vadd.f32 %v4652_v33, %v15875_v2  ;;  %v4674_v22 = vadd.f32 %v4673_v39, %v15876_v40  ;;  %v15891_v40 = vld [vmem:[#allocation102_spill] sm:$0xff] }
 0x435   : > { %v6721_v43 = vsel %vm15874_vm3, 1.0, %v14625_v24  ;;  %v4290_v32 = vadd.s32 %v4289_v19, %v4017_v20  ;;  %v4315_v4 = vadd.s32 1, %v4307_v30  ;;  %v4578_v48 = vrot.slane %v4577_v18, 1  ;;  %v15887_v20 = vld [vmem:[#allocation178_spill] sm:$0xff] }
 0x436   : > { %v4639_v59 = vrot.slane %v4638_v47, 2  ;;  %v4316_v26 = vadd.s32 1, %v4308_v25  ;;  %v4599_v0 = vrot.slane %v4598_v3, 1  ;;  %v4250_v28 = vrot.slane %v4249_v52, 4 }
 0x437   : > { %v4694_v9 = vadd.f32 %v4693_v6, %v15877_v38  ;;  %vm15879_vm12 = vnez %v15878_v54  ;;  %v4309_v60 = vsub.s32 %v15880_v17, %v4301_v7  ;;  %v4619_v41 = vadd.f32 %v4618_v57, %v4617_v61  ;;  %v5432_v7 = vpop.f32.mrf.mxu0 }
 0x438   : > { %v4009_v31 = vsel %vm15879_vm12, %v15648_v15, 0  ;;  %v4271_v12 = vrot.slane %v4270_v53, 4  ;;  %vm15882_vm10 = vnez %v15881_v5  ;;  %v4310_v51 = vsub.s32 %v15883_v46, %v4302_v45 }
 0x439   : > { %v6722_v16 = vsel %vm15882_vm10, 1.0, %v14625_v24  ;;  %v4654_v21 = vadd.f32 %v4653_v62, %v15884_v42  ;;  %v4675_v14 = vadd.f32 %v4674_v22, %v15885_v23  ;;  %v4323_v63 = vcvt.s32.f32 %v4315_v4  ;;  %v5492_v42 = vpop.f32.mrf.mxu1 }
 0x43a   : > { %v4579_v34 = vadd.f32 %v4578_v48, %v4577_v18  ;;  %v4640_v29 = vadd.f32 %v4639_v59, %v4638_v47  ;;  %v4695_v33 = vadd.f32 %v4694_v9, %v15886_v56  ;;  %v4291_v15 = vadd.s32 %v4290_v32, %v4009_v31 }
 0x43b   : > { %v4324_v50 = vcvt.s32.f32 %v4316_v26  ;;  %v4600_v39 = vadd.f32 %v4599_v0, %v4598_v3  ;;  %v4251_v61 = vadd.s32 %v4250_v28, %v4249_v52  ;;  %v4317_v55 = vadd.s32 1, %v4309_v60  ;;  %v15889_v3 = vld [vmem:[#allocation81_spill] sm:$0xff] }
 0x43c   : > { %v4620_v6 = vrot.slane %v4619_v41, 1  ;;  %v4272_v19 = vadd.s32 %v4271_v12, %v4270_v53  ;;  %v4696_v1 = vadd.f32 %v4695_v33, %v4513_v13  ;;  %v4535_v30 = vmul.f32 %v6721_v43, %v15848_v37  ;;  %v15890_v13 = vld [vmem:[#allocation109_spill] sm:$0xff]  ;;  %v5452_v43 = vpop.f32.mrf.mxu2 }
 0x43d   : > { %vm15888_vm1 = vnez %v15887_v20  ;;  %v4529_v18 = vmul.f32 %v13567_v58, %v15804_v44  ;;  %v4318_v47 = vadd.s32 1, %v4310_v51  ;;  %v4536_v25 = vmul.f32 %v6722_v16, %v15848_v37  ;;  %v7443_v16 = vld [vmem:[#allocation2 + $0x18] sm:$0x7f] }
 0x43e   : > { %v6723_v11 = vsel %vm15888_vm1, 1.0, %v14625_v24  ;;  %vm4707_vm13 = vcmp.gt.f32.partialorder %v4323_v63, %v4579_v34  ;;  %v4641_v36 = vrot.slane %v4640_v29, 1  ;;  %v4655_v52 = vadd.f32 %v4654_v21, %v15889_v3 }
 0x43f   : > { %vm4708_vm14 = vcmp.gt.f32.partialorder %v4324_v50, %v4600_v39  ;;  %v4252_v53 = vrot.slane %v4251_v61, 2  ;;  %v4676_v57 = vadd.f32 %v4675_v14, %v15890_v13  ;;  %v4292_v10 = vrot.slane %v4291_v15, 4 }
 0x440   : > { %v4325_v45 = vcvt.s32.f32 %v4317_v55  ;;  %v4621_v2 = vadd.f32 %v4620_v6, %v4619_v41  ;;  %v4273_v62 = vrot.slane %v4272_v19, 2  ;;  %v4697_v22 = vadd.f32 %v4696_v1, %v15891_v40 }
 0x441   : > { %v6725_v44 = vsel %vm4707_vm13, 1.0, %v14625_v24  ;;  %v4326_v58 = vcvt.s32.f32 %v4318_v47  ;;  %v4656_v32 = vadd.f32 %v4655_v52, %v13573_v49  ;;  %v4677_v4 = vadd.f32 %v4676_v57, %v13599_v35  ;;  %v7442_v49 = vld [vmem:[#allocation2] sm:$0x7f]  ;;  %v5472_v35 = vpop.f32.mrf.mxu3 }
 0x442   : > { %v5557_v48 = vmul.f32 %v6725_v44, %v5432_v7  ;;  %v6726_v59 = vsel %vm4708_vm14, 1.0, %v14625_v24  ;;  %v4642_v26 = vadd.f32 %v4641_v36, %v4640_v29  ;;  %vm4731_vm2 = vcmp.eq.f32.partialorder %v4579_v34, 0.0 }
 0x443   : > { %v5558_v0 = vmul.f32 %v6726_v59, %v5452_v43  ;;  %v4253_v28 = vadd.s32 %v4252_v53, %v4251_v61  ;;  %v4293_v38 = vadd.s32 %v4292_v10, %v4291_v15  ;;  %vm4732_vm8 = vcmp.eq.f32.partialorder %v4600_v39, 0.0 }
 0x444   : > { %vm4709_vm15 = vcmp.gt.f32.partialorder %v4325_v45, %v4621_v2  ;;  %v4657_v9 = vadd.f32 %v4656_v32, %v4535_v30  ;;  %v4274_v54 = vadd.s32 %v4273_v62, %v4272_v19  ;;  %v4678_v31 = vadd.f32 %v4677_v4, %v4536_v25  ;;  %v7444_v30 = vld [vmem:[#allocation2 + $0x10] sm:$0x7f]  ;;  %v7445_v25 = vld [vmem:[#allocation2 + $0x8] sm:$0x7f] }
 0x445   : > { %v4537_v17 = vmul.f32 %v6723_v11, %v15848_v37  ;;  %v6733_v60 = vsel %vm4731_vm2, 1.0, %v14625_v24  ;;  %v5565_v41 = vadd.f32 %v7442_v49, %v5557_v48  ;;  %vm4710_vm9 = vcmp.gt.f32.partialorder %v4326_v58, %v4642_v26  ;;  %v15893_v32 = vld [vmem:[#allocation84_spill] sm:$0xff] }
 0x446   : > { %v4698_v12 = vadd.f32 %v4697_v22, %v4529_v18  ;;  %v6734_v5 = vsel %vm4732_vm8, 1.0, %v14625_v24  ;;  %v5566_v46 = vadd.f32 %v7443_v16, %v5558_v0  ;;  %v6727_v51 = vsel %vm4709_vm15, 1.0, %v14625_v24  ;;  %v15892_v22 = vld [vmem:[#allocation82_spill] sm:$0xff] }
 0x447   : > { %v4254_v21 = vrot.slane %v4253_v28, 1  ;;  %v4294_v23 = vrot.slane %v4293_v38, 2  ;;  %v4658_v14 = vrot.slane %v4657_v9, 4  ;;  %v4275_v63 = vrot.slane %v4274_v54, 1 }
 0x448   : > { %v4679_v37 = vrot.slane %v4678_v31, 4  ;;  %v5578_v34 = vmul.f32 %v6733_v60, %v13695_v27  ;;  %v5559_v29 = vmul.f32 %v6727_v51, %v5472_v35  ;;  %v6728_v56 = vsel %vm4710_vm9, 1.0, %v14625_v24 }
 0x449   : > { %v5579_v33 = vmul.f32 %v6734_v5, %v13695_v27  ;;  %vm4733_vm11 = vcmp.eq.f32.partialorder %v4621_v2, 0.0  ;;  %v5560_v15 = vmul.f32 %v6728_v56, %v5492_v42  ;;  %vm4734_vm7 = vcmp.eq.f32.partialorder %v4642_v26, 0.0 }
 0x44a   : > { %v13776_v50 = vadd.f32 %v5578_v34, %v5565_v41  ;;  %v4295_v39 = vadd.s32 %v4294_v23, %v4293_v38  ;;  %v4699_v61 = vadd.f32 %v4698_v12, %v4537_v17  ;;  %v4255_v6 = vadd.s32 %v4254_v21, %v4253_v28  ;;  %v5512_v12 = vpop.f32.mrf.mxu0 }
 0x44b   : > { %v13778_v55 = vadd.f32 %v5579_v33, %v5566_v46  ;;  %v4659_v19 = vadd.f32 %v4658_v14, %v4657_v9  ;;  %v6735_v1 = vsel %vm4733_vm11, 1.0, %v14625_v24  ;;  %v5567_v20 = vadd.f32 %v7444_v30, %v5559_v29  ;;  %v5532_v46 = vpop.f32.mrf.mxu2  ;;  %v7446_v33 = vld [vmem:[#allocation2 + $0x20] sm:$0x7f] }
 0x44c   : > { %5802 = vst [vmem:[%s13721_s5 + $0x8] sm:$0x78] %v13776_v50  ;;  %v4276_v11 = vadd.s32 %v4275_v63, %v4274_v54  ;;  %v4680_v18 = vadd.f32 %v4679_v37, %v4678_v31  ;;  %v6736_v47 = vsel %vm4734_vm7, 1.0, %v14625_v24  ;;  %v5568_v36 = vadd.f32 %v7445_v25, %v5560_v15  ;;  %v15894_v54 = vld [vmem:[#allocation87_spill] sm:$0xff]  ;;  %v5552_v37 = vpop.f32.mrf.mxu3 }
 0x44d   : > { %5803 = vst [vmem:[%s13721_s5 + $0x10] sm:$0x78] %v13778_v55  ;;  %v4296_v3 = vrot.slane %v4295_v39, 1  ;;  %v4700_v52 = vrot.slane %v4699_v61, 4  ;;  %v5580_v7 = vmul.f32 %v6735_v1, %v13695_v27  ;;  %v4303_v53 = vmul.u32 8, %v4255_v6 }
 0x44e   : > { %v4660_v13 = vrot.slane %v4659_v19, 2  ;;  %v5581_v57 = vmul.f32 %v6736_v47, %v13695_v27  ;;  %v4304_v10 = vmul.u32 8, %v4276_v11  ;;  %v4681_v43 = vrot.slane %v4680_v18, 2 }
 0x44f   : > { %v13788_v45 = vadd.f32 %v5580_v7, %v5567_v20  ;;  %v4297_v62 = vadd.s32 %v4296_v3, %v4295_v39  ;;  %v4701_v40 = vadd.f32 %v4700_v52, %v4699_v61  ;;  %v4311_v44 = vsub.s32 %v15892_v22, %v4303_v53  ;;  %v5642_v34 = vpop.f32.mrf.mxu1  ;;  %v7448_v3 = vld [vmem:[#allocation2 + $0x38] sm:$0x7f] }
 0x450   : > { %v13790_v2 = vadd.f32 %v5581_v57, %v5568_v36  ;;  %v4661_v58 = vadd.f32 %v4660_v13, %v4659_v19  ;;  %v4312_v4 = vsub.s32 %v15893_v32, %v4304_v10  ;;  %v4682_v48 = vadd.f32 %v4681_v43, %v4680_v18  ;;  %v7447_v19 = vld [vmem:[#allocation2 + $0x28] sm:$0x7f] }
 0x451   : > { %5804 = vst [vmem:[%s13721_s5 + $0x18] sm:$0x78] %v13788_v45  ;;  %v4305_v59 = vmul.u32 8, %v4297_v62  ;;  %v4702_v26 = vrot.slane %v4701_v40, 2  ;;  %v4319_v0 = vadd.s32 1, %v4311_v44  ;;  %v5785_v39 = vsub.f32 %v13723_v8, %v5642_v34 }
 0x452   : > { %5805 = vst [vmem:[%s13721_s5 + $0x20] sm:$0x78] %v13790_v2  ;;  %v4662_v28 = vrot.slane %v4661_v58, 1  ;;  %v4320_v38 = vadd.s32 1, %v4312_v4  ;;  %v4683_v9 = vrot.slane %v4682_v48, 1  ;;  %v5662_v29 = vpop.f32.mrf.mxu0 }
 0x453   : > { %v4313_v31 = vsub.s32 %v15894_v54, %v4305_v59  ;;  %v4703_v17 = vadd.f32 %v4702_v26, %v4701_v40  ;;  %v4327_v60 = vcvt.s32.f32 %v4319_v0  ;;  %v5786_v61 = vsub.f32 %v13776_v50, %v5662_v29  ;;  %5793 = vst [vmem:[%s13721_s5] sm:$0x7] %v5785_v39 }
 0x454   : > { %v4663_v49 = vadd.f32 %v4662_v28, %v4661_v58  ;;  %v4328_v41 = vcvt.s32.f32 %v4320_v38  ;;  %v4684_v35 = vadd.f32 %v4683_v9, %v4682_v48 }
 0x455   : > { %v4321_v5 = vadd.s32 1, %v4313_v31  ;;  %v4704_v16 = vrot.slane %v4703_v17, 1  ;;  %5794 = vst [vmem:[%s13721_s5 + $0x8] sm:$0x7] %v5786_v61 }
 0x456   : > { %vm4711_vm6 = vcmp.gt.f32.partialorder %v4327_v60, %v4663_v49  ;;  %vm4712_vm4 = vcmp.gt.f32.partialorder %v4328_v41, %v4684_v35  ;;  %vm4735_vm5 = vcmp.eq.f32.partialorder %v4663_v49, 0.0  ;;  %vm4736_vm0 = vcmp.eq.f32.partialorder %v4684_v35, 0.0 }
 0x457   : > { %v6729_v51 = vsel %vm4711_vm6, 1.0, %v14625_v24  ;;  %v4329_v42 = vcvt.s32.f32 %v4321_v5  ;;  %v4705_v21 = vadd.f32 %v4704_v16, %v4703_v17  ;;  %v6730_v14 = vsel %vm4712_vm4, 1.0, %v14625_v24  ;;  %v5682_v47 = vpop.f32.mrf.mxu2 }
 0x458   : > { %v5561_v23 = vmul.f32 %v6729_v51, %v5512_v12  ;;  %v5562_v63 = vmul.f32 %v6730_v14, %v5532_v46  ;;  %v6737_v56 = vsel %vm4735_vm5, 1.0, %v14625_v24  ;;  %v6738_v6 = vsel %vm4736_vm0, 1.0, %v14625_v24  ;;  %v5702_v25 = vpop.f32.mrf.mxu3 }
 0x459   : > { %vm4713_vm3 = vcmp.gt.f32.partialorder %v4329_v42, %v4705_v21  ;;  %v5582_v20 = vmul.f32 %v6737_v56, %v13695_v27  ;;  %v5583_v18 = vmul.f32 %v6738_v6, %v13695_v27  ;;  %vm4737_vm12 = vcmp.eq.f32.partialorder %v4705_v21, 0.0 }
 0x45a   : > { %v5569_v15 = vadd.f32 %v7446_v33, %v5561_v23  ;;  %v5570_v1 = vadd.f32 %v7447_v19, %v5562_v63  ;;  %v6731_v30 = vsel %vm4713_vm3, 1.0, %v14625_v24  ;;  %v6739_v36 = vsel %vm4737_vm12, 1.0, %v14625_v24 }
 0x45b   : > { %v5563_v11 = vmul.f32 %v6731_v30, %v5552_v37  ;;  %v5787_v7 = vsub.f32 %v13778_v55, %v5682_v47  ;;  %v5788_v53 = vsub.f32 %v13788_v45, %v5702_v25  ;;  %v5584_v13 = vmul.f32 %v6739_v36, %v13695_v27 }
 0x45c   : > { %v5590_v8 = vadd.f32 %v5582_v20, %v5569_v15  ;;  %v5591_v50 = vadd.f32 %v5583_v18, %v5570_v1 }
 0x45d   : > { %v5571_v52 = vadd.f32 %v7448_v3, %v5563_v11  ;;  %5795 = vst [vmem:[%s13721_s5 + $0x10] sm:$0x7] %v5787_v7 }
 0x45e   : > { %5806 = vst [vmem:[%s13721_s5 + $0x28] sm:$0x78] %v5590_v8 }
 0x45f   : > { %5807 = vst [vmem:[%s13721_s5 + $0x30] sm:$0x78] %v5591_v50  ;;  %v5592_v57 = vadd.f32 %v5584_v13, %v5571_v52 }
 0x460   : > { %5796 = vst [vmem:[%s13721_s5 + $0x18] sm:$0x7] %v5788_v53 }
 0x461   : > { %5808 = vst [vmem:[%s13721_s5 + $0x38] sm:$0x78] %v5592_v57 }
 0x484   : > { %v5722_v10 = vpop.f32.mrf.mxu1  ;;  %v5742_v43 = vpop.f32.mrf.mxu0 }
 0x485   : > { %v5789_v24 = vsub.f32 %v13790_v2, %v5722_v10  ;;  %v5790_v62 = vsub.f32 %v5590_v8, %v5742_v43 }
 0x487   : > { %5797 = vst [vmem:[%s13721_s5 + $0x20] sm:$0x7] %v5789_v24 }
 0x488   : > { %5798 = vst [vmem:[%s13721_s5 + $0x28] sm:$0x7] %v5790_v62 }
 0x48b   : > { %v5762_v40 = vpop.f32.mrf.mxu2  ;;  %v5782_v55 = vpop.f32.mrf.mxu3 }
 0x48c   : > { %v5791_v22 = vsub.f32 %v5591_v50, %v5762_v40  ;;  %v5792_v45 = vsub.f32 %v5592_v57, %v5782_v55 }
 0x48e   : > { %5799 = vst [vmem:[%s13721_s5 + $0x30] sm:$0x7] %v5791_v22 }
 0x48f   : > { %5800 = vst [vmem:[%s13721_s5 + $0x38] sm:$0x7] %v5792_v45 }
 0x490 PF: > { %s12_s13 = sadd.s32 1, %s7487_s13   ;;  %s15895_s9 = smov %s7479_s11 }
 0x491   : > { %p9_p8 = scmp.ge.s32.totalorder %s12_s13, 6   ;;  %s15896_s10 = smov %s7483_s12 }
 0x492   : > { %s15897_s11 = smov %s15900_s14  ;;  %s15898_s12 = smov %s15904_s15 }
 0x493   :  { %11 = sbr.rel (!%p9_p8) target bundleno = 3 (0x3), region = 61 }

</bundles_post_ra>
